<compile_context>
chip_gen: v6e
topology: v6e:2x2x1
jax: 0.10.0
libtpu: 0.0.40
codegen_flags: <defaults>
</compile_context>

<pallas_src>
import functools
import math

import jax
import jax.numpy as jnp
from jax.experimental import pallas as pl
from jax.experimental.pallas import tpu as pltpu

EPS = 1e-5  # ComplexBatchNorm2d default eps


def _pick_block(n, cap):
    """Largest divisor of n that is <= cap, preferring multiples of 8 (or n itself)."""
    best = 1
    for b in range(1, min(n, cap) + 1):
        if n % b == 0 and (b % 8 == 0 or b == n):
            best = b
    if best == 1:
        for b in range(1, min(n, cap) + 1):
            if n % b == 0:
                best = b
    return best


# ---------------------------------------------------------------------------
# Call A per layer: complex conv (folded taps, packed [re|im] lanes) + batch stats.
# ---------------------------------------------------------------------------
def _conv_stats_kernel(x_ref, w_ref, y_ref, stat_ref, *, n_taps, l_out):
    bsz = x_ref.shape[0]
    cf = x_ref.shape[-1]
    co2 = y_ref.shape[-1]
    co = co2 // 2

    acc = jnp.zeros((bsz * l_out, co2), jnp.float32)
    for r in range(n_taps):                                   # static, contiguous tap slices
        xs = x_ref[:, r:r + l_out, :].reshape(bsz * l_out, cf).astype(jnp.bfloat16)
        acc = acc + jnp.dot(xs, w_ref[r], preferred_element_type=jnp.float32)
    y_ref[...] = acc.reshape(bsz, l_out, co2)                 # packed [yr(co) | yi(co)]

    # Per-channel batch statistics, coalesced into a single (8, 2*co) read-modify-write.
    yr = acc[:, :co]
    yi = acc[:, co:]
    s_mean = jnp.sum(acc, axis=0, keepdims=True)              # [sum yr   | sum yi  ]
    s_sq = jnp.sum(acc * acc, axis=0, keepdims=True)          # [sum yr^2 | sum yi^2]
    s_ri = jnp.sum(yr * yi, axis=0, keepdims=True)            # sum yr*yi
    block = jnp.concatenate(
        [s_mean, s_sq, jnp.concatenate([s_ri, s_ri], axis=-1),
         jnp.zeros((5, co2), jnp.float32)], axis=0)

    @pl.when(pl.program_id(0) == 0)
    def _():
        stat_ref[...] = jnp.zeros_like(stat_ref)

    stat_ref[...] += block


def conv_stats(x, w, *, n_taps, l_out, block_b=8):
    """x: (N, L_fold, C_fold) f32; w: (n_taps, C_fold, 2*C_out) bf16.
    Returns raw conv output (N, l_out, 2*C_out) f32 and stats (8, 2*C_out) f32."""
    n, lf, cf = x.shape
    co2 = w.shape[-1]
    bb = _pick_block(n, block_b)
    kernel = functools.partial(_conv_stats_kernel, n_taps=n_taps, l_out=l_out)
    return pl.pallas_call(
        kernel,
        out_shape=(jax.ShapeDtypeStruct((n, l_out, co2), jnp.float32),
                   jax.ShapeDtypeStruct((8, co2), jnp.float32)),
        grid=(n // bb,),
        in_specs=[pl.BlockSpec((bb, lf, cf), lambda i: (i, 0, 0)),
                  pl.BlockSpec(w.shape, lambda i: (0, 0, 0))],
        out_specs=(pl.BlockSpec((bb, l_out, co2), lambda i: (i, 0, 0)),
                   pl.BlockSpec((8, co2), lambda i: (0, 0))),      # resident accumulator
        compiler_params=pltpu.CompilerParams(
            dimension_semantics=("arbitrary",),
            vmem_limit_bytes=32 * 1024 * 1024),
    )(x, w)


# ---------------------------------------------------------------------------
# Call B per layer: BN whitening + 2x2 affine + complex ReLU (batch-parallel).
# ---------------------------------------------------------------------------
def _bn_relu_kernel(y_ref, stat_ref, bnw_ref, bnb_ref, o_ref, *, count):
    co2 = y_ref.shape[-1]
    co = co2 // 2
    inv_cnt = 1.0 / count
    mean = stat_ref[0:1, :] * inv_cnt
    msq = stat_ref[1:2, :] * inv_cnt
    mri = stat_ref[2:3, :co] * inv_cnt
    mr, mi = mean[:, :co], mean[:, co:]
    vr = msq[:, :co] - mr * mr + EPS          # Crr (+eps)  -- training/batch statistics
    vi = msq[:, co:] - mi * mi + EPS          # Cii (+eps)
    cri = mri - mr * mi                       # Cri
    s = jnp.sqrt(vr * vi - cri * cri)
    t = jnp.sqrt(vr + vi + 2.0 * s)
    inv_st = 1.0 / (s * t)                    # exact reciprocal (tiny per-channel vector)
    rrr = (vi + s) * inv_st
    rii = (vr + s) * inv_st
    rri = -cri * inv_st
    wrr, wii, wri = bnw_ref[0:1, :], bnw_ref[1:2, :], bnw_ref[2:3, :]
    br, bi = bnb_ref[0:1, :], bnb_ref[1:2, :]
    # Fold whitening + affine into one per-channel 2x2 affine on the raw conv output.
    g_rr = wrr * rrr + wri * rri
    g_ri = wrr * rri + wri * rii
    g_ir = wri * rrr + wii * rri
    g_ii = wri * rri + wii * rii
    h_r = br - g_rr * mr - g_ri * mi
    h_i = bi - g_ir * mr - g_ii * mi
    y = y_ref[...]
    yr = y[..., :co]
    yi = y[..., co:]
    outr = jnp.maximum(g_rr * yr + g_ri * yi + h_r, 0.0)   # complex_relu: per-part ReLU
    outi = jnp.maximum(g_ir * yr + g_ii * yi + h_i, 0.0)
    o_ref[...] = jnp.concatenate([outr, outi], axis=-1)


def bn_relu(y, stats, bn_w, bn_b, *, count, block_b=8):
    n, l, co2 = y.shape
    co = co2 // 2
    bb = _pick_block(n, block_b)
    kernel = functools.partial(_bn_relu_kernel, count=float(count))
    return pl.pallas_call(
        kernel,
        out_shape=jax.ShapeDtypeStruct((n, l, co2), jnp.float32),
        grid=(n // bb,),
        in_specs=[pl.BlockSpec((bb, l, co2), lambda i: (i, 0, 0)),
                  pl.BlockSpec((8, co2), lambda i: (0, 0)),
                  pl.BlockSpec((3, co), lambda i: (0, 0)),
                  pl.BlockSpec((2, co), lambda i: (0, 0))],
        out_specs=pl.BlockSpec((bb, l, co2), lambda i: (i, 0, 0)),
        compiler_params=pltpu.CompilerParams(
            dimension_semantics=("parallel",),              # megacore-shardable (v7x)
            vmem_limit_bytes=32 * 1024 * 1024),
    )(y, stats, bn_w, bn_b)


# ---------------------------------------------------------------------------
# Merged classify + regress ComplexLinear heads + magnitude (lane-padded output).
# ---------------------------------------------------------------------------
def _heads_kernel(x_ref, w_ref, b_ref, o_ref):
    x = x_ref[...].astype(jnp.bfloat16)
    res = jnp.dot(x, w_ref[...], preferred_element_type=jnp.float32) + b_ref[...]
    p = o_ref.shape[-1]
    yr = res[:, :p]
    yi = res[:, p:]
    o_ref[...] = jnp.sqrt(yr * yr + yi * yi)


def heads_abs(x, w, b, out_width):
    """x: (N, feat2) f32; w: (feat2, 2*P) bf16; b: (1, 2*P) f32.  Returns (N, out_width)."""
    n, feat = x.shape
    p2 = w.shape[-1]
    p = p2 // 2
    tm = _pick_block(n, 256)
    out = pl.pallas_call(
        _heads_kernel,
        out_shape=jax.ShapeDtypeStruct((n, p), jnp.float32),
        grid=(n // tm,),
        in_specs=[pl.BlockSpec((tm, feat), lambda i: (i, 0)),
                  pl.BlockSpec((feat, p2), lambda i: (0, 0)),
                  pl.BlockSpec((1, p2), lambda i: (0, 0))],
        out_specs=pl.BlockSpec((tm, p), lambda i: (i, 0)),
        compiler_params=pltpu.CompilerParams(
            dimension_semantics=("parallel",),
            vmem_limit_bytes=32 * 1024 * 1024),
    )(x, w, b)
    return out[:, :out_width]


# ---------------------------------------------------------------------------
# Parameter preparation (PyTorch layouts -> kernel-native folded/packed layouts).
# ---------------------------------------------------------------------------
def fold_conv_weights(wr, wi, stride, unfold_taps=False):
    """wr, wi: (K, C_in, C_out) (== PyTorch weight[..., 0].permute(2, 1, 0)).
    Returns (K//stride, stride*2*C_in, 2*C_out) bf16 block-embedded, stride-folded weights."""
    k, cin, cout = wr.shape
    top = jnp.concatenate([wr, wi], axis=-1)     # real-input rows -> [out_r | out_i]
    bot = jnp.concatenate([-wi, wr], axis=-1)    # imag-input rows
    wt = jnp.concatenate([top, bot], axis=1)     # (K, 2*C_in, 2*C_out)
    wf = wt.reshape(k // stride, stride * 2 * cin, 2 * cout)
    if unfold_taps:                              # layer 1: single matmul over all 8 taps
        wf = wf.reshape(1, k * 2 * cin, 2 * cout)
    return wf.astype(jnp.bfloat16)


def make_head_weights(wr_pt, wi_pt, br, bi, l3, pad_to):
    """PyTorch ComplexLinear weights (out, 128*l3) over channel-major flatten -> one
    (l3*256, 2*pad_to) bf16 matrix matching the kernel's position-major packed flatten."""
    out_dim, _ = wr_pt.shape

    def perm(w):  # (out, 128*l3) -> (l3, 128, out)
        return w.reshape(out_dim, 128, l3).transpose(2, 1, 0)

    wr_r, wi_r = perm(wr_pt), perm(wi_pt)
    w_real = jnp.concatenate([wr_r, -wi_r], axis=1).reshape(l3 * 256, out_dim)
    w_imag = jnp.concatenate([wi_r, wr_r], axis=1).reshape(l3 * 256, out_dim)
    pad = pad_to - out_dim
    w_real = jnp.pad(w_real, ((0, 0), (0, pad)))
    w_imag = jnp.pad(w_imag, ((0, 0), (0, pad)))
    w_big = jnp.concatenate([w_real, w_imag], axis=1).astype(jnp.bfloat16)
    b_big = jnp.concatenate([jnp.pad(br - bi, (0, pad)),
                             jnp.pad(br + bi, (0, pad))])[None, :].astype(jnp.float32)
    return w_big, b_big


def init_params(key, num_channels=1, num_classes=10, sig_length=256):
    assert sig_length in (128, 256), "That signal size has not been implemented, sorry."
    l3 = 8 if sig_length == 128 else 16
    feat = 128 * l3
    p_out = ((num_classes + 1 + 127) // 128) * 128
    inv_sqrt2 = 1.0 / math.sqrt(2.0)
    ks = jax.random.split(key, 14)

    def w(k, shape, scale):
        return (scale * jax.random.normal(k, shape)).astype(jnp.float32)

    def bn(c):
        # ComplexBatchNorm2d affine init: Wrr = Wii = 1/sqrt(2), Wri = 0, bias = 0.
        weight = jnp.concatenate([jnp.full((2, c), inv_sqrt2, jnp.float32),
                                  jnp.zeros((1, c), jnp.float32)], axis=0)  # rows [Wrr, Wii, Wri]
        return weight, jnp.zeros((2, c), jnp.float32)                       # rows [Br, Bi]

    c1r, c1i = w(ks[0], (8, num_channels, 64), 0.1), w(ks[1], (8, num_channels, 64), 0.1)
    c2r, c2i = w(ks[2], (8, 64, 64), 0.05), w(ks[3], (8, 64, 64), 0.05)
    c3r, c3i = w(ks[4], (8, 64, 128), 0.05), w(ks[5], (8, 64, 128), 0.05)

    head_wr = jnp.concatenate([w(ks[6], (num_classes, feat), 0.02), w(ks[8], (1, feat), 0.02)], 0)
    head_wi = jnp.concatenate([w(ks[7], (num_classes, feat), 0.02), w(ks[9], (1, feat), 0.02)], 0)
    head_br = jnp.concatenate([w(ks[10], (num_classes,), 0.02), w(ks[12], (1,), 0.02)])
    head_bi = jnp.concatenate([w(ks[11], (num_classes,), 0.02), w(ks[13], (1,), 0.02)])

    bn1_w, bn1_b = bn(64)
    bn2_w, bn2_b = bn(64)
    bn3_w, bn3_b = bn(128)
    head_w, head_b = make_head_weights(head_wr, head_wi, head_br, head_bi, l3, p_out)
    return {
        "conv1_w": fold_conv_weights(c1r, c1i, 2, unfold_taps=True),  # (1, 16*Cin, 128)
        "conv2_w": fold_conv_weights(c2r, c2i, 2),                    # (4, 256, 128)
        "conv3_w": fold_conv_weights(c3r, c3i, 4),                    # (2, 512, 256)
        "bn1_w": bn1_w, "bn1_b": bn1_b,
        "bn2_w": bn2_w, "bn2_b": bn2_b,
        "bn3_w": bn3_w, "bn3_b": bn3_b,
        "head_w": head_w, "head_b": head_b,
    }


# ---------------------------------------------------------------------------
# Forward pass.
# ---------------------------------------------------------------------------
def _pad_fold(y, pad_left, pad_right, stride):
    """Zero-pad along length and fold the next layer's stride into lanes (free row-major reshape)."""
    n, l, c = y.shape
    yp = jnp.pad(y, ((0, 0), (pad_left, pad_right), (0, 0)))
    return yp.reshape(n, (pad_left + l + pad_right) // stride, stride * c)


def closed_set_classifier_forward(params, xr, xi, *, num_classes=10):
    """xr/xi: (N, num_channels, sig_length, 1) real/imag parts of the complex input."""
    n, _, sig, _ = xr.shape
    # NCHW (W == 1) -> (N, L, C), packed [real | imag] along the lane axis.
    x = jnp.concatenate([jnp.transpose(xr[..., 0], (0, 2, 1)),
                         jnp.transpose(xi[..., 0], (0, 2, 1))], axis=-1)

    # --- layer 1: conv(1->64, K=8, s=2, p=3); stride-fold then fully unfold the taps ---
    x1f = _pad_fold(x, 3, 3, 2)
    l1 = (sig + 6 - 8) // 2 + 1
    x1 = jnp.concatenate([x1f[:, r:r + l1, :] for r in range(4)], axis=-1)   # (N, l1, 16*Cin)
    y1_raw, st1 = conv_stats(x1, params["conv1_w"], n_taps=1, l_out=l1)
    y1 = bn_relu(y1_raw, st1, params["bn1_w"], params["bn1_b"], count=n * l1)

    # --- layer 2: conv(64->64, K=8, s=2, p=3); 4 folded taps of 256 lanes ---
    x2 = _pad_fold(y1, 3, 3, 2)
    l2 = (l1 + 6 - 8) // 2 + 1
    y2_raw, st2 = conv_stats(x2, params["conv2_w"], n_taps=4, l_out=l2)
    y2 = bn_relu(y2_raw, st2, params["bn2_w"], params["bn2_b"], count=n * l2)

    # --- layer 3: conv(64->128, K=8, s=4, p=3); 2 folded taps of 512 lanes ---
    pad_r3 = 3 + (-(l2 + 6)) % 4          # extra right zeros so padded length divides the stride
    x3 = _pad_fold(y2, 3, pad_r3, 4)
    l3 = (l2 + 6 - 8) // 4 + 1
    y3_raw, st3 = conv_stats(x3, params["conv3_w"], n_taps=2, l_out=l3)
    y3 = bn_relu(y3_raw, st3, params["bn3_w"], params["bn3_b"], count=n * l3)

    # --- x.view(batch, -1): position-major packed flatten (head weights were permuted in
    #     init_params so this matches PyTorch's channel-major flatten exactly), then the
    #     merged classify+regress ComplexLinear heads + |.| ---
    feats = y3.reshape(n, l3 * y3.shape[-1])
    out = heads_abs(feats, params["head_w"], params["head_b"], num_classes + 1)
    return out[:, :num_classes], out[:, num_classes:num_classes + 1]
    # TODO(synk): BN uses batch (training-mode) statistics; running-stat (eval-mode) BN and the
    # ctor's dropout / init_weights args are not used in the reference forward and are not ported.


# ---------------------------------------------------------------------------
if __name__ == "__main__":
    batch, num_channels, sig_length, num_classes = 2, 1, 256, 10
    key = jax.random.PRNGKey(0)
    kx_r, kx_i, kp = jax.random.split(key, 3)
    xr = jax.random.normal(kx_r, (batch, num_channels, sig_length, 1), dtype=jnp.float32)
    xi = jax.random.normal(kx_i, (batch, num_channels, sig_length, 1), dtype=jnp.float32)
    params = init_params(kp, num_channels=num_channels,
                         num_classes=num_classes, sig_length=sig_length)

    fwd = jax.jit(functools.partial(closed_set_classifier_forward, num_classes=num_classes))
    out_linear, out_regress = fwd(params, xr, xi)
    jax.block_until_ready((out_linear, out_regress))

    assert out_linear.shape == (batch, num_classes), out_linear.shape
    assert out_regress.shape == (batch, 1), out_regress.shape
    assert bool(jnp.all(jnp.isfinite(out_linear))) and bool(jnp.all(jnp.isfinite(out_regress)))
    print("KERNEL_OK")
</pallas_src>

<mosaic_0001>
module attributes {stable_mosaic.version = 11 : i64} {
  func.func @_conv_stats_kernel(%arg0: i32, %arg1: memref<2x128x16xf32, #tpu.memory_space<vmem>>, %arg2: memref<1x16x128xbf16, #tpu.memory_space<vmem>>, %arg3: memref<2x128x128xf32, #tpu.memory_space<vmem>>, %arg4: memref<8x128xf32, #tpu.memory_space<vmem>>) attributes {dimension_semantics = [#tpu.dimension_semantics<arbitrary>], iteration_bounds = array<i64: 1>, scalar_prefetch = 0 : i64, scratch_operands = 0 : i64, tpu.core_type = #tpu.core_type<tc>, window_params = [{transform_indices = @transform_0, window_bounds = array<i64: 2, 128, 16>}, {pipeline_mode = #tpu.pipeline_mode<synchronous>, transform_indices = @transform_1, window_bounds = array<i64: 1, 16, 128>}, {transform_indices = @transform_2, window_bounds = array<i64: 2, 128, 128>}, {pipeline_mode = #tpu.pipeline_mode<synchronous>, transform_indices = @transform_3, window_bounds = array<i64: 8, 128>}]} {
    %cst = arith.constant 0.000000e+00 : f32
    %0 = vector.broadcast %cst : f32 to vector<256x128xf32>
    %c0 = arith.constant 0 : index
    %c0_0 = arith.constant 0 : index
    %c0_1 = arith.constant 0 : index
    %1 = vector.load %arg1[%c0, %c0_0, %c0_1] : memref<2x128x16xf32, #tpu.memory_space<vmem>>, vector<2x128x16xf32>
    %2 = vector.shape_cast %1 : vector<2x128x16xf32> to vector<256x16xf32>
    %3 = arith.truncf %2 : vector<256x16xf32> to vector<256x16xbf16>
    %c0_2 = arith.constant 0 : index
    %c0_3 = arith.constant 0 : index
    %c0_4 = arith.constant 0 : index
    %4 = vector.load %arg2[%c0_2, %c0_3, %c0_4] : memref<1x16x128xbf16, #tpu.memory_space<vmem>>, vector<1x16x128xbf16>
    %5 = vector.shape_cast %4 : vector<1x16x128xbf16> to vector<16x128xbf16>
    %cst_5 = arith.constant dense<0.000000e+00> : vector<256x128xf32>
    %6 = tpu.matmul %3, %5, %cst_5 {dimension_numbers = #tpu.dot_dimension_numbers<[1], [0], [0], [1], [0, 0, 1, 1], [], []>} : vector<256x16xbf16>, vector<16x128xbf16>, vector<256x128xf32> -> vector<256x128xf32>
    %7 = arith.addf %0, %6 : vector<256x128xf32>
    %8 = vector.shape_cast %7 : vector<256x128xf32> to vector<2x128x128xf32>
    %c0_6 = arith.constant 0 : index
    %c0_7 = arith.constant 0 : index
    %c0_8 = arith.constant 0 : index
    %9 = vector.load %arg3[%c0_6, %c0_7, %c0_8] : memref<2x128x128xf32, #tpu.memory_space<vmem>>, vector<2x128x128xf32>
    tpu.vector_store %arg3[%c0_6, %c0_7, %c0_8], %8 {strides = array<i32>} : memref<2x128x128xf32, #tpu.memory_space<vmem>>, vector<2x128x128xf32>,
    %10 = vector.extract_strided_slice %7 {offsets = [0, 0], sizes = [256, 64], strides = [1, 1]} : vector<256x128xf32> to vector<256x64xf32>
    %11 = vector.extract_strided_slice %7 {offsets = [0, 64], sizes = [256, 64], strides = [1, 1]} : vector<256x128xf32> to vector<256x64xf32>
    %cst_9 = arith.constant dense<0.000000e+00> : vector<128xf32>
    %12 = vector.multi_reduction <add>, %7, %cst_9 [0] : vector<256x128xf32> to vector<128xf32>
    %13 = vector.shape_cast %12 : vector<128xf32> to vector<1x128xf32>
    %14 = arith.mulf %7, %7 : vector<256x128xf32>
    %cst_10 = arith.constant dense<0.000000e+00> : vector<128xf32>
    %15 = vector.multi_reduction <add>, %14, %cst_10 [0] : vector<256x128xf32> to vector<128xf32>
    %16 = vector.shape_cast %15 : vector<128xf32> to vector<1x128xf32>
    %17 = arith.mulf %10, %11 : vector<256x64xf32>
    %cst_11 = arith.constant dense<0.000000e+00> : vector<64xf32>
    %18 = vector.multi_reduction <add>, %17, %cst_11 [0] : vector<256x64xf32> to vector<64xf32>
    %19 = vector.shape_cast %18 : vector<64xf32> to vector<1x64xf32>
    %20 = tpu.concatenate %19, %19 in 1 : vector<1x64xf32>, vector<1x64xf32> -> vector<1x128xf32>
    %cst_12 = arith.constant 0.000000e+00 : f32
    %21 = vector.broadcast %cst_12 : f32 to vector<5x128xf32>
    %22 = tpu.concatenate %13, %16, %20, %21 in 0 : vector<1x128xf32>, vector<1x128xf32>, vector<1x128xf32>, vector<5x128xf32> -> vector<8x128xf32>
    %c0_i32 = arith.constant 0 : i32
    %23 = arith.cmpi eq, %arg0, %c0_i32 : i32
    %24 = arith.extui %23 : i1 to i32
    %c0_i32_13 = arith.constant 0 : i32
    %25 = arith.cmpi ne, %24, %c0_i32_13 : i32
    scf.if %25 {
      %cst_18 = arith.constant 0.000000e+00 : f32
      %29 = vector.broadcast %cst_18 : f32 to vector<8x128xf32>
      %c0_19 = arith.constant 0 : index
      %c0_20 = arith.constant 0 : index
      %30 = vector.load %arg4[%c0_19, %c0_20] : memref<8x128xf32, #tpu.memory_space<vmem>>, vector<8x128xf32>
      tpu.vector_store %arg4[%c0_19, %c0_20], %29 {strides = array<i32>} : memref<8x128xf32, #tpu.memory_space<vmem>>, vector<8x128xf32>,
    } else {
    }
    %c0_14 = arith.constant 0 : index
    %c0_15 = arith.constant 0 : index
    %26 = vector.load %arg4[%c0_14, %c0_15] : memref<8x128xf32, #tpu.memory_space<vmem>>, vector<8x128xf32>
    %27 = arith.addf %26, %22 : vector<8x128xf32>
    %c0_16 = arith.constant 0 : index
    %c0_17 = arith.constant 0 : index
    %28 = vector.load %arg4[%c0_16, %c0_17] : memref<8x128xf32, #tpu.memory_space<vmem>>, vector<8x128xf32>
    tpu.vector_store %arg4[%c0_16, %c0_17], %27 {strides = array<i32>} : memref<8x128xf32, #tpu.memory_space<vmem>>, vector<8x128xf32>,
    return
  }
  func.func @transform_0(%arg0: i32) -> (i32, i32, i32) {
    %c0_i32 = arith.constant 0 : i32
    %c0_i32_0 = arith.constant 0 : i32
    %c0_i32_1 = arith.constant 0 : i32
    return %arg0, %c0_i32, %c0_i32_0 : i32, i32, i32
  }
  func.func @transform_1(%arg0: i32) -> (i32, i32, i32) {
    %c0_i32 = arith.constant 0 : i32
    %c0_i32_0 = arith.constant 0 : i32
    %c0_i32_1 = arith.constant 0 : i32
    %c0_i32_2 = arith.constant 0 : i32
    return %c0_i32, %c0_i32_0, %c0_i32_1 : i32, i32, i32
  }
  func.func @transform_2(%arg0: i32) -> (i32, i32, i32) {
    %c0_i32 = arith.constant 0 : i32
    %c0_i32_0 = arith.constant 0 : i32
    %c0_i32_1 = arith.constant 0 : i32
    return %arg0, %c0_i32, %c0_i32_0 : i32, i32, i32
  }
  func.func @transform_3(%arg0: i32) -> (i32, i32) {
    %c0_i32 = arith.constant 0 : i32
    %c0_i32_0 = arith.constant 0 : i32
    %c0_i32_1 = arith.constant 0 : i32
    return %c0_i32, %c0_i32_0 : i32, i32
  }
}

module attributes {stable_mosaic.version = 11 : i64} {
  func.func @_bn_relu_kernel(%arg0: i32, %arg1: memref<2x128x128xf32, #tpu.memory_space<vmem>>, %arg2: memref<8x128xf32, #tpu.memory_space<vmem>>, %arg3: memref<3x64xf32, #tpu.memory_space<vmem>>, %arg4: memref<2x64xf32, #tpu.memory_space<vmem>>, %arg5: memref<2x128x128xf32, #tpu.memory_space<vmem>>) attributes {dimension_semantics = [#tpu.dimension_semantics<parallel>], iteration_bounds = array<i64: 1>, scalar_prefetch = 0 : i64, scratch_operands = 0 : i64, tpu.core_type = #tpu.core_type<tc>, window_params = [{transform_indices = @transform_0, window_bounds = array<i64: 2, 128, 128>}, {pipeline_mode = #tpu.pipeline_mode<synchronous>, transform_indices = @transform_1, window_bounds = array<i64: 8, 128>}, {pipeline_mode = #tpu.pipeline_mode<synchronous>, transform_indices = @transform_2, window_bounds = array<i64: 3, 64>}, {pipeline_mode = #tpu.pipeline_mode<synchronous>, transform_indices = @transform_3, window_bounds = array<i64: 2, 64>}, {transform_indices = @transform_4, window_bounds = array<i64: 2, 128, 128>}]} {
    %c0 = arith.constant 0 : index
    %c0_0 = arith.constant 0 : index
    %0 = vector.load %arg2[%c0, %c0_0] : memref<8x128xf32, #tpu.memory_space<vmem>>, vector<1x128xf32>
    %cst = arith.constant 3.906250e-03 : f32
    %1 = vector.broadcast %cst : f32 to vector<1x128xf32>
    %2 = arith.mulf %0, %1 : vector<1x128xf32>
    %c1 = arith.constant 1 : index
    %c0_1 = arith.constant 0 : index
    %3 = vector.load %arg2[%c1, %c0_1] : memref<8x128xf32, #tpu.memory_space<vmem>>, vector<1x128xf32>
    %cst_2 = arith.constant 3.906250e-03 : f32
    %4 = vector.broadcast %cst_2 : f32 to vector<1x128xf32>
    %5 = arith.mulf %3, %4 : vector<1x128xf32>
    %c2 = arith.constant 2 : index
    %c0_3 = arith.constant 0 : index
    %6 = vector.load %arg2[%c2, %c0_3] : memref<8x128xf32, #tpu.memory_space<vmem>>, vector<1x64xf32>
    %cst_4 = arith.constant 3.906250e-03 : f32
    %7 = vector.broadcast %cst_4 : f32 to vector<1x64xf32>
    %8 = arith.mulf %6, %7 : vector<1x64xf32>
    %9 = vector.extract_strided_slice %2 {offsets = [0, 0], sizes = [1, 64], strides = [1, 1]} : vector<1x128xf32> to vector<1x64xf32>
    %10 = vector.extract_strided_slice %2 {offsets = [0, 64], sizes = [1, 64], strides = [1, 1]} : vector<1x128xf32> to vector<1x64xf32>
    %11 = vector.extract_strided_slice %5 {offsets = [0, 0], sizes = [1, 64], strides = [1, 1]} : vector<1x128xf32> to vector<1x64xf32>
    %12 = arith.mulf %9, %9 : vector<1x64xf32>
    %13 = arith.subf %11, %12 : vector<1x64xf32>
    %cst_5 = arith.constant 9.99999974E-6 : f32
    %14 = vector.broadcast %cst_5 : f32 to vector<1x64xf32>
    %15 = arith.addf %13, %14 : vector<1x64xf32>
    %16 = vector.extract_strided_slice %5 {offsets = [0, 64], sizes = [1, 64], strides = [1, 1]} : vector<1x128xf32> to vector<1x64xf32>
    %17 = arith.mulf %10, %10 : vector<1x64xf32>
    %18 = arith.subf %16, %17 : vector<1x64xf32>
    %cst_6 = arith.constant 9.99999974E-6 : f32
    %19 = vector.broadcast %cst_6 : f32 to vector<1x64xf32>
    %20 = arith.addf %18, %19 : vector<1x64xf32>
    %21 = arith.mulf %9, %10 : vector<1x64xf32>
    %22 = arith.subf %8, %21 : vector<1x64xf32>
    %23 = arith.mulf %15, %20 : vector<1x64xf32>
    %24 = arith.mulf %22, %22 : vector<1x64xf32>
    %25 = arith.subf %23, %24 : vector<1x64xf32>
    %26 = math.sqrt %25 : vector<1x64xf32>
    %27 = arith.addf %15, %20 : vector<1x64xf32>
    %cst_7 = arith.constant 2.000000e+00 : f32
    %28 = vector.broadcast %cst_7 : f32 to vector<1x64xf32>
    %29 = arith.mulf %28, %26 : vector<1x64xf32>
    %30 = arith.addf %27, %29 : vector<1x64xf32>
    %31 = math.sqrt %30 : vector<1x64xf32>
    %32 = arith.mulf %26, %31 : vector<1x64xf32>
    %cst_8 = arith.constant 1.000000e+00 : f32
    %33 = vector.broadcast %cst_8 : f32 to vector<1x64xf32>
    %34 = arith.divf %33, %32 : vector<1x64xf32>
    %35 = arith.addf %20, %26 : vector<1x64xf32>
    %36 = arith.mulf %35, %34 : vector<1x64xf32>
    %37 = arith.addf %15, %26 : vector<1x64xf32>
    %38 = arith.mulf %37, %34 : vector<1x64xf32>
    %cst_9 = arith.constant 0.000000e+00 : f32
    %39 = vector.broadcast %cst_9 : f32 to vector<1x64xf32>
    %40 = arith.subf %39, %22 : vector<1x64xf32>
    %41 = arith.mulf %40, %34 : vector<1x64xf32>
    %c0_10 = arith.constant 0 : index
    %c0_11 = arith.constant 0 : index
    %42 = vector.load %arg3[%c0_10, %c0_11] : memref<3x64xf32, #tpu.memory_space<vmem>>, vector<1x64xf32>
    %c1_12 = arith.constant 1 : index
    %c0_13 = arith.constant 0 : index
    %43 = vector.load %arg3[%c1_12, %c0_13] : memref<3x64xf32, #tpu.memory_space<vmem>>, vector<1x64xf32>
    %c2_14 = arith.constant 2 : index
    %c0_15 = arith.constant 0 : index
    %44 = vector.load %arg3[%c2_14, %c0_15] : memref<3x64xf32, #tpu.memory_space<vmem>>, vector<1x64xf32>
    %c0_16 = arith.constant 0 : index
    %c0_17 = arith.constant 0 : index
    %45 = vector.load %arg4[%c0_16, %c0_17] : memref<2x64xf32, #tpu.memory_space<vmem>>, vector<1x64xf32>
    %c1_18 = arith.constant 1 : index
    %c0_19 = arith.constant 0 : index
    %46 = vector.load %arg4[%c1_18, %c0_19] : memref<2x64xf32, #tpu.memory_space<vmem>>, vector<1x64xf32>
    %47 = arith.mulf %42, %36 : vector<1x64xf32>
    %48 = arith.mulf %44, %41 : vector<1x64xf32>
    %49 = arith.addf %47, %48 : vector<1x64xf32>
    %50 = arith.mulf %42, %41 : vector<1x64xf32>
    %51 = arith.mulf %44, %38 : vector<1x64xf32>
    %52 = arith.addf %50, %51 : vector<1x64xf32>
    %53 = arith.mulf %44, %36 : vector<1x64xf32>
    %54 = arith.mulf %43, %41 : vector<1x64xf32>
    %55 = arith.addf %53, %54 : vector<1x64xf32>
    %56 = arith.mulf %44, %41 : vector<1x64xf32>
    %57 = arith.mulf %43, %38 : vector<1x64xf32>
    %58 = arith.addf %56, %57 : vector<1x64xf32>
    %59 = arith.mulf %49, %9 : vector<1x64xf32>
    %60 = arith.subf %45, %59 : vector<1x64xf32>
    %61 = arith.mulf %52, %10 : vector<1x64xf32>
    %62 = arith.subf %60, %61 : vector<1x64xf32>
    %63 = arith.mulf %55, %9 : vector<1x64xf32>
    %64 = arith.subf %46, %63 : vector<1x64xf32>
    %65 = arith.mulf %58, %10 : vector<1x64xf32>
    %66 = arith.subf %64, %65 : vector<1x64xf32>
    %c0_20 = arith.constant 0 : index
    %c0_21 = arith.constant 0 : index
    %c0_22 = arith.constant 0 : index
    %67 = vector.load %arg1[%c0_20, %c0_21, %c0_22] : memref<2x128x128xf32, #tpu.memory_space<vmem>>, vector<2x128x128xf32>
    %68 = vector.extract_strided_slice %67 {offsets = [0, 0, 0], sizes = [2, 128, 64], strides = [1, 1, 1]} : vector<2x128x128xf32> to vector<2x128x64xf32>
    %69 = vector.extract_strided_slice %67 {offsets = [0, 0, 64], sizes = [2, 128, 64], strides = [1, 1, 1]} : vector<2x128x128xf32> to vector<2x128x64xf32>
    %70 = vector.shape_cast %49 : vector<1x64xf32> to vector<1x1x64xf32>
    %71 = vector.broadcast %70 : vector<1x1x64xf32> to vector<2x128x64xf32>
    %72 = arith.mulf %71, %68 : vector<2x128x64xf32>
    %73 = vector.shape_cast %52 : vector<1x64xf32> to vector<1x1x64xf32>
    %74 = vector.broadcast %73 : vector<1x1x64xf32> to vector<2x128x64xf32>
    %75 = arith.mulf %74, %69 : vector<2x128x64xf32>
    %76 = arith.addf %72, %75 : vector<2x128x64xf32>
    %77 = vector.shape_cast %62 : vector<1x64xf32> to vector<1x1x64xf32>
    %78 = vector.broadcast %77 : vector<1x1x64xf32> to vector<2x128x64xf32>
    %79 = arith.addf %76, %78 : vector<2x128x64xf32>
    %cst_23 = arith.constant 0.000000e+00 : f32
    %80 = vector.broadcast %cst_23 : f32 to vector<2x128x64xf32>
    %81 = arith.maximumf %79, %80 : vector<2x128x64xf32>
    %82 = vector.shape_cast %55 : vector<1x64xf32> to vector<1x1x64xf32>
    %83 = vector.broadcast %82 : vector<1x1x64xf32> to vector<2x128x64xf32>
    %84 = arith.mulf %83, %68 : vector<2x128x64xf32>
    %85 = vector.shape_cast %58 : vector<1x64xf32> to vector<1x1x64xf32>
    %86 = vector.broadcast %85 : vector<1x1x64xf32> to vector<2x128x64xf32>
    %87 = arith.mulf %86, %69 : vector<2x128x64xf32>
    %88 = arith.addf %84, %87 : vector<2x128x64xf32>
    %89 = vector.shape_cast %66 : vector<1x64xf32> to vector<1x1x64xf32>
    %90 = vector.broadcast %89 : vector<1x1x64xf32> to vector<2x128x64xf32>
    %91 = arith.addf %88, %90 : vector<2x128x64xf32>
    %cst_24 = arith.constant 0.000000e+00 : f32
    %92 = vector.broadcast %cst_24 : f32 to vector<2x128x64xf32>
    %93 = arith.maximumf %91, %92 : vector<2x128x64xf32>
    %94 = tpu.concatenate %81, %93 in 2 : vector<2x128x64xf32>, vector<2x128x64xf32> -> vector<2x128x128xf32>
    %c0_25 = arith.constant 0 : index
    %c0_26 = arith.constant 0 : index
    %c0_27 = arith.constant 0 : index
    %95 = vector.load %arg5[%c0_25, %c0_26, %c0_27] : memref<2x128x128xf32, #tpu.memory_space<vmem>>, vector<2x128x128xf32>
    tpu.vector_store %arg5[%c0_25, %c0_26, %c0_27], %94 {strides = array<i32>} : memref<2x128x128xf32, #tpu.memory_space<vmem>>, vector<2x128x128xf32>,
    return
  }
  func.func @transform_0(%arg0: i32) -> (i32, i32, i32) {
    %c0_i32 = arith.constant 0 : i32
    %c0_i32_0 = arith.constant 0 : i32
    %c0_i32_1 = arith.constant 0 : i32
    return %arg0, %c0_i32, %c0_i32_0 : i32, i32, i32
  }
  func.func @transform_1(%arg0: i32) -> (i32, i32) {
    %c0_i32 = arith.constant 0 : i32
    %c0_i32_0 = arith.constant 0 : i32
    %c0_i32_1 = arith.constant 0 : i32
    return %c0_i32, %c0_i32_0 : i32, i32
  }
  func.func @transform_2(%arg0: i32) -> (i32, i32) {
    %c0_i32 = arith.constant 0 : i32
    %c0_i32_0 = arith.constant 0 : i32
    %c0_i32_1 = arith.constant 0 : i32
    return %c0_i32, %c0_i32_0 : i32, i32
  }
  func.func @transform_3(%arg0: i32) -> (i32, i32) {
    %c0_i32 = arith.constant 0 : i32
    %c0_i32_0 = arith.constant 0 : i32
    %c0_i32_1 = arith.constant 0 : i32
    return %c0_i32, %c0_i32_0 : i32, i32
  }
  func.func @transform_4(%arg0: i32) -> (i32, i32, i32) {
    %c0_i32 = arith.constant 0 : i32
    %c0_i32_0 = arith.constant 0 : i32
    %c0_i32_1 = arith.constant 0 : i32
    return %arg0, %c0_i32, %c0_i32_0 : i32, i32, i32
  }
}

module attributes {stable_mosaic.version = 11 : i64} {
  func.func @_bn_relu_kernel(%arg0: i32, %arg1: memref<2x64x128xf32, #tpu.memory_space<vmem>>, %arg2: memref<8x128xf32, #tpu.memory_space<vmem>>, %arg3: memref<3x64xf32, #tpu.memory_space<vmem>>, %arg4: memref<2x64xf32, #tpu.memory_space<vmem>>, %arg5: memref<2x64x128xf32, #tpu.memory_space<vmem>>) attributes {dimension_semantics = [#tpu.dimension_semantics<parallel>], iteration_bounds = array<i64: 1>, scalar_prefetch = 0 : i64, scratch_operands = 0 : i64, tpu.core_type = #tpu.core_type<tc>, window_params = [{transform_indices = @transform_0, window_bounds = array<i64: 2, 64, 128>}, {pipeline_mode = #tpu.pipeline_mode<synchronous>, transform_indices = @transform_1, window_bounds = array<i64: 8, 128>}, {pipeline_mode = #tpu.pipeline_mode<synchronous>, transform_indices = @transform_2, window_bounds = array<i64: 3, 64>}, {pipeline_mode = #tpu.pipeline_mode<synchronous>, transform_indices = @transform_3, window_bounds = array<i64: 2, 64>}, {transform_indices = @transform_4, window_bounds = array<i64: 2, 64, 128>}]} {
    %c0 = arith.constant 0 : index
    %c0_0 = arith.constant 0 : index
    %0 = vector.load %arg2[%c0, %c0_0] : memref<8x128xf32, #tpu.memory_space<vmem>>, vector<1x128xf32>
    %cst = arith.constant 7.812500e-03 : f32
    %1 = vector.broadcast %cst : f32 to vector<1x128xf32>
    %2 = arith.mulf %0, %1 : vector<1x128xf32>
    %c1 = arith.constant 1 : index
    %c0_1 = arith.constant 0 : index
    %3 = vector.load %arg2[%c1, %c0_1] : memref<8x128xf32, #tpu.memory_space<vmem>>, vector<1x128xf32>
    %cst_2 = arith.constant 7.812500e-03 : f32
    %4 = vector.broadcast %cst_2 : f32 to vector<1x128xf32>
    %5 = arith.mulf %3, %4 : vector<1x128xf32>
    %c2 = arith.constant 2 : index
    %c0_3 = arith.constant 0 : index
    %6 = vector.load %arg2[%c2, %c0_3] : memref<8x128xf32, #tpu.memory_space<vmem>>, vector<1x64xf32>
    %cst_4 = arith.constant 7.812500e-03 : f32
    %7 = vector.broadcast %cst_4 : f32 to vector<1x64xf32>
    %8 = arith.mulf %6, %7 : vector<1x64xf32>
    %9 = vector.extract_strided_slice %2 {offsets = [0, 0], sizes = [1, 64], strides = [1, 1]} : vector<1x128xf32> to vector<1x64xf32>
    %10 = vector.extract_strided_slice %2 {offsets = [0, 64], sizes = [1, 64], strides = [1, 1]} : vector<1x128xf32> to vector<1x64xf32>
    %11 = vector.extract_strided_slice %5 {offsets = [0, 0], sizes = [1, 64], strides = [1, 1]} : vector<1x128xf32> to vector<1x64xf32>
    %12 = arith.mulf %9, %9 : vector<1x64xf32>
    %13 = arith.subf %11, %12 : vector<1x64xf32>
    %cst_5 = arith.constant 9.99999974E-6 : f32
    %14 = vector.broadcast %cst_5 : f32 to vector<1x64xf32>
    %15 = arith.addf %13, %14 : vector<1x64xf32>
    %16 = vector.extract_strided_slice %5 {offsets = [0, 64], sizes = [1, 64], strides = [1, 1]} : vector<1x128xf32> to vector<1x64xf32>
    %17 = arith.mulf %10, %10 : vector<1x64xf32>
    %18 = arith.subf %16, %17 : vector<1x64xf32>
    %cst_6 = arith.constant 9.99999974E-6 : f32
    %19 = vector.broadcast %cst_6 : f32 to vector<1x64xf32>
    %20 = arith.addf %18, %19 : vector<1x64xf32>
    %21 = arith.mulf %9, %10 : vector<1x64xf32>
    %22 = arith.subf %8, %21 : vector<1x64xf32>
    %23 = arith.mulf %15, %20 : vector<1x64xf32>
    %24 = arith.mulf %22, %22 : vector<1x64xf32>
    %25 = arith.subf %23, %24 : vector<1x64xf32>
    %26 = math.sqrt %25 : vector<1x64xf32>
    %27 = arith.addf %15, %20 : vector<1x64xf32>
    %cst_7 = arith.constant 2.000000e+00 : f32
    %28 = vector.broadcast %cst_7 : f32 to vector<1x64xf32>
    %29 = arith.mulf %28, %26 : vector<1x64xf32>
    %30 = arith.addf %27, %29 : vector<1x64xf32>
    %31 = math.sqrt %30 : vector<1x64xf32>
    %32 = arith.mulf %26, %31 : vector<1x64xf32>
    %cst_8 = arith.constant 1.000000e+00 : f32
    %33 = vector.broadcast %cst_8 : f32 to vector<1x64xf32>
    %34 = arith.divf %33, %32 : vector<1x64xf32>
    %35 = arith.addf %20, %26 : vector<1x64xf32>
    %36 = arith.mulf %35, %34 : vector<1x64xf32>
    %37 = arith.addf %15, %26 : vector<1x64xf32>
    %38 = arith.mulf %37, %34 : vector<1x64xf32>
    %cst_9 = arith.constant 0.000000e+00 : f32
    %39 = vector.broadcast %cst_9 : f32 to vector<1x64xf32>
    %40 = arith.subf %39, %22 : vector<1x64xf32>
    %41 = arith.mulf %40, %34 : vector<1x64xf32>
    %c0_10 = arith.constant 0 : index
    %c0_11 = arith.constant 0 : index
    %42 = vector.load %arg3[%c0_10, %c0_11] : memref<3x64xf32, #tpu.memory_space<vmem>>, vector<1x64xf32>
    %c1_12 = arith.constant 1 : index
    %c0_13 = arith.constant 0 : index
    %43 = vector.load %arg3[%c1_12, %c0_13] : memref<3x64xf32, #tpu.memory_space<vmem>>, vector<1x64xf32>
    %c2_14 = arith.constant 2 : index
    %c0_15 = arith.constant 0 : index
    %44 = vector.load %arg3[%c2_14, %c0_15] : memref<3x64xf32, #tpu.memory_space<vmem>>, vector<1x64xf32>
    %c0_16 = arith.constant 0 : index
    %c0_17 = arith.constant 0 : index
    %45 = vector.load %arg4[%c0_16, %c0_17] : memref<2x64xf32, #tpu.memory_space<vmem>>, vector<1x64xf32>
    %c1_18 = arith.constant 1 : index
    %c0_19 = arith.constant 0 : index
    %46 = vector.load %arg4[%c1_18, %c0_19] : memref<2x64xf32, #tpu.memory_space<vmem>>, vector<1x64xf32>
    %47 = arith.mulf %42, %36 : vector<1x64xf32>
    %48 = arith.mulf %44, %41 : vector<1x64xf32>
    %49 = arith.addf %47, %48 : vector<1x64xf32>
    %50 = arith.mulf %42, %41 : vector<1x64xf32>
    %51 = arith.mulf %44, %38 : vector<1x64xf32>
    %52 = arith.addf %50, %51 : vector<1x64xf32>
    %53 = arith.mulf %44, %36 : vector<1x64xf32>
    %54 = arith.mulf %43, %41 : vector<1x64xf32>
    %55 = arith.addf %53, %54 : vector<1x64xf32>
    %56 = arith.mulf %44, %41 : vector<1x64xf32>
    %57 = arith.mulf %43, %38 : vector<1x64xf32>
    %58 = arith.addf %56, %57 : vector<1x64xf32>
    %59 = arith.mulf %49, %9 : vector<1x64xf32>
    %60 = arith.subf %45, %59 : vector<1x64xf32>
    %61 = arith.mulf %52, %10 : vector<1x64xf32>
    %62 = arith.subf %60, %61 : vector<1x64xf32>
    %63 = arith.mulf %55, %9 : vector<1x64xf32>
    %64 = arith.subf %46, %63 : vector<1x64xf32>
    %65 = arith.mulf %58, %10 : vector<1x64xf32>
    %66 = arith.subf %64, %65 : vector<1x64xf32>
    %c0_20 = arith.constant 0 : index
    %c0_21 = arith.constant 0 : index
    %c0_22 = arith.constant 0 : index
    %67 = vector.load %arg1[%c0_20, %c0_21, %c0_22] : memref<2x64x128xf32, #tpu.memory_space<vmem>>, vector<2x64x128xf32>
    %68 = vector.extract_strided_slice %67 {offsets = [0, 0, 0], sizes = [2, 64, 64], strides = [1, 1, 1]} : vector<2x64x128xf32> to vector<2x64x64xf32>
    %69 = vector.extract_strided_slice %67 {offsets = [0, 0, 64], sizes = [2, 64, 64], strides = [1, 1, 1]} : vector<2x64x128xf32> to vector<2x64x64xf32>
    %70 = vector.shape_cast %49 : vector<1x64xf32> to vector<1x1x64xf32>
    %71 = vector.broadcast %70 : vector<1x1x64xf32> to vector<2x64x64xf32>
    %72 = arith.mulf %71, %68 : vector<2x64x64xf32>
    %73 = vector.shape_cast %52 : vector<1x64xf32> to vector<1x1x64xf32>
    %74 = vector.broadcast %73 : vector<1x1x64xf32> to vector<2x64x64xf32>
    %75 = arith.mulf %74, %69 : vector<2x64x64xf32>
    %76 = arith.addf %72, %75 : vector<2x64x64xf32>
    %77 = vector.shape_cast %62 : vector<1x64xf32> to vector<1x1x64xf32>
    %78 = vector.broadcast %77 : vector<1x1x64xf32> to vector<2x64x64xf32>
    %79 = arith.addf %76, %78 : vector<2x64x64xf32>
    %cst_23 = arith.constant 0.000000e+00 : f32
    %80 = vector.broadcast %cst_23 : f32 to vector<2x64x64xf32>
    %81 = arith.maximumf %79, %80 : vector<2x64x64xf32>
    %82 = vector.shape_cast %55 : vector<1x64xf32> to vector<1x1x64xf32>
    %83 = vector.broadcast %82 : vector<1x1x64xf32> to vector<2x64x64xf32>
    %84 = arith.mulf %83, %68 : vector<2x64x64xf32>
    %85 = vector.shape_cast %58 : vector<1x64xf32> to vector<1x1x64xf32>
    %86 = vector.broadcast %85 : vector<1x1x64xf32> to vector<2x64x64xf32>
    %87 = arith.mulf %86, %69 : vector<2x64x64xf32>
    %88 = arith.addf %84, %87 : vector<2x64x64xf32>
    %89 = vector.shape_cast %66 : vector<1x64xf32> to vector<1x1x64xf32>
    %90 = vector.broadcast %89 : vector<1x1x64xf32> to vector<2x64x64xf32>
    %91 = arith.addf %88, %90 : vector<2x64x64xf32>
    %cst_24 = arith.constant 0.000000e+00 : f32
    %92 = vector.broadcast %cst_24 : f32 to vector<2x64x64xf32>
    %93 = arith.maximumf %91, %92 : vector<2x64x64xf32>
    %94 = tpu.concatenate %81, %93 in 2 : vector<2x64x64xf32>, vector<2x64x64xf32> -> vector<2x64x128xf32>
    %c0_25 = arith.constant 0 : index
    %c0_26 = arith.constant 0 : index
    %c0_27 = arith.constant 0 : index
    %95 = vector.load %arg5[%c0_25, %c0_26, %c0_27] : memref<2x64x128xf32, #tpu.memory_space<vmem>>, vector<2x64x128xf32>
    tpu.vector_store %arg5[%c0_25, %c0_26, %c0_27], %94 {strides = array<i32>} : memref<2x64x128xf32, #tpu.memory_space<vmem>>, vector<2x64x128xf32>,
    return
  }
  func.func @transform_0(%arg0: i32) -> (i32, i32, i32) {
    %c0_i32 = arith.constant 0 : i32
    %c0_i32_0 = arith.constant 0 : i32
    %c0_i32_1 = arith.constant 0 : i32
    return %arg0, %c0_i32, %c0_i32_0 : i32, i32, i32
  }
  func.func @transform_1(%arg0: i32) -> (i32, i32) {
    %c0_i32 = arith.constant 0 : i32
    %c0_i32_0 = arith.constant 0 : i32
    %c0_i32_1 = arith.constant 0 : i32
    return %c0_i32, %c0_i32_0 : i32, i32
  }
  func.func @transform_2(%arg0: i32) -> (i32, i32) {
    %c0_i32 = arith.constant 0 : i32
    %c0_i32_0 = arith.constant 0 : i32
    %c0_i32_1 = arith.constant 0 : i32
    return %c0_i32, %c0_i32_0 : i32, i32
  }
  func.func @transform_3(%arg0: i32) -> (i32, i32) {
    %c0_i32 = arith.constant 0 : i32
    %c0_i32_0 = arith.constant 0 : i32
    %c0_i32_1 = arith.constant 0 : i32
    return %c0_i32, %c0_i32_0 : i32, i32
  }
  func.func @transform_4(%arg0: i32) -> (i32, i32, i32) {
    %c0_i32 = arith.constant 0 : i32
    %c0_i32_0 = arith.constant 0 : i32
    %c0_i32_1 = arith.constant 0 : i32
    return %arg0, %c0_i32, %c0_i32_0 : i32, i32, i32
  }
}

module attributes {stable_mosaic.version = 11 : i64} {
  func.func @_conv_stats_kernel(%arg0: i32, %arg1: memref<2x67x256xf32, #tpu.memory_space<vmem>>, %arg2: memref<4x256x128xbf16, #tpu.memory_space<vmem>>, %arg3: memref<2x64x128xf32, #tpu.memory_space<vmem>>, %arg4: memref<8x128xf32, #tpu.memory_space<vmem>>) attributes {dimension_semantics = [#tpu.dimension_semantics<arbitrary>], iteration_bounds = array<i64: 1>, scalar_prefetch = 0 : i64, scratch_operands = 0 : i64, tpu.core_type = #tpu.core_type<tc>, window_params = [{transform_indices = @transform_0, window_bounds = array<i64: 2, 67, 256>}, {pipeline_mode = #tpu.pipeline_mode<synchronous>, transform_indices = @transform_1, window_bounds = array<i64: 4, 256, 128>}, {transform_indices = @transform_2, window_bounds = array<i64: 2, 64, 128>}, {pipeline_mode = #tpu.pipeline_mode<synchronous>, transform_indices = @transform_3, window_bounds = array<i64: 8, 128>}]} {
    %cst = arith.constant 0.000000e+00 : f32
    %0 = vector.broadcast %cst : f32 to vector<128x128xf32>
    %c0 = arith.constant 0 : index
    %c0_0 = arith.constant 0 : index
    %c0_1 = arith.constant 0 : index
    %1 = vector.load %arg1[%c0, %c0_0, %c0_1] : memref<2x67x256xf32, #tpu.memory_space<vmem>>, vector<2x64x256xf32>
    %2 = vector.shape_cast %1 : vector<2x64x256xf32> to vector<128x256xf32>
    %3 = arith.truncf %2 : vector<128x256xf32> to vector<128x256xbf16>
    %c0_2 = arith.constant 0 : index
    %c0_3 = arith.constant 0 : index
    %c0_4 = arith.constant 0 : index
    %4 = vector.load %arg2[%c0_2, %c0_3, %c0_4] : memref<4x256x128xbf16, #tpu.memory_space<vmem>>, vector<1x256x128xbf16>
    %5 = vector.shape_cast %4 : vector<1x256x128xbf16> to vector<256x128xbf16>
    %cst_5 = arith.constant dense<0.000000e+00> : vector<128x128xf32>
    %6 = tpu.matmul %3, %5, %cst_5 {dimension_numbers = #tpu.dot_dimension_numbers<[1], [0], [0], [1], [0, 0, 1, 1], [], []>} : vector<128x256xbf16>, vector<256x128xbf16>, vector<128x128xf32> -> vector<128x128xf32>
    %7 = arith.addf %0, %6 : vector<128x128xf32>
    %c0_6 = arith.constant 0 : index
    %c1 = arith.constant 1 : index
    %c0_7 = arith.constant 0 : index
    %8 = vector.load %arg1[%c0_6, %c1, %c0_7] : memref<2x67x256xf32, #tpu.memory_space<vmem>>, vector<2x64x256xf32>
    %9 = vector.shape_cast %8 : vector<2x64x256xf32> to vector<128x256xf32>
    %10 = arith.truncf %9 : vector<128x256xf32> to vector<128x256xbf16>
    %c1_8 = arith.constant 1 : index
    %c0_9 = arith.constant 0 : index
    %c0_10 = arith.constant 0 : index
    %11 = vector.load %arg2[%c1_8, %c0_9, %c0_10] : memref<4x256x128xbf16, #tpu.memory_space<vmem>>, vector<1x256x128xbf16>
    %12 = vector.shape_cast %11 : vector<1x256x128xbf16> to vector<256x128xbf16>
    %cst_11 = arith.constant dense<0.000000e+00> : vector<128x128xf32>
    %13 = tpu.matmul %10, %12, %cst_11 {dimension_numbers = #tpu.dot_dimension_numbers<[1], [0], [0], [1], [0, 0, 1, 1], [], []>} : vector<128x256xbf16>, vector<256x128xbf16>, vector<128x128xf32> -> vector<128x128xf32>
    %14 = arith.addf %7, %13 : vector<128x128xf32>
    %c0_12 = arith.constant 0 : index
    %c2 = arith.constant 2 : index
    %c0_13 = arith.constant 0 : index
    %15 = vector.load %arg1[%c0_12, %c2, %c0_13] : memref<2x67x256xf32, #tpu.memory_space<vmem>>, vector<2x64x256xf32>
    %16 = vector.shape_cast %15 : vector<2x64x256xf32> to vector<128x256xf32>
    %17 = arith.truncf %16 : vector<128x256xf32> to vector<128x256xbf16>
    %c2_14 = arith.constant 2 : index
    %c0_15 = arith.constant 0 : index
    %c0_16 = arith.constant 0 : index
    %18 = vector.load %arg2[%c2_14, %c0_15, %c0_16] : memref<4x256x128xbf16, #tpu.memory_space<vmem>>, vector<1x256x128xbf16>
    %19 = vector.shape_cast %18 : vector<1x256x128xbf16> to vector<256x128xbf16>
    %cst_17 = arith.constant dense<0.000000e+00> : vector<128x128xf32>
    %20 = tpu.matmul %17, %19, %cst_17 {dimension_numbers = #tpu.dot_dimension_numbers<[1], [0], [0], [1], [0, 0, 1, 1], [], []>} : vector<128x256xbf16>, vector<256x128xbf16>, vector<128x128xf32> -> vector<128x128xf32>
    %21 = arith.addf %14, %20 : vector<128x128xf32>
    %c0_18 = arith.constant 0 : index
    %c3 = arith.constant 3 : index
    %c0_19 = arith.constant 0 : index
    %22 = vector.load %arg1[%c0_18, %c3, %c0_19] : memref<2x67x256xf32, #tpu.memory_space<vmem>>, vector<2x64x256xf32>
    %23 = vector.shape_cast %22 : vector<2x64x256xf32> to vector<128x256xf32>
    %24 = arith.truncf %23 : vector<128x256xf32> to vector<128x256xbf16>
    %c3_20 = arith.constant 3 : index
    %c0_21 = arith.constant 0 : index
    %c0_22 = arith.constant 0 : index
    %25 = vector.load %arg2[%c3_20, %c0_21, %c0_22] : memref<4x256x128xbf16, #tpu.memory_space<vmem>>, vector<1x256x128xbf16>
    %26 = vector.shape_cast %25 : vector<1x256x128xbf16> to vector<256x128xbf16>
    %cst_23 = arith.constant dense<0.000000e+00> : vector<128x128xf32>
    %27 = tpu.matmul %24, %26, %cst_23 {dimension_numbers = #tpu.dot_dimension_numbers<[1], [0], [0], [1], [0, 0, 1, 1], [], []>} : vector<128x256xbf16>, vector<256x128xbf16>, vector<128x128xf32> -> vector<128x128xf32>
    %28 = arith.addf %21, %27 : vector<128x128xf32>
    %29 = vector.shape_cast %28 : vector<128x128xf32> to vector<2x64x128xf32>
    %c0_24 = arith.constant 0 : index
    %c0_25 = arith.constant 0 : index
    %c0_26 = arith.constant 0 : index
    %30 = vector.load %arg3[%c0_24, %c0_25, %c0_26] : memref<2x64x128xf32, #tpu.memory_space<vmem>>, vector<2x64x128xf32>
    tpu.vector_store %arg3[%c0_24, %c0_25, %c0_26], %29 {strides = array<i32>} : memref<2x64x128xf32, #tpu.memory_space<vmem>>, vector<2x64x128xf32>,
    %31 = vector.extract_strided_slice %28 {offsets = [0, 0], sizes = [128, 64], strides = [1, 1]} : vector<128x128xf32> to vector<128x64xf32>
    %32 = vector.extract_strided_slice %28 {offsets = [0, 64], sizes = [128, 64], strides = [1, 1]} : vector<128x128xf32> to vector<128x64xf32>
    %cst_27 = arith.constant dense<0.000000e+00> : vector<128xf32>
    %33 = vector.multi_reduction <add>, %28, %cst_27 [0] : vector<128x128xf32> to vector<128xf32>
    %34 = vector.shape_cast %33 : vector<128xf32> to vector<1x128xf32>
    %35 = arith.mulf %28, %28 : vector<128x128xf32>
    %cst_28 = arith.constant dense<0.000000e+00> : vector<128xf32>
    %36 = vector.multi_reduction <add>, %35, %cst_28 [0] : vector<128x128xf32> to vector<128xf32>
    %37 = vector.shape_cast %36 : vector<128xf32> to vector<1x128xf32>
    %38 = arith.mulf %31, %32 : vector<128x64xf32>
    %cst_29 = arith.constant dense<0.000000e+00> : vector<64xf32>
    %39 = vector.multi_reduction <add>, %38, %cst_29 [0] : vector<128x64xf32> to vector<64xf32>
    %40 = vector.shape_cast %39 : vector<64xf32> to vector<1x64xf32>
    %41 = tpu.concatenate %40, %40 in 1 : vector<1x64xf32>, vector<1x64xf32> -> vector<1x128xf32>
    %cst_30 = arith.constant 0.000000e+00 : f32
    %42 = vector.broadcast %cst_30 : f32 to vector<5x128xf32>
    %43 = tpu.concatenate %34, %37, %41, %42 in 0 : vector<1x128xf32>, vector<1x128xf32>, vector<1x128xf32>, vector<5x128xf32> -> vector<8x128xf32>
    %c0_i32 = arith.constant 0 : i32
    %44 = arith.cmpi eq, %arg0, %c0_i32 : i32
    %45 = arith.extui %44 : i1 to i32
    %c0_i32_31 = arith.constant 0 : i32
    %46 = arith.cmpi ne, %45, %c0_i32_31 : i32
    scf.if %46 {
      %cst_36 = arith.constant 0.000000e+00 : f32
      %50 = vector.broadcast %cst_36 : f32 to vector<8x128xf32>
      %c0_37 = arith.constant 0 : index
      %c0_38 = arith.constant 0 : index
      %51 = vector.load %arg4[%c0_37, %c0_38] : memref<8x128xf32, #tpu.memory_space<vmem>>, vector<8x128xf32>
      tpu.vector_store %arg4[%c0_37, %c0_38], %50 {strides = array<i32>} : memref<8x128xf32, #tpu.memory_space<vmem>>, vector<8x128xf32>,
    } else {
    }
    %c0_32 = arith.constant 0 : index
    %c0_33 = arith.constant 0 : index
    %47 = vector.load %arg4[%c0_32, %c0_33] : memref<8x128xf32, #tpu.memory_space<vmem>>, vector<8x128xf32>
    %48 = arith.addf %47, %43 : vector<8x128xf32>
    %c0_34 = arith.constant 0 : index
    %c0_35 = arith.constant 0 : index
    %49 = vector.load %arg4[%c0_34, %c0_35] : memref<8x128xf32, #tpu.memory_space<vmem>>, vector<8x128xf32>
    tpu.vector_store %arg4[%c0_34, %c0_35], %48 {strides = array<i32>} : memref<8x128xf32, #tpu.memory_space<vmem>>, vector<8x128xf32>,
    return
  }
  func.func @transform_0(%arg0: i32) -> (i32, i32, i32) {
    %c0_i32 = arith.constant 0 : i32
    %c0_i32_0 = arith.constant 0 : i32
    %c0_i32_1 = arith.constant 0 : i32
    return %arg0, %c0_i32, %c0_i32_0 : i32, i32, i32
  }
  func.func @transform_1(%arg0: i32) -> (i32, i32, i32) {
    %c0_i32 = arith.constant 0 : i32
    %c0_i32_0 = arith.constant 0 : i32
    %c0_i32_1 = arith.constant 0 : i32
    %c0_i32_2 = arith.constant 0 : i32
    return %c0_i32, %c0_i32_0, %c0_i32_1 : i32, i32, i32
  }
  func.func @transform_2(%arg0: i32) -> (i32, i32, i32) {
    %c0_i32 = arith.constant 0 : i32
    %c0_i32_0 = arith.constant 0 : i32
    %c0_i32_1 = arith.constant 0 : i32
    return %arg0, %c0_i32, %c0_i32_0 : i32, i32, i32
  }
  func.func @transform_3(%arg0: i32) -> (i32, i32) {
    %c0_i32 = arith.constant 0 : i32
    %c0_i32_0 = arith.constant 0 : i32
    %c0_i32_1 = arith.constant 0 : i32
    return %c0_i32, %c0_i32_0 : i32, i32
  }
}

module attributes {stable_mosaic.version = 11 : i64} {
  func.func @_conv_stats_kernel(%arg0: i32, %arg1: memref<2x18x512xf32, #tpu.memory_space<vmem>>, %arg2: memref<2x512x256xbf16, #tpu.memory_space<vmem>>, %arg3: memref<2x16x256xf32, #tpu.memory_space<vmem>>, %arg4: memref<8x256xf32, #tpu.memory_space<vmem>>) attributes {dimension_semantics = [#tpu.dimension_semantics<arbitrary>], iteration_bounds = array<i64: 1>, scalar_prefetch = 0 : i64, scratch_operands = 0 : i64, tpu.core_type = #tpu.core_type<tc>, window_params = [{transform_indices = @transform_0, window_bounds = array<i64: 2, 18, 512>}, {pipeline_mode = #tpu.pipeline_mode<synchronous>, transform_indices = @transform_1, window_bounds = array<i64: 2, 512, 256>}, {transform_indices = @transform_2, window_bounds = array<i64: 2, 16, 256>}, {pipeline_mode = #tpu.pipeline_mode<synchronous>, transform_indices = @transform_3, window_bounds = array<i64: 8, 256>}]} {
    %cst = arith.constant 0.000000e+00 : f32
    %0 = vector.broadcast %cst : f32 to vector<32x256xf32>
    %c0 = arith.constant 0 : index
    %c0_0 = arith.constant 0 : index
    %c0_1 = arith.constant 0 : index
    %1 = vector.load %arg1[%c0, %c0_0, %c0_1] : memref<2x18x512xf32, #tpu.memory_space<vmem>>, vector<2x16x512xf32>
    %2 = vector.shape_cast %1 : vector<2x16x512xf32> to vector<32x512xf32>
    %3 = arith.truncf %2 : vector<32x512xf32> to vector<32x512xbf16>
    %c0_2 = arith.constant 0 : index
    %c0_3 = arith.constant 0 : index
    %c0_4 = arith.constant 0 : index
    %4 = vector.load %arg2[%c0_2, %c0_3, %c0_4] : memref<2x512x256xbf16, #tpu.memory_space<vmem>>, vector<1x512x256xbf16>
    %5 = vector.shape_cast %4 : vector<1x512x256xbf16> to vector<512x256xbf16>
    %cst_5 = arith.constant dense<0.000000e+00> : vector<32x256xf32>
    %6 = tpu.matmul %3, %5, %cst_5 {dimension_numbers = #tpu.dot_dimension_numbers<[1], [0], [0], [1], [0, 0, 1, 1], [], []>} : vector<32x512xbf16>, vector<512x256xbf16>, vector<32x256xf32> -> vector<32x256xf32>
    %7 = arith.addf %0, %6 : vector<32x256xf32>
    %c0_6 = arith.constant 0 : index
    %c1 = arith.constant 1 : index
    %c0_7 = arith.constant 0 : index
    %8 = vector.load %arg1[%c0_6, %c1, %c0_7] : memref<2x18x512xf32, #tpu.memory_space<vmem>>, vector<2x16x512xf32>
    %9 = vector.shape_cast %8 : vector<2x16x512xf32> to vector<32x512xf32>
    %10 = arith.truncf %9 : vector<32x512xf32> to vector<32x512xbf16>
    %c1_8 = arith.constant 1 : index
    %c0_9 = arith.constant 0 : index
    %c0_10 = arith.constant 0 : index
    %11 = vector.load %arg2[%c1_8, %c0_9, %c0_10] : memref<2x512x256xbf16, #tpu.memory_space<vmem>>, vector<1x512x256xbf16>
    %12 = vector.shape_cast %11 : vector<1x512x256xbf16> to vector<512x256xbf16>
    %cst_11 = arith.constant dense<0.000000e+00> : vector<32x256xf32>
    %13 = tpu.matmul %10, %12, %cst_11 {dimension_numbers = #tpu.dot_dimension_numbers<[1], [0], [0], [1], [0, 0, 1, 1], [], []>} : vector<32x512xbf16>, vector<512x256xbf16>, vector<32x256xf32> -> vector<32x256xf32>
    %14 = arith.addf %7, %13 : vector<32x256xf32>
    %15 = vector.shape_cast %14 : vector<32x256xf32> to vector<2x16x256xf32>
    %c0_12 = arith.constant 0 : index
    %c0_13 = arith.constant 0 : index
    %c0_14 = arith.constant 0 : index
    %16 = vector.load %arg3[%c0_12, %c0_13, %c0_14] : memref<2x16x256xf32, #tpu.memory_space<vmem>>, vector<2x16x256xf32>
    tpu.vector_store %arg3[%c0_12, %c0_13, %c0_14], %15 {strides = array<i32>} : memref<2x16x256xf32, #tpu.memory_space<vmem>>, vector<2x16x256xf32>,
    %17 = vector.extract_strided_slice %14 {offsets = [0, 0], sizes = [32, 128], strides = [1, 1]} : vector<32x256xf32> to vector<32x128xf32>
    %18 = vector.extract_strided_slice %14 {offsets = [0, 128], sizes = [32, 128], strides = [1, 1]} : vector<32x256xf32> to vector<32x128xf32>
    %cst_15 = arith.constant dense<0.000000e+00> : vector<256xf32>
    %19 = vector.multi_reduction <add>, %14, %cst_15 [0] : vector<32x256xf32> to vector<256xf32>
    %20 = vector.shape_cast %19 : vector<256xf32> to vector<1x256xf32>
    %21 = arith.mulf %14, %14 : vector<32x256xf32>
    %cst_16 = arith.constant dense<0.000000e+00> : vector<256xf32>
    %22 = vector.multi_reduction <add>, %21, %cst_16 [0] : vector<32x256xf32> to vector<256xf32>
    %23 = vector.shape_cast %22 : vector<256xf32> to vector<1x256xf32>
    %24 = arith.mulf %17, %18 : vector<32x128xf32>
    %cst_17 = arith.constant dense<0.000000e+00> : vector<128xf32>
    %25 = vector.multi_reduction <add>, %24, %cst_17 [0] : vector<32x128xf32> to vector<128xf32>
    %26 = vector.shape_cast %25 : vector<128xf32> to vector<1x128xf32>
    %27 = tpu.concatenate %26, %26 in 1 : vector<1x128xf32>, vector<1x128xf32> -> vector<1x256xf32>
    %cst_18 = arith.constant 0.000000e+00 : f32
    %28 = vector.broadcast %cst_18 : f32 to vector<5x256xf32>
    %29 = tpu.concatenate %20, %23, %27, %28 in 0 : vector<1x256xf32>, vector<1x256xf32>, vector<1x256xf32>, vector<5x256xf32> -> vector<8x256xf32>
    %c0_i32 = arith.constant 0 : i32
    %30 = arith.cmpi eq, %arg0, %c0_i32 : i32
    %31 = arith.extui %30 : i1 to i32
    %c0_i32_19 = arith.constant 0 : i32
    %32 = arith.cmpi ne, %31, %c0_i32_19 : i32
    scf.if %32 {
      %cst_24 = arith.constant 0.000000e+00 : f32
      %36 = vector.broadcast %cst_24 : f32 to vector<8x256xf32>
      %c0_25 = arith.constant 0 : index
      %c0_26 = arith.constant 0 : index
      %37 = vector.load %arg4[%c0_25, %c0_26] : memref<8x256xf32, #tpu.memory_space<vmem>>, vector<8x256xf32>
      tpu.vector_store %arg4[%c0_25, %c0_26], %36 {strides = array<i32>} : memref<8x256xf32, #tpu.memory_space<vmem>>, vector<8x256xf32>,
    } else {
    }
    %c0_20 = arith.constant 0 : index
    %c0_21 = arith.constant 0 : index
    %33 = vector.load %arg4[%c0_20, %c0_21] : memref<8x256xf32, #tpu.memory_space<vmem>>, vector<8x256xf32>
    %34 = arith.addf %33, %29 : vector<8x256xf32>
    %c0_22 = arith.constant 0 : index
    %c0_23 = arith.constant 0 : index
    %35 = vector.load %arg4[%c0_22, %c0_23] : memref<8x256xf32, #tpu.memory_space<vmem>>, vector<8x256xf32>
    tpu.vector_store %arg4[%c0_22, %c0_23], %34 {strides = array<i32>} : memref<8x256xf32, #tpu.memory_space<vmem>>, vector<8x256xf32>,
    return
  }
  func.func @transform_0(%arg0: i32) -> (i32, i32, i32) {
    %c0_i32 = arith.constant 0 : i32
    %c0_i32_0 = arith.constant 0 : i32
    %c0_i32_1 = arith.constant 0 : i32
    return %arg0, %c0_i32, %c0_i32_0 : i32, i32, i32
  }
  func.func @transform_1(%arg0: i32) -> (i32, i32, i32) {
    %c0_i32 = arith.constant 0 : i32
    %c0_i32_0 = arith.constant 0 : i32
    %c0_i32_1 = arith.constant 0 : i32
    %c0_i32_2 = arith.constant 0 : i32
    return %c0_i32, %c0_i32_0, %c0_i32_1 : i32, i32, i32
  }
  func.func @transform_2(%arg0: i32) -> (i32, i32, i32) {
    %c0_i32 = arith.constant 0 : i32
    %c0_i32_0 = arith.constant 0 : i32
    %c0_i32_1 = arith.constant 0 : i32
    return %arg0, %c0_i32, %c0_i32_0 : i32, i32, i32
  }
  func.func @transform_3(%arg0: i32) -> (i32, i32) {
    %c0_i32 = arith.constant 0 : i32
    %c0_i32_0 = arith.constant 0 : i32
    %c0_i32_1 = arith.constant 0 : i32
    return %c0_i32, %c0_i32_0 : i32, i32
  }
}

module attributes {stable_mosaic.version = 11 : i64} {
  func.func @_bn_relu_kernel(%arg0: i32, %arg1: memref<2x16x256xf32, #tpu.memory_space<vmem>>, %arg2: memref<8x256xf32, #tpu.memory_space<vmem>>, %arg3: memref<3x128xf32, #tpu.memory_space<vmem>>, %arg4: memref<2x128xf32, #tpu.memory_space<vmem>>, %arg5: memref<2x16x256xf32, #tpu.memory_space<vmem>>) attributes {dimension_semantics = [#tpu.dimension_semantics<parallel>], iteration_bounds = array<i64: 1>, scalar_prefetch = 0 : i64, scratch_operands = 0 : i64, tpu.core_type = #tpu.core_type<tc>, window_params = [{transform_indices = @transform_0, window_bounds = array<i64: 2, 16, 256>}, {pipeline_mode = #tpu.pipeline_mode<synchronous>, transform_indices = @transform_1, window_bounds = array<i64: 8, 256>}, {pipeline_mode = #tpu.pipeline_mode<synchronous>, transform_indices = @transform_2, window_bounds = array<i64: 3, 128>}, {pipeline_mode = #tpu.pipeline_mode<synchronous>, transform_indices = @transform_3, window_bounds = array<i64: 2, 128>}, {transform_indices = @transform_4, window_bounds = array<i64: 2, 16, 256>}]} {
    %c0 = arith.constant 0 : index
    %c0_0 = arith.constant 0 : index
    %0 = vector.load %arg2[%c0, %c0_0] : memref<8x256xf32, #tpu.memory_space<vmem>>, vector<1x256xf32>
    %cst = arith.constant 3.125000e-02 : f32
    %1 = vector.broadcast %cst : f32 to vector<1x256xf32>
    %2 = arith.mulf %0, %1 : vector<1x256xf32>
    %c1 = arith.constant 1 : index
    %c0_1 = arith.constant 0 : index
    %3 = vector.load %arg2[%c1, %c0_1] : memref<8x256xf32, #tpu.memory_space<vmem>>, vector<1x256xf32>
    %cst_2 = arith.constant 3.125000e-02 : f32
    %4 = vector.broadcast %cst_2 : f32 to vector<1x256xf32>
    %5 = arith.mulf %3, %4 : vector<1x256xf32>
    %c2 = arith.constant 2 : index
    %c0_3 = arith.constant 0 : index
    %6 = vector.load %arg2[%c2, %c0_3] : memref<8x256xf32, #tpu.memory_space<vmem>>, vector<1x128xf32>
    %cst_4 = arith.constant 3.125000e-02 : f32
    %7 = vector.broadcast %cst_4 : f32 to vector<1x128xf32>
    %8 = arith.mulf %6, %7 : vector<1x128xf32>
    %9 = vector.extract_strided_slice %2 {offsets = [0, 0], sizes = [1, 128], strides = [1, 1]} : vector<1x256xf32> to vector<1x128xf32>
    %10 = vector.extract_strided_slice %2 {offsets = [0, 128], sizes = [1, 128], strides = [1, 1]} : vector<1x256xf32> to vector<1x128xf32>
    %11 = vector.extract_strided_slice %5 {offsets = [0, 0], sizes = [1, 128], strides = [1, 1]} : vector<1x256xf32> to vector<1x128xf32>
    %12 = arith.mulf %9, %9 : vector<1x128xf32>
    %13 = arith.subf %11, %12 : vector<1x128xf32>
    %cst_5 = arith.constant 9.99999974E-6 : f32
    %14 = vector.broadcast %cst_5 : f32 to vector<1x128xf32>
    %15 = arith.addf %13, %14 : vector<1x128xf32>
    %16 = vector.extract_strided_slice %5 {offsets = [0, 128], sizes = [1, 128], strides = [1, 1]} : vector<1x256xf32> to vector<1x128xf32>
    %17 = arith.mulf %10, %10 : vector<1x128xf32>
    %18 = arith.subf %16, %17 : vector<1x128xf32>
    %cst_6 = arith.constant 9.99999974E-6 : f32
    %19 = vector.broadcast %cst_6 : f32 to vector<1x128xf32>
    %20 = arith.addf %18, %19 : vector<1x128xf32>
    %21 = arith.mulf %9, %10 : vector<1x128xf32>
    %22 = arith.subf %8, %21 : vector<1x128xf32>
    %23 = arith.mulf %15, %20 : vector<1x128xf32>
    %24 = arith.mulf %22, %22 : vector<1x128xf32>
    %25 = arith.subf %23, %24 : vector<1x128xf32>
    %26 = math.sqrt %25 : vector<1x128xf32>
    %27 = arith.addf %15, %20 : vector<1x128xf32>
    %cst_7 = arith.constant 2.000000e+00 : f32
    %28 = vector.broadcast %cst_7 : f32 to vector<1x128xf32>
    %29 = arith.mulf %28, %26 : vector<1x128xf32>
    %30 = arith.addf %27, %29 : vector<1x128xf32>
    %31 = math.sqrt %30 : vector<1x128xf32>
    %32 = arith.mulf %26, %31 : vector<1x128xf32>
    %cst_8 = arith.constant 1.000000e+00 : f32
    %33 = vector.broadcast %cst_8 : f32 to vector<1x128xf32>
    %34 = arith.divf %33, %32 : vector<1x128xf32>
    %35 = arith.addf %20, %26 : vector<1x128xf32>
    %36 = arith.mulf %35, %34 : vector<1x128xf32>
    %37 = arith.addf %15, %26 : vector<1x128xf32>
    %38 = arith.mulf %37, %34 : vector<1x128xf32>
    %cst_9 = arith.constant 0.000000e+00 : f32
    %39 = vector.broadcast %cst_9 : f32 to vector<1x128xf32>
    %40 = arith.subf %39, %22 : vector<1x128xf32>
    %41 = arith.mulf %40, %34 : vector<1x128xf32>
    %c0_10 = arith.constant 0 : index
    %c0_11 = arith.constant 0 : index
    %42 = vector.load %arg3[%c0_10, %c0_11] : memref<3x128xf32, #tpu.memory_space<vmem>>, vector<1x128xf32>
    %c1_12 = arith.constant 1 : index
    %c0_13 = arith.constant 0 : index
    %43 = vector.load %arg3[%c1_12, %c0_13] : memref<3x128xf32, #tpu.memory_space<vmem>>, vector<1x128xf32>
    %c2_14 = arith.constant 2 : index
    %c0_15 = arith.constant 0 : index
    %44 = vector.load %arg3[%c2_14, %c0_15] : memref<3x128xf32, #tpu.memory_space<vmem>>, vector<1x128xf32>
    %c0_16 = arith.constant 0 : index
    %c0_17 = arith.constant 0 : index
    %45 = vector.load %arg4[%c0_16, %c0_17] : memref<2x128xf32, #tpu.memory_space<vmem>>, vector<1x128xf32>
    %c1_18 = arith.constant 1 : index
    %c0_19 = arith.constant 0 : index
    %46 = vector.load %arg4[%c1_18, %c0_19] : memref<2x128xf32, #tpu.memory_space<vmem>>, vector<1x128xf32>
    %47 = arith.mulf %42, %36 : vector<1x128xf32>
    %48 = arith.mulf %44, %41 : vector<1x128xf32>
    %49 = arith.addf %47, %48 : vector<1x128xf32>
    %50 = arith.mulf %42, %41 : vector<1x128xf32>
    %51 = arith.mulf %44, %38 : vector<1x128xf32>
    %52 = arith.addf %50, %51 : vector<1x128xf32>
    %53 = arith.mulf %44, %36 : vector<1x128xf32>
    %54 = arith.mulf %43, %41 : vector<1x128xf32>
    %55 = arith.addf %53, %54 : vector<1x128xf32>
    %56 = arith.mulf %44, %41 : vector<1x128xf32>
    %57 = arith.mulf %43, %38 : vector<1x128xf32>
    %58 = arith.addf %56, %57 : vector<1x128xf32>
    %59 = arith.mulf %49, %9 : vector<1x128xf32>
    %60 = arith.subf %45, %59 : vector<1x128xf32>
    %61 = arith.mulf %52, %10 : vector<1x128xf32>
    %62 = arith.subf %60, %61 : vector<1x128xf32>
    %63 = arith.mulf %55, %9 : vector<1x128xf32>
    %64 = arith.subf %46, %63 : vector<1x128xf32>
    %65 = arith.mulf %58, %10 : vector<1x128xf32>
    %66 = arith.subf %64, %65 : vector<1x128xf32>
    %c0_20 = arith.constant 0 : index
    %c0_21 = arith.constant 0 : index
    %c0_22 = arith.constant 0 : index
    %67 = vector.load %arg1[%c0_20, %c0_21, %c0_22] : memref<2x16x256xf32, #tpu.memory_space<vmem>>, vector<2x16x256xf32>
    %68 = vector.extract_strided_slice %67 {offsets = [0, 0, 0], sizes = [2, 16, 128], strides = [1, 1, 1]} : vector<2x16x256xf32> to vector<2x16x128xf32>
    %69 = vector.extract_strided_slice %67 {offsets = [0, 0, 128], sizes = [2, 16, 128], strides = [1, 1, 1]} : vector<2x16x256xf32> to vector<2x16x128xf32>
    %70 = vector.shape_cast %49 : vector<1x128xf32> to vector<1x1x128xf32>
    %71 = vector.broadcast %70 : vector<1x1x128xf32> to vector<2x16x128xf32>
    %72 = arith.mulf %71, %68 : vector<2x16x128xf32>
    %73 = vector.shape_cast %52 : vector<1x128xf32> to vector<1x1x128xf32>
    %74 = vector.broadcast %73 : vector<1x1x128xf32> to vector<2x16x128xf32>
    %75 = arith.mulf %74, %69 : vector<2x16x128xf32>
    %76 = arith.addf %72, %75 : vector<2x16x128xf32>
    %77 = vector.shape_cast %62 : vector<1x128xf32> to vector<1x1x128xf32>
    %78 = vector.broadcast %77 : vector<1x1x128xf32> to vector<2x16x128xf32>
    %79 = arith.addf %76, %78 : vector<2x16x128xf32>
    %cst_23 = arith.constant 0.000000e+00 : f32
    %80 = vector.broadcast %cst_23 : f32 to vector<2x16x128xf32>
    %81 = arith.maximumf %79, %80 : vector<2x16x128xf32>
    %82 = vector.shape_cast %55 : vector<1x128xf32> to vector<1x1x128xf32>
    %83 = vector.broadcast %82 : vector<1x1x128xf32> to vector<2x16x128xf32>
    %84 = arith.mulf %83, %68 : vector<2x16x128xf32>
    %85 = vector.shape_cast %58 : vector<1x128xf32> to vector<1x1x128xf32>
    %86 = vector.broadcast %85 : vector<1x1x128xf32> to vector<2x16x128xf32>
    %87 = arith.mulf %86, %69 : vector<2x16x128xf32>
    %88 = arith.addf %84, %87 : vector<2x16x128xf32>
    %89 = vector.shape_cast %66 : vector<1x128xf32> to vector<1x1x128xf32>
    %90 = vector.broadcast %89 : vector<1x1x128xf32> to vector<2x16x128xf32>
    %91 = arith.addf %88, %90 : vector<2x16x128xf32>
    %cst_24 = arith.constant 0.000000e+00 : f32
    %92 = vector.broadcast %cst_24 : f32 to vector<2x16x128xf32>
    %93 = arith.maximumf %91, %92 : vector<2x16x128xf32>
    %94 = tpu.concatenate %81, %93 in 2 : vector<2x16x128xf32>, vector<2x16x128xf32> -> vector<2x16x256xf32>
    %c0_25 = arith.constant 0 : index
    %c0_26 = arith.constant 0 : index
    %c0_27 = arith.constant 0 : index
    %95 = vector.load %arg5[%c0_25, %c0_26, %c0_27] : memref<2x16x256xf32, #tpu.memory_space<vmem>>, vector<2x16x256xf32>
    tpu.vector_store %arg5[%c0_25, %c0_26, %c0_27], %94 {strides = array<i32>} : memref<2x16x256xf32, #tpu.memory_space<vmem>>, vector<2x16x256xf32>,
    return
  }
  func.func @transform_0(%arg0: i32) -> (i32, i32, i32) {
    %c0_i32 = arith.constant 0 : i32
    %c0_i32_0 = arith.constant 0 : i32
    %c0_i32_1 = arith.constant 0 : i32
    return %arg0, %c0_i32, %c0_i32_0 : i32, i32, i32
  }
  func.func @transform_1(%arg0: i32) -> (i32, i32) {
    %c0_i32 = arith.constant 0 : i32
    %c0_i32_0 = arith.constant 0 : i32
    %c0_i32_1 = arith.constant 0 : i32
    return %c0_i32, %c0_i32_0 : i32, i32
  }
  func.func @transform_2(%arg0: i32) -> (i32, i32) {
    %c0_i32 = arith.constant 0 : i32
    %c0_i32_0 = arith.constant 0 : i32
    %c0_i32_1 = arith.constant 0 : i32
    return %c0_i32, %c0_i32_0 : i32, i32
  }
  func.func @transform_3(%arg0: i32) -> (i32, i32) {
    %c0_i32 = arith.constant 0 : i32
    %c0_i32_0 = arith.constant 0 : i32
    %c0_i32_1 = arith.constant 0 : i32
    return %c0_i32, %c0_i32_0 : i32, i32
  }
  func.func @transform_4(%arg0: i32) -> (i32, i32, i32) {
    %c0_i32 = arith.constant 0 : i32
    %c0_i32_0 = arith.constant 0 : i32
    %c0_i32_1 = arith.constant 0 : i32
    return %arg0, %c0_i32, %c0_i32_0 : i32, i32, i32
  }
}

module attributes {stable_mosaic.version = 11 : i64} {
  func.func @_heads_kernel(%arg0: i32, %arg1: memref<2x4096xf32, #tpu.memory_space<vmem>>, %arg2: memref<4096x256xbf16, #tpu.memory_space<vmem>>, %arg3: memref<1x256xf32, #tpu.memory_space<vmem>>, %arg4: memref<2x128xf32, #tpu.memory_space<vmem>>) attributes {dimension_semantics = [#tpu.dimension_semantics<parallel>], iteration_bounds = array<i64: 1>, scalar_prefetch = 0 : i64, scratch_operands = 0 : i64, tpu.core_type = #tpu.core_type<tc>, window_params = [{transform_indices = @transform_0, window_bounds = array<i64: 2, 4096>}, {pipeline_mode = #tpu.pipeline_mode<synchronous>, transform_indices = @transform_1, window_bounds = array<i64: 4096, 256>}, {pipeline_mode = #tpu.pipeline_mode<synchronous>, transform_indices = @transform_2, window_bounds = array<i64: 1, 256>}, {transform_indices = @transform_3, window_bounds = array<i64: 2, 128>}]} {
    %c0 = arith.constant 0 : index
    %c0_0 = arith.constant 0 : index
    %0 = vector.load %arg1[%c0, %c0_0] : memref<2x4096xf32, #tpu.memory_space<vmem>>, vector<2x4096xf32>
    %1 = arith.truncf %0 : vector<2x4096xf32> to vector<2x4096xbf16>
    %c0_1 = arith.constant 0 : index
    %c0_2 = arith.constant 0 : index
    %2 = vector.load %arg2[%c0_1, %c0_2] : memref<4096x256xbf16, #tpu.memory_space<vmem>>, vector<4096x256xbf16>
    %cst = arith.constant dense<0.000000e+00> : vector<2x256xf32>
    %3 = tpu.matmul %1, %2, %cst {dimension_numbers = #tpu.dot_dimension_numbers<[1], [0], [0], [1], [0, 0, 1, 1], [], []>} : vector<2x4096xbf16>, vector<4096x256xbf16>, vector<2x256xf32> -> vector<2x256xf32>
    %c0_3 = arith.constant 0 : index
    %c0_4 = arith.constant 0 : index
    %4 = vector.load %arg3[%c0_3, %c0_4] : memref<1x256xf32, #tpu.memory_space<vmem>>, vector<1x256xf32>
    %5 = vector.broadcast %4 : vector<1x256xf32> to vector<2x256xf32>
    %6 = arith.addf %3, %5 : vector<2x256xf32>
    %7 = vector.extract_strided_slice %6 {offsets = [0, 0], sizes = [2, 128], strides = [1, 1]} : vector<2x256xf32> to vector<2x128xf32>
    %8 = vector.extract_strided_slice %6 {offsets = [0, 128], sizes = [2, 128], strides = [1, 1]} : vector<2x256xf32> to vector<2x128xf32>
    %9 = arith.mulf %7, %7 : vector<2x128xf32>
    %10 = arith.mulf %8, %8 : vector<2x128xf32>
    %11 = arith.addf %9, %10 : vector<2x128xf32>
    %12 = math.sqrt %11 : vector<2x128xf32>
    %c0_5 = arith.constant 0 : index
    %c0_6 = arith.constant 0 : index
    %13 = vector.load %arg4[%c0_5, %c0_6] : memref<2x128xf32, #tpu.memory_space<vmem>>, vector<2x128xf32>
    tpu.vector_store %arg4[%c0_5, %c0_6], %12 {strides = array<i32>} : memref<2x128xf32, #tpu.memory_space<vmem>>, vector<2x128xf32>,
    return
  }
  func.func @transform_0(%arg0: i32) -> (i32, i32) {
    %c0_i32 = arith.constant 0 : i32
    %c0_i32_0 = arith.constant 0 : i32
    return %arg0, %c0_i32 : i32, i32
  }
  func.func @transform_1(%arg0: i32) -> (i32, i32) {
    %c0_i32 = arith.constant 0 : i32
    %c0_i32_0 = arith.constant 0 : i32
    %c0_i32_1 = arith.constant 0 : i32
    return %c0_i32, %c0_i32_0 : i32, i32
  }
  func.func @transform_2(%arg0: i32) -> (i32, i32) {
    %c0_i32 = arith.constant 0 : i32
    %c0_i32_0 = arith.constant 0 : i32
    %c0_i32_1 = arith.constant 0 : i32
    return %c0_i32, %c0_i32_0 : i32, i32
  }
  func.func @transform_3(%arg0: i32) -> (i32, i32) {
    %c0_i32 = arith.constant 0 : i32
    %c0_i32_0 = arith.constant 0 : i32
    return %arg0, %c0_i32 : i32, i32
  }
}

</mosaic_0001>

<bundles_post_ra>
// kernel: closed_set_classifier_forward.7
= control target key start
LH: loop header
LB: loop body
LE: loop exit
PB: predicated region body
PF: predicated region fallthrough
CT: control target
= control target key end

     0   :  { %vm70_vm0 = vcmask 130048   ;;  %s751_s23 = smov 64   ;;  %vm578_vm1 = vcmask 523264   ;;  %vm656_vm2 = vcmask 1040384   ;;  %vm658_vm3 = vcmask 1041408   ;;  %s1312_s1 = inlined_call_operand.vmem [shape: bf16[1,16,128], index: 1, kind: input, shape index: {}]   ;;  %s1313_s0 = inlined_call_operand.vmem [shape: f32[2,128,16], index: 0, kind: input, shape index: {}]   ;;  %s1314_s2 = inlined_call_operand.vmem [shape: f32[2,128,128], index: 2, kind: output, shape index: {0}]   ;;  %s1315_s3 = inlined_call_operand.vmem [shape: f32[8,128], index: 3, kind: output, shape index: {1}]  }
   0x1   :  { %v750_v0 = vld [vmem:[%s1312_s1] sm:$0xff]   ;;  %v15_v2 = vld [vmem:[%s1313_s0 + $0x8] sm:$0xff]  ;;  %v16_v3 = vld [vmem:[%s1313_s0 + $0x10] sm:$0xff]  ;;  %vm660_vm4 = vcmask 1042432  }
   0x2   :  { %v14_v1 = vld [vmem:[%s1313_s0] sm:$0xff]  ;;  %712 = vmatprep.subr.bf16.mxu0 %v750_v0  ;;  %v17_v5 = vld [vmem:[%s1313_s0 + $0x18] sm:$0xff]  ;;  %v19_v7 = vld [vmem:[%s1313_s0 + $0x28] sm:$0xff]  ;;  %746 = vmatprep.subr.bf16.mxu1 %v750_v0 }
   0x3   :  { %v46_v4 = vpack.c.bf16 %v15_v2, %v14_v1  ;;  %v18_v6 = vld [vmem:[%s1313_s0 + $0x20] sm:$0xff]  ;;  %713 = vmatpush3.bf16.msra.mxu0 %v750_v0  ;;  %v47_v8 = vpack.c.bf16 %v17_v5, %v16_v3  ;;  %747 = vmatpush3.bf16.msra.mxu1 %v750_v0  ;;  %v20_v10 = vld [vmem:[%s1313_s0 + $0x30] sm:$0xff]  ;;  %v21_v11 = vld [vmem:[%s1313_s0 + $0x38] sm:$0xff] }
   0x4   :  { %v48_v9 = vpack.c.bf16 %v19_v7, %v18_v6  ;;  %v30_v12 = vld [vmem:[%s1313_s0 + $0x80] sm:$0xff]  ;;  %v31_v13 = vld [vmem:[%s1313_s0 + $0x88] sm:$0xff]  ;;  %v32_v15 = vld [vmem:[%s1313_s0 + $0x90] sm:$0xff]  ;;  %v49_v23 = vpack.c.bf16 %v21_v11, %v20_v10 }
   0x5   :  { %714 = vmatprep.mubr.msk.bf16.mxu0 %vm70_vm0, %v46_v4  ;;  %v54_v14 = vpack.c.bf16 %v31_v13, %v30_v12  ;;  %v33_v16 = vld [vmem:[%s1313_s0 + $0x98] sm:$0xff]  ;;  %v34_v17 = vld [vmem:[%s1313_s0 + $0xa0] sm:$0xff]  ;;  %v23_v19 = vld [vmem:[%s1313_s0 + $0x48] sm:$0xff] }
   0x6   :  { %715 = vmatmul.mubr.msk.bf16.vlgmr.msra.gmra.mxu0 %vm70_vm0, %v47_v8  ;;  %v22_v18 = vld [vmem:[%s1313_s0 + $0x40] sm:$0xff]  ;;  %v55_v20 = vpack.c.bf16 %v33_v16, %v32_v15  ;;  %v35_v21 = vld [vmem:[%s1313_s0 + $0xa8] sm:$0xff]  ;;  %v36_v25 = vld [vmem:[%s1313_s0 + $0xb0] sm:$0xff] }
   0x7   :  { %718 = vmatprep.mubr.msk.bf16.mxu0 %vm70_vm0, %v48_v9  ;;  %730 = vmatprep.mubr.msk.bf16.mxu1 %vm70_vm0, %v54_v14  ;;  %v56_v22 = vpack.c.bf16 %v35_v21, %v34_v17  ;;  %v50_v24 = vpack.c.bf16 %v23_v19, %v22_v18  ;;  %v37_v26 = vld [vmem:[%s1313_s0 + $0xb8] sm:$0xff]  ;;  %v38_v27 = vld [vmem:[%s1313_s0 + $0xc0] sm:$0xff]  ;;  %v39_v28 = vld [vmem:[%s1313_s0 + $0xc8] sm:$0xff] }
   0x8   :  { %731 = vmatmul.mubr.msk.bf16.vlgmr.msra.gmra.mxu1 %vm70_vm0, %v55_v20  ;;  %v57_v29 = vpack.c.bf16 %v37_v26, %v36_v25  ;;  %v24_v30 = vld [vmem:[%s1313_s0 + $0x50] sm:$0xff]  ;;  %v25_v31 = vld [vmem:[%s1313_s0 + $0x58] sm:$0xff]  ;;  %v58_v32 = vpack.c.bf16 %v39_v28, %v38_v27  ;;  %v26_v33 = vld [vmem:[%s1313_s0 + $0x60] sm:$0xff] }
   0x9   :  { %734 = vmatprep.mubr.msk.bf16.mxu1 %vm70_vm0, %v56_v22  ;;  %v27_v34 = vld [vmem:[%s1313_s0 + $0x68] sm:$0xff]  ;;  %v51_v35 = vpack.c.bf16 %v25_v31, %v24_v30  ;;  %v40_v37 = vld [vmem:[%s1313_s0 + $0xd0] sm:$0xff]  ;;  %v41_v38 = vld [vmem:[%s1313_s0 + $0xd8] sm:$0xff] }
   0xa   :  { %v52_v36 = vpack.c.bf16 %v27_v34, %v26_v33  ;;  %v42_v39 = vld [vmem:[%s1313_s0 + $0xe0] sm:$0xff]  ;;  %v43_v40 = vld [vmem:[%s1313_s0 + $0xe8] sm:$0xff]  ;;  %v59_v41 = vpack.c.bf16 %v41_v38, %v40_v37  ;;  %v28_v42 = vld [vmem:[%s1313_s0 + $0x70] sm:$0xff] }
   0xb   :  { %v29_v43 = vld [vmem:[%s1313_s0 + $0x78] sm:$0xff]  ;;  %v60_v44 = vpack.c.bf16 %v43_v40, %v42_v39  ;;  %v44_v46 = vld [vmem:[%s1313_s0 + $0xf0] sm:$0xff] }
   0xc   :  { %v53_v45 = vpack.c.bf16 %v29_v43, %v28_v42  ;;  %v45_v47 = vld [vmem:[%s1313_s0 + $0xf8] sm:$0xff] }
   0xd   :  { %v61_v48 = vpack.c.bf16 %v45_v47, %v44_v46 }
   0xe   :  { %719 = vmatmul.mubr.msk.bf16.gmra.mxu0 %vm70_vm0, %v49_v23 }
   0xf   :  { %722 = vmatprep.mubr.msk.bf16.mxu0 %vm70_vm0, %v50_v24 }
  0x10   :  { %735 = vmatmul.mubr.msk.bf16.gmra.mxu1 %vm70_vm0, %v57_v29 }
  0x11   :  { %738 = vmatprep.mubr.msk.bf16.mxu1 %vm70_vm0, %v58_v32 }
  0x16   :  { %723 = vmatmul.mubr.msk.bf16.gmra.mxu0 %vm70_vm0, %v51_v35 }
  0x17   :  { %726 = vmatprep.mubr.msk.bf16.mxu0 %vm70_vm0, %v52_v36 }
  0x18   :  { %739 = vmatmul.mubr.msk.bf16.gmra.mxu1 %vm70_vm0, %v59_v41 }
  0x19   :  { %742 = vmatprep.mubr.msk.bf16.mxu1 %vm70_vm0, %v60_v44 }
  0x1e   :  { %727 = vmatmul.mubr.msk.bf16.gmra.mxu0 %vm70_vm0, %v53_v45 }
  0x20   :  { %743 = vmatmul.mubr.msk.bf16.gmra.mxu1 %vm70_vm0, %v61_v48 }
  0xc6   :  { %v887_v49 = vpop.f32.mrf.mxu0 }
  0xc7   :  { %282 = vst [vmem:[%s1314_s2 + $0x10] sm:$0xff] %v887_v49  ;;  %454 = vrot.lane.b32.xlu1 %v887_v49, %s751_s23 }
  0xc8   :  { %v895_v50 = vpop.f32.mrf.mxu0  ;;  %v905_v52 = vpop.f32.mrf.mxu1 }
  0xc9   :  { %280 = vst [vmem:[%s1314_s2] sm:$0xff] %v895_v50  ;;  %450 = vrot.lane.b32.xlu0 %v895_v50, %s751_s23  ;;  %298 = vst [vmem:[%s1314_s2 + $0x90] sm:$0xff] %v905_v52 }
  0xca   :  { %v903_v51 = vpop.f32.mrf.mxu0  ;;  %v919_v54 = vpop.f32.mrf.mxu1 }
  0xcb   :  { %283 = vst [vmem:[%s1314_s2 + $0x18] sm:$0xff] %v903_v51  ;;  %456 = vrot.lane.b32.xlu1 %v903_v51, %s751_s23  ;;  %296 = vst [vmem:[%s1314_s2 + $0x80] sm:$0xff] %v919_v54 }
  0xcc   :  { %v917_v53 = vpop.f32.mrf.mxu0  ;;  %v933_v56 = vpop.f32.mrf.mxu1 }
  0xcd   :  { %281 = vst [vmem:[%s1314_s2 + $0x8] sm:$0xff] %v917_v53  ;;  %452 = vrot.lane.b32.xlu0 %v917_v53, %s751_s23  ;;  %299 = vst [vmem:[%s1314_s2 + $0x98] sm:$0xff] %v933_v56 }
  0xce   :  { %v931_v55 = vpop.f32.mrf.mxu0  ;;  %v945_v58 = vpop.f32.mrf.mxu1 }
  0xcf   :  { %286 = vst [vmem:[%s1314_s2 + $0x30] sm:$0xff] %v931_v55  ;;  %297 = vst [vmem:[%s1314_s2 + $0x88] sm:$0xff] %v945_v58 }
  0xd0   :  { %v943_v57 = vpop.f32.mrf.mxu0  ;;  %v959_v60 = vpop.f32.mrf.mxu1 }
  0xd1   :  { %284 = vst [vmem:[%s1314_s2 + $0x20] sm:$0xff] %v943_v57  ;;  %458 = vrot.lane.b32.xlu0 %v943_v57, %s751_s23  ;;  %302 = vst [vmem:[%s1314_s2 + $0xb0] sm:$0xff] %v959_v60 }
  0xd2   :  { %v957_v59 = vpop.f32.mrf.mxu0  ;;  %v971_v62 = vpop.f32.mrf.mxu1 }
  0xd3   :  { %287 = vst [vmem:[%s1314_s2 + $0x38] sm:$0xff] %v957_v59  ;;  %300 = vst [vmem:[%s1314_s2 + $0xa0] sm:$0xff] %v971_v62 }
  0xd4   :  { %v969_v61 = vpop.f32.mrf.mxu0  ;;  %v987_v0 = vpop.f32.mrf.mxu1 }
  0xd5   :  { %285 = vst [vmem:[%s1314_s2 + $0x28] sm:$0xff] %v969_v61  ;;  %462 = vrot.lane.b32.xlu0 %v931_v55, %s751_s23  ;;  %460 = vrot.lane.b32.xlu1 %v969_v61, %s751_s23  ;;  %303 = vst [vmem:[%s1314_s2 + $0xb8] sm:$0xff] %v987_v0 }
  0xd6   :  { %v985_v63 = vpop.f32.mrf.mxu0  ;;  %v999_v2 = vpop.f32.mrf.mxu1 }
  0xd7   :  { %290 = vst [vmem:[%s1314_s2 + $0x50] sm:$0xff] %v985_v63  ;;  %301 = vst [vmem:[%s1314_s2 + $0xa8] sm:$0xff] %v999_v2 }
  0xd8   :  { %v997_v1 = vpop.f32.mrf.mxu0  ;;  %v1015_v4 = vpop.f32.mrf.mxu1 }
  0xd9   :  { %288 = vst [vmem:[%s1314_s2 + $0x40] sm:$0xff] %v997_v1  ;;  %464 = vrot.lane.b32.xlu1 %v957_v59, %s751_s23  ;;  %466 = vrot.lane.b32.xlu0 %v997_v1, %s751_s23  ;;  %306 = vst [vmem:[%s1314_s2 + $0xd0] sm:$0xff] %v1015_v4 }
  0xda   :  { %v1013_v3 = vpop.f32.mrf.mxu0  ;;  %v1027_v6 = vpop.f32.mrf.mxu1 }
  0xdb   :  { %291 = vst [vmem:[%s1314_s2 + $0x58] sm:$0xff] %v1013_v3  ;;  %304 = vst [vmem:[%s1314_s2 + $0xc0] sm:$0xff] %v1027_v6 }
  0xdc   :  { %v1025_v5 = vpop.f32.mrf.mxu0  ;;  %v1043_v8 = vpop.f32.mrf.mxu1 }
  0xdd   :  { %289 = vst [vmem:[%s1314_s2 + $0x48] sm:$0xff] %v1025_v5  ;;  %470 = vrot.lane.b32.xlu0 %v985_v63, %s751_s23  ;;  %468 = vrot.lane.b32.xlu1 %v1025_v5, %s751_s23  ;;  %307 = vst [vmem:[%s1314_s2 + $0xd8] sm:$0xff] %v1043_v8 }
  0xde   :  { %v1041_v7 = vpop.f32.mrf.mxu0  ;;  %v1055_v10 = vpop.f32.mrf.mxu1 }
  0xdf   :  { %294 = vst [vmem:[%s1314_s2 + $0x70] sm:$0xff] %v1041_v7  ;;  %305 = vst [vmem:[%s1314_s2 + $0xc8] sm:$0xff] %v1055_v10 }
  0xe0   :  { %v1053_v9 = vpop.f32.mrf.mxu0  ;;  %v1071_v12 = vpop.f32.mrf.mxu1 }
  0xe1   :  { %292 = vst [vmem:[%s1314_s2 + $0x60] sm:$0xff] %v1053_v9  ;;  %472 = vrot.lane.b32.xlu1 %v1013_v3, %s751_s23  ;;  %474 = vrot.lane.b32.xlu0 %v1053_v9, %s751_s23  ;;  %310 = vst [vmem:[%s1314_s2 + $0xf0] sm:$0xff] %v1071_v12 }
  0xe2   :  { %v1069_v11 = vpop.f32.mrf.mxu0  ;;  %v1083_v14 = vpop.f32.mrf.mxu1 }
  0xe3   :  { %295 = vst [vmem:[%s1314_s2 + $0x78] sm:$0xff] %v1069_v11  ;;  %308 = vst [vmem:[%s1314_s2 + $0xe0] sm:$0xff] %v1083_v14 }
  0xe4   :  { %v1081_v13 = vpop.f32.mrf.mxu0  ;;  %v1097_v15 = vpop.f32.mrf.mxu1 }
  0xe5   :  { %293 = vst [vmem:[%s1314_s2 + $0x68] sm:$0xff] %v1081_v13  ;;  %478 = vrot.lane.b32.xlu0 %v1041_v7, %s751_s23  ;;  %476 = vrot.lane.b32.xlu1 %v1081_v13, %s751_s23  ;;  %311 = vst [vmem:[%s1314_s2 + $0xf8] sm:$0xff] %v1097_v15 }
  0xe6   :  { %v1103_v16 = vpop.f32.mrf.mxu1 }
  0xe7   :  { %309 = vst [vmem:[%s1314_s2 + $0xe8] sm:$0xff] %v1103_v16 }
  0xe9   :  { %482 = vrot.lane.b32.xlu0 %v919_v54, %s751_s23  ;;  %480 = vrot.lane.b32.xlu1 %v1069_v11, %s751_s23 }
  0xed   :  { %486 = vrot.lane.b32.xlu0 %v905_v52, %s751_s23  ;;  %484 = vrot.lane.b32.xlu1 %v945_v58, %s751_s23 }
  0xf1   :  { %490 = vrot.lane.b32.xlu0 %v971_v62, %s751_s23  ;;  %488 = vrot.lane.b32.xlu1 %v933_v56, %s751_s23 }
  0xf5   :  { %494 = vrot.lane.b32.xlu0 %v959_v60, %s751_s23  ;;  %492 = vrot.lane.b32.xlu1 %v999_v2, %s751_s23 }
  0xf9   :  { %498 = vrot.lane.b32.xlu0 %v1027_v6, %s751_s23  ;;  %496 = vrot.lane.b32.xlu1 %v987_v0, %s751_s23 }
  0xfd   :  { %502 = vrot.lane.b32.xlu0 %v1015_v4, %s751_s23  ;;  %500 = vrot.lane.b32.xlu1 %v1055_v10, %s751_s23 }
 0x101   :  { %506 = vrot.lane.b32.xlu0 %v1083_v14, %s751_s23  ;;  %504 = vrot.lane.b32.xlu1 %v1043_v8, %s751_s23 }
 0x105   :  { %510 = vrot.lane.b32.xlu0 %v1071_v12, %s751_s23  ;;  %508 = vrot.lane.b32.xlu1 %v1103_v16, %s751_s23 }
 0x109   :  { %512 = vrot.lane.b32.xlu1 %v1097_v15, %s751_s23 }
 0x139   :  { %v455_v17 = vpop.permute.xlu1 %454 }
 0x13a   :  { %v548_v22 = vmul.f32 %v887_v49, %v455_v17 }
 0x13b   :  { %v451_v18 = vpop.permute.xlu0 %450 }
 0x13c   :  { %v546_v19 = vmul.f32 %v451_v18, %v895_v50  ;;  %v582_v29 = vsel %vm578_vm1, %v548_v22, 0.0 }
 0x13d   :  { %v457_v20 = vpop.permute.xlu1 %456 }
 0x13e   :  { %v579_v24 = vsel %vm578_vm1, %v546_v19, 0.0  ;;  %v549_v25 = vmul.f32 %v903_v51, %v457_v20 }
 0x13f   :  { %v453_v21 = vpop.permute.xlu0 %452 }
 0x140   :  { %v547_v23 = vmul.f32 %v453_v21, %v917_v53  ;;  %v584_v32 = vsel %vm578_vm1, %v549_v25, 0.0 }
 0x142   :  { %v580_v26 = vsel %vm578_vm1, %v547_v23, 0.0 }
 0x143   :  { %v581_v27 = vadd.f32 %v580_v26, %v579_v24  ;;  %v459_v28 = vpop.permute.xlu0 %458 }
 0x144   :  { %v550_v30 = vmul.f32 %v459_v28, %v943_v57 }
 0x145   :  { %v583_v31 = vadd.f32 %v582_v29, %v581_v27 }
 0x146   :  { %v586_v36 = vsel %vm578_vm1, %v550_v30, 0.0 }
 0x147   :  { %v585_v33 = vadd.f32 %v584_v32, %v583_v31  ;;  %v463_v34 = vpop.permute.xlu0 %462  ;;  %v461_v35 = vpop.permute.xlu1 %460 }
 0x148   :  { %v552_v37 = vmul.f32 %v931_v55, %v463_v34  ;;  %v551_v38 = vmul.f32 %v461_v35, %v969_v61 }
 0x149   :  { %v587_v39 = vadd.f32 %v586_v36, %v585_v33 }
 0x14a   :  { %v588_v40 = vsel %vm578_vm1, %v551_v38, 0.0  ;;  %v590_v44 = vsel %vm578_vm1, %v552_v37, 0.0 }
 0x14b   :  { %v589_v41 = vadd.f32 %v588_v40, %v587_v39  ;;  %v465_v42 = vpop.permute.xlu1 %464  ;;  %v467_v43 = vpop.permute.xlu0 %466 }
 0x14c   :  { %v553_v45 = vmul.f32 %v957_v59, %v465_v42  ;;  %v554_v46 = vmul.f32 %v467_v43, %v997_v1 }
 0x14d   :  { %v591_v47 = vadd.f32 %v590_v44, %v589_v41 }
 0x14e   :  { %v592_v48 = vsel %vm578_vm1, %v553_v45, 0.0  ;;  %v594_v20 = vsel %vm578_vm1, %v554_v46, 0.0 }
 0x14f   :  { %v593_v17 = vadd.f32 %v592_v48, %v591_v47  ;;  %v471_v18 = vpop.permute.xlu0 %470  ;;  %v469_v19 = vpop.permute.xlu1 %468 }
 0x150   :  { %v556_v21 = vmul.f32 %v985_v63, %v471_v18  ;;  %v555_v22 = vmul.f32 %v469_v19, %v1025_v5 }
 0x151   :  { %v595_v23 = vadd.f32 %v594_v20, %v593_v17 }
 0x152   :  { %v596_v24 = vsel %vm578_vm1, %v555_v22, 0.0  ;;  %v598_v28 = vsel %vm578_vm1, %v556_v21, 0.0 }
 0x153   :  { %v597_v25 = vadd.f32 %v596_v24, %v595_v23  ;;  %v473_v26 = vpop.permute.xlu1 %472  ;;  %v475_v27 = vpop.permute.xlu0 %474 }
 0x154   :  { %v557_v29 = vmul.f32 %v1013_v3, %v473_v26  ;;  %v558_v30 = vmul.f32 %v475_v27, %v1053_v9 }
 0x155   :  { %v599_v31 = vadd.f32 %v598_v28, %v597_v25 }
 0x156   :  { %v600_v32 = vsel %vm578_vm1, %v557_v29, 0.0  ;;  %v602_v36 = vsel %vm578_vm1, %v558_v30, 0.0 }
 0x157   :  { %v601_v33 = vadd.f32 %v600_v32, %v599_v31  ;;  %v479_v34 = vpop.permute.xlu0 %478  ;;  %v477_v35 = vpop.permute.xlu1 %476 }
 0x158   :  { %v560_v37 = vmul.f32 %v1041_v7, %v479_v34  ;;  %v559_v38 = vmul.f32 %v477_v35, %v1081_v13 }
 0x159   :  { %v603_v39 = vadd.f32 %v602_v36, %v601_v33 }
 0x15a   :  { %v604_v40 = vsel %vm578_vm1, %v559_v38, 0.0  ;;  %v606_v44 = vsel %vm578_vm1, %v560_v37, 0.0 }
 0x15b   :  { %v605_v41 = vadd.f32 %v604_v40, %v603_v39  ;;  %v483_v42 = vpop.permute.xlu0 %482  ;;  %v481_v43 = vpop.permute.xlu1 %480  ;;  %v350_v40 = vmul.f32 %v917_v53, %v917_v53 }
 0x15c   :  { %v562_v45 = vmul.f32 %v483_v42, %v919_v54  ;;  %v561_v46 = vmul.f32 %v1069_v11, %v481_v43 }
 0x15d   :  { %v607_v47 = vadd.f32 %v606_v44, %v605_v41 }
 0x15e   :  { %v608_v48 = vsel %vm578_vm1, %v561_v46, 0.0  ;;  %v610_v20 = vsel %vm578_vm1, %v562_v45, 0.0  ;;  %v349_v45 = vmul.f32 %v895_v50, %v895_v50 }
 0x15f   :  { %v609_v17 = vadd.f32 %v608_v48, %v607_v47  ;;  %v487_v18 = vpop.permute.xlu0 %486  ;;  %v485_v19 = vpop.permute.xlu1 %484 }
 0x160   :  { %v564_v21 = vmul.f32 %v905_v52, %v487_v18  ;;  %v563_v22 = vmul.f32 %v485_v19, %v945_v58  ;;  %v381_v18 = vadd.f32 %v350_v40, %v349_v45 }
 0x161   :  { %v611_v23 = vadd.f32 %v610_v20, %v609_v17  ;;  %v312_v20 = vadd.f32 %v917_v53, %v895_v50 }
 0x162   :  { %v612_v24 = vsel %vm578_vm1, %v563_v22, 0.0  ;;  %v614_v28 = vsel %vm578_vm1, %v564_v21, 0.0 }
 0x163   :  { %v613_v25 = vadd.f32 %v612_v24, %v611_v23  ;;  %v491_v26 = vpop.permute.xlu0 %490  ;;  %v489_v27 = vpop.permute.xlu1 %488  ;;  %v351_v24 = vmul.f32 %v887_v49, %v887_v49 }
 0x164   :  { %v566_v29 = vmul.f32 %v491_v26, %v971_v62  ;;  %v565_v30 = vmul.f32 %v933_v56, %v489_v27 }
 0x165   :  { %v615_v31 = vadd.f32 %v614_v28, %v613_v25 }
 0x166   :  { %v616_v32 = vsel %vm578_vm1, %v565_v30, 0.0  ;;  %v618_v36 = vsel %vm578_vm1, %v566_v29, 0.0  ;;  %v382_v29 = vadd.f32 %v381_v18, %v351_v24 }
 0x167   :  { %v617_v33 = vadd.f32 %v616_v32, %v615_v31  ;;  %v495_v34 = vpop.permute.xlu0 %494  ;;  %v493_v35 = vpop.permute.xlu1 %492  ;;  %v313_v31 = vadd.f32 %v887_v49, %v312_v20 }
 0x168   :  { %v568_v37 = vmul.f32 %v959_v60, %v495_v34  ;;  %v567_v38 = vmul.f32 %v493_v35, %v999_v2 }
 0x169   :  { %v619_v39 = vadd.f32 %v618_v36, %v617_v33  ;;  %v352_v33 = vmul.f32 %v903_v51, %v903_v51  ;;  %v314_v40 = vadd.f32 %v903_v51, %v313_v31 }
 0x16a   :  { %v620_v41 = vsel %vm578_vm1, %v567_v38, 0.0  ;;  %v622_v46 = vsel %vm578_vm1, %v568_v37, 0.0 }
 0x16b   :  { %v621_v42 = vadd.f32 %v620_v41, %v619_v39  ;;  %v499_v43 = vpop.permute.xlu0 %498  ;;  %v497_v44 = vpop.permute.xlu1 %496  ;;  %v383_v38 = vadd.f32 %v382_v29, %v352_v33  ;;  %v315_v20 = vadd.f32 %v314_v40, %v943_v57  ;;  %v359_v40 = vmul.f32 %v985_v63, %v985_v63 }
 0x16c   :  { %v570_v47 = vmul.f32 %v499_v43, %v1027_v6  ;;  %v569_v48 = vmul.f32 %v987_v0, %v497_v44  ;;  %v353_v43 = vmul.f32 %v943_v57, %v943_v57  ;;  %v356_v57 = vmul.f32 %v957_v59, %v957_v59 }
 0x16d   :  { %v623_v17 = vadd.f32 %v622_v46, %v621_v42 }
 0x16e   :  { %v624_v19 = vsel %vm578_vm1, %v569_v48, 0.0  ;;  %v626_v25 = vsel %vm578_vm1, %v570_v47, 0.0  ;;  %v384_v48 = vadd.f32 %v383_v38, %v353_v43 }
 0x16f   :  { %v625_v21 = vadd.f32 %v624_v19, %v623_v17  ;;  %v503_v22 = vpop.permute.xlu0 %502  ;;  %v501_v23 = vpop.permute.xlu1 %500  ;;  %v354_v17 = vmul.f32 %v969_v61, %v969_v61 }
 0x170   :  { %v572_v26 = vmul.f32 %v1015_v4, %v503_v22  ;;  %v571_v27 = vmul.f32 %v501_v23, %v1055_v10 }
 0x171   :  { %v627_v28 = vadd.f32 %v626_v25, %v625_v21  ;;  %v385_v24 = vadd.f32 %v384_v48, %v354_v17 }
 0x172   :  { %v628_v30 = vsel %vm578_vm1, %v571_v27, 0.0  ;;  %v630_v34 = vsel %vm578_vm1, %v572_v26, 0.0  ;;  %v355_v27 = vmul.f32 %v931_v55, %v931_v55 }
 0x173   :  { %v629_v32 = vadd.f32 %v628_v30, %v627_v28  ;;  %v507_v50 = vpop.permute.xlu0 %506  ;;  %v505_v53 = vpop.permute.xlu1 %504  ;;  %v316_v28 = vadd.f32 %v315_v20, %v969_v61  ;;  %v358_v61 = vmul.f32 %v1025_v5, %v1025_v5 }
 0x174   :  { %v574_v35 = vmul.f32 %v507_v50, %v1083_v14  ;;  %v573_v36 = vmul.f32 %v1043_v8, %v505_v53  ;;  %v386_v30 = vadd.f32 %v385_v24, %v355_v27 }
 0x175   :  { %v631_v37 = vadd.f32 %v630_v34, %v629_v32  ;;  %v317_v32 = vadd.f32 %v931_v55, %v316_v28 }
 0x176   :  { %v632_v39 = vsel %vm578_vm1, %v573_v36, 0.0  ;;  %v634_v44 = vsel %vm578_vm1, %v574_v35, 0.0  ;;  %v387_v53 = vadd.f32 %v386_v30, %v356_v57  ;;  %v357_v35 = vmul.f32 %v997_v1, %v997_v1 }
 0x177   :  { %v633_v41 = vadd.f32 %v632_v39, %v631_v37  ;;  %v511_v49 = vpop.permute.xlu0 %510  ;;  %v509_v42 = vpop.permute.xlu1 %508  ;;  %v318_v34 = vadd.f32 %v957_v59, %v317_v32  ;;  %v370_v30 = vmul.f32 %v999_v2, %v999_v2 }
 0x178   :  { %v576_v45 = vmul.f32 %v1071_v12, %v511_v49  ;;  %v575_v46 = vmul.f32 %v509_v42, %v1103_v16  ;;  %v388_v37 = vadd.f32 %v387_v53, %v357_v35  ;;  %v360_v49 = vmul.f32 %v1013_v3, %v1013_v3 }
 0x179   :  { %v635_v47 = vadd.f32 %v634_v44, %v633_v41  ;;  %v319_v39 = vadd.f32 %v318_v34, %v997_v1  ;;  %v361_v44 = vmul.f32 %v1053_v9, %v1053_v9  ;;  %v374_v35 = vmul.f32 %v1055_v10, %v1055_v10 }
 0x17a   :  { %v636_v18 = vsel %vm578_vm1, %v575_v46, 0.0  ;;  %v638_v21 = vsel %vm578_vm1, %v576_v45, 0.0  ;;  %v389_v55 = vadd.f32 %v388_v37, %v358_v61  ;;  %v362_v45 = vmul.f32 %v1081_v13, %v1081_v13 }
 0x17b   :  { %v637_v51 = vadd.f32 %v636_v18, %v635_v47  ;;  %v513_v19 = vpop.permute.xlu1 %512  ;;  %v320_v59 = vadd.f32 %v319_v39, %v1025_v5  ;;  %v363_v5 = vmul.f32 %v1041_v7, %v1041_v7 }
 0x17c   :  { %v577_v22 = vmul.f32 %v1097_v15, %v513_v19  ;;  %v390_v41 = vadd.f32 %v389_v55, %v359_v40  ;;  %v377_v55 = vmul.f32 %v1083_v14, %v1083_v14 }
 0x17d   :  { %v639_v23 = vadd.f32 %v638_v21, %v637_v51  ;;  %v321_v42 = vadd.f32 %v985_v63, %v320_v59  ;;  %v364_v63 = vmul.f32 %v1069_v11, %v1069_v11 }
 0x17e   :  { %v640_v25 = vsel %vm578_vm1, %v577_v22, 0.0  ;;  %v391_v43 = vadd.f32 %v390_v41, %v360_v49  ;;  %v366_v22 = vmul.f32 %v945_v58, %v945_v58  ;;  %v378_v41 = vmul.f32 %v1103_v16, %v1103_v16 }
 0x17f   :  { %v641_v26 = vadd.f32 %v640_v25, %v639_v23  ;;  %v322_v1 = vadd.f32 %v1013_v3, %v321_v42  ;;  %v365_v3 = vmul.f32 %v919_v54, %v919_v54 }
 0x180   :  { %v392_v46 = vadd.f32 %v391_v43, %v361_v44 }
 0x181   :  { %v642_v29 = vrot.slane %v641_v26, 4  ;;  %v323_v47 = vadd.f32 %v322_v1, %v1053_v9 }
 0x182   :  { %v393_v48 = vadd.f32 %v392_v46, %v362_v45 }
 0x183   :  { %v643_v31 = vadd.f32 %v642_v29, %v641_v26  ;;  %v324_v17 = vadd.f32 %v323_v47, %v1081_v13  ;;  %v367_v13 = vmul.f32 %v905_v52, %v905_v52 }
 0x184   :  { %v394_v18 = vadd.f32 %v393_v48, %v363_v5 }
 0x185   :  { %v644_v50 = vrot.slane %v643_v31, 2  ;;  %v325_v51 = vadd.f32 %v1041_v7, %v324_v17  ;;  %v368_v7 = vmul.f32 %v933_v56, %v933_v56 }
 0x186   :  { %v395_v19 = vadd.f32 %v394_v18, %v364_v63 }
 0x187   :  { %v645_v33 = vadd.f32 %v644_v50, %v643_v31  ;;  %v326_v20 = vadd.f32 %v1069_v11, %v325_v51 }
 0x188   :  { %v396_v21 = vadd.f32 %v395_v19, %v365_v3 }
 0x189   :  { %v646_v36 = vrot.slane %v645_v33, 1  ;;  %v327_v9 = vadd.f32 %v326_v20, %v919_v54  ;;  %v369_v54 = vmul.f32 %v971_v62, %v971_v62 }
 0x18a   :  { %v397_v23 = vadd.f32 %v396_v21, %v366_v22 }
 0x18b   :  { %v1235_v38 = vadd.f32 %v646_v36, %v645_v33  ;;  %v328_v24 = vadd.f32 %v327_v9, %v945_v58  ;;  %v371_v58 = vmul.f32 %v959_v60, %v959_v60 }
 0x18c   :  { %v398_v25 = vadd.f32 %v397_v23, %v367_v13 }
 0x18d   :  { %649 = vrot.lane.b32.xlu0 %v1235_v38, %s751_s23  ;;  %v329_v26 = vadd.f32 %v905_v52, %v328_v24  ;;  %v372_v52 = vmul.f32 %v987_v0, %v987_v0 }
 0x18e   :  { %v399_v27 = vadd.f32 %v398_v25, %v368_v7 }
 0x18f   :  { %v330_v11 = vadd.f32 %v933_v56, %v329_v26 }
 0x190   :  { %v400_v28 = vadd.f32 %v399_v27, %v369_v54 }
 0x191   :  { %v331_v29 = vadd.f32 %v330_v11, %v971_v62  ;;  %v373_v62 = vmul.f32 %v1027_v6, %v1027_v6 }
 0x192   :  { %v401_v31 = vadd.f32 %v400_v28, %v370_v30 }
 0x193   :  { %v332_v57 = vadd.f32 %v331_v29, %v999_v2  ;;  %v375_v2 = vmul.f32 %v1015_v4, %v1015_v4 }
 0x194   :  { %v402_v32 = vadd.f32 %v401_v31, %v371_v58 }
 0x195   :  { %v333_v56 = vadd.f32 %v959_v60, %v332_v57  ;;  %v376_v60 = vmul.f32 %v1043_v8, %v1043_v8 }
 0x196   :  { %v403_v50 = vadd.f32 %v402_v32, %v372_v52 }
 0x197   :  { %v334_v53 = vadd.f32 %v987_v0, %v333_v56 }
 0x198   :  { %v404_v33 = vadd.f32 %v403_v50, %v373_v62 }
 0x199   :  { %v335_v34 = vadd.f32 %v334_v53, %v1027_v6 }
 0x19a   :  { %v405_v36 = vadd.f32 %v404_v33, %v374_v35 }
 0x19b   :  { %v336_v37 = vadd.f32 %v335_v34, %v1055_v10  ;;  %v379_v10 = vmul.f32 %v1071_v12, %v1071_v12 }
 0x19c   :  { %v406_v61 = vadd.f32 %v405_v36, %v375_v2 }
 0x19d   :  { %v337_v0 = vadd.f32 %v1015_v4, %v336_v37  ;;  %v380_v4 = vmul.f32 %v1097_v15, %v1097_v15 }
 0x19e   :  { %v407_v39 = vadd.f32 %v406_v61, %v376_v60 }
 0x19f   :  { %v338_v6 = vadd.f32 %v1043_v8, %v337_v0 }
 0x1a0   :  { %v408_v40 = vadd.f32 %v407_v39, %v377_v55 }
 0x1a1   :  { %v339_v59 = vadd.f32 %v338_v6, %v1083_v14 }
 0x1a2   :  { %v409_v49 = vadd.f32 %v408_v40, %v378_v41 }
 0x1a3   :  { %v340_v42 = vadd.f32 %v339_v59, %v1103_v16 }
 0x1a4   :  { %v410_v43 = vadd.f32 %v409_v49, %v379_v10 }
 0x1a5   :  { %v341_v44 = vadd.f32 %v1071_v12, %v340_v42 }
 0x1a6   :  { %v411_v1 = vadd.f32 %v410_v43, %v380_v4 }
 0x1a7   :  { %v342_v8 = vadd.f32 %v1097_v15, %v341_v44 }
 0x1a8   :  { %v412_v45 = vrot.slane %v411_v1, 4 }
 0x1a9   :  { %v343_v14 = vrot.slane %v342_v8, 4 }
 0x1aa   :  { %v413_v46 = vadd.f32 %v412_v45, %v411_v1 }
 0x1ab   :  { %v344_v47 = vadd.f32 %v343_v14, %v342_v8 }
 0x1ac   :  { %v414_v48 = vrot.slane %v413_v46, 2 }
 0x1ad   :  { %v345_v5 = vrot.slane %v344_v47, 2 }
 0x1ae   :  { %v415_v17 = vadd.f32 %v414_v48, %v413_v46 }
 0x1af   :  { %v346_v18 = vadd.f32 %v345_v5, %v344_v47 }
 0x1b0   :  { %v416_v63 = vrot.slane %v415_v17, 1 }
 0x1b1   :  { %v347_v51 = vrot.slane %v346_v18, 1 }
 0x1b2   :  { %v417_v16 = vadd.f32 %v416_v63, %v415_v17 }
 0x1b3   :  { %v348_v3 = vadd.f32 %v347_v51, %v346_v18 }
 0x1b5   :  { %v657_v20 = vsel %vm656_vm2, %v348_v3, %v417_v16 }
 0x1ff   :  { %v650_v19 = vpop.permute.xlu0 %649 }
 0x200   :  { %v652_v12 = vsel %vm578_vm1, %v1235_v38, %v650_v19 }
 0x201   :  { %v654_v15 = vrot.slane %v652_v12, 6 }
 0x203   :  { %v659_v21 = vsel %vm658_vm3, %v657_v20, %v654_v15 }
 0x204   :  { %v661_v9 = vsel %vm660_vm4, %v659_v21, 0.0 }
 0x205   :  { %669 = vst [vmem:[%s1315_s3] sm:$0xff] %v661_v9 }

// kernel: closed_set_classifier_forward.8
= control target key start
LH: loop header
LB: loop body
LE: loop exit
PB: predicated region body
PF: predicated region fallthrough
CT: control target
= control target key end

     0   :  { %s809_s19 = smov 64   ;;  %v133_v53 = vlaneseq  ;;  %vm733_vm4 = vcmask 523264   ;;  %s1884_s1 = inlined_call_operand.vmem [shape: f32[8,128], index: 1, kind: input, shape index: {}]   ;;  %s1885_s0 = inlined_call_operand.vmem [shape: f32[2,128,128], index: 0, kind: input, shape index: {}]   ;;  %s1886_s2 = inlined_call_operand.vmem [shape: f32[3,64], index: 2, kind: input, shape index: {}]   ;;  %s1887_s3 = inlined_call_operand.vmem [shape: f32[2,64], index: 3, kind: input, shape index: {}]   ;;  %s1888_s4 = inlined_call_operand.vmem [shape: f32[2,128,128], index: 4, kind: output, shape index: {}]  }
   0x1   :  { %v17_v0 = vld [vmem:[%s1884_s1] sm:$0x1]  ;;  %v19_v1 = vld [vmem:[%s1884_s1 + $0x1] sm:$0x1]  ;;  %v854_v7 = vld [vmem:[%s1885_s0 + $0x8] sm:$0xff] }
   0x2   :  { %v841_v2 = vmul.f32 0.00390625, %v17_v0  ;;  %v20_v3 = vmul.f32 0.00390625, %v19_v1  ;;  %1931 = vst [vmem:[#allocation2_spill] sm:$0xff] %v854_v7  ;;  %v861_v8 = vld [vmem:[%s1885_s0 + $0x18] sm:$0xff]  ;;  %v868_v9 = vld [vmem:[%s1885_s0 + $0x28] sm:$0xff]  ;;  %v134_v55 = vshrl.u32 %v133_v53, 7 }
   0x3   :  { %1932 = vst [vmem:[#allocation3_spill] sm:$0xff] %v861_v8  ;;  %1933 = vst [vmem:[#allocation4_spill] sm:$0xff] %v868_v9  ;;  %v875_v10 = vld [vmem:[%s1885_s0 + $0x38] sm:$0xff]  ;;  %v882_v11 = vld [vmem:[%s1885_s0 + $0x48] sm:$0xff] }
   0x4   :  { %27 = vrot.lane.b32.xlu0 %v841_v2, %s809_s19  ;;  %v23_v4 = vmul.f32 %v841_v2, %v841_v2  ;;  %1934 = vst [vmem:[#allocation5_spill] sm:$0xff] %v875_v10  ;;  %1935 = vst [vmem:[#allocation6_spill] sm:$0xff] %v882_v11  ;;  %v889_v12 = vld [vmem:[%s1885_s0 + $0x58] sm:$0xff]  ;;  %v896_v13 = vld [vmem:[%s1885_s0 + $0x68] sm:$0xff]  ;;  %v978_v0 = vsub.s32 0, %v134_v55 }
   0x5   :  { %1936 = vst [vmem:[#allocation7_spill] sm:$0xff] %v889_v12  ;;  %1937 = vst [vmem:[#allocation8_spill] sm:$0xff] %v896_v13  ;;  %v903_v14 = vld [vmem:[%s1885_s0 + $0x78] sm:$0xff]  ;;  %v910_v15 = vld [vmem:[%s1885_s0 + $0x88] sm:$0xff] }
   0x6   :  { %v24_v5 = vsub.f32 %v20_v3, %v23_v4  ;;  %1938 = vst [vmem:[#allocation9_spill] sm:$0xff] %v903_v14  ;;  %1939 = vst [vmem:[#allocation10_spill] sm:$0xff] %v910_v15  ;;  %v917_v16 = vld [vmem:[%s1885_s0 + $0x98] sm:$0xff]  ;;  %v924_v17 = vld [vmem:[%s1885_s0 + $0xa8] sm:$0xff] }
   0x7   :  { %1940 = vst [vmem:[#allocation11_spill] sm:$0xff] %v917_v16  ;;  %1941 = vst [vmem:[#allocation12_spill] sm:$0xff] %v924_v17  ;;  %v931_v18 = vld [vmem:[%s1885_s0 + $0xb8] sm:$0xff]  ;;  %v938_v19 = vld [vmem:[%s1885_s0 + $0xc8] sm:$0xff] }
   0x8   :  { %v847_v6 = vadd.f32 1e-05, %v24_v5  ;;  %1942 = vst [vmem:[#allocation13_spill] sm:$0xff] %v931_v18  ;;  %1943 = vst [vmem:[#allocation14_spill] sm:$0xff] %v938_v19  ;;  %v945_v20 = vld [vmem:[%s1885_s0 + $0xd8] sm:$0xff]  ;;  %v983_v3 = vld [vmem:[%s1885_s0] sm:$0xff] }
   0x9   :  { %1944 = vst [vmem:[#allocation15_spill] sm:$0xff] %v945_v20  ;;  %v21_v21 = vld [vmem:[%s1884_s1 + $0x2] sm:$0x1]  ;;  %v963_v59 = vld [vmem:[%s1886_s2] sm:$0x1]  ;;  %1945 = vst [vmem:[#allocation16_spill] sm:$0xff] %v983_v3 }
   0xa   :  { %33 = vrot.lane.b32.xlu0 %v847_v6, %s809_s19  ;;  %v22_v22 = vmul.f32 0.00390625, %v21_v21  ;;  %v968_v60 = vld [vmem:[%s1886_s2 + $0x2] sm:$0x1]  ;;  %v973_v61 = vld [vmem:[%s1886_s2 + $0x1] sm:$0x1] }
   0xe   :  { %207 = vrot.lane.b32.xlu0 %v854_v7, %s809_s19 }
  0x12   :  { %211 = vrot.lane.b32.xlu0 %v861_v8, %s809_s19 }
  0x16   :  { %215 = vrot.lane.b32.xlu0 %v868_v9, %s809_s19 }
  0x1a   :  { %219 = vrot.lane.b32.xlu0 %v875_v10, %s809_s19 }
  0x1e   :  { %223 = vrot.lane.b32.xlu0 %v882_v11, %s809_s19 }
  0x22   :  { %227 = vrot.lane.b32.xlu0 %v889_v12, %s809_s19 }
  0x26   :  { %231 = vrot.lane.b32.xlu0 %v896_v13, %s809_s19 }
  0x2a   :  { %235 = vrot.lane.b32.xlu0 %v903_v14, %s809_s19 }
  0x2e   :  { %239 = vrot.lane.b32.xlu0 %v910_v15, %s809_s19 }
  0x32   :  { %243 = vrot.lane.b32.xlu0 %v917_v16, %s809_s19 }
  0x36   :  { %247 = vrot.lane.b32.xlu0 %v924_v17, %s809_s19 }
  0x3a   :  { %251 = vrot.lane.b32.xlu0 %v931_v18, %s809_s19 }
  0x3e   :  { %255 = vrot.lane.b32.xlu0 %v938_v19, %s809_s19 }
  0x42   :  { %259 = vrot.lane.b32.xlu0 %v945_v20, %s809_s19 }
  0x76   :  { %v952_v23 = vpop.permute.xlu0 %27 }
  0x77   :  { %v30_v24 = vmul.f32 %v952_v23, %v841_v2 }
  0x79   :  { %v31_v25 = vsub.f32 %v22_v22, %v30_v24 }
  0x7b   :  { %v37_v26 = vmul.f32 %v31_v25, %v31_v25  ;;  %v71_v56 = vsub.f32 0.0, %v31_v25 }
  0x7c   :  { %v34_v27 = vpop.permute.xlu0 %33 }
  0x7d   :  { %v36_v28 = vmul.f32 %v34_v27, %v847_v6  ;;  %v46_v39 = vadd.f32 %v34_v27, %v847_v6 }
  0x7f   :  { %v38_v29 = vsub.f32 %v36_v28, %v37_v26  ;;  %v1003_v26 = vld [vmem:[%s1885_s0 + $0x10] sm:$0xff] }
  0x80   :  { %v208_v30 = vpop.permute.xlu0 %207  ;;  %1946 = vst [vmem:[#allocation17_spill] sm:$0xff] %v1003_v26 }
  0x81   :  { %803 = vrsqrt.f32 %v38_v29  ;;  %vm41_vm0 = vcmp.eq.f32.partialorder %v38_v29, inf  ;;  %v44_v35 = vand.u32 2147483648, %v38_v29  ;;  %vm43_vm1 = vcmp.eq.f32.partialorder %v38_v29, 0.0 }
  0x84   :  { %v212_v31 = vpop.permute.xlu0 %211 }
  0x88   :  { %v216_v32 = vpop.permute.xlu0 %215 }
  0x8c   :  { %v220_v36 = vpop.permute.xlu0 %219 }
  0x8e   :  { %v804_v33 = vpop.eup %803 }
  0x8f   :  { %v40_v34 = vmul.f32 %v804_v33, %v38_v29 }
  0x90   :  { %v224_v42 = vpop.permute.xlu0 %223 }
  0x91   :  { %v42_v37 = vsel %vm41_vm0, %v38_v29, %v40_v34 }
  0x92   :  { %v45_v38 = vsel %vm43_vm1, %v44_v35, %v42_v37 }
  0x93   :  { %v47_v40 = vmul.f32 2.0, %v45_v38  ;;  %60 = vrot.lane.b32.xlu1 %v45_v38, %s809_s19  ;;  %v69_v57 = vadd.f32 %v45_v38, %v847_v6 }
  0x94   :  { %v228_v43 = vpop.permute.xlu0 %227 }
  0x95   :  { %v48_v41 = vadd.f32 %v47_v40, %v46_v39 }
  0x97   :  { %805 = vrsqrt.f32 %v48_v41  ;;  %vm51_vm2 = vcmp.eq.f32.partialorder %v48_v41, inf  ;;  %v54_v47 = vand.u32 2147483648, %v48_v41  ;;  %vm53_vm3 = vcmp.eq.f32.partialorder %v48_v41, 0.0 }
  0x98   :  { %v232_v44 = vpop.permute.xlu0 %231 }
  0x9c   :  { %v236_v50 = vpop.permute.xlu0 %235 }
  0xa0   :  { %v240_v52 = vpop.permute.xlu0 %239 }
  0xa4   :  { %v806_v45 = vpop.eup %805  ;;  %v244_v54 = vpop.permute.xlu0 %243 }
  0xa5   :  { %v50_v46 = vmul.f32 %v806_v45, %v48_v41 }
  0xa7   :  { %v52_v48 = vsel %vm51_vm2, %v48_v41, %v50_v46 }
  0xa8   :  { %v55_v49 = vsel %vm53_vm3, %v54_v47, %v52_v48  ;;  %v248_v1 = vpop.permute.xlu0 %247 }
  0xa9   :  { %v56_v51 = vmul.f32 %v55_v49, %v45_v38 }
  0xab   :  { %807 = vrcp.f32 %v56_v51 }
  0xac   :  { %v252_v29 = vpop.permute.xlu0 %251 }
  0xb8   :  { %v808_v58 = vpop.eup %807 }
  0xb9   :  { %v70_v62 = vmul.f32 %v808_v58, %v69_v57  ;;  %v975_v63 = vmul.f32 %v808_v58, %v71_v56  ;;  %65 = vrot.lane.b32.xlu1 %v808_v58, %s809_s19  ;;  %v256_v56 = vpop.permute.xlu0 %255 }
  0xbb   :  { %v85_v4 = vmul.f32 %v963_v59, %v975_v63  ;;  %v86_v5 = vmul.f32 %v968_v60, %v70_v62  ;;  %v990_v21 = vmul.f32 %v968_v60, %v975_v63  ;;  %v91_v22 = vmul.f32 %v973_v61, %v70_v62  ;;  %v1110_v62 = vld [vmem:[%s1885_s0 + $0x40] sm:$0xff] }
  0xbc   :  { %1977 = vst [vmem:[#allocation48_spill] sm:$0xff] %v1110_v62 }
  0xbd   :  { %v993_v24 = vadd.f32 %v86_v5, %v85_v4  ;;  %v996_v25 = vadd.f32 %v91_v22, %v990_v21  ;;  %205 = vrot.lane.b32.xlu1 %v983_v3, %s809_s19  ;;  %v1124_v4 = vld [vmem:[%s1885_s0 + $0x60] sm:$0xff]  ;;  %v1131_v5 = vld [vmem:[%s1885_s0 + $0x70] sm:$0xff] }
  0xbe   :  { %1979 = vst [vmem:[#allocation50_spill] sm:$0xff] %v1124_v4  ;;  %1980 = vst [vmem:[#allocation51_spill] sm:$0xff] %v1131_v5  ;;  %v1138_v22 = vld [vmem:[%s1885_s0 + $0x80] sm:$0xff] }
  0xbf   :  { %v1007_v27 = vrot.slane %v993_v24, %v978_v0  ;;  %v1011_v28 = vrot.slane %v996_v25, %v978_v0  ;;  %1981 = vst [vmem:[#allocation52_spill] sm:$0xff] %v1138_v22 }
  0xc1   :  { %1947 = vst [vmem:[#allocation18_spill] sm:$0xff] %v1007_v27  ;;  %1948 = vst [vmem:[#allocation19_spill] sm:$0xff] %v1011_v28  ;;  %v1014_v33 = vmul.f32 %v208_v30, %v1007_v27  ;;  %v1017_v34 = vmul.f32 %v1011_v28, %v208_v30  ;;  %v1020_v35 = vmul.f32 %v212_v31, %v1007_v27  ;;  %209 = vrot.lane.b32.xlu1 %v1003_v26, %s809_s19 }
  0xc2   :  { %v1023_v37 = vmul.f32 %v1011_v28, %v212_v31  ;;  %v1028_v38 = vmul.f32 %v216_v32, %v1007_v27  ;;  %v1031_v39 = vmul.f32 %v1011_v28, %v216_v32  ;;  %v1034_v40 = vmul.f32 %v220_v36, %v1007_v27  ;;  %v1042_v31 = vld [vmem:[%s1885_s0 + $0x20] sm:$0xff] }
  0xc3   :  { %1949 = vst [vmem:[#allocation20_spill] sm:$0xff] %v1014_v33  ;;  %1950 = vst [vmem:[#allocation21_spill] sm:$0xff] %v1017_v34  ;;  %v1037_v30 = vmul.f32 %v1011_v28, %v220_v36  ;;  %v1045_v41 = vmul.f32 %v224_v42, %v1007_v27  ;;  %v1048_v45 = vmul.f32 %v1011_v28, %v224_v42 }
  0xc4   :  { %1951 = vst [vmem:[#allocation22_spill] sm:$0xff] %v1020_v35  ;;  %1952 = vst [vmem:[#allocation23_spill] sm:$0xff] %v1023_v37  ;;  %v1051_v32 = vmul.f32 %v228_v43, %v1007_v27  ;;  %v1054_v46 = vmul.f32 %v1011_v28, %v228_v43  ;;  %v1057_v36 = vmul.f32 %v232_v44, %v1007_v27 }
  0xc5   :  { %1953 = vst [vmem:[#allocation24_spill] sm:$0xff] %v1028_v38  ;;  %1954 = vst [vmem:[#allocation25_spill] sm:$0xff] %v1031_v39  ;;  %v1060_v47 = vmul.f32 %v1011_v28, %v232_v44  ;;  %v1063_v48 = vmul.f32 %v236_v50, %v1007_v27  ;;  %v1066_v49 = vmul.f32 %v1011_v28, %v236_v50  ;;  %213 = vrot.lane.b32.xlu1 %v1042_v31, %s809_s19  ;;  %v1196_v38 = vld [vmem:[%s1885_s0 + $0xe8] sm:$0xff] }
  0xc6   :  { %1955 = vst [vmem:[#allocation26_spill] sm:$0xff] %v1034_v40  ;;  %1956 = vst [vmem:[#allocation27_spill] sm:$0xff] %v1037_v30  ;;  %v1069_v42 = vmul.f32 %v240_v52, %v1007_v27  ;;  %v1072_v51 = vmul.f32 %v1011_v28, %v240_v52  ;;  %v1075_v43 = vmul.f32 %v244_v54, %v1007_v27 }
  0xc7   :  { %1957 = vst [vmem:[#allocation28_spill] sm:$0xff] %v1042_v31  ;;  %1958 = vst [vmem:[#allocation29_spill] sm:$0xff] %v1045_v41  ;;  %v1078_v53 = vmul.f32 %v1011_v28, %v244_v54  ;;  %v1083_v44 = vmul.f32 %v248_v1, %v1007_v27  ;;  %v1086_v50 = vmul.f32 %v1011_v28, %v248_v1  ;;  %v1097_v54 = vld [vmem:[%s1885_s0 + $0x30] sm:$0xff] }
  0xc8   :  { %1959 = vst [vmem:[#allocation30_spill] sm:$0xff] %v1048_v45  ;;  %1960 = vst [vmem:[#allocation31_spill] sm:$0xff] %v1051_v32  ;;  %v1089_v55 = vmul.f32 %v252_v29, %v1007_v27  ;;  %v1092_v52 = vmul.f32 %v1011_v28, %v252_v29  ;;  %v1100_v57 = vmul.f32 %v256_v56, %v1007_v27  ;;  %v1117_v1 = vld [vmem:[%s1885_s0 + $0x50] sm:$0xff] }
  0xc9   :  { %1961 = vst [vmem:[#allocation32_spill] sm:$0xff] %v1054_v46  ;;  %1962 = vst [vmem:[#allocation33_spill] sm:$0xff] %v1057_v36  ;;  %v1103_v58 = vmul.f32 %v1011_v28, %v256_v56  ;;  %217 = vrot.lane.b32.xlu1 %v1097_v54, %s809_s19  ;;  %v1145_v29 = vld [vmem:[%s1885_s0 + $0x90] sm:$0xff]  ;;  %v1152_v56 = vld [vmem:[%s1885_s0 + $0xa0] sm:$0xff] }
  0xca   :  { %1963 = vst [vmem:[#allocation34_spill] sm:$0xff] %v1060_v47  ;;  %1964 = vst [vmem:[#allocation35_spill] sm:$0xff] %v1063_v48 }
  0xcb   :  { %1965 = vst [vmem:[#allocation36_spill] sm:$0xff] %v1066_v49  ;;  %1966 = vst [vmem:[#allocation37_spill] sm:$0xff] %v1069_v42  ;;  %v1187_v42 = vld [vmem:[%s1885_s0 + $0xf0] sm:$0xff] }
  0xcc   :  { %1967 = vst [vmem:[#allocation38_spill] sm:$0xff] %v1072_v51  ;;  %1968 = vst [vmem:[#allocation39_spill] sm:$0xff] %v1075_v43  ;;  %v1180_v43 = vld [vmem:[%s1885_s0 + $0xe0] sm:$0xff] }
  0xcd   :  { %1969 = vst [vmem:[#allocation40_spill] sm:$0xff] %v1078_v53  ;;  %1970 = vst [vmem:[#allocation41_spill] sm:$0xff] %v1083_v44  ;;  %221 = vrot.lane.b32.xlu1 %v1110_v62, %s809_s19  ;;  %v1173_v44 = vld [vmem:[%s1885_s0 + $0xd0] sm:$0xff] }
  0xce   :  { %1971 = vst [vmem:[#allocation42_spill] sm:$0xff] %v1086_v50  ;;  %1972 = vst [vmem:[#allocation43_spill] sm:$0xff] %v1089_v55  ;;  %v1166_v55 = vld [vmem:[%s1885_s0 + $0xc0] sm:$0xff] }
  0xcf   :  { %1973 = vst [vmem:[#allocation44_spill] sm:$0xff] %v1092_v52  ;;  %1974 = vst [vmem:[#allocation45_spill] sm:$0xff] %v1097_v54 }
  0xd0   :  { %1975 = vst [vmem:[#allocation46_spill] sm:$0xff] %v1100_v57  ;;  %1976 = vst [vmem:[#allocation47_spill] sm:$0xff] %v1103_v58  ;;  %v1159_v57 = vld [vmem:[%s1885_s0 + $0xb0] sm:$0xff] }
  0xd1   :  { %1978 = vst [vmem:[#allocation49_spill] sm:$0xff] %v1117_v1  ;;  %225 = vrot.lane.b32.xlu1 %v1117_v1, %s809_s19  ;;  %1982 = vst [vmem:[#allocation53_spill] sm:$0xff] %v1145_v29 }
  0xd2   :  { %1983 = vst [vmem:[#allocation54_spill] sm:$0xff] %v1152_v56  ;;  %1984 = vst [vmem:[#allocation55_spill] sm:$0xff] %v1159_v57 }
  0xd3   :  { %1985 = vst [vmem:[#allocation56_spill] sm:$0xff] %v1166_v55  ;;  %1986 = vst [vmem:[#allocation57_spill] sm:$0xff] %v1173_v44 }
  0xd4   :  { %1987 = vst [vmem:[#allocation58_spill] sm:$0xff] %v1180_v43  ;;  %1988 = vst [vmem:[#allocation59_spill] sm:$0xff] %v1187_v42 }
  0xd5   :  { %229 = vrot.lane.b32.xlu1 %v1124_v4, %s809_s19  ;;  %1989 = vst [vmem:[#allocation60_spill] sm:$0xff] %v1196_v38 }
  0xd9   :  { %233 = vrot.lane.b32.xlu1 %v1131_v5, %s809_s19 }
  0xdd   :  { %237 = vrot.lane.b32.xlu1 %v1138_v22, %s809_s19 }
  0xe1   :  { %241 = vrot.lane.b32.xlu1 %v1145_v29, %s809_s19 }
  0xe5   :  { %245 = vrot.lane.b32.xlu1 %v1152_v56, %s809_s19 }
  0xe9   :  { %249 = vrot.lane.b32.xlu1 %v1159_v57, %s809_s19 }
  0xed   :  { %253 = vrot.lane.b32.xlu1 %v1166_v55, %s809_s19 }
  0xf1   :  { %257 = vrot.lane.b32.xlu1 %v1173_v44, %s809_s19 }
  0xf5   :  { %261 = vrot.lane.b32.xlu1 %v1180_v43, %s809_s19 }
  0xf9   :  { %265 = vrot.lane.b32.xlu1 %v1187_v42, %s809_s19 }
 0x105   :  { %v61_v48 = vpop.permute.xlu1 %60 }
 0x106   :  { %v63_v36 = vadd.f32 %v61_v48, %v847_v6  ;;  %v1206_v6 = vld [vmem:[%s1885_s0 + $0xf8] sm:$0xff] }
 0x107   :  { %1991 = vst [vmem:[#allocation62_spill] sm:$0xff] %v1206_v6 }
 0x12b   :  { %v66_v32 = vpop.permute.xlu1 %65 }
 0x12c   :  { %v68_v41 = vmul.f32 %v66_v32, %v63_v36 }
 0x12e   :  { %79 = vrot.lane.b32.xlu0 %v68_v41, %s809_s19 }
 0x12f   :  { %v206_v40 = vpop.permute.xlu1 %205 }
 0x130   :  { %v1199_v35 = vmul.f32 %v206_v40, %v1007_v27 }
 0x132   :  { %1990 = vst [vmem:[#allocation61_spill] sm:$0xff] %v1199_v35  ;;  %263 = vrot.lane.b32.xlu0 %v1196_v38, %s809_s19 }
 0x133   :  { %v210_v33 = vpop.permute.xlu1 %209 }
 0x134   :  { %v1209_v41 = vmul.f32 %v210_v33, %v1007_v27 }
 0x136   :  { %1992 = vst [vmem:[#allocation63_spill] sm:$0xff] %v1209_v41  ;;  %267 = vrot.lane.b32.xlu0 %v1206_v6, %s809_s19 }
 0x137   :  { %v214_v32 = vpop.permute.xlu1 %213 }
 0x138   :  { %v1214_v36 = vmul.f32 %v214_v32, %v1007_v27  ;;  %v1271_v43 = vmul.f32 %v1011_v28, %v214_v32 }
 0x13a   :  { %1993 = vst [vmem:[#allocation64_spill] sm:$0xff] %v1214_v36 }
 0x13b   :  { %v218_v48 = vpop.permute.xlu1 %217 }
 0x13c   :  { %v1217_v35 = vmul.f32 %v218_v48, %v1007_v27 }
 0x13e   :  { %1994 = vst [vmem:[#allocation65_spill] sm:$0xff] %v1217_v35 }
 0x13f   :  { %v222_v58 = vpop.permute.xlu1 %221 }
 0x140   :  { %v1220_v52 = vmul.f32 %v222_v58, %v1007_v27 }
 0x142   :  { %1995 = vst [vmem:[#allocation66_spill] sm:$0xff] %v1220_v52 }
 0x143   :  { %v226_v50 = vpop.permute.xlu1 %225 }
 0x144   :  { %v1223_v53 = vmul.f32 %v226_v50, %v1007_v27 }
 0x146   :  { %1996 = vst [vmem:[#allocation67_spill] sm:$0xff] %v1223_v53 }
 0x147   :  { %v230_v41 = vpop.permute.xlu1 %229 }
 0x148   :  { %v1226_v51 = vmul.f32 %v230_v41, %v1007_v27 }
 0x14a   :  { %1997 = vst [vmem:[#allocation68_spill] sm:$0xff] %v1226_v51 }
 0x14b   :  { %v234_v49 = vpop.permute.xlu1 %233 }
 0x14c   :  { %v1229_v47 = vmul.f32 %v234_v49, %v1007_v27 }
 0x14e   :  { %1998 = vst [vmem:[#allocation69_spill] sm:$0xff] %v1229_v47 }
 0x14f   :  { %v238_v36 = vpop.permute.xlu1 %237 }
 0x150   :  { %v1232_v46 = vmul.f32 %v238_v36, %v1007_v27 }
 0x152   :  { %1999 = vst [vmem:[#allocation70_spill] sm:$0xff] %v1232_v46 }
 0x153   :  { %v242_v35 = vpop.permute.xlu1 %241 }
 0x154   :  { %v1235_v45 = vmul.f32 %v242_v35, %v1007_v27  ;;  %v1294_v32 = vmul.f32 %v1011_v28, %v242_v35  ;;  %v76_v35 = vld [vmem:[%s1887_s3] sm:$0x1] }
 0x156   :  { %2000 = vst [vmem:[#allocation71_spill] sm:$0xff] %v1235_v45  ;;  %v1252_v45 = vpop.permute.xlu0 %259 }
 0x157   :  { %v246_v52 = vpop.permute.xlu1 %245  ;;  %2006 = vst [vmem:[#allocation77_spill] sm:$0xff] %v1252_v45  ;;  %v1260_v42 = vmul.f32 %v1011_v28, %v1252_v45  ;;  %v1285_v45 = vmul.f32 %v1011_v28, %v230_v41 }
 0x158   :  { %v1238_v30 = vmul.f32 %v246_v52, %v1007_v27 }
 0x159   :  { %2007 = vst [vmem:[#allocation78_spill] sm:$0xff] %v1260_v42 }
 0x15a   :  { %2001 = vst [vmem:[#allocation72_spill] sm:$0xff] %v1238_v30  ;;  %v89_v30 = vmul.f32 %v973_v61, %v975_v63  ;;  %v1274_v61 = vmul.f32 %v1011_v28, %v218_v48 }
 0x15b   :  { %v250_v53 = vpop.permute.xlu1 %249 }
 0x15c   :  { %v1241_v39 = vmul.f32 %v250_v53, %v1007_v27 }
 0x15e   :  { %2002 = vst [vmem:[#allocation73_spill] sm:$0xff] %v1241_v39  ;;  %v95_v39 = vmul.f32 %v993_v24, %v952_v23 }
 0x15f   :  { %v254_v51 = vpop.permute.xlu1 %253 }
 0x160   :  { %v1244_v37 = vmul.f32 %v254_v51, %v1007_v27 }
 0x162   :  { %2003 = vst [vmem:[#allocation74_spill] sm:$0xff] %v1244_v37  ;;  %v1263_v37 = vmul.f32 %v1011_v28, %v206_v40  ;;  %v1279_v40 = vmul.f32 %v1011_v28, %v222_v58  ;;  %v1303_v58 = vmul.f32 %v1011_v28, %v250_v53 }
 0x163   :  { %v258_v47 = vpop.permute.xlu1 %257 }
 0x164   :  { %v1247_v34 = vmul.f32 %v258_v47, %v1007_v27  ;;  %v1309_v41 = vmul.f32 %v1011_v28, %v258_v47 }
 0x166   :  { %2004 = vst [vmem:[#allocation75_spill] sm:$0xff] %v1247_v34  ;;  %v1266_v34 = vmul.f32 %v1011_v28, %v210_v33  ;;  %v1282_v33 = vmul.f32 %v1011_v28, %v226_v50  ;;  %v1300_v50 = vmul.f32 %v1011_v28, %v246_v52  ;;  %2010 = vst [vmem:[#allocation81_spill] sm:$0xff] %v1309_v41 }
 0x167   :  { %v262_v46 = vpop.permute.xlu1 %261 }
 0x168   :  { %v1250_v6 = vmul.f32 %v262_v46, %v1007_v27  ;;  %v1318_v52 = vmul.f32 %v1011_v28, %v262_v46 }
 0x16a   :  { %2005 = vst [vmem:[#allocation76_spill] sm:$0xff] %v1250_v6  ;;  %v99_v6 = vmul.f32 %v996_v25, %v952_v23  ;;  %v1288_v23 = vmul.f32 %v1011_v28, %v234_v49  ;;  %v1291_v25 = vmul.f32 %v1011_v28, %v238_v36  ;;  %v1306_v49 = vmul.f32 %v1011_v28, %v254_v51 }
 0x16b   :  { %2011 = vst [vmem:[#allocation82_spill] sm:$0xff] %v1318_v52 }
 0x16c   :  { %2009 = vst [vmem:[#allocation80_spill] sm:$0xff] %v1306_v49 }
 0x1a0   :  { %v80_v38 = vpop.permute.xlu0 %79 }
 0x1a1   :  { %v82_v63 = vmul.f32 %v80_v38, %v963_v59  ;;  %v88_v24 = vmul.f32 %v80_v38, %v968_v60  ;;  %v1296_v59 = vpop.permute.xlu1 %265 }
 0x1a2   :  { %2008 = vst [vmem:[#allocation79_spill] sm:$0xff] %v1296_v59  ;;  %v1325_v47 = vmul.f32 %v1011_v28, %v1296_v59 }
 0x1a3   :  { %v84_v60 = vadd.f32 %v990_v21, %v82_v63  ;;  %v90_v38 = vadd.f32 %v89_v30, %v88_v24  ;;  %v77_v21 = vld [vmem:[%s1887_s3 + $0x1] sm:$0x1] }
 0x1a4   :  { %v264_v30 = vpop.permute.xlu0 %263  ;;  %2012 = vst [vmem:[#allocation83_spill] sm:$0xff] %v1325_v47 }
 0x1a5   :  { %v93_v53 = vmul.f32 %v84_v60, %v841_v2  ;;  %v97_v51 = vmul.f32 %v90_v38, %v841_v2  ;;  %v436_v36 = vrot.slane %v90_v38, %v978_v0  ;;  %v1328_v48 = vrot.slane %v84_v60, %v978_v0 }
 0x1a6   :  { %v330_v63 = vmul.f32 %v264_v30, %v1007_v27  ;;  %v502_v24 = vmul.f32 %v1011_v28, %v264_v30  ;;  %v2021_v28 = vld [vmem:[#allocation27_spill] sm:$0xff] }
 0x1a7   :  { %v94_v42 = vsub.f32 %v76_v35, %v93_v53  ;;  %v98_v46 = vsub.f32 %v77_v21, %v97_v51  ;;  %v437_v52 = vmul.f32 %v436_v36, %v983_v3  ;;  %v438_v41 = vmul.f32 %v436_v36, %v854_v7 }
 0x1a8   :  { %v439_v2 = vmul.f32 %v436_v36, %v1003_v26  ;;  %v440_v38 = vmul.f32 %v436_v36, %v861_v8  ;;  %v441_v59 = vmul.f32 %v436_v36, %v1042_v31  ;;  %v442_v47 = vmul.f32 %v436_v36, %v868_v9  ;;  %v2017_v9 = vld [vmem:[#allocation62_spill] sm:$0xff] }
 0x1a9   :  { %v96_v60 = vsub.f32 %v94_v42, %v95_v39  ;;  %v100_v49 = vsub.f32 %v98_v46, %v99_v6  ;;  %v443_v27 = vmul.f32 %v436_v36, %v1097_v54  ;;  %v444_v30 = vmul.f32 %v436_v36, %v875_v10  ;;  %v2015_v54 = vld [vmem:[#allocation60_spill] sm:$0xff]  ;;  %v2016_v10 = vld [vmem:[#allocation59_spill] sm:$0xff] }
 0x1aa   :  { %v445_v35 = vmul.f32 %v436_v36, %v1110_v62  ;;  %v446_v21 = vmul.f32 %v436_v36, %v882_v11  ;;  %v447_v53 = vmul.f32 %v436_v36, %v1117_v1  ;;  %v448_v51 = vmul.f32 %v436_v36, %v889_v12 }
 0x1ab   :  { %v1345_v26 = vrot.slane %v96_v60, %v978_v0  ;;  %v1348_v31 = vrot.slane %v100_v49, %v978_v0  ;;  %v449_v39 = vmul.f32 %v436_v36, %v1124_v4  ;;  %v450_v42 = vmul.f32 %v436_v36, %v896_v13  ;;  %v2014_v13 = vld [vmem:[#allocation58_spill] sm:$0xff] }
 0x1ac   :  { %v451_v6 = vmul.f32 %v436_v36, %v1131_v5  ;;  %v452_v46 = vmul.f32 %v436_v36, %v903_v14  ;;  %v453_v62 = vmul.f32 %v436_v36, %v1138_v22  ;;  %v454_v1 = vmul.f32 %v436_v36, %v910_v15 }
 0x1ad   :  { %2013 = vst [vmem:[#allocation84_spill] sm:$0xff] %v1348_v31  ;;  %v455_v12 = vmul.f32 %v436_v36, %v1145_v29  ;;  %v456_v60 = vmul.f32 %v436_v36, %v917_v16  ;;  %v457_v11 = vmul.f32 %v436_v36, %v1152_v56  ;;  %v458_v0 = vmul.f32 %v436_v36, %v924_v17  ;;  %v2020_v31 = vld [vmem:[#allocation25_spill] sm:$0xff] }
 0x1ae   :  { %v459_v49 = vmul.f32 %v436_v36, %v1159_v57  ;;  %v460_v4 = vmul.f32 %v436_v36, %v931_v18  ;;  %v461_v5 = vmul.f32 %v436_v36, %v1166_v55  ;;  %v462_v14 = vmul.f32 %v436_v36, %v938_v19  ;;  %v2018_v19 = vld [vmem:[#allocation21_spill] sm:$0xff] }
 0x1af   :  { %v463_v22 = vmul.f32 %v436_v36, %v1173_v44  ;;  %v464_v15 = vmul.f32 %v436_v36, %v945_v20  ;;  %v465_v29 = vmul.f32 %v436_v36, %v2014_v13  ;;  %v466_v16 = vmul.f32 %v436_v36, %v2015_v54  ;;  %v2019_v20 = vld [vmem:[#allocation23_spill] sm:$0xff] }
 0x1b0   :  { %v467_v56 = vmul.f32 %v436_v36, %v2016_v10  ;;  %v468_v17 = vmul.f32 %v436_v36, %v2017_v9  ;;  %v166_v57 = vmul.f32 %v1328_v48, %v2015_v54  ;;  %v505_v18 = vadd.f32 %v1263_v37, %v437_v52  ;;  %v2022_v37 = vld [vmem:[#allocation30_spill] sm:$0xff] }
 0x1b1   :  { %v1373_v55 = vadd.f32 %v502_v24, %v466_v16  ;;  %v506_v8 = vadd.f32 %v2018_v19, %v438_v41  ;;  %v507_v44 = vadd.f32 %v1266_v34, %v439_v2  ;;  %v508_v3 = vadd.f32 %v2019_v20, %v440_v38  ;;  %v2023_v34 = vld [vmem:[#allocation32_spill] sm:$0xff]  ;;  %v2028_v24 = vld [vmem:[#allocation42_spill] sm:$0xff]  ;;  %v268_v38 = vpop.permute.xlu0 %267 }
 0x1b2   :  { %v362_v13 = vadd.f32 %v330_v63, %v166_v57  ;;  %v509_v7 = vadd.f32 %v1271_v43, %v441_v59  ;;  %v510_v10 = vadd.f32 %v2020_v31, %v442_v47  ;;  %v511_v36 = vadd.f32 %v1274_v61, %v443_v27  ;;  %v2024_v43 = vld [vmem:[#allocation34_spill] sm:$0xff]  ;;  %v2025_v27 = vld [vmem:[#allocation36_spill] sm:$0xff] }
 0x1b3   :  { %v512_v9 = vadd.f32 %v2021_v28, %v444_v30  ;;  %v513_v54 = vadd.f32 %v1279_v40, %v445_v35  ;;  %v514_v16 = vadd.f32 %v2022_v37, %v446_v21  ;;  %v515_v52 = vadd.f32 %v1282_v33, %v447_v53  ;;  %v2026_v40 = vld [vmem:[#allocation38_spill] sm:$0xff]  ;;  %v2027_v33 = vld [vmem:[#allocation40_spill] sm:$0xff]  ;;  %v2031_v53 = vld [vmem:[#allocation47_spill] sm:$0xff] }
 0x1b4   :  { %v1386_v19 = vadd.f32 %v1345_v26, %v362_v13  ;;  %v516_v20 = vadd.f32 %v2023_v34, %v448_v51  ;;  %v517_v57 = vadd.f32 %v1285_v45, %v449_v39  ;;  %v518_v59 = vadd.f32 %v2024_v43, %v450_v42  ;;  %v2029_v30 = vld [vmem:[#allocation44_spill] sm:$0xff]  ;;  %v2035_v42 = vld [vmem:[#allocation83_spill] sm:$0xff] }
 0x1b5   :  { %v519_v31 = vadd.f32 %v1288_v23, %v451_v6  ;;  %v520_v61 = vadd.f32 %v2025_v27, %v452_v46  ;;  %v521_v28 = vadd.f32 %v1291_v25, %v453_v62  ;;  %v522_v41 = vadd.f32 %v2026_v40, %v454_v1  ;;  %v2030_v23 = vld [vmem:[#allocation80_spill] sm:$0xff]  ;;  %v2032_v62 = vld [vmem:[#allocation81_spill] sm:$0xff]  ;;  %v2033_v1 = vld [vmem:[#allocation78_spill] sm:$0xff] }
 0x1b6   :  { %v523_v47 = vadd.f32 %v1294_v32, %v455_v12  ;;  %v524_v63 = vadd.f32 %v2027_v33, %v456_v60  ;;  %v525_v13 = vadd.f32 %v1300_v50, %v457_v11  ;;  %v526_v2 = vadd.f32 %v2028_v24, %v458_v0  ;;  %v2034_v12 = vld [vmem:[#allocation82_spill] sm:$0xff] }
 0x1b7   :  { %v527_v45 = vadd.f32 %v1303_v58, %v459_v49  ;;  %v528_v35 = vadd.f32 %v2029_v30, %v460_v4  ;;  %v529_v21 = vadd.f32 %v2030_v23, %v461_v5  ;;  %v530_v51 = vadd.f32 %v2031_v53, %v462_v14  ;;  %v2036_v11 = vld [vmem:[#allocation62_spill] sm:$0xff]  ;;  %v2038_v58 = vld [vmem:[#allocation19_spill] sm:$0xff]  ;;  %v2039_v4 = vld [vmem:[#allocation84_spill] sm:$0xff] }
 0x1b8   :  { %v531_v25 = vadd.f32 %v2032_v62, %v463_v22  ;;  %v532_v39 = vadd.f32 %v2033_v1, %v464_v15  ;;  %v533_v32 = vadd.f32 %v2034_v12, %v465_v29  ;;  %v535_v6 = vadd.f32 %v2035_v42, %v467_v56  ;;  %v2037_v46 = vld [vmem:[#allocation18_spill] sm:$0xff]  ;;  %v2042_v1 = vld [vmem:[#allocation3_spill] sm:$0xff]  ;;  %v2043_v12 = vld [vmem:[#allocation17_spill] sm:$0xff] }
 0x1b9   :  { %v168_v50 = vmul.f32 %v1328_v48, %v2036_v11  ;;  %v332_v60 = vmul.f32 %v268_v38, %v2037_v46  ;;  %v504_v0 = vmul.f32 %v2038_v58, %v268_v38  ;;  %v542_v49 = vadd.f32 %v2039_v4, %v506_v8 }
 0x1ba   :  { %v541_v5 = vadd.f32 %v2039_v4, %v505_v18  ;;  %v544_v14 = vadd.f32 %v2039_v4, %v508_v3  ;;  %v543_v22 = vadd.f32 %v2039_v4, %v507_v44  ;;  %v546_v15 = vadd.f32 %v2039_v4, %v510_v10 }
 0x1bb   :  { %v364_v29 = vadd.f32 %v332_v60, %v168_v50  ;;  %v536_v37 = vadd.f32 %v504_v0, %v468_v17  ;;  %v574_v56 = vmax.f32 %v542_v49, 0.0  ;;  %v545_v34 = vadd.f32 %v2039_v4, %v509_v7  ;;  %v2044_v50 = vld [vmem:[#allocation4_spill] sm:$0xff]  ;;  %v2047_v49 = vld [vmem:[#allocation61_spill] sm:$0xff] }
 0x1bc   :  { %v573_v43 = vmax.f32 %v541_v5, 0.0  ;;  %v548_v8 = vadd.f32 %v2039_v4, %v512_v9  ;;  %v547_v18 = vadd.f32 %v2039_v4, %v511_v36  ;;  %v550_v3 = vadd.f32 %v2039_v4, %v514_v16  ;;  %v2045_v60 = vld [vmem:[#allocation28_spill] sm:$0xff] }
 0x1bd   :  { %v1418_v27 = vadd.f32 %v1345_v26, %v364_v29  ;;  %639 = vrot.lane.b32.xlu0 %v574_v56, %s809_s19  ;;  %v549_v10 = vadd.f32 %v2039_v4, %v513_v54  ;;  %v552_v17 = vadd.f32 %v2039_v4, %v516_v20  ;;  %v1428_v7 = vadd.f32 %v2039_v4, %v515_v52  ;;  %v2046_v0 = vld [vmem:[#allocation20_spill] sm:$0xff] }
 0x1be   :  { %637 = vrot.lane.b32.xlu1 %v573_v43, %s809_s19  ;;  %v576_v44 = vmax.f32 %v544_v14, 0.0  ;;  %v1431_v40 = vadd.f32 %v2039_v4, %v518_v59  ;;  %v1434_v33 = vadd.f32 %v2039_v4, %v517_v57  ;;  %v575_v9 = vmax.f32 %v543_v22, 0.0  ;;  %v2048_v14 = vld [vmem:[#allocation22_spill] sm:$0xff] }
 0x1bf   :  { %v1438_v36 = vadd.f32 %v2039_v4, %v520_v61  ;;  %v1441_v54 = vadd.f32 %v2039_v4, %v519_v31  ;;  %v1445_v16 = vadd.f32 %v2039_v4, %v522_v41  ;;  %v1448_v52 = vadd.f32 %v2039_v4, %v521_v28 }
 0x1c0   :  { %v1451_v20 = vadd.f32 %v2039_v4, %v524_v63  ;;  %v1454_v57 = vadd.f32 %v2039_v4, %v523_v47  ;;  %v578_v59 = vmax.f32 %v546_v15, 0.0  ;;  %v1457_v61 = vadd.f32 %v2039_v4, %v526_v2  ;;  %v2049_v15 = vld [vmem:[#allocation63_spill] sm:$0xff] }
 0x1c1   :  { %643 = vrot.lane.b32.xlu0 %v576_v44, %s809_s19  ;;  %v1460_v31 = vadd.f32 %v2039_v4, %v525_v13  ;;  %v577_v24 = vmax.f32 %v545_v34, 0.0  ;;  %v1464_v41 = vadd.f32 %v2039_v4, %v528_v35  ;;  %v1467_v28 = vadd.f32 %v2039_v4, %v527_v45  ;;  %v2051_v34 = vld [vmem:[#allocation64_spill] sm:$0xff] }
 0x1c2   :  { %641 = vrot.lane.b32.xlu1 %v575_v9, %s809_s19  ;;  %v1471_v47 = vadd.f32 %v2039_v4, %v530_v51  ;;  %v1474_v63 = vadd.f32 %v2039_v4, %v529_v21  ;;  %v1477_v13 = vadd.f32 %v2039_v4, %v532_v39  ;;  %v1480_v2 = vadd.f32 %v2039_v4, %v531_v25  ;;  %v2040_v51 = vld [vmem:[#allocation2_spill] sm:$0xff] }
 0x1c3   :  { %v580_v38 = vmax.f32 %v548_v8, 0.0  ;;  %v1484_v30 = vadd.f32 %v2039_v4, %v1373_v55  ;;  %v1487_v45 = vadd.f32 %v2039_v4, %v533_v32  ;;  %v579_v35 = vmax.f32 %v547_v18, 0.0  ;;  %v2041_v55 = vld [vmem:[#allocation16_spill] sm:$0xff]  ;;  %v2052_v8 = vld [vmem:[#allocation5_spill] sm:$0xff] }
 0x1c4   :  { %v582_v23 = vmax.f32 %v550_v3, 0.0  ;;  %v1491_v21 = vadd.f32 %v2039_v4, %v536_v37  ;;  %v1494_v53 = vadd.f32 %v2039_v4, %v535_v6  ;;  %v138_v62 = vmul.f32 %v1328_v48, %v2040_v51  ;;  %v2050_v37 = vld [vmem:[#allocation24_spill] sm:$0xff]  ;;  %v2053_v3 = vld [vmem:[#allocation45_spill] sm:$0xff] }
 0x1c5   :  { %647 = vrot.lane.b32.xlu0 %v578_v59, %s809_s19  ;;  %v137_v25 = vmul.f32 %v1328_v48, %v2041_v55  ;;  %v140_v39 = vmul.f32 %v1328_v48, %v2042_v1  ;;  %v139_v32 = vmul.f32 %v1328_v48, %v2043_v12  ;;  %v581_v42 = vmax.f32 %v549_v10, 0.0  ;;  %v2055_v51 = vld [vmem:[#allocation65_spill] sm:$0xff]  ;;  %v2056_v12 = vld [vmem:[#allocation6_spill] sm:$0xff] }
 0x1c6   :  { %645 = vrot.lane.b32.xlu1 %v577_v24, %s809_s19  ;;  %v584_v11 = vmax.f32 %v552_v17, 0.0  ;;  %v142_v6 = vmul.f32 %v1328_v48, %v2044_v50  ;;  %v141_v58 = vmul.f32 %v1328_v48, %v2045_v60  ;;  %v334_v4 = vadd.f32 %v2046_v0, %v138_v62  ;;  %v2060_v0 = vld [vmem:[#allocation8_spill] sm:$0xff] }
 0x1c7   :  { %v333_v5 = vadd.f32 %v2047_v49, %v137_v25  ;;  %v336_v22 = vadd.f32 %v2048_v14, %v140_v39  ;;  %v335_v29 = vadd.f32 %v2049_v15, %v139_v32  ;;  %v144_v18 = vmul.f32 %v1328_v48, %v2052_v8  ;;  %v2061_v49 = vld [vmem:[#allocation50_spill] sm:$0xff]  ;;  %v2062_v14 = vld [vmem:[#allocation29_spill] sm:$0xff] }
 0x1c8   :  { %v338_v56 = vadd.f32 %v2050_v37, %v142_v6  ;;  %v337_v43 = vadd.f32 %v2051_v34, %v141_v58  ;;  %v143_v10 = vmul.f32 %v1328_v48, %v2053_v3  ;;  %v1522_v17 = vadd.f32 %v1345_v26, %v334_v4  ;;  %v2058_v6 = vld [vmem:[#allocation7_spill] sm:$0xff]  ;;  %v2063_v15 = vld [vmem:[#allocation66_spill] sm:$0xff]  ;;  %v2066_v8 = vld [vmem:[#allocation33_spill] sm:$0xff] }
 0x1c9   :  { %651 = vrot.lane.b32.xlu0 %v580_v38, %s809_s19  ;;  %v1525_v44 = vadd.f32 %v1345_v26, %v333_v5  ;;  %v1528_v9 = vadd.f32 %v1345_v26, %v336_v22  ;;  %v1531_v59 = vadd.f32 %v1345_v26, %v335_v29  ;;  %v583_v55 = vmax.f32 %v1428_v7, 0.0  ;;  %v2064_v37 = vld [vmem:[#allocation31_spill] sm:$0xff]  ;;  %v2068_v3 = vld [vmem:[#allocation9_spill] sm:$0xff] }
 0x1ca   :  { %649 = vrot.lane.b32.xlu1 %v579_v35, %s809_s19  ;;  %v1534_v24 = vadd.f32 %v1345_v26, %v338_v56  ;;  %v1537_v38 = vadd.f32 %v1345_v26, %v337_v43  ;;  %v2054_v35 = vld [vmem:[#allocation26_spill] sm:$0xff]  ;;  %v339_v62 = vadd.f32 %v2055_v51, %v143_v10  ;;  %v586_v25 = vmax.f32 %v1431_v40, 0.0  ;;  %v2065_v34 = vld [vmem:[#allocation67_spill] sm:$0xff] }
 0x1cb   :  { %v146_v32 = vmul.f32 %v1328_v48, %v2056_v12  ;;  %v148_v7 = vmul.f32 %v1328_v48, %v2058_v6  ;;  %v585_v60 = vmax.f32 %v1434_v33, 0.0  ;;  %v588_v58 = vmax.f32 %v1438_v36, 0.0  ;;  %v2071_v6 = vld [vmem:[#allocation69_spill] sm:$0xff] }
 0x1cc   :  { %v1548_v39 = vadd.f32 %v1345_v26, %v339_v62  ;;  %v150_v4 = vmul.f32 %v1328_v48, %v2060_v0  ;;  %v149_v5 = vmul.f32 %v1328_v48, %v2061_v49  ;;  %v152_v10 = vmul.f32 %v1328_v48, %v2068_v3  ;;  %v2080_v3 = vld [vmem:[#allocation39_spill] sm:$0xff] }
 0x1cd   :  { %655 = vrot.lane.b32.xlu0 %v582_v23, %s809_s19  ;;  %v340_v23 = vadd.f32 %v2054_v35, %v144_v18  ;;  %v342_v22 = vadd.f32 %v2062_v14, %v146_v32  ;;  %v344_v56 = vadd.f32 %v2064_v37, %v148_v7  ;;  %v2067_v18 = vld [vmem:[#allocation68_spill] sm:$0xff]  ;;  %v2069_v35 = vld [vmem:[#allocation51_spill] sm:$0xff] }
 0x1ce   :  { %653 = vrot.lane.b32.xlu1 %v581_v42, %s809_s19  ;;  %v2057_v42 = vld [vmem:[#allocation48_spill] sm:$0xff]  ;;  %v346_v33 = vadd.f32 %v2066_v8, %v150_v4  ;;  %v345_v36 = vadd.f32 %v2067_v18, %v149_v5  ;;  %v2072_v4 = vld [vmem:[#allocation10_spill] sm:$0xff]  ;;  %v2078_v8 = vld [vmem:[#allocation37_spill] sm:$0xff] }
 0x1cf   :  { %v1545_v1 = vadd.f32 %v1345_v26, %v340_v23  ;;  %v145_v50 = vmul.f32 %v1328_v48, %v2057_v42  ;;  %v151_v23 = vmul.f32 %v1328_v48, %v2069_v35  ;;  %v1578_v51 = vadd.f32 %v1345_v26, %v342_v22  ;;  %v2070_v42 = vld [vmem:[#allocation35_spill] sm:$0xff]  ;;  %v2073_v5 = vld [vmem:[#allocation52_spill] sm:$0xff]  ;;  %v2079_v18 = vld [vmem:[#allocation70_spill] sm:$0xff] }
 0x1d0   :  { %v1590_v12 = vadd.f32 %v1345_v26, %v346_v33  ;;  %v1593_v32 = vadd.f32 %v1345_v26, %v345_v36  ;;  %v154_v49 = vmul.f32 %v1328_v48, %v2072_v4  ;;  %v153_v14 = vmul.f32 %v1328_v48, %v2073_v5  ;;  %v2074_v22 = vld [vmem:[#allocation11_spill] sm:$0xff]  ;;  %v2076_v37 = vld [vmem:[#allocation12_spill] sm:$0xff] }
 0x1d1   :  { %659 = vrot.lane.b32.xlu0 %v584_v11, %s809_s19  ;;  %v2059_v11 = vld [vmem:[#allocation49_spill] sm:$0xff]  ;;  %v341_v29 = vadd.f32 %v2063_v15, %v145_v50  ;;  %v348_v50 = vadd.f32 %v2070_v42, %v152_v10  ;;  %v347_v7 = vadd.f32 %v2071_v6, %v151_v23  ;;  %v589_v15 = vmax.f32 %v1448_v52, 0.0  ;;  %v2081_v35 = vld [vmem:[#allocation71_spill] sm:$0xff] }
 0x1d2   :  { %657 = vrot.lane.b32.xlu1 %v583_v55, %s809_s19  ;;  %v147_v40 = vmul.f32 %v1328_v48, %v2059_v11  ;;  %v1584_v55 = vadd.f32 %v1345_v26, %v344_v56  ;;  %v587_v11 = vmax.f32 %v1441_v54, 0.0  ;;  %v156_v54 = vmul.f32 %v1328_v48, %v2074_v22  ;;  %v2082_v42 = vld [vmem:[#allocation41_spill] sm:$0xff] }
 0x1d3   :  { %v1581_v62 = vadd.f32 %v1345_v26, %v341_v29  ;;  %v1604_v0 = vadd.f32 %v1345_v26, %v347_v7  ;;  %v592_v29 = vmax.f32 %v1451_v20, 0.0  ;;  %v158_v56 = vmul.f32 %v1328_v48, %v2076_v37  ;;  %v2084_v6 = vld [vmem:[#allocation13_spill] sm:$0xff] }
 0x1d4   :  { %v343_v43 = vadd.f32 %v2065_v34, %v147_v40  ;;  %v590_v40 = vmax.f32 %v1445_v16, 0.0  ;;  %v2077_v34 = vld [vmem:[#allocation54_spill] sm:$0xff]  ;;  %v350_v33 = vadd.f32 %v2078_v8, %v154_v49  ;;  %v349_v36 = vadd.f32 %v2079_v18, %v153_v14 }
 0x1d5   :  { %663 = vrot.lane.b32.xlu0 %v586_v25, %s809_s19  ;;  %v352_v10 = vadd.f32 %v2080_v3, %v156_v54  ;;  %v354_v52 = vadd.f32 %v2082_v42, %v158_v56  ;;  %v160_v7 = vmul.f32 %v1328_v48, %v2084_v6  ;;  %v591_v56 = vmax.f32 %v1454_v57, 0.0  ;;  %v2089_v18 = vld [vmem:[#allocation14_spill] sm:$0xff]  ;;  %v2090_v3 = vld [vmem:[#allocation56_spill] sm:$0xff]  ;;  %v2091_v57 = vld [vmem:[#allocation15_spill] sm:$0xff] }
 0x1d6   :  { %661 = vrot.lane.b32.xlu1 %v585_v60, %s809_s19  ;;  %v1587_v25 = vadd.f32 %v1345_v26, %v343_v43  ;;  %v1601_v60 = vadd.f32 %v1345_v26, %v348_v50  ;;  %v157_v43 = vmul.f32 %v1328_v48, %v2077_v34  ;;  %v2083_v50 = vld [vmem:[#allocation72_spill] sm:$0xff]  ;;  %v1634_v49 = vadd.f32 %v1345_v26, %v350_v33  ;;  %v2088_v34 = vld [vmem:[#allocation77_spill] sm:$0xff]  ;;  %v2094_v6 = vld [vmem:[#allocation46_spill] sm:$0xff] }
 0x1d7   :  { %v1637_v5 = vadd.f32 %v1345_v26, %v349_v36  ;;  %v1646_v22 = vadd.f32 %v1345_v26, %v354_v52  ;;  %v162_v36 = vmul.f32 %v1328_v48, %v2089_v18  ;;  %v594_v42 = vmax.f32 %v1457_v61, 0.0  ;;  %v2099_v61 = vld [vmem:[#allocation59_spill] sm:$0xff] }
 0x1d8   :  { %v353_v20 = vadd.f32 %v2083_v50, %v157_v43  ;;  %v328_v43 = vmul.f32 %v2088_v34, %v2037_v46  ;;  %v593_v52 = vmax.f32 %v1460_v31, 0.0  ;;  %v2093_v50 = vld [vmem:[#allocation58_spill] sm:$0xff]  ;;  %v2098_v34 = vld [vmem:[#allocation76_spill] sm:$0xff]  ;;  %v167_v31 = vmul.f32 %v1328_v48, %v2099_v61 }
 0x1d9   :  { %667 = vrot.lane.b32.xlu0 %v588_v58, %s809_s19  ;;  %v2075_v58 = vld [vmem:[#allocation53_spill] sm:$0xff] }
 0x1da   :  { %665 = vrot.lane.b32.xlu1 %v587_v11, %s809_s19  ;;  %v155_v16 = vmul.f32 %v1328_v48, %v2075_v58  ;;  %v2085_v11 = vld [vmem:[#allocation55_spill] sm:$0xff]  ;;  %v1649_v54 = vadd.f32 %v1345_v26, %v353_v20  ;;  %v165_v20 = vmul.f32 %v1328_v48, %v2093_v50 }
 0x1db   :  { %v159_v4 = vmul.f32 %v1328_v48, %v2085_v11  ;;  %v2086_v58 = vld [vmem:[#allocation43_spill] sm:$0xff]  ;;  %v2095_v11 = vld [vmem:[#allocation74_spill] sm:$0xff] }
 0x1dc   :  { %v351_v23 = vadd.f32 %v2081_v35, %v155_v16  ;;  %v356_v16 = vadd.f32 %v2086_v58, %v160_v7  ;;  %v164_v35 = vmul.f32 %v1328_v48, %v2091_v57  ;;  %v358_v7 = vadd.f32 %v2094_v6, %v162_v36 }
 0x1dd   :  { %671 = vrot.lane.b32.xlu0 %v590_v40, %s809_s19  ;;  %v1640_v40 = vadd.f32 %v1345_v26, %v352_v10  ;;  %v161_v10 = vmul.f32 %v1328_v48, %v2090_v3  ;;  %v361_v18 = vadd.f32 %v2098_v34, %v165_v20 }
 0x1de   :  { %669 = vrot.lane.b32.xlu1 %v589_v15, %s809_s19  ;;  %v1643_v14 = vadd.f32 %v1345_v26, %v351_v23  ;;  %v2087_v15 = vld [vmem:[#allocation73_spill] sm:$0xff]  ;;  %v1658_v8 = vadd.f32 %v1345_v26, %v356_v16  ;;  %v360_v58 = vadd.f32 %v328_v43, %v164_v35  ;;  %v2096_v16 = vld [vmem:[#allocation75_spill] sm:$0xff]  ;;  %v1687_v3 = vadd.f32 %v1345_v26, %v358_v7 }
 0x1df   :  { %v355_v37 = vadd.f32 %v2087_v15, %v159_v4  ;;  %v2092_v23 = vld [vmem:[#allocation57_spill] sm:$0xff]  ;;  %v357_v4 = vadd.f32 %v2095_v11, %v161_v10  ;;  %v596_v10 = vmax.f32 %v1464_v41, 0.0  ;;  %v1700_v57 = vadd.f32 %v1345_v26, %v361_v18 }
 0x1e0   :  { %v1693_v43 = vadd.f32 %v1345_v26, %v360_v58  ;;  %v595_v35 = vmax.f32 %v1467_v28, 0.0  ;;  %v600_v41 = vmax.f32 %v1477_v13, 0.0  ;;  %v601_v28 = vmax.f32 %v1487_v45, 0.0 }
 0x1e1   :  { %675 = vrot.lane.b32.xlu0 %v592_v29, %s809_s19  ;;  %v1661_v33 = vadd.f32 %v1345_v26, %v355_v37  ;;  %v163_v29 = vmul.f32 %v1328_v48, %v2092_v23  ;;  %v2097_v37 = vld [vmem:[#allocation79_spill] sm:$0xff]  ;;  %v1690_v36 = vadd.f32 %v1345_v26, %v357_v4  ;;  %v402_v13 = vmax.f32 %v1522_v17, 0.0 }
 0x1e2   :  { %673 = vrot.lane.b32.xlu1 %v591_v56, %s809_s19  ;;  %v331_v56 = vmul.f32 %v2097_v37, %v2037_v46  ;;  %v403_v17 = vmax.f32 %v1531_v59, 0.0  ;;  %v406_v11 = vmax.f32 %v1534_v24, 0.0  ;;  %v407_v24 = vmax.f32 %v1548_v39, 0.0 }
 0x1e3   :  { %v359_v15 = vadd.f32 %v2096_v16, %v163_v29  ;;  %v598_v29 = vmax.f32 %v1471_v47, 0.0  ;;  %v604_v47 = vmax.f32 %v1491_v21, 0.0  ;;  %v410_v18 = vmax.f32 %v1578_v51, 0.0 }
 0x1e4   :  { %v363_v48 = vadd.f32 %v331_v56, %v167_v31  ;;  %v411_v51 = vmax.f32 %v1587_v25, 0.0 }
 0x1e5   :  { %679 = vrot.lane.b32.xlu0 %v594_v42, %s809_s19  ;;  %v1696_v46 = vadd.f32 %v1345_v26, %v359_v15  ;;  %v597_v42 = vmax.f32 %v1474_v63, 0.0  ;;  %v603_v63 = vmax.f32 %v1494_v53, 0.0  ;;  %v404_v53 = vmax.f32 %v1528_v9, 0.0 }
 0x1e6   :  { %677 = vrot.lane.b32.xlu1 %v593_v52, %s809_s19  ;;  %v1705_v23 = vadd.f32 %v1345_v26, %v363_v48  ;;  %v599_v52 = vmax.f32 %v1480_v2, 0.0  ;;  %v602_v26 = vmax.f32 %v1484_v30, 0.0  ;;  %v401_v30 = vmax.f32 %v1525_v44, 0.0 }
 0x1e7   :  { %v405_v9 = vmax.f32 %v1537_v38, 0.0  ;;  %v408_v15 = vmax.f32 %v1545_v1, 0.0  ;;  %v409_v1 = vmax.f32 %v1581_v62, 0.0  ;;  %v412_v48 = vmax.f32 %v1584_v55, 0.0 }
 0x1e8   :  { %v413_v55 = vmax.f32 %v1593_v32, 0.0 }
 0x1e9   :  { %683 = vrot.lane.b32.xlu0 %v596_v10, %s809_s19 }
 0x1ea   :  { %681 = vrot.lane.b32.xlu1 %v595_v35, %s809_s19 }
 0x1ed   :  { %687 = vrot.lane.b32.xlu0 %v598_v29, %s809_s19 }
 0x1ee   :  { %685 = vrot.lane.b32.xlu1 %v597_v42, %s809_s19 }
 0x1f1   :  { %691 = vrot.lane.b32.xlu0 %v600_v41, %s809_s19  ;;  %v414_v41 = vmax.f32 %v1590_v12, 0.0  ;;  %v415_v12 = vmax.f32 %v1604_v0, 0.0 }
 0x1f2   :  { %689 = vrot.lane.b32.xlu1 %v599_v52, %s809_s19 }
 0x1f5   :  { %695 = vrot.lane.b32.xlu0 %v602_v26, %s809_s19 }
 0x1f6   :  { %693 = vrot.lane.b32.xlu1 %v601_v28, %s809_s19 }
 0x1f9   :  { %699 = vrot.lane.b32.xlu0 %v604_v47, %s809_s19  ;;  %v416_v47 = vmax.f32 %v1601_v60, 0.0  ;;  %v417_v60 = vmax.f32 %v1637_v5, 0.0 }
 0x1fa   :  { %697 = vrot.lane.b32.xlu1 %v603_v63, %s809_s19 }
 0x22f   :  { %v640_v2 = vpop.permute.xlu0 %639 }
 0x230   :  { %v735_v45 = vsel %vm733_vm4, %v402_v13, %v640_v2  ;;  %v638_v50 = vpop.permute.xlu1 %637 }
 0x231   :  { %767 = vst [vmem:[%s1888_s4 + $0x8] sm:$0xff] %v735_v45  ;;  %v734_v21 = vsel %vm733_vm4, %v401_v30, %v638_v50  ;;  %v418_v30 = vmax.f32 %v1634_v49, 0.0  ;;  %v419_v49 = vmax.f32 %v1643_v14, 0.0 }
 0x232   :  { %766 = vst [vmem:[%s1888_s4] sm:$0xff] %v734_v21 }
 0x233   :  { %v644_v20 = vpop.permute.xlu0 %643 }
 0x234   :  { %v737_v44 = vsel %vm733_vm4, %v404_v53, %v644_v20  ;;  %v642_v6 = vpop.permute.xlu1 %641  ;;  %v420_v53 = vmax.f32 %v1640_v40, 0.0  ;;  %v421_v40 = vmax.f32 %v1649_v54, 0.0 }
 0x235   :  { %769 = vst [vmem:[%s1888_s4 + $0x18] sm:$0xff] %v737_v44  ;;  %v736_v7 = vsel %vm733_vm4, %v403_v17, %v642_v6  ;;  %v422_v6 = vmax.f32 %v1646_v22, 0.0  ;;  %v423_v22 = vmax.f32 %v1661_v33, 0.0 }
 0x236   :  { %768 = vst [vmem:[%s1888_s4 + $0x10] sm:$0xff] %v736_v7 }
 0x237   :  { %v648_v4 = vpop.permute.xlu0 %647 }
 0x238   :  { %v739_v59 = vsel %vm733_vm4, %v406_v11, %v648_v4  ;;  %v646_v58 = vpop.permute.xlu1 %645 }
 0x239   :  { %771 = vst [vmem:[%s1888_s4 + $0x28] sm:$0xff] %v739_v59  ;;  %v738_v16 = vsel %vm733_vm4, %v405_v9, %v646_v58  ;;  %v424_v9 = vmax.f32 %v1658_v8, 0.0  ;;  %v425_v8 = vmax.f32 %v1690_v36, 0.0 }
 0x23a   :  { %770 = vst [vmem:[%s1888_s4 + $0x20] sm:$0xff] %v738_v16 }
 0x23b   :  { %v652_v37 = vpop.permute.xlu0 %651 }
 0x23c   :  { %v741_v38 = vsel %vm733_vm4, %v408_v15, %v652_v37  ;;  %v650_v56 = vpop.permute.xlu1 %649  ;;  %v426_v15 = vmax.f32 %v1687_v3, 0.0  ;;  %v427_v3 = vmax.f32 %v1696_v46, 0.0 }
 0x23d   :  { %773 = vst [vmem:[%s1888_s4 + $0x38] sm:$0xff] %v741_v38  ;;  %v740_v34 = vsel %vm733_vm4, %v407_v24, %v650_v56  ;;  %v428_v56 = vmax.f32 %v1693_v43, 0.0  ;;  %v429_v43 = vmax.f32 %v1700_v57, 0.0 }
 0x23e   :  { %772 = vst [vmem:[%s1888_s4 + $0x30] sm:$0xff] %v740_v34 }
 0x23f   :  { %v656_v61 = vpop.permute.xlu0 %655 }
 0x240   :  { %v743_v39 = vsel %vm733_vm4, %v410_v18, %v656_v61  ;;  %v654_v31 = vpop.permute.xlu1 %653 }
 0x241   :  { %775 = vst [vmem:[%s1888_s4 + $0x48] sm:$0xff] %v743_v39  ;;  %v742_v10 = vsel %vm733_vm4, %v409_v1, %v654_v31  ;;  %v430_v1 = vmax.f32 %v1386_v19, 0.0  ;;  %v431_v19 = vmax.f32 %v1705_v23, 0.0 }
 0x242   :  { %774 = vst [vmem:[%s1888_s4 + $0x40] sm:$0xff] %v742_v10 }
 0x243   :  { %v660_v35 = vpop.permute.xlu0 %659 }
 0x244   :  { %v745_v62 = vsel %vm733_vm4, %v412_v48, %v660_v35  ;;  %v658_v29 = vpop.permute.xlu1 %657  ;;  %v432_v48 = vmax.f32 %v1418_v27, 0.0 }
 0x245   :  { %777 = vst [vmem:[%s1888_s4 + $0x58] sm:$0xff] %v745_v62  ;;  %v744_v42 = vsel %vm733_vm4, %v411_v51, %v658_v29 }
 0x246   :  { %776 = vst [vmem:[%s1888_s4 + $0x50] sm:$0xff] %v744_v42 }
 0x247   :  { %v664_v52 = vpop.permute.xlu0 %663 }
 0x248   :  { %v747_v25 = vsel %vm733_vm4, %v414_v41, %v664_v52  ;;  %v662_v26 = vpop.permute.xlu1 %661 }
 0x249   :  { %779 = vst [vmem:[%s1888_s4 + $0x68] sm:$0xff] %v747_v25  ;;  %v746_v28 = vsel %vm733_vm4, %v413_v55, %v662_v26 }
 0x24a   :  { %778 = vst [vmem:[%s1888_s4 + $0x60] sm:$0xff] %v746_v28 }
 0x24b   :  { %v668_v63 = vpop.permute.xlu0 %667 }
 0x24c   :  { %v749_v32 = vsel %vm733_vm4, %v416_v47, %v668_v63  ;;  %v666_v13 = vpop.permute.xlu1 %665 }
 0x24d   :  { %781 = vst [vmem:[%s1888_s4 + $0x78] sm:$0xff] %v749_v32  ;;  %v748_v2 = vsel %vm733_vm4, %v415_v12, %v666_v13 }
 0x24e   :  { %780 = vst [vmem:[%s1888_s4 + $0x70] sm:$0xff] %v748_v2 }
 0x24f   :  { %v672_v45 = vpop.permute.xlu0 %671 }
 0x250   :  { %v751_v0 = vsel %vm733_vm4, %v418_v30, %v672_v45  ;;  %v670_v50 = vpop.permute.xlu1 %669 }
 0x251   :  { %783 = vst [vmem:[%s1888_s4 + $0x88] sm:$0xff] %v751_v0  ;;  %v750_v21 = vsel %vm733_vm4, %v417_v60, %v670_v50 }
 0x252   :  { %782 = vst [vmem:[%s1888_s4 + $0x80] sm:$0xff] %v750_v21 }
 0x253   :  { %v676_v20 = vpop.permute.xlu0 %675 }
 0x254   :  { %v753_v5 = vsel %vm733_vm4, %v420_v53, %v676_v20  ;;  %v674_v17 = vpop.permute.xlu1 %673 }
 0x255   :  { %785 = vst [vmem:[%s1888_s4 + $0x98] sm:$0xff] %v753_v5  ;;  %v752_v44 = vsel %vm733_vm4, %v419_v49, %v674_v17 }
 0x256   :  { %784 = vst [vmem:[%s1888_s4 + $0x90] sm:$0xff] %v752_v44 }
 0x257   :  { %v680_v7 = vpop.permute.xlu0 %679 }
 0x258   :  { %v755_v14 = vsel %vm733_vm4, %v422_v6, %v680_v7  ;;  %v678_v11 = vpop.permute.xlu1 %677 }
 0x259   :  { %787 = vst [vmem:[%s1888_s4 + $0xa8] sm:$0xff] %v755_v14  ;;  %v754_v4 = vsel %vm733_vm4, %v421_v40, %v678_v11 }
 0x25a   :  { %786 = vst [vmem:[%s1888_s4 + $0xa0] sm:$0xff] %v754_v4 }
 0x25b   :  { %v684_v59 = vpop.permute.xlu0 %683 }
 0x25c   :  { %v757_v54 = vsel %vm733_vm4, %v424_v9, %v684_v59  ;;  %v682_v58 = vpop.permute.xlu1 %681 }
 0x25d   :  { %789 = vst [vmem:[%s1888_s4 + $0xb8] sm:$0xff] %v757_v54  ;;  %v756_v16 = vsel %vm733_vm4, %v423_v22, %v682_v58 }
 0x25e   :  { %788 = vst [vmem:[%s1888_s4 + $0xb0] sm:$0xff] %v756_v16 }
 0x25f   :  { %v688_v37 = vpop.permute.xlu0 %687 }
 0x260   :  { %v759_v33 = vsel %vm733_vm4, %v426_v15, %v688_v37  ;;  %v686_v24 = vpop.permute.xlu1 %685 }
 0x261   :  { %791 = vst [vmem:[%s1888_s4 + $0xc8] sm:$0xff] %v759_v33  ;;  %v758_v38 = vsel %vm733_vm4, %v425_v8, %v686_v24 }
 0x262   :  { %790 = vst [vmem:[%s1888_s4 + $0xc0] sm:$0xff] %v758_v38 }
 0x263   :  { %v692_v34 = vpop.permute.xlu0 %691 }
 0x264   :  { %v761_v36 = vsel %vm733_vm4, %v428_v56, %v692_v34  ;;  %v690_v18 = vpop.permute.xlu1 %689 }
 0x265   :  { %793 = vst [vmem:[%s1888_s4 + $0xd8] sm:$0xff] %v761_v36  ;;  %v760_v61 = vsel %vm733_vm4, %v427_v3, %v690_v18 }
 0x266   :  { %792 = vst [vmem:[%s1888_s4 + $0xd0] sm:$0xff] %v760_v61 }
 0x267   :  { %v696_v39 = vpop.permute.xlu0 %695 }
 0x268   :  { %v763_v46 = vsel %vm733_vm4, %v430_v1, %v696_v39  ;;  %v694_v31 = vpop.permute.xlu1 %693 }
 0x269   :  { %795 = vst [vmem:[%s1888_s4 + $0xe8] sm:$0xff] %v763_v46  ;;  %v762_v10 = vsel %vm733_vm4, %v429_v43, %v694_v31 }
 0x26a   :  { %794 = vst [vmem:[%s1888_s4 + $0xe0] sm:$0xff] %v762_v10 }
 0x26b   :  { %v700_v35 = vpop.permute.xlu0 %699 }
 0x26c   :  { %v765_v57 = vsel %vm733_vm4, %v432_v48, %v700_v35  ;;  %v698_v51 = vpop.permute.xlu1 %697 }
 0x26d   :  { %797 = vst [vmem:[%s1888_s4 + $0xf8] sm:$0xff] %v765_v57  ;;  %v764_v62 = vsel %vm733_vm4, %v431_v19, %v698_v51 }
 0x26e   :  { %796 = vst [vmem:[%s1888_s4 + $0xf0] sm:$0xff] %v764_v62 }

// kernel: closed_set_classifier_forward.10
= control target key start
LH: loop header
LB: loop body
LE: loop exit
PB: predicated region body
PF: predicated region fallthrough
CT: control target
= control target key end

     0   :  { %s473_s19 = smov 64   ;;  %v117_v38 = vlaneseq  ;;  %vm429_vm4 = vcmask 523264   ;;  %s999_s1 = inlined_call_operand.vmem [shape: f32[8,128], index: 1, kind: input, shape index: {}]   ;;  %s1000_s0 = inlined_call_operand.vmem [shape: f32[2,64,128], index: 0, kind: input, shape index: {}]   ;;  %s1001_s2 = inlined_call_operand.vmem [shape: f32[3,64], index: 2, kind: input, shape index: {}]   ;;  %s1002_s3 = inlined_call_operand.vmem [shape: f32[2,64], index: 3, kind: input, shape index: {}]   ;;  %s1003_s4 = inlined_call_operand.vmem [shape: f32[2,64,128], index: 4, kind: output, shape index: {}]  }
   0x1   :  { %v17_v0 = vld [vmem:[%s999_s1] sm:$0x1]  ;;  %v19_v1 = vld [vmem:[%s999_s1 + $0x1] sm:$0x1]  ;;  %v518_v7 = vld [vmem:[%s1000_s0 + $0x8] sm:$0xff] }
   0x2   :  { %v505_v2 = vmul.f32 0.0078125, %v17_v0  ;;  %v20_v3 = vmul.f32 0.0078125, %v19_v1  ;;  %v525_v8 = vld [vmem:[%s1000_s0 + $0x18] sm:$0xff]  ;;  %v532_v9 = vld [vmem:[%s1000_s0 + $0x28] sm:$0xff]  ;;  %v21_v13 = vld [vmem:[%s999_s1 + $0x2] sm:$0x1] }
   0x3   :  { %v539_v10 = vld [vmem:[%s1000_s0 + $0x38] sm:$0xff]  ;;  %v546_v11 = vld [vmem:[%s1000_s0 + $0x48] sm:$0xff]  ;;  %v22_v14 = vmul.f32 0.0078125, %v21_v13  ;;  %v118_v41 = vshrl.u32 %v117_v38, 7  ;;  %v577_v44 = vld [vmem:[%s1001_s2] sm:$0x1] }
   0x4   :  { %27 = vrot.lane.b32.xlu0 %v505_v2, %s473_s19  ;;  %v23_v4 = vmul.f32 %v505_v2, %v505_v2  ;;  %v553_v12 = vld [vmem:[%s1000_s0 + $0x58] sm:$0xff]  ;;  %v582_v45 = vld [vmem:[%s1001_s2 + $0x2] sm:$0x1]  ;;  %v601_v54 = vld [vmem:[%s1000_s0 + $0x10] sm:$0xff] }
   0x5   :  { %v588_v48 = vld [vmem:[%s1000_s0] sm:$0xff]  ;;  %v590_v49 = vsub.s32 0, %v118_v41  ;;  %v637_v63 = vld [vmem:[%s1000_s0 + $0x30] sm:$0xff] }
   0x6   :  { %v24_v5 = vsub.f32 %v20_v3, %v23_v4  ;;  %v627_v61 = vld [vmem:[%s1000_s0 + $0x20] sm:$0xff]  ;;  %v651_v1 = vld [vmem:[%s1000_s0 + $0x50] sm:$0xff] }
   0x7   :  { %v644_v0 = vld [vmem:[%s1000_s0 + $0x40] sm:$0xff]  ;;  %v665_v4 = vld [vmem:[%s1000_s0 + $0x70] sm:$0xff] }
   0x8   :  { %v511_v6 = vadd.f32 1e-05, %v24_v5  ;;  %v658_v3 = vld [vmem:[%s1000_s0 + $0x60] sm:$0xff] }
   0xa   :  { %33 = vrot.lane.b32.xlu0 %v511_v6, %s473_s19 }
   0xe   :  { %159 = vrot.lane.b32.xlu0 %v518_v7, %s473_s19 }
  0x12   :  { %163 = vrot.lane.b32.xlu0 %v525_v8, %s473_s19 }
  0x16   :  { %167 = vrot.lane.b32.xlu0 %v532_v9, %s473_s19 }
  0x1a   :  { %171 = vrot.lane.b32.xlu0 %v539_v10, %s473_s19 }
  0x1e   :  { %175 = vrot.lane.b32.xlu0 %v546_v11, %s473_s19 }
  0x22   :  { %179 = vrot.lane.b32.xlu0 %v553_v12, %s473_s19 }
  0x76   :  { %v560_v15 = vpop.permute.xlu0 %27 }
  0x77   :  { %v30_v16 = vmul.f32 %v560_v15, %v505_v2 }
  0x79   :  { %v31_v17 = vsub.f32 %v22_v14, %v30_v16 }
  0x7b   :  { %v37_v18 = vmul.f32 %v31_v17, %v31_v17  ;;  %v71_v40 = vsub.f32 0.0, %v31_v17 }
  0x7c   :  { %v34_v19 = vpop.permute.xlu0 %33 }
  0x7d   :  { %v36_v20 = vmul.f32 %v34_v19, %v511_v6  ;;  %v46_v27 = vadd.f32 %v34_v19, %v511_v6 }
  0x7f   :  { %v38_v21 = vsub.f32 %v36_v20, %v37_v18  ;;  %v114_v18 = vld [vmem:[%s1000_s0 + $0x68] sm:$0xff] }
  0x80   :  { %v567_v36 = vpop.permute.xlu0 %159 }
  0x81   :  { %467 = vrsqrt.f32 %v38_v21  ;;  %vm41_vm0 = vcmp.eq.f32.partialorder %v38_v21, inf  ;;  %v44_v24 = vand.u32 2147483648, %v38_v21  ;;  %vm43_vm1 = vcmp.eq.f32.partialorder %v38_v21, 0.0 }
  0x84   :  { %v569_v37 = vpop.permute.xlu0 %163 }
  0x88   :  { %v571_v39 = vpop.permute.xlu0 %167 }
  0x8c   :  { %v594_v52 = vpop.permute.xlu0 %171 }
  0x8e   :  { %v468_v22 = vpop.eup %467 }
  0x8f   :  { %v40_v23 = vmul.f32 %v468_v22, %v38_v21 }
  0x90   :  { %v176_v60 = vpop.permute.xlu0 %175 }
  0x91   :  { %v42_v25 = vsel %vm41_vm0, %v38_v21, %v40_v23  ;;  %v116_v21 = vld [vmem:[%s1000_s0 + $0x78] sm:$0xff] }
  0x92   :  { %v45_v26 = vsel %vm43_vm1, %v44_v24, %v42_v25 }
  0x93   :  { %v47_v28 = vmul.f32 2.0, %v45_v26  ;;  %60 = vrot.lane.b32.xlu1 %v45_v26, %s473_s19  ;;  %v69_v42 = vadd.f32 %v45_v26, %v511_v6 }
  0x94   :  { %v707_v38 = vpop.permute.xlu0 %179 }
  0x95   :  { %v48_v29 = vadd.f32 %v47_v28, %v46_v27 }
  0x97   :  { %469 = vrsqrt.f32 %v48_v29  ;;  %vm51_vm2 = vcmp.eq.f32.partialorder %v48_v29, inf  ;;  %v54_v32 = vand.u32 2147483648, %v48_v29  ;;  %vm53_vm3 = vcmp.eq.f32.partialorder %v48_v29, 0.0 }
  0xa4   :  { %v470_v30 = vpop.eup %469 }
  0xa5   :  { %v50_v31 = vmul.f32 %v470_v30, %v48_v29 }
  0xa7   :  { %v52_v33 = vsel %vm51_vm2, %v48_v29, %v50_v31 }
  0xa8   :  { %v55_v34 = vsel %vm53_vm3, %v54_v32, %v52_v33  ;;  %v74_v32 = vld [vmem:[%s1001_s2 + $0x1] sm:$0x1] }
  0xa9   :  { %v56_v35 = vmul.f32 %v55_v34, %v45_v26 }
  0xab   :  { %471 = vrcp.f32 %v56_v35 }
  0xb8   :  { %v472_v43 = vpop.eup %471 }
  0xb9   :  { %v70_v46 = vmul.f32 %v472_v43, %v69_v42  ;;  %v72_v47 = vmul.f32 %v472_v43, %v71_v40  ;;  %65 = vrot.lane.b32.xlu1 %v472_v43, %s473_s19 }
  0xbb   :  { %v85_v50 = vmul.f32 %v577_v44, %v72_v47  ;;  %v86_v51 = vmul.f32 %v582_v45, %v70_v46  ;;  %v83_v33 = vmul.f32 %v582_v45, %v72_v47  ;;  %v91_v34 = vmul.f32 %v74_v32, %v70_v46 }
  0xbc   :  { %v89_v41 = vmul.f32 %v74_v32, %v72_v47 }
  0xbd   :  { %v87_v53 = vadd.f32 %v86_v51, %v85_v50  ;;  %157 = vrot.lane.b32.xlu1 %v588_v48, %s473_s19  ;;  %v92_v35 = vadd.f32 %v91_v34, %v83_v33 }
  0xbf   :  { %v604_v55 = vrot.slane %v87_v53, %v590_v49  ;;  %v710_v40 = vrot.slane %v92_v35, %v590_v49  ;;  %v95_v43 = vmul.f32 %v87_v53, %v560_v15  ;;  %v99_v50 = vmul.f32 %v92_v35, %v560_v15 }
  0xc1   :  { %v608_v56 = vmul.f32 %v567_v36, %v604_v55  ;;  %v612_v57 = vmul.f32 %v569_v37, %v604_v55  ;;  %161 = vrot.lane.b32.xlu1 %v601_v54, %s473_s19  ;;  %v618_v58 = vmul.f32 %v571_v39, %v604_v55  ;;  %v622_v59 = vmul.f32 %v594_v52, %v604_v55 }
  0xc2   :  { %v630_v62 = vmul.f32 %v176_v60, %v604_v55  ;;  %v300_v46 = vmul.f32 %v710_v40, %v569_v37  ;;  %v724_v47 = vmul.f32 %v710_v40, %v594_v52  ;;  %v727_v53 = vmul.f32 %v710_v40, %v176_v60  ;;  %v76_v52 = vld [vmem:[%s1002_s3] sm:$0x1]  ;;  %v77_v60 = vld [vmem:[%s1002_s3 + $0x1] sm:$0x1] }
  0xc3   :  { %v731_v15 = vmul.f32 %v710_v40, %v707_v38 }
  0xc4   :  { %1004 = vst [vmem:[#allocation2_spill] sm:$0xff] %v630_v62 }
  0xc5   :  { %165 = vrot.lane.b32.xlu1 %v627_v61, %s473_s19 }
  0xc9   :  { %169 = vrot.lane.b32.xlu1 %v637_v63, %s473_s19 }
  0xcd   :  { %173 = vrot.lane.b32.xlu1 %v644_v0, %s473_s19 }
  0xd1   :  { %177 = vrot.lane.b32.xlu1 %v651_v1, %s473_s19 }
  0xd5   :  { %181 = vrot.lane.b32.xlu1 %v658_v3, %s473_s19 }
  0xd9   :  { %185 = vrot.lane.b32.xlu1 %v665_v4, %s473_s19 }
 0x105   :  { %v61_v5 = vpop.permute.xlu1 %60 }
 0x106   :  { %v63_v13 = vadd.f32 %v61_v5, %v511_v6 }
 0x12b   :  { %v66_v14 = vpop.permute.xlu1 %65 }
 0x12c   :  { %v68_v16 = vmul.f32 %v66_v14, %v63_v13  ;;  %v298_v13 = vmul.f32 %v710_v40, %v567_v36  ;;  %v302_v14 = vmul.f32 %v710_v40, %v571_v39 }
 0x12e   :  { %79 = vrot.lane.b32.xlu0 %v68_v16, %s473_s19 }
 0x12f   :  { %v158_v17 = vpop.permute.xlu1 %157 }
 0x130   :  { %v675_v19 = vmul.f32 %v158_v17, %v604_v55  ;;  %v297_v36 = vmul.f32 %v710_v40, %v158_v17 }
 0x132   :  { %183 = vrot.lane.b32.xlu0 %v114_v18, %s473_s19 }
 0x133   :  { %v162_v20 = vpop.permute.xlu1 %161 }
 0x134   :  { %v682_v6 = vmul.f32 %v162_v20, %v604_v55  ;;  %v299_v37 = vmul.f32 %v710_v40, %v162_v20 }
 0x136   :  { %187 = vrot.lane.b32.xlu0 %v116_v21, %s473_s19 }
 0x137   :  { %v166_v22 = vpop.permute.xlu1 %165 }
 0x138   :  { %v686_v23 = vmul.f32 %v166_v22, %v604_v55  ;;  %v301_v16 = vmul.f32 %v710_v40, %v166_v22 }
 0x13b   :  { %v170_v24 = vpop.permute.xlu1 %169 }
 0x13c   :  { %v689_v25 = vmul.f32 %v170_v24, %v604_v55  ;;  %v303_v39 = vmul.f32 %v710_v40, %v170_v24 }
 0x13e   :  { %1005 = vst [vmem:[#allocation3_spill] sm:$0xff] %v689_v25 }
 0x13f   :  { %v174_v26 = vpop.permute.xlu1 %173 }
 0x140   :  { %v692_v27 = vmul.f32 %v174_v26, %v604_v55  ;;  %v305_v22 = vmul.f32 %v710_v40, %v174_v26 }
 0x142   :  { %1006 = vst [vmem:[#allocation4_spill] sm:$0xff] %v692_v27 }
 0x143   :  { %v178_v28 = vpop.permute.xlu1 %177 }
 0x144   :  { %v695_v29 = vmul.f32 %v178_v28, %v604_v55  ;;  %v753_v24 = vmul.f32 %v710_v40, %v178_v28 }
 0x146   :  { %1007 = vst [vmem:[#allocation5_spill] sm:$0xff] %v695_v29 }
 0x147   :  { %v697_v30 = vpop.permute.xlu1 %181 }
 0x148   :  { %v701_v31 = vmul.f32 %v697_v30, %v604_v55 }
 0x14a   :  { %1008 = vst [vmem:[#allocation6_spill] sm:$0xff] %v701_v31 }
 0x1a0   :  { %v80_v42 = vpop.permute.xlu0 %79 }
 0x1a1   :  { %v82_v51 = vmul.f32 %v80_v42, %v577_v44  ;;  %v88_v5 = vmul.f32 %v80_v42, %v582_v45 }
 0x1a3   :  { %v84_v44 = vadd.f32 %v83_v33, %v82_v51  ;;  %v90_v45 = vadd.f32 %v89_v41, %v88_v5 }
 0x1a4   :  { %v184_v32 = vpop.permute.xlu0 %183 }
 0x1a5   :  { %v93_v33 = vmul.f32 %v84_v44, %v505_v2  ;;  %v97_v34 = vmul.f32 %v90_v45, %v505_v2  ;;  %v746_v17 = vrot.slane %v84_v44, %v590_v49  ;;  %v749_v20 = vrot.slane %v90_v45, %v590_v49 }
 0x1a6   :  { %v218_v35 = vmul.f32 %v184_v32, %v604_v55  ;;  %v310_v41 = vmul.f32 %v710_v40, %v184_v32 }
 0x1a7   :  { %v94_v42 = vsub.f32 %v76_v52, %v93_v33  ;;  %v98_v51 = vsub.f32 %v77_v60, %v97_v34  ;;  %v134_v5 = vmul.f32 %v746_v17, %v114_v18  ;;  %v290_v2 = vmul.f32 %v749_v20, %v114_v18 }
 0x1a8   :  { %v136_v44 = vmul.f32 %v746_v17, %v116_v21  ;;  %v292_v45 = vmul.f32 %v749_v20, %v116_v21  ;;  %v188_v31 = vpop.permute.xlu0 %187  ;;  %v278_v26 = vmul.f32 %v749_v20, %v518_v7  ;;  %v277_v28 = vmul.f32 %v749_v20, %v588_v48 }
 0x1a9   :  { %v96_v29 = vsub.f32 %v94_v42, %v95_v43  ;;  %v100_v27 = vsub.f32 %v98_v51, %v99_v50  ;;  %v234_v32 = vadd.f32 %v218_v35, %v134_v5  ;;  %v326_v52 = vadd.f32 %v310_v41, %v290_v2 }
 0x1aa   :  { %v220_v60 = vmul.f32 %v188_v31, %v604_v55  ;;  %v312_v33 = vmul.f32 %v710_v40, %v188_v31  ;;  %v314_v18 = vadd.f32 %v298_v13, %v278_v26  ;;  %v313_v34 = vadd.f32 %v297_v36, %v277_v28 }
 0x1ab   :  { %v768_v62 = vrot.slane %v96_v29, %v590_v49  ;;  %v771_v21 = vrot.slane %v100_v27, %v590_v49  ;;  %v280_v25 = vmul.f32 %v749_v20, %v525_v8  ;;  %v279_v43 = vmul.f32 %v749_v20, %v601_v54 }
 0x1ac   :  { %v236_v50 = vadd.f32 %v220_v60, %v136_v44  ;;  %v328_v35 = vadd.f32 %v312_v33, %v292_v45  ;;  %v282_v41 = vmul.f32 %v749_v20, %v532_v9  ;;  %v281_v31 = vmul.f32 %v749_v20, %v627_v61 }
 0x1ad   :  { %v782_v29 = vadd.f32 %v768_v62, %v234_v32  ;;  %v334_v49 = vadd.f32 %v771_v21, %v314_v18  ;;  %v333_v27 = vadd.f32 %v771_v21, %v313_v34  ;;  %v316_v13 = vadd.f32 %v300_v46, %v280_v25 }
 0x1ae   :  { %v787_v36 = vadd.f32 %v768_v62, %v236_v50  ;;  %v315_v42 = vadd.f32 %v299_v37, %v279_v43  ;;  %v318_v51 = vadd.f32 %v302_v14, %v282_v41  ;;  %v317_v5 = vadd.f32 %v301_v16, %v281_v31  ;;  %v806_v43 = vpop.permute.xlu1 %185 }
 0x1af   :  { %v350_v2 = vmax.f32 %v334_v49, 0.0  ;;  %v349_v44 = vmax.f32 %v333_v27, 0.0  ;;  %v336_v45 = vadd.f32 %v771_v21, %v316_v13  ;;  %v284_v26 = vmul.f32 %v749_v20, %v539_v10 }
 0x1b0   :  { %v335_v28 = vadd.f32 %v771_v21, %v315_v42  ;;  %v338_v32 = vadd.f32 %v771_v21, %v318_v51  ;;  %v337_v60 = vadd.f32 %v771_v21, %v317_v5  ;;  %v283_v25 = vmul.f32 %v749_v20, %v637_v63 }
 0x1b1   :  { %383 = vrot.lane.b32.xlu0 %v350_v2, %s473_s19  ;;  %381 = vrot.lane.b32.xlu1 %v349_v44, %s473_s19  ;;  %v320_v46 = vadd.f32 %v724_v47, %v284_v26  ;;  %v286_v14 = vmul.f32 %v749_v20, %v546_v11  ;;  %v285_v37 = vmul.f32 %v749_v20, %v644_v0  ;;  %v352_v33 = vmax.f32 %v336_v45, 0.0 }
 0x1b2   :  { %v309_v16 = vmul.f32 %v710_v40, %v697_v30  ;;  %v351_v18 = vmax.f32 %v335_v28, 0.0  ;;  %v319_v34 = vadd.f32 %v303_v39, %v283_v25  ;;  %v288_v47 = vmul.f32 %v749_v20, %v553_v12 }
 0x1b3   :  { %v340_v50 = vadd.f32 %v771_v21, %v320_v46  ;;  %v322_v41 = vadd.f32 %v727_v53, %v286_v14  ;;  %v321_v31 = vadd.f32 %v305_v22, %v285_v37  ;;  %v287_v27 = vmul.f32 %v749_v20, %v651_v1 }
 0x1b4   :  { %v339_v49 = vadd.f32 %v771_v21, %v319_v34  ;;  %v816_v30 = vadd.f32 %v771_v21, %v326_v52  ;;  %v289_v39 = vmul.f32 %v749_v20, %v658_v3  ;;  %v324_v13 = vadd.f32 %v731_v15, %v288_v47  ;;  %v1009_v47 = vld [vmem:[#allocation3_spill] sm:$0xff] }
 0x1b5   :  { %387 = vrot.lane.b32.xlu0 %v352_v33, %s473_s19  ;;  %385 = vrot.lane.b32.xlu1 %v351_v18, %s473_s19  ;;  %v342_v53 = vadd.f32 %v771_v21, %v322_v41  ;;  %v341_v22 = vadd.f32 %v771_v21, %v321_v31  ;;  %v311_v42 = vmul.f32 %v710_v40, %v806_v43  ;;  %v354_v5 = vmax.f32 %v338_v32, 0.0 }
 0x1b6   :  { %v323_v51 = vadd.f32 %v753_v24, %v287_v27  ;;  %v325_v52 = vadd.f32 %v309_v16, %v289_v39  ;;  %v353_v2 = vmax.f32 %v337_v60, 0.0  ;;  %v344_v44 = vadd.f32 %v771_v21, %v324_v13 }
 0x1b7   :  { %v830_v45 = vadd.f32 %v771_v21, %v328_v35  ;;  %v291_v15 = vmul.f32 %v749_v20, %v665_v4  ;;  %v122_v40 = vmul.f32 %v746_v17, %v518_v7  ;;  %v121_v24 = vmul.f32 %v746_v17, %v588_v48 }
 0x1b8   :  { %v343_v26 = vadd.f32 %v771_v21, %v323_v51  ;;  %v834_v28 = vadd.f32 %v771_v21, %v325_v52  ;;  %v124_v35 = vmul.f32 %v746_v17, %v525_v8  ;;  %v356_v32 = vmax.f32 %v340_v50, 0.0 }
 0x1b9   :  { %391 = vrot.lane.b32.xlu0 %v354_v5, %s473_s19  ;;  %389 = vrot.lane.b32.xlu1 %v353_v2, %s473_s19  ;;  %v355_v60 = vmax.f32 %v339_v49, 0.0  ;;  %v327_v25 = vadd.f32 %v311_v42, %v291_v15  ;;  %v222_v46 = vadd.f32 %v608_v56, %v122_v40  ;;  %v221_v20 = vadd.f32 %v675_v19, %v121_v24  ;;  %v1012_v5 = vld [vmem:[#allocation5_spill] sm:$0xff] }
 0x1ba   :  { %v224_v14 = vadd.f32 %v612_v57, %v124_v35  ;;  %v123_v7 = vmul.f32 %v746_v17, %v601_v54  ;;  %v126_v37 = vmul.f32 %v746_v17, %v532_v9  ;;  %v125_v8 = vmul.f32 %v746_v17, %v627_v61 }
 0x1bb   :  { %v347_v48 = vadd.f32 %v771_v21, %v327_v25  ;;  %v242_v16 = vadd.f32 %v768_v62, %v222_v46  ;;  %v128_v56 = vmul.f32 %v746_v17, %v539_v10  ;;  %v241_v57 = vadd.f32 %v768_v62, %v221_v20 }
 0x1bc   :  { %v863_v54 = vadd.f32 %v768_v62, %v224_v14  ;;  %v223_v9 = vadd.f32 %v682_v6, %v123_v7  ;;  %v216_v19 = vmul.f32 %v707_v38, %v604_v55  ;;  %v226_v21 = vadd.f32 %v618_v58, %v126_v37 }
 0x1bd   :  { %395 = vrot.lane.b32.xlu0 %v356_v32, %s473_s19  ;;  %393 = vrot.lane.b32.xlu1 %v355_v60, %s473_s19  ;;  %v225_v61 = vadd.f32 %v686_v23, %v125_v8  ;;  %v358_v33 = vmax.f32 %v342_v53, 0.0  ;;  %v357_v10 = vmax.f32 %v341_v22, 0.0  ;;  %v228_v34 = vadd.f32 %v622_v59, %v128_v56 }
 0x1be   :  { %v243_v18 = vadd.f32 %v768_v62, %v223_v9  ;;  %v873_v50 = vadd.f32 %v768_v62, %v226_v21  ;;  %v127_v6 = vmul.f32 %v746_v17, %v637_v63  ;;  %v130_v58 = vmul.f32 %v746_v17, %v546_v11  ;;  %v1010_v63 = vld [vmem:[#allocation2_spill] sm:$0xff]  ;;  %v1011_v11 = vld [vmem:[#allocation4_spill] sm:$0xff] }
 0x1bf   :  { %v876_v41 = vadd.f32 %v768_v62, %v225_v61  ;;  %v885_v23 = vadd.f32 %v768_v62, %v228_v34  ;;  %v129_v59 = vmul.f32 %v746_v17, %v644_v0  ;;  %v132_v38 = vmul.f32 %v746_v17, %v553_v12 }
 0x1c0   :  { %v360_v31 = vmax.f32 %v344_v44, 0.0  ;;  %v227_v49 = vadd.f32 %v1009_v47, %v127_v6  ;;  %v230_v27 = vadd.f32 %v1010_v63, %v130_v58  ;;  %v359_v39 = vmax.f32 %v343_v26, 0.0  ;;  %v1013_v44 = vld [vmem:[#allocation6_spill] sm:$0xff] }
 0x1c1   :  { %399 = vrot.lane.b32.xlu0 %v358_v33, %s473_s19  ;;  %397 = vrot.lane.b32.xlu1 %v357_v10, %s473_s19  ;;  %v229_v53 = vadd.f32 %v1011_v11, %v129_v59  ;;  %v232_v22 = vadd.f32 %v216_v19, %v132_v38  ;;  %v131_v13 = vmul.f32 %v746_v17, %v651_v1  ;;  %v361_v40 = vmax.f32 %v834_v28, 0.0 }
 0x1c2   :  { %v247_v42 = vadd.f32 %v768_v62, %v227_v49  ;;  %v250_v51 = vadd.f32 %v768_v62, %v230_v27  ;;  %v133_v0 = vmul.f32 %v746_v17, %v658_v3  ;;  %v219_v1 = vmul.f32 %v806_v43, %v604_v55 }
 0x1c3   :  { %v249_v12 = vadd.f32 %v768_v62, %v229_v53  ;;  %v904_v52 = vadd.f32 %v768_v62, %v232_v22  ;;  %v231_v2 = vadd.f32 %v1012_v5, %v131_v13  ;;  %v135_v15 = vmul.f32 %v746_v17, %v665_v4 }
 0x1c4   :  { %v233_v26 = vadd.f32 %v1013_v44, %v133_v0  ;;  %v362_v3 = vmax.f32 %v816_v30, 0.0  ;;  %v364_v43 = vmax.f32 %v830_v45, 0.0  ;;  %v363_v4 = vmax.f32 %v347_v48, 0.0 }
 0x1c5   :  { %403 = vrot.lane.b32.xlu0 %v360_v31, %s473_s19  ;;  %401 = vrot.lane.b32.xlu1 %v359_v39, %s473_s19  ;;  %v251_v24 = vadd.f32 %v768_v62, %v231_v2  ;;  %v235_v32 = vadd.f32 %v219_v1, %v135_v15  ;;  %v258_v17 = vmax.f32 %v242_v16, 0.0  ;;  %v257_v30 = vmax.f32 %v241_v57, 0.0 }
 0x1c6   :  { %v916_v35 = vadd.f32 %v768_v62, %v233_v26  ;;  %v259_v45 = vmax.f32 %v243_v18, 0.0  ;;  %v262_v48 = vmax.f32 %v873_v50, 0.0  ;;  %v261_v16 = vmax.f32 %v876_v41, 0.0 }
 0x1c7   :  { %v921_v55 = vadd.f32 %v768_v62, %v235_v32  ;;  %v260_v62 = vmax.f32 %v863_v54, 0.0  ;;  %v264_v9 = vmax.f32 %v885_v23, 0.0  ;;  %v263_v19 = vmax.f32 %v247_v42, 0.0 }
 0x1c8   :  { %v266_v18 = vmax.f32 %v250_v51, 0.0  ;;  %v265_v34 = vmax.f32 %v249_v12, 0.0  ;;  %v268_v23 = vmax.f32 %v904_v52, 0.0  ;;  %v267_v59 = vmax.f32 %v251_v24, 0.0 }
 0x1c9   :  { %407 = vrot.lane.b32.xlu0 %v362_v3, %s473_s19  ;;  %405 = vrot.lane.b32.xlu1 %v361_v40, %s473_s19  ;;  %v270_v63 = vmax.f32 %v782_v29, 0.0  ;;  %v269_v27 = vmax.f32 %v916_v35, 0.0  ;;  %v272_v13 = vmax.f32 %v787_v36, 0.0  ;;  %v271_v29 = vmax.f32 %v921_v55, 0.0 }
 0x1cd   :  { %411 = vrot.lane.b32.xlu0 %v364_v43, %s473_s19  ;;  %409 = vrot.lane.b32.xlu1 %v363_v4, %s473_s19 }
 0x223   :  { %v384_v28 = vpop.permute.xlu0 %383  ;;  %v382_v60 = vpop.permute.xlu1 %381 }
 0x224   :  { %v431_v25 = vsel %vm429_vm4, %v258_v17, %v384_v28  ;;  %v430_v46 = vsel %vm429_vm4, %v257_v30, %v382_v60 }
 0x225   :  { %447 = vst [vmem:[%s1003_s4 + $0x8] sm:$0xff] %v431_v25  ;;  %446 = vst [vmem:[%s1003_s4] sm:$0xff] %v430_v46 }
 0x227   :  { %v388_v20 = vpop.permute.xlu0 %387  ;;  %v386_v14 = vpop.permute.xlu1 %385 }
 0x228   :  { %v433_v7 = vsel %vm429_vm4, %v260_v62, %v388_v20  ;;  %v432_v37 = vsel %vm429_vm4, %v259_v45, %v386_v14 }
 0x229   :  { %449 = vst [vmem:[%s1003_s4 + $0x18] sm:$0xff] %v433_v7  ;;  %448 = vst [vmem:[%s1003_s4 + $0x10] sm:$0xff] %v432_v37 }
 0x22b   :  { %v392_v8 = vpop.permute.xlu0 %391  ;;  %v390_v56 = vpop.permute.xlu1 %389 }
 0x22c   :  { %v435_v57 = vsel %vm429_vm4, %v262_v48, %v392_v8  ;;  %v434_v54 = vsel %vm429_vm4, %v261_v16, %v390_v56 }
 0x22d   :  { %451 = vst [vmem:[%s1003_s4 + $0x28] sm:$0xff] %v435_v57  ;;  %450 = vst [vmem:[%s1003_s4 + $0x20] sm:$0xff] %v434_v54 }
 0x22f   :  { %v396_v21 = vpop.permute.xlu0 %395  ;;  %v394_v61 = vpop.permute.xlu1 %393 }
 0x230   :  { %v437_v33 = vsel %vm429_vm4, %v264_v9, %v396_v21  ;;  %v436_v10 = vsel %vm429_vm4, %v263_v19, %v394_v61 }
 0x231   :  { %453 = vst [vmem:[%s1003_s4 + $0x38] sm:$0xff] %v437_v33  ;;  %452 = vst [vmem:[%s1003_s4 + $0x30] sm:$0xff] %v436_v10 }
 0x233   :  { %v400_v50 = vpop.permute.xlu0 %399  ;;  %v398_v41 = vpop.permute.xlu1 %397 }
 0x234   :  { %v439_v6 = vsel %vm429_vm4, %v266_v18, %v400_v50  ;;  %v438_v58 = vsel %vm429_vm4, %v265_v34, %v398_v41 }
 0x235   :  { %455 = vst [vmem:[%s1003_s4 + $0x48] sm:$0xff] %v439_v6  ;;  %454 = vst [vmem:[%s1003_s4 + $0x40] sm:$0xff] %v438_v58 }
 0x237   :  { %v404_v38 = vpop.permute.xlu0 %403  ;;  %v402_v31 = vpop.permute.xlu1 %401 }
 0x238   :  { %v441_v47 = vsel %vm429_vm4, %v268_v23, %v404_v38  ;;  %v440_v49 = vsel %vm429_vm4, %v267_v59, %v402_v31 }
 0x239   :  { %457 = vst [vmem:[%s1003_s4 + $0x58] sm:$0xff] %v441_v47  ;;  %456 = vst [vmem:[%s1003_s4 + $0x50] sm:$0xff] %v440_v49 }
 0x23b   :  { %v408_v39 = vpop.permute.xlu0 %407  ;;  %v406_v11 = vpop.permute.xlu1 %405 }
 0x23c   :  { %v443_v53 = vsel %vm429_vm4, %v270_v63, %v408_v39  ;;  %v442_v22 = vsel %vm429_vm4, %v269_v27, %v406_v11 }
 0x23d   :  { %459 = vst [vmem:[%s1003_s4 + $0x68] sm:$0xff] %v443_v53  ;;  %458 = vst [vmem:[%s1003_s4 + $0x60] sm:$0xff] %v442_v22 }
 0x23f   :  { %v412_v42 = vpop.permute.xlu0 %411  ;;  %v410_v51 = vpop.permute.xlu1 %409 }
 0x240   :  { %v445_v0 = vsel %vm429_vm4, %v272_v13, %v412_v42  ;;  %v444_v12 = vsel %vm429_vm4, %v271_v29, %v410_v51 }
 0x241   :  { %461 = vst [vmem:[%s1003_s4 + $0x78] sm:$0xff] %v445_v0  ;;  %460 = vst [vmem:[%s1003_s4 + $0x70] sm:$0xff] %v444_v12 }

// kernel: closed_set_classifier_forward.12
= control target key start
LH: loop header
LB: loop body
LE: loop exit
PB: predicated region body
PF: predicated region fallthrough
CT: control target
= control target key end

     0   :  { %v85_v33 = vlaneseq  ;;  %s293_s1 = inlined_call_operand.vmem [shape: f32[8,256], index: 1, kind: input, shape index: {}]   ;;  %s294_s2 = inlined_call_operand.vmem [shape: f32[3,128], index: 2, kind: input, shape index: {}]   ;;  %s295_s3 = inlined_call_operand.vmem [shape: f32[2,128], index: 3, kind: input, shape index: {}]   ;;  %s296_s0 = inlined_call_operand.vmem [shape: f32[2,16,256], index: 0, kind: input, shape index: {}]   ;;  %s297_s4 = inlined_call_operand.vmem [shape: f32[2,16,256], index: 4, kind: output, shape index: {}]  }
   0x1   :  { %v17_v0 = vld [vmem:[%s293_s1] ss:$8 sm:$0x3]  ;;  %v180_v1 = vld [vmem:[%s293_s1 + $0x1] ss:$8 sm:$0x3] }
   0x2   :  { %v218_v2 = vmul.f32 0.03125, %v17_v0  ;;  %v21_v3 = vmul.f32 0.03125, %v180_v1  ;;  %v22_v4 = vld [vmem:[%s293_s1 + $0x2] ss:$0 sm:$0xff]  ;;  %v86_v34 = vshrl.u32 %v85_v33, 7  ;;  %v97_v59 = vld [vmem:[%s296_s0 + $0x8] sm:$0xff] }
   0x3   :  { %v23_v5 = vmul.f32 0.03125, %v22_v4  ;;  %v67_v40 = vld [vmem:[%s294_s2] sm:$0x1]  ;;  %v69_v41 = vld [vmem:[%s294_s2 + $0x2] sm:$0x1]  ;;  %v98_v62 = vld [vmem:[%s296_s0 + $0x10] sm:$0xff] }
   0x4   :  { %v24_v6 = vmul.f32 %v218_v2, %v218_v2  ;;  %v28_v7 = vrot.slane %v218_v2, 1  ;;  %v32_v8 = vrot.slane %v21_v3, 1  ;;  %v87_v38 = vsub.s32 1, %v86_v34  ;;  %v68_v45 = vld [vmem:[%s294_s2 + $0x1] sm:$0x1] }
   0x5   :  { %v106_v47 = vsub.s32 0, %v86_v34  ;;  %v70_v55 = vld [vmem:[%s295_s3] sm:$0x1]  ;;  %v71_v4 = vld [vmem:[%s295_s3 + $0x1] sm:$0x1] }
   0x6   :  { %v25_v9 = vsub.f32 %v21_v3, %v24_v6  ;;  %v30_v10 = vmul.f32 %v28_v7, %v28_v7  ;;  %v36_v11 = vmul.f32 %v28_v7, %v218_v2  ;;  %v88_v46 = vrot.slane %v218_v2, %v87_v38  ;;  %v96_v58 = vld [vmem:[%s296_s0] sm:$0xff] }
   0x8   :  { %v26_v12 = vadd.f32 1e-05, %v25_v9  ;;  %v34_v13 = vsub.f32 %v32_v8, %v30_v10  ;;  %v37_v14 = vsub.f32 %v23_v5, %v36_v11  ;;  %v99_v5 = vld [vmem:[%s296_s0 + $0x18] sm:$0xff] }
   0xa   :  { %v35_v15 = vadd.f32 1e-05, %v34_v13  ;;  %v39_v16 = vmul.f32 %v37_v14, %v37_v14  ;;  %v65_v37 = vsub.f32 0.0, %v37_v14  ;;  %v100_v14 = vld [vmem:[%s296_s0 + $0x20] sm:$0xff] }
   0xc   :  { %v38_v17 = vmul.f32 %v35_v15, %v26_v12  ;;  %v48_v23 = vadd.f32 %v35_v15, %v26_v12 }
   0xe   :  { %v40_v18 = vsub.f32 %v38_v17, %v39_v16 }
  0x10   :  { %181 = vrsqrt.f32 %v40_v18  ;;  %vm43_vm0 = vcmp.eq.f32.partialorder %v40_v18, inf  ;;  %v46_v20 = vand.u32 2147483648, %v40_v18  ;;  %vm45_vm1 = vcmp.eq.f32.partialorder %v40_v18, 0.0 }
  0x1d   :  { %v182_v19 = vpop.eup %181 }
  0x1e   :  { %v42_v21 = vmul.f32 %v182_v19, %v40_v18  ;;  %v101_v19 = vld [vmem:[%s296_s0 + $0x28] sm:$0xff] }
  0x20   :  { %v44_v22 = vsel %vm43_vm0, %v40_v18, %v42_v21 }
  0x21   :  { %v47_v24 = vsel %vm45_vm1, %v46_v20, %v44_v22 }
  0x22   :  { %v49_v25 = vmul.f32 2.0, %v47_v24  ;;  %v61_v35 = vadd.f32 %v47_v24, %v35_v15  ;;  %v63_v36 = vadd.f32 %v47_v24, %v26_v12 }
  0x24   :  { %v50_v26 = vadd.f32 %v49_v25, %v48_v23  ;;  %v102_v23 = vld [vmem:[%s296_s0 + $0x30] sm:$0xff] }
  0x26   :  { %183 = vrsqrt.f32 %v50_v26  ;;  %vm53_vm2 = vcmp.eq.f32.partialorder %v50_v26, inf  ;;  %v56_v28 = vand.u32 2147483648, %v50_v26  ;;  %vm55_vm3 = vcmp.eq.f32.partialorder %v50_v26, 0.0 }
  0x33   :  { %v184_v27 = vpop.eup %183 }
  0x34   :  { %v52_v29 = vmul.f32 %v184_v27, %v50_v26 }
  0x36   :  { %v54_v30 = vsel %vm53_vm2, %v50_v26, %v52_v29 }
  0x37   :  { %v57_v31 = vsel %vm55_vm3, %v56_v28, %v54_v30 }
  0x38   :  { %v58_v32 = vmul.f32 %v57_v31, %v47_v24  ;;  %v103_v24 = vld [vmem:[%s296_s0 + $0x38] sm:$0xff] }
  0x3a   :  { %185 = vrcp.f32 %v58_v32 }
  0x47   :  { %v186_v39 = vpop.eup %185 }
  0x48   :  { %v62_v42 = vmul.f32 %v186_v39, %v61_v35  ;;  %v64_v43 = vmul.f32 %v186_v39, %v63_v36  ;;  %v66_v44 = vmul.f32 %v186_v39, %v65_v37 }
  0x4a   :  { %v72_v48 = vmul.f32 %v67_v40, %v62_v42  ;;  %v73_v49 = vmul.f32 %v69_v41, %v66_v44  ;;  %v75_v50 = vmul.f32 %v67_v40, %v66_v44  ;;  %v76_v51 = vmul.f32 %v69_v41, %v64_v43 }
  0x4b   :  { %v78_v52 = vmul.f32 %v69_v41, %v62_v42  ;;  %v79_v53 = vmul.f32 %v68_v45, %v66_v44  ;;  %v81_v54 = vmul.f32 %v68_v45, %v64_v43 }
  0x4c   :  { %v74_v56 = vadd.f32 %v73_v49, %v72_v48  ;;  %v77_v57 = vadd.f32 %v76_v51, %v75_v50 }
  0x4d   :  { %v80_v60 = vadd.f32 %v79_v53, %v78_v52  ;;  %v82_v61 = vadd.f32 %v81_v54, %v73_v49 }
  0x4e   :  { %v83_v63 = vmul.f32 %v74_v56, %v218_v2  ;;  %v90_v0 = vmul.f32 %v88_v46, %v77_v57  ;;  %v107_v1 = vrot.slane %v74_v56, %v106_v47  ;;  %v115_v3 = vrot.slane %v77_v57, %v106_v47 }
  0x4f   :  { %v92_v6 = vmul.f32 %v80_v60, %v218_v2  ;;  %v94_v7 = vmul.f32 %v88_v46, %v82_v61  ;;  %v139_v8 = vrot.slane %v80_v60, %v106_v47  ;;  %v147_v9 = vrot.slane %v82_v61, %v106_v47 }
  0x50   :  { %v84_v10 = vsub.f32 %v70_v55, %v83_v63  ;;  %v108_v11 = vmul.f32 %v107_v1, %v96_v58  ;;  %v116_v12 = vmul.f32 %v115_v3, %v97_v59  ;;  %v109_v13 = vmul.f32 %v107_v1, %v98_v62 }
  0x51   :  { %v93_v15 = vsub.f32 %v71_v4, %v92_v6  ;;  %v140_v16 = vmul.f32 %v139_v8, %v96_v58  ;;  %v148_v17 = vmul.f32 %v147_v9, %v97_v59  ;;  %v117_v18 = vmul.f32 %v115_v3, %v99_v5 }
  0x52   :  { %v91_v2 = vsub.f32 %v84_v10, %v90_v0  ;;  %v120_v20 = vadd.f32 %v116_v12, %v108_v11  ;;  %v141_v21 = vmul.f32 %v139_v8, %v98_v62  ;;  %v149_v22 = vmul.f32 %v147_v9, %v99_v5 }
  0x53   :  { %v95_v25 = vsub.f32 %v93_v15, %v94_v7  ;;  %v152_v26 = vadd.f32 %v148_v17, %v140_v16  ;;  %v121_v27 = vadd.f32 %v117_v18, %v109_v13  ;;  %v110_v28 = vmul.f32 %v107_v1, %v100_v14 }
  0x54   :  { %v127_v29 = vrot.slane %v91_v2, %v106_v47  ;;  %v153_v30 = vadd.f32 %v149_v22, %v141_v21  ;;  %v118_v31 = vmul.f32 %v115_v3, %v101_v19  ;;  %v142_v32 = vmul.f32 %v139_v8, %v100_v14 }
  0x55   :  { %v159_v33 = vrot.slane %v95_v25, %v106_v47  ;;  %v150_v34 = vmul.f32 %v147_v9, %v101_v19  ;;  %v111_v35 = vmul.f32 %v107_v1, %v102_v23  ;;  %v119_v36 = vmul.f32 %v115_v3, %v103_v24 }
  0x56   :  { %v128_v37 = vadd.f32 %v127_v29, %v120_v20  ;;  %v129_v38 = vadd.f32 %v127_v29, %v121_v27  ;;  %v122_v39 = vadd.f32 %v118_v31, %v110_v28  ;;  %v143_v40 = vmul.f32 %v139_v8, %v102_v23 }
  0x57   :  { %v160_v41 = vadd.f32 %v159_v33, %v152_v26  ;;  %v161_v42 = vadd.f32 %v159_v33, %v153_v30  ;;  %v154_v43 = vadd.f32 %v150_v34, %v142_v32  ;;  %v123_v44 = vadd.f32 %v119_v36, %v111_v35 }
  0x58   :  { %v132_v45 = vmax.f32 %v128_v37, 0.0  ;;  %v133_v46 = vmax.f32 %v129_v38, 0.0  ;;  %v130_v48 = vadd.f32 %v127_v29, %v122_v39  ;;  %v151_v49 = vmul.f32 %v147_v9, %v103_v24 }
  0x59   :  { %v164_v50 = vmax.f32 %v160_v41, 0.0  ;;  %v165_v51 = vmax.f32 %v161_v42, 0.0  ;;  %v162_v52 = vadd.f32 %v159_v33, %v154_v43  ;;  %v131_v53 = vadd.f32 %v127_v29, %v123_v44 }
  0x5a   :  { %168 = vst [vmem:[%s297_s4] sm:$0xff] %v132_v45  ;;  %170 = vst [vmem:[%s297_s4 + $0x10] sm:$0xff] %v133_v46  ;;  %v134_v47 = vmax.f32 %v130_v48, 0.0  ;;  %v155_v54 = vadd.f32 %v151_v49, %v143_v40 }
  0x5b   :  { %169 = vst [vmem:[%s297_s4 + $0x8] sm:$0xff] %v164_v50  ;;  %171 = vst [vmem:[%s297_s4 + $0x18] sm:$0xff] %v165_v51  ;;  %v166_v55 = vmax.f32 %v162_v52, 0.0  ;;  %v135_v56 = vmax.f32 %v131_v53, 0.0 }
  0x5c   :  { %172 = vst [vmem:[%s297_s4 + $0x20] sm:$0xff] %v134_v47  ;;  %v163_v57 = vadd.f32 %v159_v33, %v155_v54 }
  0x5d   :  { %173 = vst [vmem:[%s297_s4 + $0x28] sm:$0xff] %v166_v55  ;;  %174 = vst [vmem:[%s297_s4 + $0x30] sm:$0xff] %v135_v56 }
  0x5e   :  { %v167_v58 = vmax.f32 %v163_v57, 0.0 }
  0x60   :  { %175 = vst [vmem:[%s297_s4 + $0x38] sm:$0xff] %v167_v58 }

// kernel: closed_set_classifier_forward.11
= control target key start
LH: loop header
LB: loop body
LE: loop exit
PB: predicated region body
PF: predicated region fallthrough
CT: control target
= control target key end

     0   :  { %vm141_vm0 = vcmask 1046528   ;;  %vm1191_vm1 = vcmask 1040384   ;;  %vm1194_vm2 = vcmask 1041408   ;;  %vm1197_vm3 = vcmask 1042432   ;;  %s2195_s1 = inlined_call_operand.vmem [shape: bf16[2,512,256], index: 1, kind: input, shape index: {}]   ;;  %s2196_s0 = inlined_call_operand.vmem [shape: f32[2,18,512], index: 0, kind: input, shape index: {}]   ;;  %s2197_s2 = inlined_call_operand.vmem [shape: f32[2,16,256], index: 2, kind: output, shape index: {0}]   ;;  %s2198_s3 = inlined_call_operand.vmem [shape: f32[8,256], index: 3, kind: output, shape index: {1}]  }
   0x1   :  { %v1413_v0 = vld [vmem:[%s2195_s1 + $0x274] ss:$8 sps:$4 sm:$0xff]   ;;  %v1417_v2 = vld [vmem:[%s2195_s1 + $0x270] ss:$8 sps:$4 sm:$0xff]   ;;  %v1419_v4 = vld [vmem:[%s2195_s1 + $0x264] ss:$8 sps:$4 sm:$0xff]  }
   0x2   :  { %v1415_v1 = vld [vmem:[%s2195_s1 + $0x374] ss:$8 sps:$4 sm:$0xff]   ;;  %591 = vmatprep.subr.bf16.mxu0 %v1413_v0  ;;  %v1418_v3 = vld [vmem:[%s2195_s1 + $0x370] ss:$8 sps:$4 sm:$0xff]   ;;  %v1421_v5 = vld [vmem:[%s2195_s1 + $0x364] ss:$8 sps:$4 sm:$0xff]  }
   0x3   :  { %644 = vmatprep.subr.bf16.mxu1 %v1415_v1  ;;  %592 = vmatpush1.bf16.msra.mxu0 %v1417_v2  ;;  %v1423_v6 = vld [vmem:[%s2195_s1 + $0x260] ss:$8 sps:$4 sm:$0xff]   ;;  %v1425_v8 = vld [vmem:[%s2195_s1 + $0x254] ss:$8 sps:$4 sm:$0xff]   ;;  %v1429_v10 = vld [vmem:[%s2195_s1 + $0x250] ss:$8 sps:$4 sm:$0xff]  }
   0x4   :  { %645 = vmatpush1.bf16.msra.mxu1 %v1418_v3  ;;  %593 = vmatprep.subr.bf16.mxu0 %v1419_v4  ;;  %v1424_v7 = vld [vmem:[%s2195_s1 + $0x360] ss:$8 sps:$4 sm:$0xff]   ;;  %v1427_v9 = vld [vmem:[%s2195_s1 + $0x354] ss:$8 sps:$4 sm:$0xff]   ;;  %v1430_v11 = vld [vmem:[%s2195_s1 + $0x350] ss:$8 sps:$4 sm:$0xff]  }
   0x5   :  { %646 = vmatprep.subr.bf16.mxu1 %v1421_v5  ;;  %v1431_v12 = vld [vmem:[%s2195_s1 + $0x244] ss:$8 sps:$4 sm:$0xff]   ;;  %v1435_v14 = vld [vmem:[%s2195_s1 + $0x240] ss:$8 sps:$4 sm:$0xff]   ;;  %v1437_v16 = vld [vmem:[%s2195_s1 + $0x234] ss:$8 sps:$4 sm:$0xff]  }
   0x6   :  { %v1433_v13 = vld [vmem:[%s2195_s1 + $0x344] ss:$8 sps:$4 sm:$0xff]   ;;  %v1436_v15 = vld [vmem:[%s2195_s1 + $0x340] ss:$8 sps:$4 sm:$0xff]   ;;  %v1439_v17 = vld [vmem:[%s2195_s1 + $0x334] ss:$8 sps:$4 sm:$0xff]  }
   0x7   :  { %594 = vmatpush1.bf16.msra.mxu0 %v1423_v6  ;;  %v1441_v18 = vld [vmem:[%s2195_s1 + $0x230] ss:$8 sps:$4 sm:$0xff]   ;;  %v1443_v20 = vld [vmem:[%s2195_s1 + $0x224] ss:$8 sps:$4 sm:$0xff]   ;;  %v1447_v22 = vld [vmem:[%s2195_s1 + $0x220] ss:$8 sps:$4 sm:$0xff]  }
   0x8   :  { %647 = vmatpush1.bf16.msra.mxu1 %v1424_v7  ;;  %595 = vmatprep.subr.bf16.mxu0 %v1425_v8  ;;  %v1442_v19 = vld [vmem:[%s2195_s1 + $0x330] ss:$8 sps:$4 sm:$0xff]   ;;  %v1445_v21 = vld [vmem:[%s2195_s1 + $0x324] ss:$8 sps:$4 sm:$0xff]   ;;  %v1448_v23 = vld [vmem:[%s2195_s1 + $0x320] ss:$8 sps:$4 sm:$0xff]  }
   0x9   :  { %648 = vmatprep.subr.bf16.mxu1 %v1427_v9  ;;  %v1449_v24 = vld [vmem:[%s2195_s1 + $0x214] ss:$8 sps:$4 sm:$0xff]   ;;  %v1453_v26 = vld [vmem:[%s2195_s1 + $0x210] ss:$8 sps:$4 sm:$0xff]   ;;  %v1455_v28 = vld [vmem:[%s2195_s1 + $0x204] ss:$8 sps:$4 sm:$0xff]  }
   0xa   :  { %v1451_v25 = vld [vmem:[%s2195_s1 + $0x314] ss:$8 sps:$4 sm:$0xff]   ;;  %v1454_v27 = vld [vmem:[%s2195_s1 + $0x310] ss:$8 sps:$4 sm:$0xff]   ;;  %v1457_v29 = vld [vmem:[%s2195_s1 + $0x304] ss:$8 sps:$4 sm:$0xff]  }
   0xb   :  { %596 = vmatpush1.bf16.msra.mxu0 %v1429_v10  ;;  %v1459_v30 = vld [vmem:[%s2195_s1 + $0x200] ss:$8 sps:$4 sm:$0xff]   ;;  %v1461_v32 = vld [vmem:[%s2195_s1 + $0x2f4] ss:$8 sps:$4 sm:$0xff]   ;;  %v1465_v34 = vld [vmem:[%s2195_s1 + $0x2f0] ss:$8 sps:$4 sm:$0xff]  }
   0xc   :  { %649 = vmatpush1.bf16.msra.mxu1 %v1430_v11  ;;  %597 = vmatprep.subr.bf16.mxu0 %v1431_v12  ;;  %v1460_v31 = vld [vmem:[%s2195_s1 + $0x300] ss:$8 sps:$4 sm:$0xff]   ;;  %v1463_v33 = vld [vmem:[%s2195_s1 + $0x3f4] ss:$8 sps:$4 sm:$0xff]   ;;  %v1466_v35 = vld [vmem:[%s2195_s1 + $0x3f0] ss:$8 sps:$4 sm:$0xff]  }
   0xd   :  { %650 = vmatprep.subr.bf16.mxu1 %v1433_v13  ;;  %v1467_v36 = vld [vmem:[%s2195_s1 + $0x2e4] ss:$8 sps:$4 sm:$0xff]   ;;  %v1471_v38 = vld [vmem:[%s2195_s1 + $0x2e0] ss:$8 sps:$4 sm:$0xff]   ;;  %v1473_v40 = vld [vmem:[%s2195_s1 + $0x2d4] ss:$8 sps:$4 sm:$0xff]  }
   0xe   :  { %v1469_v37 = vld [vmem:[%s2195_s1 + $0x3e4] ss:$8 sps:$4 sm:$0xff]   ;;  %v1472_v39 = vld [vmem:[%s2195_s1 + $0x3e0] ss:$8 sps:$4 sm:$0xff]   ;;  %v1475_v41 = vld [vmem:[%s2195_s1 + $0x3d4] ss:$8 sps:$4 sm:$0xff]  }
   0xf   :  { %598 = vmatpush1.bf16.msra.mxu0 %v1435_v14  ;;  %v1477_v42 = vld [vmem:[%s2195_s1 + $0x2d0] ss:$8 sps:$4 sm:$0xff]   ;;  %v1479_v44 = vld [vmem:[%s2195_s1 + $0x2c4] ss:$8 sps:$4 sm:$0xff]   ;;  %v1483_v46 = vld [vmem:[%s2195_s1 + $0x2c0] ss:$8 sps:$4 sm:$0xff]  }
  0x10   :  { %651 = vmatpush1.bf16.msra.mxu1 %v1436_v15  ;;  %599 = vmatprep.subr.bf16.mxu0 %v1437_v16  ;;  %v1478_v43 = vld [vmem:[%s2195_s1 + $0x3d0] ss:$8 sps:$4 sm:$0xff]   ;;  %v1481_v45 = vld [vmem:[%s2195_s1 + $0x3c4] ss:$8 sps:$4 sm:$0xff]   ;;  %v1484_v47 = vld [vmem:[%s2195_s1 + $0x3c0] ss:$8 sps:$4 sm:$0xff]  }
  0x11   :  { %652 = vmatprep.subr.bf16.mxu1 %v1439_v17  ;;  %v1772_v48 = vld [vmem:[%s2196_s0 + $0x28] sm:$0xff]  ;;  %v1485_v49 = vld [vmem:[%s2195_s1 + $0x2b4] ss:$8 sps:$4 sm:$0xff]   ;;  %v108_v58 = vld [vmem:[%s2196_s0 + $0x58] sm:$0x1] }
  0x12   :  { %v1487_v50 = vld [vmem:[%s2195_s1 + $0x3b4] ss:$8 sps:$4 sm:$0xff]   ;;  %v102_v51 = vld [vmem:[%s2196_s0 + $0x8] sm:$0xfe]  ;;  %v106_v52 = vld [vmem:[%s2196_s0 + $0x48] sm:$0x1] }
  0x13   :  { %600 = vmatpush1.bf16.msra.mxu0 %v1441_v18  ;;  %v146_v53 = vrot.slane %v1772_v48, 1  ;;  %v1790_v54 = vld [vmem:[%s2196_s0 + $0x38] sm:$0xff]  ;;  %v145_v55 = vrot.slane %v102_v51, 1  ;;  %v156_v56 = vrot.slane %v106_v52, 1  ;;  %v160_v61 = vrot.slane %v108_v58, 1  ;;  %v1802_v62 = vld [vmem:[%s2196_s0] sm:$0xff] }
  0x14   :  { %653 = vmatpush1.bf16.msra.mxu1 %v1442_v19  ;;  %601 = vmatprep.subr.bf16.mxu0 %v1443_v20  ;;  %v104_v57 = vld [vmem:[%s2196_s0 + $0x18] sm:$0xfe]  ;;  %v152_v60 = vrot.slane %v1790_v54, 1  ;;  %v1807_v63 = vld [vmem:[%s2196_s0 + $0x20] sm:$0xff]  ;;  %v1812_v0 = vld [vmem:[%s2196_s0 + $0x10] sm:$0xff] }
  0x15   :  { %654 = vmatprep.subr.bf16.mxu1 %v1445_v21  ;;  %v151_v59 = vrot.slane %v104_v57, 1  ;;  %v1489_v1 = vld [vmem:[%s2195_s1 + $0x2b0] ss:$8 sps:$4 sm:$0xff]   ;;  %v147_v2 = vsel %vm141_vm0, %v145_v55, %v146_v53  ;;  %v157_v3 = vsel %vm141_vm0, %v146_v53, %v156_v56  ;;  %v29_v4 = vpack.c.bf16 %v1807_v63, %v1802_v62  ;;  %v1491_v10 = vld [vmem:[%s2195_s1 + $0x2a4] ss:$8 sps:$4 sm:$0xff]  }
  0x16   :  { %v1490_v5 = vld [vmem:[%s2195_s1 + $0x3b0] ss:$8 sps:$4 sm:$0xff]   ;;  %v199_v6 = vpack.c.bf16 %v157_v3, %v147_v2  ;;  %v161_v8 = vsel %vm141_vm0, %v152_v60, %v160_v61  ;;  %v1493_v13 = vld [vmem:[%s2195_s1 + $0x3a4] ss:$8 sps:$4 sm:$0xff]   ;;  %v1495_v14 = vld [vmem:[%s2195_s1 + $0x2a0] ss:$8 sps:$4 sm:$0xff]  }
  0x17   :  { %602 = vmatpush1.bf16.msra.mxu0 %v1447_v22  ;;  %v153_v7 = vsel %vm141_vm0, %v151_v59, %v152_v60  ;;  %v1829_v9 = vld [vmem:[%s2196_s0 + $0x30] sm:$0xff]  ;;  %v1496_v15 = vld [vmem:[%s2195_s1 + $0x3a0] ss:$8 sps:$4 sm:$0xff]   ;;  %v1529_v53 = vld [vmem:[%s2195_s1 + $0x44] ss:$8 sps:$4 sm:$0xff]  }
  0x18   :  { %655 = vmatpush1.bf16.msra.mxu1 %v1448_v23  ;;  %603 = vmatprep.subr.bf16.mxu0 %v1449_v24  ;;  %v201_v11 = vpack.c.bf16 %v161_v8, %v153_v7  ;;  %v31_v12 = vpack.c.bf16 %v1829_v9, %v1812_v0  ;;  %v1497_v16 = vld [vmem:[%s2195_s1 + $0x294] ss:$8 sps:$4 sm:$0xff]   ;;  %v101_v18 = vld [vmem:[%s2196_s0] sm:$0xfe]  ;;  %v105_v19 = vld [vmem:[%s2196_s0 + $0x40] sm:$0x1] }
  0x19   :  { %656 = vmatprep.subr.bf16.mxu1 %v1451_v25  ;;  %623 = vmatprep.mubr.bf16.mxu0 %v199_v6  ;;  %v1499_v17 = vld [vmem:[%s2195_s1 + $0x394] ss:$8 sps:$4 sm:$0xff]   ;;  %v107_v21 = vld [vmem:[%s2196_s0 + $0x50] sm:$0x1]  ;;  %v1503_v24 = vld [vmem:[%s2195_s1 + $0x284] ss:$8 sps:$4 sm:$0xff]  }
  0x1a   :  { %676 = vmatprep.mubr.bf16.mxu1 %v201_v11  ;;  %v103_v20 = vld [vmem:[%s2196_s0 + $0x10] sm:$0xfe]  ;;  %v142_v25 = vrot.slane %v101_v18, 1  ;;  %v1532_v55 = vld [vmem:[%s2195_s1 + $0x144] ss:$8 sps:$4 sm:$0xff]  }
  0x1b   :  { %604 = vmatpush1.bf16.msra.mxu0 %v1453_v26  ;;  %v1501_v22 = vld [vmem:[%s2195_s1 + $0x290] ss:$8 sps:$4 sm:$0xff]   ;;  %v143_v26 = vrot.slane %v1807_v63, 1  ;;  %v1527_v56 = vld [vmem:[%s2195_s1 + $0x40] ss:$8 sps:$4 sm:$0xff]  }
  0x1c   :  { %657 = vmatpush1.bf16.msra.mxu1 %v1454_v27  ;;  %605 = vmatprep.subr.bf16.mxu0 %v1455_v28  ;;  %v1502_v23 = vld [vmem:[%s2195_s1 + $0x390] ss:$8 sps:$4 sm:$0xff]   ;;  %v154_v27 = vrot.slane %v105_v19, 1  ;;  %v148_v28 = vrot.slane %v103_v20, 1  ;;  %v1530_v57 = vld [vmem:[%s2195_s1 + $0x140] ss:$8 sps:$4 sm:$0xff]  }
  0x1d   :  { %658 = vmatprep.subr.bf16.mxu1 %v1457_v29  ;;  %v149_v29 = vrot.slane %v1829_v9, 1  ;;  %v1521_v51 = vld [vmem:[%s2195_s1 + $0x50] ss:$8 sps:$4 sm:$0xff]   ;;  %v1535_v58 = vld [vmem:[%s2195_s1 + $0x34] ss:$8 sps:$4 sm:$0xff]   ;;  %v1962_v6 = vld [vmem:[%s2196_s0 + $0x88] sm:$0xff] }
  0x1e   :  { %v1524_v52 = vld [vmem:[%s2195_s1 + $0x150] ss:$8 sps:$4 sm:$0xff]   ;;  %v1538_v59 = vld [vmem:[%s2195_s1 + $0x134] ss:$8 sps:$4 sm:$0xff]   ;;  %v1544_v2 = vld [vmem:[%s2195_s1 + $0x124] ss:$8 sps:$4 sm:$0xff]  }
  0x1f   :  { %606 = vmatpush1.bf16.msra.mxu0 %v1459_v30  ;;  %v158_v30 = vrot.slane %v107_v21, 1  ;;  %v1533_v60 = vld [vmem:[%s2195_s1 + $0x30] ss:$8 sps:$4 sm:$0xff]   ;;  %v1539_v3 = vld [vmem:[%s2195_s1 + $0x20] ss:$8 sps:$4 sm:$0xff]  }
  0x20   :  { %659 = vmatpush1.bf16.msra.mxu1 %v1460_v31  ;;  %607 = vmatprep.subr.bf16.mxu0 %v1461_v32  ;;  %v1505_v31 = vld [vmem:[%s2195_s1 + $0x384] ss:$8 sps:$4 sm:$0xff]   ;;  %v1507_v32 = vld [vmem:[%s2195_s1 + $0x280] ss:$8 sps:$4 sm:$0xff]   ;;  %v1536_v61 = vld [vmem:[%s2195_s1 + $0x130] ss:$8 sps:$4 sm:$0xff]  }
  0x21   :  { %660 = vmatprep.subr.bf16.mxu1 %v1463_v33  ;;  %v144_v33 = vsel %vm141_vm0, %v142_v25, %v143_v26  ;;  %v110_v7 = vld [vmem:[%s2196_s0 + $0x68] sm:$0xfe]  ;;  %v1547_v8 = vld [vmem:[%s2195_s1 + $0x14] ss:$8 sps:$4 sm:$0xff]   ;;  %v114_v11 = vld [vmem:[%s2196_s0 + $0xa8] sm:$0x1] }
  0x22   :  { %v112_v18 = vld [vmem:[%s2196_s0 + $0x78] sm:$0xfe]  ;;  %v116_v19 = vld [vmem:[%s2196_s0 + $0xb8] sm:$0x1]  ;;  %v113_v25 = vld [vmem:[%s2196_s0 + $0xa0] sm:$0x1] }
  0x23   :  { %608 = vmatpush2.bf16.msra.mxu0 %v1465_v34  ;;  %v1508_v34 = vld [vmem:[%s2195_s1 + $0x380] ss:$8 sps:$4 sm:$0xff]  }
  0x24   :  { %661 = vmatpush2.bf16.msra.mxu1 %v1466_v35  ;;  %609 = vmatprep.subr.bf16.mxu0 %v1467_v36  ;;  %v155_v35 = vsel %vm141_vm0, %v143_v26, %v154_v27  ;;  %v150_v36 = vsel %vm141_vm0, %v148_v28, %v149_v29 }
  0x25   :  { %662 = vmatprep.subr.bf16.mxu1 %v1469_v37  ;;  %v159_v37 = vsel %vm141_vm0, %v149_v29, %v158_v30  ;;  %v174_v29 = vrot.slane %v113_v25, 1  ;;  %v2006_v30 = vld [vmem:[%s2196_s0 + $0x90] sm:$0xff] }
  0x26   :  { %v1595_v25 = vld [vmem:[%s2195_s1 + $0x94] ss:$8 sps:$4 sm:$0xff]  }
  0x27   :  { %610 = vmatpush2.bf16.msra.mxu0 %v1471_v38  ;;  %v1511_v38 = vld [vmem:[%s2195_s1 + $0x74] ss:$8 sps:$4 sm:$0xff]  }
  0x28   :  { %663 = vmatpush2.bf16.msra.mxu1 %v1472_v39  ;;  %611 = vmatprep.subr.bf16.mxu0 %v1473_v40  ;;  %v1514_v39 = vld [vmem:[%s2195_s1 + $0x174] ss:$8 sps:$4 sm:$0xff]   ;;  %v198_v40 = vpack.c.bf16 %v155_v35, %v144_v33  ;;  %v115_v35 = vld [vmem:[%s2196_s0 + $0xb0] sm:$0x1] }
  0x29   :  { %664 = vmatprep.subr.bf16.mxu1 %v1475_v41  ;;  %v200_v41 = vpack.c.bf16 %v159_v37, %v150_v36  ;;  %v1545_v37 = vld [vmem:[%s2195_s1 + $0x10] ss:$8 sps:$4 sm:$0xff]  }
  0x2b   :  { %612 = vmatpush2.bf16.msra.mxu0 %v1477_v42  ;;  %v1509_v42 = vld [vmem:[%s2195_s1 + $0x70] ss:$8 sps:$4 sm:$0xff]  }
  0x2c   :  { %665 = vmatpush2.bf16.msra.mxu1 %v1478_v43  ;;  %613 = vmatprep.subr.bf16.mxu0 %v1479_v44  ;;  %v1512_v43 = vld [vmem:[%s2195_s1 + $0x170] ss:$8 sps:$4 sm:$0xff]   ;;  %v1517_v44 = vld [vmem:[%s2195_s1 + $0x64] ss:$8 sps:$4 sm:$0xff]  }
  0x2d   :  { %666 = vmatprep.subr.bf16.mxu1 %v1481_v45  ;;  %v1520_v45 = vld [vmem:[%s2195_s1 + $0x164] ss:$8 sps:$4 sm:$0xff]  }
  0x2f   :  { %614 = vmatpush2.bf16.msra.mxu0 %v1483_v46  ;;  %v1515_v46 = vld [vmem:[%s2195_s1 + $0x60] ss:$8 sps:$4 sm:$0xff]  }
  0x30   :  { %667 = vmatpush2.bf16.msra.mxu1 %v1484_v47  ;;  %615 = vmatprep.subr.bf16.mxu0 %v1485_v49  ;;  %v1518_v47 = vld [vmem:[%s2195_s1 + $0x160] ss:$8 sps:$4 sm:$0xff]   ;;  %v1523_v49 = vld [vmem:[%s2195_s1 + $0x54] ss:$8 sps:$4 sm:$0xff]  }
  0x31   :  { %668 = vmatprep.subr.bf16.mxu1 %v1487_v50  ;;  %v1526_v50 = vld [vmem:[%s2195_s1 + $0x154] ss:$8 sps:$4 sm:$0xff]  }
  0x33   :  { %616 = vmatpush2.bf16.msra.mxu0 %v1489_v1  ;;  %v1541_v1 = vld [vmem:[%s2195_s1 + $0x24] ss:$8 sps:$4 sm:$0xff]  }
  0x34   :  { %669 = vmatpush2.bf16.msra.mxu1 %v1490_v5  ;;  %617 = vmatprep.subr.bf16.mxu0 %v1491_v10  ;;  %v1542_v5 = vld [vmem:[%s2195_s1 + $0x120] ss:$8 sps:$4 sm:$0xff]   ;;  %v1550_v10 = vld [vmem:[%s2195_s1 + $0x114] ss:$8 sps:$4 sm:$0xff]  }
  0x35   :  { %670 = vmatprep.subr.bf16.mxu1 %v1493_v13  ;;  %v165_v13 = vrot.slane %v110_v7, 1  ;;  %v1569_v7 = vld [vmem:[%s2195_s1 + $0xd0] ss:$8 sps:$4 sm:$0xff]  }
  0x37   :  { %618 = vmatpush2.bf16.msra.mxu0 %v1495_v14  ;;  %v166_v14 = vrot.slane %v1962_v6, 1 }
  0x38   :  { %671 = vmatpush2.bf16.msra.mxu1 %v1496_v15  ;;  %619 = vmatprep.subr.bf16.mxu0 %v1497_v16  ;;  %v1980_v15 = vld [vmem:[%s2196_s0 + $0x98] sm:$0xff]  ;;  %v1985_v16 = vld [vmem:[%s2196_s0 + $0x80] sm:$0xff] }
  0x39   :  { %672 = vmatprep.subr.bf16.mxu1 %v1499_v17  ;;  %v176_v17 = vrot.slane %v114_v11, 1  ;;  %v172_v20 = vrot.slane %v1980_v15, 1  ;;  %v167_v21 = vsel %vm141_vm0, %v165_v13, %v166_v14  ;;  %v163_v28 = vrot.slane %v1985_v16, 1  ;;  %v1580_v11 = vld [vmem:[%s2195_s1 + $0x1c4] ss:$8 sps:$4 sm:$0xff]  }
  0x3a   :  { %v1575_v13 = vld [vmem:[%s2195_s1 + $0xc0] ss:$8 sps:$4 sm:$0xff]  }
  0x3b   :  { %620 = vmatpush2.bf16.msra.mxu0 %v1501_v22  ;;  %v171_v22 = vrot.slane %v112_v18, 1  ;;  %v177_v26 = vsel %vm141_vm0, %v166_v14, %v176_v17  ;;  %v1578_v14 = vld [vmem:[%s2195_s1 + $0x1c0] ss:$8 sps:$4 sm:$0xff]   ;;  %v1583_v17 = vld [vmem:[%s2195_s1 + $0xb4] ss:$8 sps:$4 sm:$0xff]  }
  0x3c   :  { %673 = vmatpush2.bf16.msra.mxu1 %v1502_v23  ;;  %621 = vmatprep.subr.bf16.mxu0 %v1503_v24  ;;  %v180_v23 = vrot.slane %v116_v19, 1  ;;  %v109_v24 = vld [vmem:[%s2196_s0 + $0x60] sm:$0xfe]  ;;  %v1586_v18 = vld [vmem:[%s2195_s1 + $0x1b4] ss:$8 sps:$4 sm:$0xff]  }
  0x3d   :  { %674 = vmatprep.subr.bf16.mxu1 %v1505_v31  ;;  %v162_v27 = vrot.slane %v109_v24, 1  ;;  %v111_v31 = vld [vmem:[%s2196_s0 + $0x70] sm:$0xfe]  ;;  %v173_v33 = vsel %vm141_vm0, %v171_v22, %v172_v20  ;;  %v1592_v22 = vld [vmem:[%s2195_s1 + $0x1a4] ss:$8 sps:$4 sm:$0xff]  }
  0x3e   :  { %v168_v36 = vrot.slane %v111_v31, 1  ;;  %v1581_v19 = vld [vmem:[%s2195_s1 + $0xb0] ss:$8 sps:$4 sm:$0xff]   ;;  %v1590_v24 = vld [vmem:[%s2195_s1 + $0x1a0] ss:$8 sps:$4 sm:$0xff]  }
  0x3f   :  { %622 = vmatpush2.bf16.msra.mxu0 %v1507_v32  ;;  %v203_v32 = vpack.c.bf16 %v177_v26, %v167_v21  ;;  %v1589_v21 = vld [vmem:[%s2195_s1 + $0xa4] ss:$8 sps:$4 sm:$0xff]   ;;  %v1598_v26 = vld [vmem:[%s2195_s1 + $0x194] ss:$8 sps:$4 sm:$0xff]  }
  0x40   :  { %675 = vmatpush2.bf16.msra.mxu1 %v1508_v34  ;;  %1017 = vmatprep.subr.bf16.mxu0 %v1511_v38  ;;  %v181_v34 = vsel %vm141_vm0, %v172_v20, %v180_v23  ;;  %v1548_v38 = vld [vmem:[%s2195_s1 + $0x110] ss:$8 sps:$4 sm:$0xff]   ;;  %v1587_v23 = vld [vmem:[%s2195_s1 + $0xa0] ss:$8 sps:$4 sm:$0xff]   ;;  %v1604_v31 = vld [vmem:[%s2195_s1 + $0x184] ss:$8 sps:$4 sm:$0xff]  }
  0x41   :  { %1070 = vmatprep.subr.bf16.mxu1 %v1514_v39  ;;  %v205_v39 = vpack.c.bf16 %v181_v34, %v173_v33  ;;  %v1584_v20 = vld [vmem:[%s2195_s1 + $0x1b0] ss:$8 sps:$4 sm:$0xff]   ;;  %v1602_v33 = vld [vmem:[%s2195_s1 + $0x180] ss:$8 sps:$4 sm:$0xff]  }
  0x42   :  { %624 = vmatmul.mubr.bf16.vlgmr.msra.gmra.mxu0 %v198_v40  ;;  %v164_v40 = vsel %vm141_vm0, %v162_v27, %v163_v28  ;;  %v1593_v27 = vld [vmem:[%s2195_s1 + $0x90] ss:$8 sps:$4 sm:$0xff]   ;;  %v22_v34 = vld [vmem:[%s2196_s0 + $0x68] sm:$0xff] }
  0x43   :  { %677 = vmatmul.mubr.bf16.vlgmr.msra.gmra.mxu1 %v200_v41  ;;  %1018 = vmatpush1.bf16.msra.mxu0 %v1509_v42  ;;  %v175_v41 = vsel %vm141_vm0, %v163_v28, %v174_v29  ;;  %v169_v42 = vrot.slane %v2006_v30, 1  ;;  %v1596_v28 = vld [vmem:[%s2195_s1 + $0x190] ss:$8 sps:$4 sm:$0xff]   ;;  %v1601_v29 = vld [vmem:[%s2195_s1 + $0x84] ss:$8 sps:$4 sm:$0xff]  }
  0x44   :  { %1071 = vmatpush1.bf16.msra.mxu1 %v1512_v43  ;;  %1019 = vmatprep.subr.bf16.mxu0 %v1517_v44  ;;  %v1553_v43 = vld [vmem:[%s2195_s1 + $0x4] ss:$8 sps:$4 sm:$0xff]  }
  0x45   :  { %1072 = vmatprep.subr.bf16.mxu1 %v1520_v45  ;;  %v1556_v44 = vld [vmem:[%s2195_s1 + $0x104] ss:$8 sps:$4 sm:$0xff]   ;;  %v202_v45 = vpack.c.bf16 %v175_v41, %v164_v40  ;;  %633 = vmatprep.mubr.bf16.mxu0 %v203_v32  ;;  %v1599_v32 = vld [vmem:[%s2195_s1 + $0x80] ss:$8 sps:$4 sm:$0xff]  }
  0x46   :  { %686 = vmatprep.mubr.bf16.mxu1 %v205_v39 }
  0x47   :  { %1020 = vmatpush1.bf16.msra.mxu0 %v1515_v46  ;;  %v178_v46 = vrot.slane %v115_v35, 1  ;;  %v24_v35 = vld [vmem:[%s2196_s0 + $0x78] sm:$0xff] }
  0x48   :  { %1073 = vmatpush1.bf16.msra.mxu1 %v1518_v47  ;;  %1021 = vmatprep.subr.bf16.mxu0 %v1523_v49  ;;  %v170_v47 = vsel %vm141_vm0, %v168_v36, %v169_v42  ;;  %v34_v36 = vpack.c.bf16 %v1962_v6, %v22_v34  ;;  %v23_v6 = vld [vmem:[%s2196_s0 + $0x70] sm:$0xff] }
  0x49   :  { %1074 = vmatprep.subr.bf16.mxu1 %v1526_v50  ;;  %v179_v49 = vsel %vm141_vm0, %v169_v42, %v178_v46  ;;  %v1551_v50 = vld [vmem:[%s2195_s1] ss:$8 sps:$4 sm:$0xff]   ;;  %v35_v39 = vpack.c.bf16 %v2006_v30, %v23_v6 }
  0x4a   :  { %634 = vmatmul.mubr.bf16.gmra.mxu0 %v202_v45 }
  0x4b   :  { %1022 = vmatpush1.bf16.msra.mxu0 %v1521_v51  ;;  %v1554_v51 = vld [vmem:[%s2195_s1 + $0x100] ss:$8 sps:$4 sm:$0xff]  }
  0x4c   :  { %1075 = vmatpush1.bf16.msra.mxu1 %v1524_v52  ;;  %1023 = vmatprep.subr.bf16.mxu0 %v1529_v53  ;;  %v204_v52 = vpack.c.bf16 %v179_v49, %v170_v47  ;;  %v1559_v53 = vld [vmem:[%s2195_s1 + $0xf4] ss:$8 sps:$4 sm:$0xff]  }
  0x4d   :  { %1076 = vmatprep.subr.bf16.mxu1 %v1532_v55  ;;  %v1562_v55 = vld [vmem:[%s2195_s1 + $0x1f4] ss:$8 sps:$4 sm:$0xff]  }
  0x4e   :  { %687 = vmatmul.mubr.bf16.gmra.mxu1 %v204_v52 }
  0x4f   :  { %1024 = vmatpush1.bf16.msra.mxu0 %v1527_v56  ;;  %v14_v56 = vld [vmem:[%s2196_s0 + $0x8] sm:$0xff] }
  0x50   :  { %1077 = vmatpush1.bf16.msra.mxu1 %v1530_v57  ;;  %1025 = vmatprep.subr.bf16.mxu0 %v1535_v58  ;;  %v16_v57 = vld [vmem:[%s2196_s0 + $0x18] sm:$0xff] }
  0x51   :  { %1078 = vmatprep.subr.bf16.mxu1 %v1538_v59  ;;  %v1557_v58 = vld [vmem:[%s2195_s1 + $0xf0] ss:$8 sps:$4 sm:$0xff]  }
  0x52   :  { %v1560_v59 = vld [vmem:[%s2195_s1 + $0x1f0] ss:$8 sps:$4 sm:$0xff]  }
  0x53   :  { %1026 = vmatpush1.bf16.msra.mxu0 %v1533_v60  ;;  %v30_v60 = vpack.c.bf16 %v1772_v48, %v14_v56  ;;  %v1563_v48 = vld [vmem:[%s2195_s1 + $0xe0] ss:$8 sps:$4 sm:$0xff]  }
  0x54   :  { %1079 = vmatpush1.bf16.msra.mxu1 %v1536_v61  ;;  %1027 = vmatprep.subr.bf16.mxu0 %v1541_v1  ;;  %v32_v61 = vpack.c.bf16 %v1790_v54, %v16_v57  ;;  %v1565_v1 = vld [vmem:[%s2195_s1 + $0xe4] ss:$8 sps:$4 sm:$0xff]   ;;  %v1566_v54 = vld [vmem:[%s2195_s1 + $0x1e0] ss:$8 sps:$4 sm:$0xff]  }
  0x55   :  { %1080 = vmatprep.subr.bf16.mxu1 %v1544_v2  ;;  %v1568_v2 = vld [vmem:[%s2195_s1 + $0x1e4] ss:$8 sps:$4 sm:$0xff]   ;;  %1049 = vmatprep.mubr.bf16.mxu0 %v30_v60 }
  0x56   :  { %1102 = vmatprep.mubr.bf16.mxu1 %v32_v61 }
  0x57   :  { %1028 = vmatpush1.bf16.msra.mxu0 %v1539_v3  ;;  %v1571_v3 = vld [vmem:[%s2195_s1 + $0xd4] ss:$8 sps:$4 sm:$0xff]  }
  0x58   :  { %1081 = vmatpush1.bf16.msra.mxu1 %v1542_v5  ;;  %1029 = vmatprep.subr.bf16.mxu0 %v1547_v8  ;;  %v1574_v5 = vld [vmem:[%s2195_s1 + $0x1d4] ss:$8 sps:$4 sm:$0xff]   ;;  %v1572_v8 = vld [vmem:[%s2195_s1 + $0x1d0] ss:$8 sps:$4 sm:$0xff]  }
  0x59   :  { %1082 = vmatprep.subr.bf16.mxu1 %v1550_v10  ;;  %v1577_v10 = vld [vmem:[%s2195_s1 + $0xc4] ss:$8 sps:$4 sm:$0xff]  }
  0x5b   :  { %1030 = vmatpush1.bf16.msra.mxu0 %v1545_v37  ;;  %v36_v37 = vpack.c.bf16 %v1980_v15, %v24_v35 }
  0x5c   :  { %1083 = vmatpush1.bf16.msra.mxu1 %v1548_v38  ;;  %1031 = vmatprep.subr.bf16.mxu0 %v1553_v43  ;;  %v21_v38 = vld [vmem:[%s2196_s0 + $0x60] sm:$0xff] }
  0x5d   :  { %1084 = vmatprep.subr.bf16.mxu1 %v1556_v44  ;;  %v33_v15 = vpack.c.bf16 %v1985_v16, %v21_v38 }
  0x5f   :  { %1032 = vmatpush1.bf16.msra.mxu0 %v1551_v50 }
  0x60   :  { %1085 = vmatpush1.bf16.msra.mxu1 %v1554_v51  ;;  %1033 = vmatprep.subr.bf16.mxu0 %v1559_v53 }
  0x61   :  { %1086 = vmatprep.subr.bf16.mxu1 %v1562_v55 }
  0x63   :  { %1034 = vmatpush2.bf16.msra.mxu0 %v1557_v58 }
  0x64   :  { %1087 = vmatpush2.bf16.msra.mxu1 %v1560_v59  ;;  %1035 = vmatprep.subr.bf16.mxu0 %v1565_v1 }
  0x65   :  { %1088 = vmatprep.subr.bf16.mxu1 %v1568_v2 }
  0x67   :  { %1036 = vmatpush2.bf16.msra.mxu0 %v1563_v48 }
  0x68   :  { %1089 = vmatpush2.bf16.msra.mxu1 %v1566_v54  ;;  %1037 = vmatprep.subr.bf16.mxu0 %v1571_v3 }
  0x69   :  { %1090 = vmatprep.subr.bf16.mxu1 %v1574_v5 }
  0x6b   :  { %1038 = vmatpush2.bf16.msra.mxu0 %v1569_v7 }
  0x6c   :  { %1091 = vmatpush2.bf16.msra.mxu1 %v1572_v8  ;;  %1039 = vmatprep.subr.bf16.mxu0 %v1577_v10 }
  0x6d   :  { %1092 = vmatprep.subr.bf16.mxu1 %v1580_v11 }
  0x6f   :  { %1040 = vmatpush2.bf16.msra.mxu0 %v1575_v13 }
  0x70   :  { %1093 = vmatpush2.bf16.msra.mxu1 %v1578_v14  ;;  %1041 = vmatprep.subr.bf16.mxu0 %v1583_v17 }
  0x71   :  { %1094 = vmatprep.subr.bf16.mxu1 %v1586_v18 }
  0x73   :  { %1042 = vmatpush2.bf16.msra.mxu0 %v1581_v19 }
  0x74   :  { %1095 = vmatpush2.bf16.msra.mxu1 %v1584_v20  ;;  %1043 = vmatprep.subr.bf16.mxu0 %v1589_v21 }
  0x75   :  { %1096 = vmatprep.subr.bf16.mxu1 %v1592_v22 }
  0x77   :  { %1044 = vmatpush2.bf16.msra.mxu0 %v1587_v23 }
  0x78   :  { %1097 = vmatpush2.bf16.msra.mxu1 %v1590_v24  ;;  %1045 = vmatprep.subr.bf16.mxu0 %v1595_v25 }
  0x79   :  { %1098 = vmatprep.subr.bf16.mxu1 %v1598_v26 }
  0x7b   :  { %1046 = vmatpush2.bf16.msra.mxu0 %v1593_v27 }
  0x7c   :  { %1099 = vmatpush2.bf16.msra.mxu1 %v1596_v28  ;;  %1047 = vmatprep.subr.bf16.mxu0 %v1601_v29 }
  0x7d   :  { %1100 = vmatprep.subr.bf16.mxu1 %v1604_v31 }
  0x7f   :  { %1048 = vmatpush2.bf16.msra.mxu0 %v1599_v32 }
  0x80   :  { %1101 = vmatpush2.bf16.msra.mxu1 %v1602_v33 }
  0x82   :  { %1050 = vmatmul.mubr.bf16.vlgmr.msra.gmra.mxu0 %v29_v4 }
  0x83   :  { %1103 = vmatmul.mubr.bf16.vlgmr.msra.gmra.mxu1 %v31_v12  ;;  %1059 = vmatprep.mubr.bf16.mxu0 %v34_v36 }
  0x84   :  { %1112 = vmatprep.mubr.bf16.mxu1 %v36_v37 }
  0x8a   :  { %1060 = vmatmul.mubr.bf16.gmra.mxu0 %v33_v15 }
  0x8b   :  { %1113 = vmatmul.mubr.bf16.gmra.mxu1 %v35_v39 }
 0x102   :  { %v625_v62 = vpop.f32.mrf.mxu0 }
 0x103   :  { %v678_v63 = vpop.f32.mrf.mxu1 }
 0x104   :  { %v627_v0 = vpop.f32.mrf.mxu0  ;;  %v679_v50 = vadd.f32 %v678_v63, %v625_v62 }
 0x105   :  { %v680_v4 = vpop.f32.mrf.mxu1 }
 0x106   :  { %v629_v9 = vpop.f32.mrf.mxu0  ;;  %v681_v52 = vadd.f32 %v680_v4, %v627_v0 }
 0x107   :  { %v682_v12 = vpop.f32.mrf.mxu1 }
 0x108   :  { %v631_v40 = vpop.f32.mrf.mxu0  ;;  %v683_v57 = vadd.f32 %v682_v12, %v629_v9 }
 0x109   :  { %v684_v41 = vpop.f32.mrf.mxu1 }
 0x10a   :  { %v635_v42 = vpop.f32.mrf.mxu0  ;;  %v685_v1 = vadd.f32 %v684_v41, %v631_v40 }
 0x10c   :  { %v637_v44 = vpop.f32.mrf.mxu0 }
 0x10e   :  { %v688_v43 = vpop.f32.mrf.mxu1  ;;  %v639_v46 = vpop.f32.mrf.mxu0 }
 0x10f   :  { %v689_v5 = vadd.f32 %v688_v43, %v635_v42 }
 0x110   :  { %v690_v45 = vpop.f32.mrf.mxu1  ;;  %v641_v49 = vpop.f32.mrf.mxu0 }
 0x111   :  { %v691_v17 = vadd.f32 %v690_v45, %v637_v44 }
 0x112   :  { %v692_v47 = vpop.f32.mrf.mxu1 }
 0x113   :  { %v693_v21 = vadd.f32 %v692_v47, %v639_v46 }
 0x114   :  { %v694_v16 = vpop.f32.mrf.mxu1 }
 0x115   :  { %v695_v22 = vadd.f32 %v694_v16, %v641_v49 }
 0x142   :  { %v1051_v30 = vpop.f32.mrf.mxu0 }
 0x143   :  { %v1104_v51 = vpop.f32.mrf.mxu1  ;;  %v1052_v53 = vadd.f32 %v1051_v30, %v679_v50 }
 0x144   :  { %v1053_v55 = vpop.f32.mrf.mxu0 }
 0x145   :  { %v1106_v56 = vpop.f32.mrf.mxu1  ;;  %v1105_v58 = vadd.f32 %v1104_v51, %v1052_v53  ;;  %v1054_v59 = vadd.f32 %v1053_v55, %v681_v52 }
 0x146   :  { %v1055_v60 = vpop.f32.mrf.mxu0 }
 0x147   :  { %v1108_v61 = vpop.f32.mrf.mxu1  ;;  %1123 = vst [vmem:[%s2197_s2] sm:$0xff] %v1105_v58  ;;  %v1107_v2 = vadd.f32 %v1106_v56, %v1054_v59  ;;  %v1056_v48 = vadd.f32 %v1055_v60, %v683_v57  ;;  %v1149_v23 = vmul.f32 %v1105_v58, %v1105_v58 }
 0x148   :  { %v1057_v54 = vpop.f32.mrf.mxu0 }
 0x149   :  { %v1110_v3 = vpop.f32.mrf.mxu1  ;;  %1124 = vst [vmem:[%s2197_s2 + $0x8] sm:$0xff] %v1107_v2  ;;  %v1109_v7 = vadd.f32 %v1108_v61, %v1056_v48  ;;  %v1058_v8 = vadd.f32 %v1057_v54, %v685_v1  ;;  %v1150_v29 = vmul.f32 %v1107_v2, %v1107_v2  ;;  %v1175_v31 = vmul.f32 %v1107_v2, %v1105_v58 }
 0x14a   :  { %v1061_v10 = vpop.f32.mrf.mxu0 }
 0x14b   :  { %v1114_v11 = vpop.f32.mrf.mxu1  ;;  %1125 = vst [vmem:[%s2197_s2 + $0x10] sm:$0xff] %v1109_v7  ;;  %v1111_v13 = vadd.f32 %v1110_v3, %v1058_v8  ;;  %v1062_v14 = vadd.f32 %v1061_v10, %v689_v5  ;;  %v1151_v18 = vmul.f32 %v1109_v7, %v1109_v7  ;;  %v1131_v32 = vadd.f32 %v1109_v7, %v1105_v58 }
 0x14c   :  { %v1063_v19 = vpop.f32.mrf.mxu0 }
 0x14d   :  { %v1116_v20 = vpop.f32.mrf.mxu1  ;;  %1126 = vst [vmem:[%s2197_s2 + $0x18] sm:$0xff] %v1111_v13  ;;  %v1152_v24 = vmul.f32 %v1111_v13, %v1111_v13  ;;  %v1115_v25 = vadd.f32 %v1114_v11, %v1062_v14  ;;  %v1064_v26 = vadd.f32 %v1063_v19, %v691_v17  ;;  %v1157_v34 = vadd.f32 %v1151_v18, %v1149_v23 }
 0x14e   :  { %v1065_v27 = vpop.f32.mrf.mxu0  ;;  %v1176_v35 = vmul.f32 %v1111_v13, %v1109_v7  ;;  %v1140_v6 = vadd.f32 %v1111_v13, %v1107_v2 }
 0x14f   :  { %v1118_v28 = vpop.f32.mrf.mxu1  ;;  %v1066_v33 = vadd.f32 %v1065_v27, %v693_v21  ;;  %1127 = vst [vmem:[%s2197_s2 + $0x20] sm:$0xff] %v1115_v25  ;;  %v1153_v36 = vmul.f32 %v1115_v25, %v1115_v25  ;;  %v1117_v37 = vadd.f32 %v1116_v20, %v1064_v26  ;;  %v1132_v15 = vadd.f32 %v1131_v32, %v1115_v25 }
 0x150   :  { %v1067_v38 = vpop.f32.mrf.mxu0  ;;  %v1166_v63 = vadd.f32 %v1152_v24, %v1150_v29  ;;  %v1179_v44 = vadd.f32 %v1176_v35, %v1175_v31 }
 0x151   :  { %v1119_v39 = vadd.f32 %v1118_v28, %v1066_v33  ;;  %v1068_v62 = vadd.f32 %v1067_v38, %v695_v22  ;;  %v1158_v0 = vadd.f32 %v1157_v34, %v1153_v36  ;;  %1128 = vst [vmem:[%s2197_s2 + $0x28] sm:$0xff] %v1117_v37  ;;  %v1154_v4 = vmul.f32 %v1117_v37, %v1117_v37  ;;  %v1120_v12 = vpop.f32.mrf.mxu1 }
 0x152   :  { %v1177_v9 = vmul.f32 %v1117_v37, %v1115_v25  ;;  %v1141_v40 = vadd.f32 %v1140_v6, %v1117_v37 }
 0x153   :  { %1129 = vst [vmem:[%s2197_s2 + $0x30] sm:$0xff] %v1119_v39  ;;  %v1133_v41 = vadd.f32 %v1132_v15, %v1119_v39  ;;  %v1155_v42 = vmul.f32 %v1119_v39, %v1119_v39  ;;  %v1121_v43 = vadd.f32 %v1120_v12, %v1068_v62  ;;  %v1167_v45 = vadd.f32 %v1166_v63, %v1154_v4 }
 0x154   :  { %v1180_v50 = vadd.f32 %v1179_v44, %v1177_v9 }
 0x155   :  { %v1134_v46 = vrot.slane %v1133_v41, 4  ;;  %v1159_v47 = vadd.f32 %v1158_v0, %v1155_v42  ;;  %1130 = vst [vmem:[%s2197_s2 + $0x38] sm:$0xff] %v1121_v43  ;;  %v1142_v49 = vadd.f32 %v1141_v40, %v1121_v43  ;;  %v1156_v16 = vmul.f32 %v1121_v43, %v1121_v43 }
 0x156   :  { %v1178_v30 = vmul.f32 %v1121_v43, %v1119_v39 }
 0x157   :  { %v1135_v51 = vadd.f32 %v1134_v46, %v1133_v41  ;;  %v1160_v52 = vrot.slane %v1159_v47, 4  ;;  %v1143_v53 = vrot.slane %v1142_v49, 4  ;;  %v1168_v55 = vadd.f32 %v1167_v45, %v1156_v16 }
 0x158   :  { %v1181_v56 = vadd.f32 %v1180_v50, %v1178_v30 }
 0x159   :  { %v1136_v57 = vrot.slane %v1135_v51, 2  ;;  %v1161_v58 = vadd.f32 %v1160_v52, %v1159_v47  ;;  %v1144_v59 = vadd.f32 %v1143_v53, %v1142_v49  ;;  %v1169_v60 = vrot.slane %v1168_v55, 4 }
 0x15a   :  { %v1182_v61 = vrot.slane %v1181_v56, 4 }
 0x15b   :  { %v1162_v1 = vrot.slane %v1161_v58, 2  ;;  %v1145_v2 = vrot.slane %v1144_v59, 2  ;;  %v1170_v48 = vadd.f32 %v1169_v60, %v1168_v55  ;;  %v1137_v3 = vadd.f32 %v1136_v57, %v1135_v51 }
 0x15c   :  { %v1183_v54 = vadd.f32 %v1182_v61, %v1181_v56 }
 0x15d   :  { %v1163_v5 = vadd.f32 %v1162_v1, %v1161_v58  ;;  %v1146_v7 = vadd.f32 %v1145_v2, %v1144_v59  ;;  %v1171_v8 = vrot.slane %v1170_v48, 2  ;;  %v1138_v18 = vrot.slane %v1137_v3, 1 }
 0x15e   :  { %v1184_v10 = vrot.slane %v1183_v54, 2 }
 0x15f   :  { %v1164_v11 = vrot.slane %v1163_v5, 1  ;;  %v1147_v13 = vrot.slane %v1146_v7, 1  ;;  %v1172_v14 = vadd.f32 %v1171_v8, %v1170_v48  ;;  %v1139_v25 = vadd.f32 %v1138_v18, %v1137_v3 }
 0x160   :  { %v1185_v17 = vadd.f32 %v1184_v10, %v1183_v54 }
 0x161   :  { %v1173_v19 = vrot.slane %v1172_v14, 1  ;;  %v1165_v21 = vadd.f32 %v1164_v11, %v1163_v5  ;;  %v1148_v22 = vadd.f32 %v1147_v13, %v1146_v7 }
 0x162   :  { %v1186_v20 = vrot.slane %v1185_v17, 1 }
 0x163   :  { %v1174_v23 = vadd.f32 %v1173_v19, %v1172_v14  ;;  %v1192_v28 = vsel %vm1191_vm1, %v1139_v25, %v1165_v21 }
 0x164   :  { %v1187_v24 = vadd.f32 %v1186_v20, %v1185_v17 }
 0x165   :  { %v1193_v26 = vsel %vm1191_vm1, %v1148_v22, %v1174_v23 }
 0x166   :  { %v1189_v27 = vrot.slane %v1187_v24, 6 }
 0x168   :  { %v1195_v29 = vsel %vm1194_vm2, %v1192_v28, %v1189_v27  ;;  %v1196_v31 = vsel %vm1194_vm2, %v1193_v26, %v1189_v27 }
 0x169   :  { %v1198_v32 = vsel %vm1197_vm3, %v1195_v29, 0.0  ;;  %v1199_v33 = vsel %vm1197_vm3, %v1196_v31, 0.0 }
 0x16a   :  { %1210 = vst [vmem:[%s2198_s3] sm:$0xff] %v1198_v32  ;;  %1211 = vst [vmem:[%s2198_s3 + $0x8] sm:$0xff] %v1199_v33 }

// kernel: closed_set_classifier_forward.9
= control target key start
LH: loop header
LB: loop body
LE: loop exit
PB: predicated region body
PF: predicated region fallthrough
CT: control target
= control target key end

     0   :  { %vm138_vm0 = vcmask 1046528   ;;  %vm690_vm1 = vcmask 1045504   ;;  %vm1065_vm2 = vcmask 1044480   ;;  %s2128_s8 = smov 64   ;;  %vm1578_vm3 = vcmask 523264   ;;  %s3351_s1 = inlined_call_operand.vmem [shape: bf16[4,256,128], index: 1, kind: input, shape index: {}]   ;;  %s3352_s0 = inlined_call_operand.vmem [shape: f32[2,67,256], index: 0, kind: input, shape index: {}]   ;;  %s3353_s2 = inlined_call_operand.vmem [shape: f32[2,64,128], index: 2, kind: output, shape index: {0}]   ;;  %s3354_s3 = inlined_call_operand.vmem [shape: f32[8,128], index: 3, kind: output, shape index: {1}]  }
   0x1   :  { %v2064_v0 = vld [vmem:[%s3351_s1 + $0xf8] sm:$0xff]   ;;  %v2068_v4 = vld [vmem:[%s3351_s1 + $0xf0] sm:$0xff]   ;;  %v2072_v8 = vld [vmem:[%s3351_s1 + $0xe8] sm:$0xff]   ;;  %vm1624_vm4 = vcmask 1040384   ;;  %vm1626_vm5 = vcmask 1041408   ;;  %vm1628_vm6 = vcmask 1042432  }
   0x2   :  { %v2065_v1 = vld [vmem:[%s3351_s1 + $0x78] sm:$0xff]   ;;  %1806 = vmatprep.subr.bf16.mxu0 %v2064_v0  ;;  %v2069_v5 = vld [vmem:[%s3351_s1 + $0x70] sm:$0xff]   ;;  %v2073_v9 = vld [vmem:[%s3351_s1 + $0x68] sm:$0xff]  }
   0x3   :  { %v2066_v2 = vld [vmem:[%s3351_s1 + $0xb8] sm:$0xff]   ;;  %1870 = vmatprep.subr.bf16.mxu1 %v2065_v1  ;;  %v2070_v6 = vld [vmem:[%s3351_s1 + $0xb0] sm:$0xff]   ;;  %v2074_v10 = vld [vmem:[%s3351_s1 + $0xa8] sm:$0xff]  }
   0x4   :  { %v2067_v3 = vld [vmem:[%s3351_s1 + $0x38] sm:$0xff]   ;;  %1807 = vmatpush3.bf16.msra.mxu0 %v2066_v2  ;;  %v2071_v7 = vld [vmem:[%s3351_s1 + $0x30] sm:$0xff]   ;;  %v2075_v11 = vld [vmem:[%s3351_s1 + $0x28] sm:$0xff]  }
   0x5   :  { %1871 = vmatpush3.bf16.msra.mxu1 %v2067_v3  ;;  %1808 = vmatprep.subr.bf16.mxu0 %v2068_v4  ;;  %v2076_v12 = vld [vmem:[%s3351_s1 + $0xe0] sm:$0xff]   ;;  %v2080_v16 = vld [vmem:[%s3351_s1 + $0xd8] sm:$0xff]   ;;  %v2084_v20 = vld [vmem:[%s3351_s1 + $0xd0] sm:$0xff]  }
   0x6   :  { %1872 = vmatprep.subr.bf16.mxu1 %v2069_v5  ;;  %v2077_v13 = vld [vmem:[%s3351_s1 + $0x60] sm:$0xff]   ;;  %v2081_v17 = vld [vmem:[%s3351_s1 + $0x58] sm:$0xff]   ;;  %v2085_v21 = vld [vmem:[%s3351_s1 + $0x50] sm:$0xff]  }
   0x7   :  { %v2078_v14 = vld [vmem:[%s3351_s1 + $0xa0] sm:$0xff]   ;;  %v2082_v18 = vld [vmem:[%s3351_s1 + $0x98] sm:$0xff]   ;;  %v2086_v22 = vld [vmem:[%s3351_s1 + $0x90] sm:$0xff]  }
   0x8   :  { %1809 = vmatpush3.bf16.msra.mxu0 %v2070_v6  ;;  %v2079_v15 = vld [vmem:[%s3351_s1 + $0x20] sm:$0xff]   ;;  %v2083_v19 = vld [vmem:[%s3351_s1 + $0x18] sm:$0xff]   ;;  %v2087_v23 = vld [vmem:[%s3351_s1 + $0x10] sm:$0xff]  }
   0x9   :  { %1873 = vmatpush3.bf16.msra.mxu1 %v2071_v7  ;;  %1810 = vmatprep.subr.bf16.mxu0 %v2072_v8  ;;  %v2088_v24 = vld [vmem:[%s3351_s1 + $0xc8] sm:$0xff]   ;;  %v2092_v28 = vld [vmem:[%s3351_s1 + $0xc0] sm:$0xff]   ;;  %v2248_v32 = vld [vmem:[%s3352_s0 + $0x18] sm:$0xff] }
   0xa   :  { %1874 = vmatprep.subr.bf16.mxu1 %v2073_v9  ;;  %v2089_v25 = vld [vmem:[%s3351_s1 + $0x48] sm:$0xff]   ;;  %v2093_v29 = vld [vmem:[%s3351_s1 + $0x40] sm:$0xff]   ;;  %v143_v36 = vrot.slane %v2248_v32, 1  ;;  %v2266_v39 = vld [vmem:[%s3352_s0 + $0x10] sm:$0xff] }
   0xb   :  { %v2090_v26 = vld [vmem:[%s3351_s1 + $0x88] sm:$0xff]   ;;  %v2094_v30 = vld [vmem:[%s3351_s1 + $0x80] sm:$0xff]   ;;  %v140_v43 = vrot.slane %v2266_v39, 1  ;;  %v2096_v46 = vld [vmem:[%s3351_s1 + $0x178] sm:$0xff]   ;;  %v692_v0 = vrot.slane %v2266_v39, 2 }
   0xc   :  { %1811 = vmatpush3.bf16.msra.mxu0 %v2074_v10  ;;  %v2091_v27 = vld [vmem:[%s3351_s1 + $0x8] sm:$0xff]   ;;  %v2095_v31 = vld [vmem:[%s3351_s1] sm:$0xff]   ;;  %v2097_v51 = vld [vmem:[%s3351_s1 + $0x138] sm:$0xff]  }
   0xd   :  { %1875 = vmatpush3.bf16.msra.mxu1 %v2075_v11  ;;  %1812 = vmatprep.subr.bf16.mxu0 %v2076_v12  ;;  %v2253_v33 = vld [vmem:[%s3352_s0 + $0x28] sm:$0xff]  ;;  %v2271_v40 = vld [vmem:[%s3352_s0 + $0x20] sm:$0xff]  ;;  %v2098_v55 = vld [vmem:[%s3351_s1 + $0x1f8] sm:$0xff]  }
   0xe   :  { %1876 = vmatprep.subr.bf16.mxu1 %v2077_v13  ;;  %v95_v34 = vld [vmem:[%s3352_s0 + $0x8] sm:$0xfe]  ;;  %v147_v37 = vrot.slane %v2253_v33, 1  ;;  %v94_v42 = vld [vmem:[%s3352_s0] sm:$0xfe]  ;;  %v145_v44 = vrot.slane %v2271_v40, 1 }
   0xf   :  { %v142_v35 = vrot.slane %v95_v34, 1  ;;  %v15_v38 = vld [vmem:[%s3352_s0 + $0x8] sm:$0xff]  ;;  %v14_v45 = vld [vmem:[%s3352_s0] sm:$0xff]  ;;  %v139_v49 = vrot.slane %v94_v42, 1  ;;  %v2099_v57 = vld [vmem:[%s3351_s1 + $0x1b8] sm:$0xff]   ;;  %v697_v11 = vrot.slane %v2271_v40, 2 }
  0x10   :  { %1813 = vmatpush3.bf16.msra.mxu0 %v2078_v14  ;;  %v47_v41 = vpack.c.bf16 %v2248_v32, %v15_v38  ;;  %v148_v48 = vsel %vm138_vm0, %v143_v36, %v147_v37  ;;  %v46_v50 = vpack.c.bf16 %v2266_v39, %v14_v45  ;;  %v146_v53 = vsel %vm138_vm0, %v140_v43, %v145_v44  ;;  %v2302_v58 = vld [vmem:[%s3352_s0 + $0x38] sm:$0xff]  ;;  %v2307_v59 = vld [vmem:[%s3352_s0 + $0x48] sm:$0xff]  ;;  %v2315_v62 = vld [vmem:[%s3352_s0 + $0x30] sm:$0xff] }
  0x11   :  { %1877 = vmatpush3.bf16.msra.mxu1 %v2079_v15  ;;  %1814 = vmatprep.subr.bf16.mxu0 %v2080_v16  ;;  %v144_v47 = vsel %vm138_vm0, %v142_v35, %v143_v36  ;;  %v141_v54 = vsel %vm138_vm0, %v139_v49, %v140_v43  ;;  %v151_v60 = vrot.slane %v2302_v58, 1  ;;  %v49_v61 = vpack.c.bf16 %v2302_v58, %v2253_v33  ;;  %v2320_v63 = vld [vmem:[%s3352_s0 + $0x40] sm:$0xff]  ;;  %v2100_v4 = vld [vmem:[%s3351_s1 + $0x170] sm:$0xff]   ;;  %v2348_v16 = vld [vmem:[%s3352_s0 + $0x58] sm:$0xff] }
  0x12   :  { %1878 = vmatprep.subr.bf16.mxu1 %v2081_v17  ;;  %v240_v52 = vpack.c.bf16 %v148_v48, %v144_v47  ;;  %609 = vmatprep.mubr.bf16.mxu1 %v47_v41  ;;  %v239_v56 = vpack.c.bf16 %v146_v53, %v141_v54  ;;  %v155_v1 = vrot.slane %v2307_v59, 1  ;;  %v149_v2 = vrot.slane %v2315_v62, 1  ;;  %v2101_v10 = vld [vmem:[%s3351_s1 + $0x130] sm:$0xff]   ;;  %v2353_v17 = vld [vmem:[%s3352_s0 + $0x68] sm:$0xff]  ;;  %v2397_v38 = vld [vmem:[%s3352_s0 + $0x78] sm:$0xff] }
  0x13   :  { %v153_v3 = vrot.slane %v2320_v63, 1  ;;  %v152_v5 = vsel %vm138_vm0, %v147_v37, %v151_v60  ;;  %v48_v6 = vpack.c.bf16 %v2315_v62, %v2271_v40  ;;  %v2102_v13 = vld [vmem:[%s3351_s1 + $0x1f0] sm:$0xff]   ;;  %v2107_v37 = vld [vmem:[%s3351_s1 + $0x1a8] sm:$0xff]   ;;  %v701_v41 = vrot.slane %v2315_v62, 2 }
  0x14   :  { %1815 = vmatpush3.bf16.msra.mxu0 %v2082_v18  ;;  %416 = vmatprep.mubr.bf16.mxu0 %v240_v52  ;;  %v156_v7 = vsel %vm138_vm0, %v151_v60, %v155_v1  ;;  %v150_v8 = vsel %vm138_vm0, %v145_v44, %v149_v2  ;;  %v2103_v15 = vld [vmem:[%s3351_s1 + $0x1b0] sm:$0xff]   ;;  %v2358_v18 = vsel %vm690_vm1, %v692_v0, %v697_v11  ;;  %v97_v42 = vld [vmem:[%s3352_s0 + $0x88] sm:$0x1]  ;;  %v167_v43 = vrot.slane %v2397_v38, 1  ;;  %v2110_v60 = vld [vmem:[%s3351_s1 + $0x1e0] sm:$0xff]  }
  0x15   :  { %1879 = vmatpush3.bf16.msra.mxu1 %v2083_v19  ;;  %1816 = vmatprep.subr.bf16.mxu0 %v2084_v20  ;;  %v154_v9 = vsel %vm138_vm0, %v149_v2, %v153_v3  ;;  %v242_v12 = vpack.c.bf16 %v156_v7, %v152_v5  ;;  %v159_v19 = vrot.slane %v2348_v16, 1  ;;  %v163_v20 = vrot.slane %v2353_v17, 1  ;;  %v2409_v45 = vld [vmem:[%s3352_s0 + $0x70] sm:$0xff]  ;;  %v2441_v2 = vld [vmem:[%s3352_s0 + $0xb8] sm:$0xff] }
  0x16   :  { %1880 = vmatprep.subr.bf16.mxu1 %v2085_v21  ;;  %v241_v14 = vpack.c.bf16 %v154_v9, %v150_v8  ;;  %v51_v21 = vpack.c.bf16 %v2348_v16, %v2307_v59  ;;  %v53_v44 = vpack.c.bf16 %v2397_v38, %v2353_v17  ;;  %v171_v47 = vrot.slane %v97_v42, 1  ;;  %v31_v7 = vld [vmem:[%s3352_s0 + $0x98] sm:$0xff]  ;;  %v2457_v8 = vld [vmem:[%s3352_s0 + $0xa0] sm:$0xff] }
  0x17   :  { %v165_v48 = vrot.slane %v2409_v45, 1  ;;  %v168_v52 = vsel %vm138_vm0, %v163_v20, %v167_v43  ;;  %v2420_v53 = vsel %vm690_vm1, %v697_v11, %v701_v41 }
  0x18   :  { %1817 = vmatpush3.bf16.msra.mxu0 %v2086_v22  ;;  %v2367_v22 = vld [vmem:[%s3352_s0 + $0x50] sm:$0xff]  ;;  %v172_v54 = vsel %vm138_vm0, %v167_v43, %v171_v47 }
  0x19   :  { %1881 = vmatpush3.bf16.msra.mxu1 %v2087_v23  ;;  %1818 = vmatprep.subr.bf16.mxu0 %v2088_v24  ;;  %v2372_v23 = vld [vmem:[%s3352_s0 + $0x60] sm:$0xff]  ;;  %v157_v24 = vrot.slane %v2367_v22, 1  ;;  %v50_v36 = vpack.c.bf16 %v2367_v22, %v2320_v63  ;;  %v2515_v47 = vld [vmem:[%s3352_s0 + $0xd0] sm:$0xff] }
  0x1a   :  { %1882 = vmatprep.subr.bf16.mxu1 %v2089_v25  ;;  %v161_v25 = vrot.slane %v2372_v23, 1  ;;  %v713_v42 = vrot.slane %v2372_v23, 2 }
  0x1b   :  { %v158_v34 = vsel %vm138_vm0, %v153_v3, %v157_v24 }
  0x1c   :  { %1819 = vmatpush3.bf16.msra.mxu0 %v2090_v26  ;;  %v2104_v26 = vld [vmem:[%s3351_s1 + $0x168] sm:$0xff]   ;;  %v162_v35 = vsel %vm138_vm0, %v157_v24, %v161_v25  ;;  %v174_v24 = vrot.slane %v2457_v8, 1 }
  0x1d   :  { %1883 = vmatpush3.bf16.msra.mxu1 %v2091_v27  ;;  %1820 = vmatprep.subr.bf16.mxu0 %v2092_v28  ;;  %v2105_v27 = vld [vmem:[%s3351_s1 + $0x128] sm:$0xff]   ;;  %v160_v28 = vsel %vm138_vm0, %v155_v1, %v159_v19 }
  0x1e   :  { %1884 = vmatprep.subr.bf16.mxu1 %v2093_v29  ;;  %v164_v29 = vsel %vm138_vm0, %v159_v19, %v163_v20  ;;  %v2436_v1 = vld [vmem:[%s3352_s0 + $0xa8] sm:$0xff]  ;;  %v2473_v20 = vld [vmem:[%s3352_s0 + $0xb0] sm:$0xff] }
  0x1f   :  { %v177_v5 = vrot.slane %v2436_v1, 1  ;;  %v55_v19 = vpack.c.bf16 %v2436_v1, %v31_v7  ;;  %v675_v7 = vld [vmem:[%s3352_s0 + $0x8] sm:$0xfc] }
  0x20   :  { %1821 = vmatpush3.bf16.msra.mxu0 %v2094_v30  ;;  %v244_v30 = vpack.c.bf16 %v164_v29, %v160_v28  ;;  %v30_v28 = vld [vmem:[%s3352_s0 + $0x90] sm:$0xff]  ;;  %v2113_v29 = vld [vmem:[%s3351_s1 + $0x118] sm:$0xff]  }
  0x21   :  { %1885 = vmatpush3.bf16.msra.mxu1 %v2095_v31  ;;  %1934 = vmatprep.subr.bf16.mxu0 %v2096_v46  ;;  %v2106_v31 = vld [vmem:[%s3351_s1 + $0x1e8] sm:$0xff]   ;;  %v96_v46 = vld [vmem:[%s3352_s0 + $0x80] sm:$0x1] }
  0x22   :  { %1998 = vmatprep.subr.bf16.mxu1 %v2098_v55  ;;  %v169_v49 = vrot.slane %v96_v46, 1  ;;  %v2109_v55 = vld [vmem:[%s3351_s1 + $0x120] sm:$0xff]  }
  0x23   :  { %417 = vmatmul.mubr.bf16.vlgmr.msra.gmra.mxu0 %v239_v56  ;;  %v705_v56 = vrot.slane %v2320_v63, 2  ;;  %v2510_v46 = vld [vmem:[%s3352_s0 + $0xc0] sm:$0xff] }
  0x24   :  { %610 = vmatmul.mubr.bf16.vlgmr.msra.gmra.mxu1 %v46_v50  ;;  %1935 = vmatpush3.bf16.msra.mxu0 %v2097_v51  ;;  %v2108_v50 = vld [vmem:[%s3351_s1 + $0x160] sm:$0xff]   ;;  %v243_v51 = vpack.c.bf16 %v162_v35, %v158_v34  ;;  %v170_v11 = vsel %vm138_vm0, %v165_v48, %v169_v49  ;;  %v2114_v34 = vld [vmem:[%s3351_s1 + $0x1d8] sm:$0xff]   ;;  %v2117_v49 = vld [vmem:[%s3351_s1 + $0x110] sm:$0xff]  }
  0x25   :  { %1999 = vmatpush3.bf16.msra.mxu1 %v2099_v57  ;;  %617 = vmatprep.mubr.bf16.mxu1 %v49_v61  ;;  %v246_v57 = vpack.c.bf16 %v172_v54, %v168_v52  ;;  %v2111_v61 = vld [vmem:[%s3351_s1 + $0x1a0] sm:$0xff]   ;;  %v2444_v3 = vsel %vm690_vm1, %v701_v41, %v705_v56  ;;  %v2115_v35 = vld [vmem:[%s3351_s1 + $0x198] sm:$0xff]   ;;  %v709_v41 = vrot.slane %v2367_v22, 2  ;;  %v54_v52 = vpack.c.bf16 %v2457_v8, %v30_v28 }
  0x26   :  { %1936 = vmatprep.subr.bf16.mxu0 %v2100_v4  ;;  %424 = vmatprep.mubr.bf16.mxu0 %v242_v12  ;;  %v99_v4 = vld [vmem:[%s3352_s0 + $0x98] sm:$0xfe]  ;;  %v52_v12 = vpack.c.bf16 %v2409_v45, %v2372_v23  ;;  %v3361_v28 = vrot.slane %v2248_v32, 3 }
  0x27   :  { %2000 = vmatprep.subr.bf16.mxu1 %v2102_v13  ;;  %v176_v13 = vrot.slane %v99_v4, 1  ;;  %v2527_v54 = vsel %vm690_vm1, %v705_v56, %v709_v41  ;;  %v2539_v4 = vsel %vm690_vm1, %v709_v41, %v713_v42  ;;  %v2119_v56 = vld [vmem:[%s3351_s1 + $0x190] sm:$0xff]  }
  0x28   :  { %1937 = vmatpush3.bf16.msra.mxu0 %v2101_v10  ;;  %v166_v10 = vsel %vm138_vm0, %v161_v25, %v165_v48  ;;  %v2112_v25 = vld [vmem:[%s3351_s1 + $0x158] sm:$0xff]   ;;  %v2116_v48 = vld [vmem:[%s3351_s1 + $0x150] sm:$0xff]  }
  0x29   :  { %2001 = vmatpush3.bf16.msra.mxu1 %v2103_v15  ;;  %1938 = vmatprep.subr.bf16.mxu0 %v2104_v26  ;;  %v245_v26 = vpack.c.bf16 %v170_v11, %v166_v10  ;;  %v183_v11 = vrot.slane %v2510_v46, 1 }
  0x2a   :  { %2002 = vmatprep.subr.bf16.mxu1 %v2106_v31  ;;  %v179_v31 = vrot.slane %v2473_v20, 1 }
  0x2b   :  { %425 = vmatmul.mubr.bf16.gmra.mxu0 %v241_v14  ;;  %v98_v14 = vld [vmem:[%s3352_s0 + $0x90] sm:$0xfe] }
  0x2c   :  { %618 = vmatmul.mubr.bf16.gmra.mxu1 %v48_v6  ;;  %432 = vmatprep.mubr.bf16.mxu0 %v244_v30  ;;  %v181_v6 = vrot.slane %v2441_v2, 1 }
  0x2d   :  { %625 = vmatprep.mubr.bf16.mxu1 %v51_v21  ;;  %1939 = vmatpush3.bf16.msra.mxu0 %v2105_v27  ;;  %v178_v21 = vsel %vm138_vm0, %v176_v13, %v177_v5  ;;  %v173_v27 = vrot.slane %v98_v14, 1  ;;  %v2557_v13 = vld [vmem:[%s3352_s0 + $0xf8] sm:$0xff]  ;;  %v3357_v14 = vrot.slane %v2253_v33, 2 }
  0x2e   :  { %2003 = vmatpush3.bf16.msra.mxu1 %v2107_v37  ;;  %1940 = vmatprep.subr.bf16.mxu0 %v2108_v50  ;;  %v182_v15 = vsel %vm138_vm0, %v177_v5, %v181_v6  ;;  %v2501_v37 = vld [vmem:[%s3352_s0 + $0xd8] sm:$0xff]  ;;  %v2547_v5 = vld [vmem:[%s3352_s0 + $0xe8] sm:$0xff] }
  0x2f   :  { %2004 = vmatprep.subr.bf16.mxu1 %v2110_v60  ;;  %v248_v30 = vpack.c.bf16 %v182_v15, %v178_v21  ;;  %v175_v50 = vsel %vm138_vm0, %v173_v27, %v174_v24  ;;  %v197_v21 = vrot.slane %v2557_v13, 1  ;;  %v2121_v27 = vld [vmem:[%s3351_s1 + $0x108] sm:$0xff]  }
  0x31   :  { %1941 = vmatpush3.bf16.msra.mxu0 %v2109_v55 }
  0x32   :  { %2005 = vmatpush3.bf16.msra.mxu1 %v2111_v61  ;;  %1942 = vmatprep.subr.bf16.mxu0 %v2112_v25  ;;  %v2118_v61 = vld [vmem:[%s3351_s1 + $0x1d0] sm:$0xff]   ;;  %v2120_v25 = vld [vmem:[%s3351_s1 + $0x148] sm:$0xff]  }
  0x33   :  { %433 = vmatmul.mubr.bf16.gmra.mxu0 %v243_v51  ;;  %2006 = vmatprep.subr.bf16.mxu1 %v2114_v34  ;;  %v180_v51 = vsel %vm138_vm0, %v174_v24, %v179_v31  ;;  %v2565_v24 = vld [vmem:[%s3352_s0 + $0xe0] sm:$0xff]  ;;  %v3355_v34 = vrot.slane %v2253_v33, 3 }
  0x34   :  { %626 = vmatmul.mubr.bf16.gmra.mxu1 %v50_v36  ;;  %440 = vmatprep.mubr.bf16.mxu0 %v246_v57  ;;  %v2496_v36 = vld [vmem:[%s3352_s0 + $0xc8] sm:$0xff]  ;;  %v247_v10 = vpack.c.bf16 %v180_v51, %v175_v50  ;;  %v3362_v50 = vrot.slane %v2409_v45, 2 }
  0x35   :  { %633 = vmatprep.mubr.bf16.mxu1 %v53_v44  ;;  %1943 = vmatpush3.bf16.msra.mxu0 %v2113_v29  ;;  %v185_v43 = vrot.slane %v2496_v36, 1  ;;  %v189_v44 = vrot.slane %v2501_v37, 1  ;;  %v57_v60 = vpack.c.bf16 %v2496_v36, %v2441_v2  ;;  %v56_v29 = vpack.c.bf16 %v2510_v46, %v2473_v20 }
  0x36   :  { %2007 = vmatpush3.bf16.msra.mxu1 %v2115_v35  ;;  %1944 = vmatprep.subr.bf16.mxu0 %v2116_v48  ;;  %v184_v35 = vsel %vm138_vm0, %v179_v31, %v183_v11  ;;  %v2123_v48 = vld [vmem:[%s3351_s1 + $0x188] sm:$0xff]  }
  0x37   :  { %v186_v55 = vsel %vm138_vm0, %v181_v6, %v185_v43  ;;  %v190_v57 = vsel %vm138_vm0, %v185_v43, %v189_v44  ;;  %v3359_v6 = vrot.slane %v2248_v32, 2  ;;  %2008 = vmatprep.subr.bf16.mxu1 %v2118_v61  ;;  %v59_v43 = vpack.c.bf16 %v2547_v5, %v2501_v37 }
  0x38   :  { %v250_v15 = vpack.c.bf16 %v190_v57, %v186_v55  ;;  %v101_v55 = vld [vmem:[%s3352_s0 + $0x118] sm:$0x1]  ;;  %v2124_v57 = vld [vmem:[%s3351_s1 + $0x140] sm:$0xff]  }
  0x39   :  { %1945 = vmatpush3.bf16.msra.mxu0 %v2117_v49  ;;  %v2595_v49 = vld [vmem:[%s3352_s0 + $0x108] sm:$0xff] }
  0x3a   :  { %2009 = vmatpush3.bf16.msra.mxu1 %v2119_v56  ;;  %1946 = vmatprep.subr.bf16.mxu0 %v2120_v25  ;;  %v2617_v56 = vsel %vm690_vm1, %v713_v42, %v3362_v50  ;;  %v2126_v25 = vld [vmem:[%s3351_s1 + $0x1c0] sm:$0xff]   ;;  %v3363_v50 = vrot.slane %v2271_v40, 3 }
  0x3b   :  { %441 = vmatmul.mubr.bf16.gmra.mxu0 %v245_v26  ;;  %v2573_v26 = vld [vmem:[%s3352_s0 + $0xf0] sm:$0xff]  ;;  %v2127_v42 = vld [vmem:[%s3351_s1 + $0x180] sm:$0xff]  }
  0x3c   :  { %634 = vmatmul.mubr.bf16.gmra.mxu1 %v52_v12  ;;  %448 = vmatprep.mubr.bf16.mxu0 %v248_v30  ;;  %v187_v12 = vrot.slane %v2515_v47, 1  ;;  %v2122_v30 = vld [vmem:[%s3351_s1 + $0x1c8] sm:$0xff]   ;;  %v3360_v61 = vrot.slane %v2573_v26, 1 }
  0x3d   :  { %641 = vmatprep.mubr.bf16.mxu1 %v55_v19  ;;  %v193_v19 = vrot.slane %v2547_v5, 1  ;;  %1947 = vmatpush3.bf16.msra.mxu0 %v2121_v27  ;;  %v3358_v27 = vrot.slane %v2441_v2, 2 }
  0x3e   :  { %v188_v41 = vsel %vm138_vm0, %v183_v11, %v187_v12  ;;  %2010 = vmatprep.subr.bf16.mxu1 %v2122_v30  ;;  %1948 = vmatprep.subr.bf16.mxu0 %v2124_v57  ;;  %v2125_v11 = vld [vmem:[%s3351_s1 + $0x100] sm:$0xff]   ;;  %v205_v30 = vrot.slane %v101_v55, 1 }
  0x3f   :  { %v194_v51 = vsel %vm138_vm0, %v189_v44, %v193_v19  ;;  %v198_v31 = vsel %vm138_vm0, %v193_v19, %v197_v21  ;;  %2011 = vmatpush3.bf16.msra.mxu1 %v2123_v48  ;;  %v201_v44 = vrot.slane %v2595_v49, 1  ;;  %v2660_v57 = vld [vmem:[%s3352_s0 + $0x100] sm:$0xff] }
  0x40   :  { %v252_v19 = vpack.c.bf16 %v198_v31, %v194_v51  ;;  %2012 = vmatprep.subr.bf16.mxu1 %v2126_v25  ;;  %v2648_v51 = vsel %vm690_vm1, %v3359_v6, %v3357_v14  ;;  %v1050_v31 = vld [vmem:[%s3352_s0 + $0x8] sm:$0xf8] }
  0x41   :  { %1949 = vmatpush3.bf16.msra.mxu0 %v2125_v11  ;;  %v1075_v11 = vsel %vm1065_vm2, %v3361_v28, %v3355_v34  ;;  %v1049_v28 = vld [vmem:[%s3352_s0] sm:$0xf8] }
  0x43   :  { %449 = vmatmul.mubr.bf16.gmra.mxu0 %v247_v10  ;;  %v249_v10 = vpack.c.bf16 %v188_v41, %v184_v35  ;;  %v674_v35 = vld [vmem:[%s3352_s0] sm:$0xfc]  ;;  %2013 = vmatpush3.bf16.msra.mxu1 %v2127_v42  ;;  %v202_v42 = vsel %vm138_vm0, %v197_v21, %v201_v44 }
  0x44   :  { %642 = vmatmul.mubr.bf16.gmra.mxu1 %v54_v52  ;;  %456 = vmatprep.mubr.bf16.mxu0 %v250_v15  ;;  %v191_v52 = vrot.slane %v2565_v24, 1  ;;  %v729_v15 = vrot.slane %v2436_v1, 2  ;;  %v691_v55 = vrot.slane %v674_v35, 2  ;;  %v206_v35 = vsel %vm138_vm0, %v201_v44, %v205_v30  ;;  %v679_v30 = vld [vmem:[%s3352_s0 + $0x98] sm:$0xfc] }
  0x45   :  { %649 = vmatprep.mubr.bf16.mxu1 %v57_v60  ;;  %v719_v60 = vrot.slane %v2397_v38, 2  ;;  %v1067_v44 = vrot.slane %v2266_v39, 3  ;;  %v728_v6 = vrot.slane %v679_v30, 2  ;;  %v1082_v30 = vrot.slane %v2307_v59, 3 }
  0x46   :  { %v2637_v41 = vsel %vm690_vm1, %v729_v15, %v3358_v27  ;;  %v196_v48 = vsel %vm138_vm0, %v191_v52, %v3360_v61  ;;  %v2688_v9 = vsel %vm690_vm1, %v691_v55, %v692_v0  ;;  %v1069_v27 = vrot.slane %v1050_v31, 3  ;;  %v678_v0 = vld [vmem:[%s3352_s0 + $0x90] sm:$0xfc] }
  0x47   :  { %v199_v55 = vrot.slane %v2660_v57, 1  ;;  %v254_v31 = vpack.c.bf16 %v206_v35, %v202_v42  ;;  %v694_v61 = vrot.slane %v675_v7, 2  ;;  %v703_v42 = vrot.slane %v2302_v58, 2 }
  0x48   :  { %v60_v35 = vpack.c.bf16 %v2660_v57, %v2573_v26 }
  0x4b   :  { %457 = vmatmul.mubr.bf16.gmra.mxu0 %v249_v10  ;;  %v100_v10 = vld [vmem:[%s3352_s0 + $0x110] sm:$0x1] }
  0x4c   :  { %650 = vmatmul.mubr.bf16.gmra.mxu1 %v56_v29  ;;  %v3356_v29 = vrot.slane %v2353_v17, 2  ;;  %464 = vmatprep.mubr.bf16.mxu0 %v252_v19  ;;  %v677_v19 = vld [vmem:[%s3352_s0 + $0x88] sm:$0x3]  ;;  %v203_v21 = vrot.slane %v100_v10, 1 }
  0x4d   :  { %657 = vmatprep.mubr.bf16.mxu1 %v59_v43  ;;  %v192_v43 = vsel %vm138_vm0, %v187_v12, %v191_v52  ;;  %v58_v12 = vpack.c.bf16 %v2565_v24, %v2515_v47  ;;  %v61_v52 = vpack.c.bf16 %v2595_v49, %v2557_v13  ;;  %v723_v34 = vrot.slane %v677_v19, 2 }
  0x4e   :  { %v2676_v25 = vsel %vm690_vm1, %v3356_v29, %v719_v60  ;;  %v676_v29 = vld [vmem:[%s3352_s0 + $0x80] sm:$0x3]  ;;  %v251_v14 = vpack.c.bf16 %v196_v48, %v192_v43  ;;  %v726_v48 = vrot.slane %v2457_v8, 2 }
  0x4f   :  { %v2704_v19 = vsel %vm690_vm1, %v719_v60, %v723_v34  ;;  %v721_v43 = vrot.slane %v676_v29, 2  ;;  %v3365_v34 = vrot.slane %v2409_v45, 2  ;;  %v725_v29 = vrot.slane %v678_v0, 2 }
  0x50   :  { %v737_v0 = vrot.slane %v2496_v36, 2 }
  0x51   :  { %v2716_v60 = vsel %vm690_vm1, %v3365_v34, %v721_v43  ;;  %v2733_v43 = vsel %vm690_vm1, %v725_v29, %v726_v48  ;;  %v741_v29 = vrot.slane %v2501_v37, 2 }
  0x53   :  { %465 = vmatmul.mubr.bf16.gmra.mxu0 %v251_v14  ;;  %v731_v14 = vrot.slane %v2473_v20, 2 }
  0x54   :  { %658 = vmatmul.mubr.bf16.gmra.mxu1 %v58_v12  ;;  %v3366_v12 = vrot.slane %v2248_v32, 3  ;;  %472 = vmatprep.mubr.bf16.mxu0 %v254_v31  ;;  %v1078_v31 = vrot.slane %v2302_v58, 3 }
  0x55   :  { %665 = vmatprep.mubr.bf16.mxu1 %v61_v52  ;;  %v2725_v52 = vsel %vm690_vm1, %v728_v6, %v729_v15  ;;  %v204_v6 = vsel %vm138_vm0, %v199_v55, %v203_v21  ;;  %v1066_v15 = vrot.slane %v1049_v28, 3  ;;  %v735_v28 = vrot.slane %v2510_v46, 2 }
  0x56   :  { %v1071_v10 = vsel %vm1065_vm2, %v1069_v27, %v3366_v12  ;;  %v3367_v27 = vrot.slane %v2573_v26, 1  ;;  %v3368_v12 = vrot.slane %v2248_v32, 2 }
  0x57   :  { %v1167_v39 = vpack.c.bf16 %v1075_v11, %v1071_v10  ;;  %v745_v10 = vrot.slane %v2547_v5, 2 }
  0x58   :  { %v200_v34 = vsel %vm138_vm0, %v3367_v27, %v199_v55  ;;  %v696_v7 = vsel %vm690_vm1, %v694_v61, %v3368_v12  ;;  %v2748_v27 = vsel %vm690_vm1, %v726_v48, %v731_v14  ;;  %v3369_v61 = vrot.slane %v2441_v2, 2 }
  0x59   :  { %v253_v21 = vpack.c.bf16 %v204_v6, %v200_v34  ;;  %v2759_v55 = vsel %vm690_vm1, %v737_v0, %v741_v29  ;;  %v792_v58 = vpack.c.bf16 %v2648_v51, %v696_v7  ;;  %v1073_v48 = vsel %vm1065_vm2, %v1067_v44, %v3363_v50 }
  0x5a   :  { %v2756_v11 = vsel %vm690_vm1, %v3369_v61, %v737_v0  ;;  %v1068_v34 = vsel %vm1065_vm2, %v1066_v15, %v1067_v44  ;;  %v3370_v6 = vrot.slane %v2253_v33, 2  ;;  %v2772_v0 = vsel %vm690_vm1, %v731_v14, %v735_v28 }
  0x5b   :  { %v3371_v51 = vrot.slane %v2253_v33, 3  ;;  %v1083_v61 = vsel %vm1065_vm2, %v1078_v31, %v1082_v30  ;;  %473 = vmatmul.mubr.bf16.gmra.mxu0 %v253_v21  ;;  %v3372_v44 = vrot.slane %v2307_v59, 2  ;;  %v1076_v14 = vrot.slane %v2315_v62, 3  ;;  %v681_v62 = vld [vmem:[%s3352_s0 + $0x118] sm:$0x3] }
  0x5c   :  { %666 = vmatmul.mubr.bf16.gmra.mxu1 %v60_v35  ;;  %v704_v12 = vsel %vm690_vm1, %v3370_v6, %v703_v42  ;;  %v739_v35 = vrot.slane %v2515_v47, 2  ;;  %v743_v33 = vrot.slane %v2565_v24, 2  ;;  %968 = vmatprep.mubr.bf16.mxu0 %v792_v58  ;;  %v2792_v32 = vsel %vm690_vm1, %v741_v29, %v745_v10 }
  0x5d   :  { %1343 = vmatprep.mubr.bf16.mxu1 %v1167_v39  ;;  %v1079_v7 = vsel %vm1065_vm2, %v3371_v51, %v1078_v31  ;;  %v749_v39 = vrot.slane %v2557_v13, 2  ;;  %v708_v15 = vsel %vm690_vm1, %v703_v42, %v3372_v44  ;;  %v1166_v51 = vpack.c.bf16 %v1073_v48, %v1068_v34  ;;  %3373 = vst [vmem:[#allocation2_spill] sm:$0xff] %v2792_v32 }
  0x5e   :  { %v2786_v6 = vsel %vm690_vm1, %v735_v28, %v739_v35  ;;  %v1169_v42 = vpack.c.bf16 %v1083_v61, %v1079_v7  ;;  %v1080_v28 = vrot.slane %v2320_v63, 3  ;;  %v1086_v48 = vrot.slane %v2348_v16, 3 }
  0x5f   :  { %v2795_v21 = vsel %vm690_vm1, %v745_v10, %v749_v39  ;;  %v1090_v34 = vrot.slane %v2353_v17, 3  ;;  %v2806_v29 = vsel %vm690_vm1, %v739_v35, %v743_v33  ;;  %v747_v10 = vrot.slane %v2573_v26, 2  ;;  %v680_v35 = vld [vmem:[%s3352_s0 + $0x110] sm:$0x3] }
  0x60   :  { %v794_v44 = vpack.c.bf16 %v708_v15, %v704_v12  ;;  %v753_v31 = vrot.slane %v2595_v49, 2  ;;  %v757_v50 = vrot.slane %v681_v62, 2  ;;  %v3374_v7 = vrot.slane %v2271_v40, 3 }
  0x61   :  { %v711_v61 = vrot.slane %v2348_v16, 2  ;;  %v2815_v58 = vsel %vm690_vm1, %v743_v33, %v747_v10  ;;  %v751_v32 = vrot.slane %v2660_v57, 2  ;;  %v1081_v12 = vsel %vm1065_vm2, %v1076_v14, %v1080_v28 }
  0x62   :  { %v1077_v63 = vsel %vm1065_vm2, %v3374_v7, %v1076_v14  ;;  %v2825_v40 = vsel %vm690_vm1, %v749_v39, %v753_v31  ;;  %v2828_v16 = vsel %vm690_vm1, %v753_v31, %v757_v50  ;;  %v1087_v33 = vsel %vm1065_vm2, %v1082_v30, %v1086_v48  ;;  %v1052_v14 = vld [vmem:[%s3352_s0 + $0x88] sm:$0x7] }
  0x63   :  { %v2841_v39 = vsel %vm690_vm1, %v747_v10, %v751_v32  ;;  %v755_v50 = vrot.slane %v680_v35, 2  ;;  %v1168_v31 = vpack.c.bf16 %v1081_v12, %v1077_v63  ;;  %v3376_v30 = vrot.slane %v2307_v59, 2  ;;  %v1054_v35 = vld [vmem:[%s3352_s0 + $0x98] sm:$0xf8] }
  0x64   :  { %1344 = vmatmul.mubr.bf16.vlgmr.msra.gmra.mxu1 %v1166_v51  ;;  %v1091_v51 = vsel %vm1065_vm2, %v1086_v48, %v1090_v34  ;;  %v3377_v7 = vrot.slane %v2353_v17, 2  ;;  %v1094_v10 = vrot.slane %v2397_v38, 3  ;;  %v3378_v38 = vpack.c.bf16 %v2444_v3, %v2420_v53 }
  0x65   :  { %1351 = vmatprep.mubr.bf16.mxu1 %v1169_v42  ;;  %v3375_v42 = vpack.c.bf16 %v2358_v18, %v2688_v9  ;;  %v712_v48 = vsel %vm690_vm1, %v3376_v30, %v711_v61  ;;  %v1171_v18 = vpack.c.bf16 %v1091_v51, %v1087_v33  ;;  %v1084_v9 = vrot.slane %v2367_v22, 3 }
  0x66   :  { %v716_v62 = vsel %vm690_vm1, %v711_v61, %v3377_v7  ;;  %v2852_v15 = vsel %vm690_vm1, %v751_v32, %v755_v50  ;;  %v1095_v22 = vsel %vm1065_vm2, %v1090_v34, %v1094_v10  ;;  %v1051_v32 = vld [vmem:[%s3352_s0 + $0x80] sm:$0x7]  ;;  %v1092_v33 = vrot.slane %v2409_v45, 3  ;;  %v1053_v45 = vld [vmem:[%s3352_s0 + $0x90] sm:$0xf8] }
  0x67   :  { %969 = vmatmul.mubr.bf16.vlgmr.msra.gmra.mxu0 %v3375_v42  ;;  %v1088_v42 = vrot.slane %v2372_v23, 3  ;;  %v805_v59 = vpack.c.bf16 %v2852_v15, %v2841_v39  ;;  %v796_v63 = vpack.c.bf16 %v716_v62, %v712_v48  ;;  %v1085_v17 = vsel %vm1065_vm2, %v1080_v28, %v1084_v9 }
  0x68   :  { %976 = vmatprep.mubr.bf16.mxu0 %v794_v44  ;;  %v1098_v44 = vrot.slane %v1052_v14, 3  ;;  %v1096_v34 = vrot.slane %v1051_v32, 3  ;;  %v1103_v51 = vrot.slane %v1054_v35, 3  ;;  %v1104_v62 = vrot.slane %v2436_v1, 3 }
  0x69   :  { %v1089_v61 = vsel %vm1065_vm2, %v1084_v9, %v1088_v42  ;;  %v1108_v14 = vrot.slane %v2441_v2, 3  ;;  %v1093_v53 = vsel %vm1065_vm2, %v1088_v42, %v1092_v33  ;;  %v3379_v30 = vpack.c.bf16 %v2539_v4, %v2527_v54 }
  0x6a   :  { %v1099_v23 = vsel %vm1065_vm2, %v1094_v10, %v1098_v44  ;;  %v1170_v28 = vpack.c.bf16 %v1089_v61, %v1085_v17  ;;  %v1097_v3 = vsel %vm1065_vm2, %v1092_v33, %v1096_v34  ;;  %v1105_v50 = vsel %vm1065_vm2, %v1103_v51, %v1104_v62 }
  0x6b   :  { %v1173_v12 = vpack.c.bf16 %v1099_v23, %v1095_v22  ;;  %v3380_v1 = vpack.c.bf16 %v2704_v19, %v2676_v25  ;;  %v1172_v2 = vpack.c.bf16 %v1097_v3, %v1093_v53  ;;  %v1100_v7 = vrot.slane %v1053_v45, 3 }
  0x6c   :  { %1352 = vmatmul.mubr.bf16.gmra.mxu1 %v1168_v31  ;;  %v1109_v31 = vsel %vm1065_vm2, %v1104_v62, %v1108_v14  ;;  %v1106_v9 = vrot.slane %v2473_v20, 3  ;;  %v1112_v42 = vrot.slane %v2496_v36, 3  ;;  %v1116_v10 = vrot.slane %v2501_v37, 3 }
  0x6d   :  { %1359 = vmatprep.mubr.bf16.mxu1 %v1171_v18  ;;  %v1175_v48 = vpack.c.bf16 %v1109_v31, %v1105_v50  ;;  %v1101_v18 = vrot.slane %v2457_v8, 3  ;;  %v3381_v44 = vpack.c.bf16 %v2716_v60, %v2617_v56  ;;  %v3382_v8 = vpack.c.bf16 %v2637_v41, %v2725_v52 }
  0x6e   :  { %v1113_v25 = vsel %vm1065_vm2, %v1108_v14, %v1112_v42  ;;  %v1117_v19 = vsel %vm1065_vm2, %v1112_v42, %v1116_v10  ;;  %v1110_v37 = vrot.slane %v2510_v46, 3  ;;  %v1120_v17 = vrot.slane %v2547_v5, 3  ;;  %v1056_v46 = vld [vmem:[%s3352_s0 + $0x118] sm:$0x7] }
  0x6f   :  { %977 = vmatmul.mubr.bf16.gmra.mxu0 %v3378_v38  ;;  %v1102_v54 = vsel %vm1065_vm2, %v1100_v7, %v1101_v18  ;;  %v1107_v4 = vsel %vm1065_vm2, %v1101_v18, %v1106_v9  ;;  %v1177_v36 = vpack.c.bf16 %v1117_v19, %v1113_v25  ;;  %v1124_v61 = vrot.slane %v2557_v13, 3 }
  0x70   :  { %984 = vmatprep.mubr.bf16.mxu0 %v796_v63  ;;  %v1174_v20 = vpack.c.bf16 %v1107_v4, %v1102_v54  ;;  %v1114_v63 = vrot.slane %v2515_v47, 3  ;;  %v1111_v22 = vsel %vm1065_vm2, %v1106_v9, %v1110_v37  ;;  %v1121_v60 = vsel %vm1065_vm2, %v1116_v10, %v1120_v17 }
  0x71   :  { %v1125_v41 = vsel %vm1065_vm2, %v1120_v17, %v1124_v61  ;;  %v3383_v52 = vpack.c.bf16 %v2748_v27, %v2733_v43  ;;  %v3384_v47 = vpack.c.bf16 %v2759_v55, %v2756_v11  ;;  %v1118_v23 = vrot.slane %v2565_v24, 3  ;;  %v1055_v55 = vld [vmem:[%s3352_s0 + $0x110] sm:$0x7] }
  0x72   :  { %v1115_v56 = vsel %vm1065_vm2, %v1110_v37, %v1114_v63  ;;  %v1179_v13 = vpack.c.bf16 %v1125_v41, %v1121_v60  ;;  %v1122_v32 = vrot.slane %v2573_v26, 3  ;;  %v1128_v38 = vrot.slane %v2595_v49, 3  ;;  %v3386_v26 = vld [vmem:[#allocation2_spill] sm:$0xff] }
  0x73   :  { %v1176_v5 = vpack.c.bf16 %v1115_v56, %v1111_v22  ;;  %v1132_v35 = vrot.slane %v1056_v46, 3  ;;  %v1119_v43 = vsel %vm1065_vm2, %v1114_v63, %v1118_v23  ;;  %v3385_v24 = vpack.c.bf16 %v2786_v6, %v2772_v0 }
  0x74   :  { %1360 = vmatmul.mubr.bf16.gmra.mxu1 %v1170_v28  ;;  %v1123_v27 = vsel %vm1065_vm2, %v1118_v23, %v1122_v32  ;;  %v1129_v28 = vsel %vm1065_vm2, %v1124_v61, %v1128_v38  ;;  %v3387_v49 = vpack.c.bf16 %v2795_v21, %v3386_v26  ;;  %v1126_v34 = vrot.slane %v2660_v57, 3 }
  0x75   :  { %1367 = vmatprep.mubr.bf16.mxu1 %v1173_v12  ;;  %v1133_v11 = vsel %vm1065_vm2, %v1128_v38, %v1132_v35  ;;  %v1178_v12 = vpack.c.bf16 %v1123_v27, %v1119_v43  ;;  %v1130_v51 = vrot.slane %v1055_v55, 3  ;;  %v3388_v53 = vpack.c.bf16 %v2815_v58, %v2806_v29 }
  0x76   :  { %v1181_v33 = vpack.c.bf16 %v1133_v11, %v1129_v28  ;;  %v1127_v62 = vsel %vm1065_vm2, %v1122_v32, %v1126_v34  ;;  %v3389_v0 = vpack.c.bf16 %v2828_v16, %v2825_v40 }
  0x77   :  { %985 = vmatmul.mubr.bf16.gmra.mxu0 %v3379_v30  ;;  %v1131_v14 = vsel %vm1065_vm2, %v1126_v34, %v1130_v51 }
  0x78   :  { %992 = vmatprep.mubr.bf16.mxu0 %v3380_v1  ;;  %v1180_v6 = vpack.c.bf16 %v1131_v14, %v1127_v62 }
  0x7c   :  { %1368 = vmatmul.mubr.bf16.gmra.mxu1 %v1172_v2 }
  0x7d   :  { %1375 = vmatprep.mubr.bf16.mxu1 %v1175_v48 }
  0x7f   :  { %993 = vmatmul.mubr.bf16.gmra.mxu0 %v3381_v44 }
  0x80   :  { %1000 = vmatprep.mubr.bf16.mxu0 %v3382_v8 }
  0x84   :  { %1376 = vmatmul.mubr.bf16.gmra.mxu1 %v1174_v20 }
  0x85   :  { %1383 = vmatprep.mubr.bf16.mxu1 %v1177_v36 }
  0x87   :  { %1001 = vmatmul.mubr.bf16.gmra.mxu0 %v3383_v52 }
  0x88   :  { %1008 = vmatprep.mubr.bf16.mxu0 %v3384_v47 }
  0x8c   :  { %1384 = vmatmul.mubr.bf16.gmra.mxu1 %v1176_v5 }
  0x8d   :  { %1391 = vmatprep.mubr.bf16.mxu1 %v1179_v13 }
  0x8f   :  { %1009 = vmatmul.mubr.bf16.gmra.mxu0 %v3385_v24 }
  0x90   :  { %1016 = vmatprep.mubr.bf16.mxu0 %v3387_v49 }
  0x94   :  { %1392 = vmatmul.mubr.bf16.gmra.mxu1 %v1178_v12 }
  0x95   :  { %1399 = vmatprep.mubr.bf16.mxu1 %v1181_v33 }
  0x97   :  { %1017 = vmatmul.mubr.bf16.gmra.mxu0 %v3388_v53 }
  0x98   :  { %1024 = vmatprep.mubr.bf16.mxu0 %v3389_v0 }
  0x9c   :  { %1400 = vmatmul.mubr.bf16.gmra.mxu1 %v1180_v6 }
  0x9f   :  { %1025 = vmatmul.mubr.bf16.gmra.mxu0 %v805_v59 }
  0xe3   :  { %v2949_v3 = vpop.f32.mrf.mxu0 }
  0xe4   :  { %v2945_v57 = vpop.f32.mrf.mxu1 }
  0xe5   :  { %v1823_v58 = vpop.f32.mrf.mxu0 }
  0xe6   :  { %v2947_v21 = vpop.f32.mrf.mxu1 }
  0xe7   :  { %v2955_v31 = vpop.f32.mrf.mxu0 }
  0xe8   :  { %v2951_v50 = vpop.f32.mrf.mxu1 }
  0xe9   :  { %v2959_v16 = vpop.f32.mrf.mxu0 }
  0xea   :  { %v2953_v29 = vpop.f32.mrf.mxu1 }
  0xeb   :  { %v2963_v15 = vpop.f32.mrf.mxu0 }
  0xec   :  { %v2957_v40 = vpop.f32.mrf.mxu1 }
  0xed   :  { %v2967_v59 = vpop.f32.mrf.mxu0 }
  0xee   :  { %v2961_v45 = vpop.f32.mrf.mxu1 }
  0xef   :  { %v2971_v1 = vpop.f32.mrf.mxu0 }
  0xf0   :  { %v2965_v39 = vpop.f32.mrf.mxu1 }
  0xf1   :  { %v2975_v48 = vpop.f32.mrf.mxu0 }
  0xf2   :  { %v2969_v30 = vpop.f32.mrf.mxu1 }
  0xf3   :  { %v2979_v18 = vpop.f32.mrf.mxu0 }
  0xf4   :  { %v2973_v2 = vpop.f32.mrf.mxu1 }
  0xf5   :  { %v2983_v42 = vpop.f32.mrf.mxu0 }
  0xf6   :  { %v2977_v7 = vpop.f32.mrf.mxu1 }
  0xf7   :  { %v2987_v54 = vpop.f32.mrf.mxu0 }
  0xf8   :  { %v2981_v9 = vpop.f32.mrf.mxu1 }
  0xf9   :  { %v2991_v25 = vpop.f32.mrf.mxu0 }
  0xfa   :  { %v2985_v10 = vpop.f32.mrf.mxu1 }
  0xfb   :  { %v2995_v44 = vpop.f32.mrf.mxu0 }
  0xfc   :  { %v2989_v4 = vpop.f32.mrf.mxu1 }
  0xfd   :  { %v2999_v20 = vpop.f32.mrf.mxu0 }
  0xfe   :  { %v2993_v19 = vpop.f32.mrf.mxu1 }
  0xff   :  { %v3003_v37 = vpop.f32.mrf.mxu0 }
 0x100   :  { %v2997_v8 = vpop.f32.mrf.mxu1 }
 0x101   :  { %v3007_v17 = vpop.f32.mrf.mxu0 }
 0x102   :  { %v3001_v36 = vpop.f32.mrf.mxu1 }
 0x103   :  { %v3011_v22 = vpop.f32.mrf.mxu0 }
 0x104   :  { %v3005_v63 = vpop.f32.mrf.mxu1 }
 0x105   :  { %v3015_v60 = vpop.f32.mrf.mxu0 }
 0x106   :  { %v3009_v61 = vpop.f32.mrf.mxu1 }
 0x107   :  { %v3019_v52 = vpop.f32.mrf.mxu0 }
 0x108   :  { %v3013_v56 = vpop.f32.mrf.mxu1 }
 0x109   :  { %v3023_v47 = vpop.f32.mrf.mxu0 }
 0x10a   :  { %v3017_v41 = vpop.f32.mrf.mxu1 }
 0x10b   :  { %v3027_v13 = vpop.f32.mrf.mxu0 }
 0x10c   :  { %v3021_v46 = vpop.f32.mrf.mxu1 }
 0x10d   :  { %v3031_v32 = vpop.f32.mrf.mxu0 }
 0x10e   :  { %v3025_v5 = vpop.f32.mrf.mxu1 }
 0x10f   :  { %v3035_v35 = vpop.f32.mrf.mxu0 }
 0x110   :  { %v3029_v23 = vpop.f32.mrf.mxu1 }
 0x111   :  { %v3039_v27 = vpop.f32.mrf.mxu0 }
 0x112   :  { %v3033_v38 = vpop.f32.mrf.mxu1 }
 0x113   :  { %v3043_v11 = vpop.f32.mrf.mxu0 }
 0x114   :  { %v3037_v43 = vpop.f32.mrf.mxu1  ;;  %3392 = vst [vmem:[#allocation4_spill] sm:$0xff] %v3043_v11 }
 0x115   :  { %3390 = vst [vmem:[#allocation2_spill] sm:$0xff] %v3037_v43  ;;  %v3047_v24 = vpop.f32.mrf.mxu0 }
 0x116   :  { %v3041_v28 = vpop.f32.mrf.mxu1  ;;  %3394 = vst [vmem:[#allocation6_spill] sm:$0xff] %v3047_v24 }
 0x117   :  { %3391 = vst [vmem:[#allocation3_spill] sm:$0xff] %v3041_v28  ;;  %v3051_v49 = vpop.f32.mrf.mxu0 }
 0x118   :  { %v3045_v55 = vpop.f32.mrf.mxu1  ;;  %3396 = vst [vmem:[#allocation8_spill] sm:$0xff] %v3051_v49  ;;  %v1824_v49 = vadd.f32 %v1823_v58, %v2949_v3 }
 0x119   :  { %3393 = vst [vmem:[#allocation5_spill] sm:$0xff] %v3045_v55  ;;  %v3055_v33 = vpop.f32.mrf.mxu0 }
 0x11a   :  { %v3049_v26 = vpop.f32.mrf.mxu1  ;;  %3398 = vst [vmem:[#allocation10_spill] sm:$0xff] %v3055_v33 }
 0x11b   :  { %3395 = vst [vmem:[#allocation7_spill] sm:$0xff] %v3049_v26  ;;  %v3059_v51 = vpop.f32.mrf.mxu0 }
 0x11c   :  { %v3053_v12 = vpop.f32.mrf.mxu1  ;;  %3400 = vst [vmem:[#allocation12_spill] sm:$0xff] %v3059_v51 }
 0x11d   :  { %3397 = vst [vmem:[#allocation9_spill] sm:$0xff] %v3053_v12  ;;  %v3063_v14 = vpop.f32.mrf.mxu0  ;;  %v1888_v12 = vadd.f32 %v2947_v21, %v2945_v57  ;;  %v1894_v57 = vadd.f32 %v2961_v45, %v2957_v40  ;;  %v1897_v45 = vadd.f32 %v2969_v30, %v2965_v39  ;;  %v1900_v30 = vadd.f32 %v2977_v7, %v2973_v2 }
 0x11e   :  { %v3057_v34 = vpop.f32.mrf.mxu1  ;;  %3402 = vst [vmem:[#allocation14_spill] sm:$0xff] %v3063_v14  ;;  %v1903_v7 = vadd.f32 %v2985_v10, %v2981_v9  ;;  %v1906_v10 = vadd.f32 %v2993_v19, %v2989_v4  ;;  %v1909_v19 = vadd.f32 %v3001_v36, %v2997_v8  ;;  %v1912_v36 = vadd.f32 %v3009_v61, %v3005_v63 }
 0x11f   :  { %3399 = vst [vmem:[#allocation11_spill] sm:$0xff] %v3057_v34  ;;  %v3067_v0 = vpop.f32.mrf.mxu0  ;;  %v612_v24 = vadd.f32 %v1888_v12, %v1824_v49  ;;  %v1830_v49 = vadd.f32 %v2967_v59, %v2963_v15  ;;  %v1915_v61 = vadd.f32 %v3017_v41, %v3013_v56  ;;  %v1918_v41 = vadd.f32 %v3025_v5, %v3021_v46 }
 0x120   :  { %v3061_v62 = vpop.f32.mrf.mxu1  ;;  %3404 = vst [vmem:[#allocation16_spill] sm:$0xff] %v3067_v0  ;;  %v1921_v5 = vadd.f32 %v3033_v38, %v3029_v23  ;;  %v3406_v38 = vld [vmem:[#allocation2_spill] sm:$0xff] }
 0x121   :  { %3401 = vst [vmem:[#allocation13_spill] sm:$0xff] %v3061_v62  ;;  %v3069_v26 = vpop.f32.mrf.mxu0  ;;  %v1827_v62 = vadd.f32 %v2959_v16, %v2955_v31  ;;  %v620_v59 = vadd.f32 %v1894_v57, %v1830_v49 }
 0x122   :  { %v3065_v53 = vpop.f32.mrf.mxu1  ;;  %3405 = vst [vmem:[#allocation17_spill] sm:$0xff] %v3069_v26 }
 0x123   :  { %3403 = vst [vmem:[#allocation15_spill] sm:$0xff] %v3065_v53  ;;  %v1891_v53 = vadd.f32 %v2953_v29, %v2951_v50 }
 0x124   :  { %v2014_v6 = vpop.f32.mrf.mxu1 }
 0x125   :  { %v615_v58 = vadd.f32 %v1891_v53, %v1827_v62 }
 0x126   :  { %v2015_v33 = vpop.f32.mrf.mxu1 }
 0x127   :  { %v1950_v34 = vpop.f32.mrf.mxu0  ;;  %v2016_v28 = vadd.f32 %v2015_v33, %v2014_v6 }
 0x128   :  { %v2017_v55 = vpop.f32.mrf.mxu1 }
 0x129   :  { %v1951_v51 = vpop.f32.mrf.mxu0 }
 0x12a   :  { %v1952_v0 = vadd.f32 %v1951_v51, %v1950_v34  ;;  %v2018_v14 = vpop.f32.mrf.mxu1 }
 0x12b   :  { %v1953_v11 = vpop.f32.mrf.mxu0  ;;  %v2019_v29 = vadd.f32 %v2018_v14, %v2017_v55 }
 0x12c   :  { %v1033_v26 = vadd.f32 %v1952_v0, %v612_v24  ;;  %v2020_v3 = vpop.f32.mrf.mxu1 }
 0x12d   :  { %v1954_v21 = vpop.f32.mrf.mxu0 }
 0x12e   :  { %v3082_v12 = vadd.f32 %v2016_v28, %v1033_v26  ;;  %v1955_v31 = vadd.f32 %v1954_v21, %v1953_v11  ;;  %v2021_v16 = vpop.f32.mrf.mxu1  ;;  %v1833_v28 = vadd.f32 %v2975_v48, %v2971_v1 }
 0x12f   :  { %v1956_v43 = vpop.f32.mrf.mxu0  ;;  %v2022_v34 = vadd.f32 %v2021_v16, %v2020_v3  ;;  %v1839_v3 = vadd.f32 %v2991_v25, %v2987_v54 }
 0x130   :  { %1424 = vst [vmem:[%s3353_s2] sm:$0xff] %v3082_v12  ;;  %v1034_v50 = vadd.f32 %v1955_v31, %v615_v58  ;;  %1514 = vrot.lane.b32.xlu0 %v3082_v12, %s2128_s8  ;;  %v2023_v40 = vpop.f32.mrf.mxu1  ;;  %v623_v48 = vadd.f32 %v1897_v45, %v1833_v28 }
 0x131   :  { %v1957_v15 = vpop.f32.mrf.mxu0  ;;  %v631_v25 = vadd.f32 %v1903_v7, %v1839_v3 }
 0x132   :  { %v3094_v11 = vadd.f32 %v2019_v29, %v1034_v50  ;;  %v1958_v24 = vadd.f32 %v1957_v15, %v1956_v43  ;;  %v2024_v26 = vpop.f32.mrf.mxu1  ;;  %v1836_v43 = vadd.f32 %v2983_v42, %v2979_v18  ;;  %v1842_v50 = vadd.f32 %v2999_v20, %v2995_v44 }
 0x133   :  { %v1959_v33 = vpop.f32.mrf.mxu0  ;;  %v2025_v6 = vadd.f32 %v2024_v26, %v2023_v40 }
 0x134   :  { %1425 = vst [vmem:[%s3353_s2 + $0x8] sm:$0xff] %v3094_v11  ;;  %v1035_v55 = vadd.f32 %v1958_v24, %v620_v59  ;;  %1516 = vrot.lane.b32.xlu0 %v3094_v11, %s2128_s8  ;;  %v2026_v39 = vpop.f32.mrf.mxu1  ;;  %v628_v42 = vadd.f32 %v1900_v30, %v1836_v43  ;;  %v636_v20 = vadd.f32 %v1906_v10, %v1842_v50 }
 0x135   :  { %v1960_v1 = vpop.f32.mrf.mxu0  ;;  %v1845_v24 = vadd.f32 %v3007_v17, %v3003_v37 }
 0x136   :  { %v3106_v51 = vadd.f32 %v2022_v34, %v1035_v55  ;;  %v1961_v62 = vadd.f32 %v1960_v1, %v1959_v33  ;;  %v2027_v14 = vpop.f32.mrf.mxu1  ;;  %v1848_v1 = vadd.f32 %v3015_v60, %v3011_v22 }
 0x137   :  { %v1962_v53 = vpop.f32.mrf.mxu0  ;;  %v2028_v16 = vadd.f32 %v2027_v14, %v2026_v39  ;;  %v639_v17 = vadd.f32 %v1909_v19, %v1845_v24 }
 0x138   :  { %1426 = vst [vmem:[%s3353_s2 + $0x10] sm:$0xff] %v3106_v51  ;;  %v1036_v0 = vadd.f32 %v1961_v62, %v623_v48  ;;  %1518 = vrot.lane.b32.xlu1 %v3106_v51, %s2128_s8  ;;  %v2029_v2 = vpop.f32.mrf.mxu1  ;;  %v644_v60 = vadd.f32 %v1912_v36, %v1848_v1 }
 0x139   :  { %v1963_v18 = vpop.f32.mrf.mxu0 }
 0x13a   :  { %v3118_v57 = vadd.f32 %v2025_v6, %v1036_v0  ;;  %v1964_v21 = vadd.f32 %v1963_v18, %v1962_v53  ;;  %v2030_v58 = vpop.f32.mrf.mxu1  ;;  %v1851_v6 = vadd.f32 %v3023_v47, %v3019_v52 }
 0x13b   :  { %v1965_v49 = vpop.f32.mrf.mxu0  ;;  %v2031_v28 = vadd.f32 %v2030_v58, %v2029_v2  ;;  %v1854_v58 = vadd.f32 %v3031_v32, %v3027_v13 }
 0x13c   :  { %1427 = vst [vmem:[%s3353_s2 + $0x18] sm:$0xff] %v3118_v57  ;;  %v1037_v31 = vadd.f32 %v1964_v21, %v628_v42  ;;  %1520 = vrot.lane.b32.xlu1 %v3118_v57, %s2128_s8  ;;  %v2032_v9 = vpop.f32.mrf.mxu1  ;;  %v647_v47 = vadd.f32 %v1915_v61, %v1851_v6 }
 0x13d   :  { %v1966_v54 = vpop.f32.mrf.mxu0  ;;  %v652_v32 = vadd.f32 %v1918_v41, %v1854_v58 }
 0x13e   :  { %v3130_v29 = vadd.f32 %v2028_v16, %v1037_v31  ;;  %v1967_v40 = vadd.f32 %v1966_v54, %v1965_v49  ;;  %v2033_v45 = vpop.f32.mrf.mxu1 }
 0x13f   :  { %v1968_v15 = vpop.f32.mrf.mxu0  ;;  %v2034_v30 = vadd.f32 %v2033_v45, %v2032_v9 }
 0x140   :  { %1428 = vst [vmem:[%s3353_s2 + $0x20] sm:$0xff] %v3130_v29  ;;  %v1038_v59 = vadd.f32 %v1967_v40, %v631_v25  ;;  %1522 = vrot.lane.b32.xlu0 %v3130_v29, %s2128_s8  ;;  %v2035_v4 = vpop.f32.mrf.mxu1  ;;  %v1857_v25 = vadd.f32 %v3039_v27, %v3035_v35 }
 0x141   :  { %v1969_v44 = vpop.f32.mrf.mxu0 }
 0x142   :  { %v3142_v26 = vadd.f32 %v2031_v28, %v1038_v59  ;;  %v1970_v33 = vadd.f32 %v1969_v44, %v1968_v15  ;;  %v2036_v55 = vpop.f32.mrf.mxu1  ;;  %v655_v27 = vadd.f32 %v1921_v5, %v1857_v25  ;;  %v3408_v44 = vld [vmem:[#allocation4_spill] sm:$0xff]  ;;  %v3418_v5 = vld [vmem:[#allocation13_spill] sm:$0xff] }
 0x143   :  { %v1971_v34 = vpop.f32.mrf.mxu0  ;;  %v2037_v0 = vadd.f32 %v2036_v55, %v2035_v4  ;;  %v3407_v4 = vld [vmem:[#allocation3_spill] sm:$0xff] }
 0x144   :  { %1429 = vst [vmem:[%s3353_s2 + $0x28] sm:$0xff] %v3142_v26  ;;  %v1039_v39 = vadd.f32 %v1970_v33, %v636_v20  ;;  %1524 = vrot.lane.b32.xlu1 %v3142_v26, %s2128_s8  ;;  %v2038_v8 = vpop.f32.mrf.mxu1  ;;  %v1924_v19 = vadd.f32 %v3407_v4, %v3406_v38  ;;  %v3409_v20 = vld [vmem:[#allocation6_spill] sm:$0xff] }
 0x145   :  { %v1972_v37 = vpop.f32.mrf.mxu0  ;;  %v1860_v24 = vadd.f32 %v3409_v20, %v3408_v44 }
 0x146   :  { %v3154_v48 = vadd.f32 %v2034_v30, %v1039_v39  ;;  %v1973_v43 = vadd.f32 %v1972_v37, %v1971_v34  ;;  %v2039_v62 = vpop.f32.mrf.mxu1  ;;  %v3410_v37 = vld [vmem:[#allocation5_spill] sm:$0xff] }
 0x147   :  { %v1974_v14 = vpop.f32.mrf.mxu0  ;;  %v2040_v21 = vadd.f32 %v2039_v62, %v2038_v8  ;;  %v660_v62 = vadd.f32 %v1924_v19, %v1860_v24 }
 0x148   :  { %1430 = vst [vmem:[%s3353_s2 + $0x30] sm:$0xff] %v3154_v48  ;;  %v1040_v53 = vadd.f32 %v1973_v43, %v639_v17  ;;  %1526 = vrot.lane.b32.xlu0 %v3154_v48, %s2128_s8  ;;  %v2041_v63 = vpop.f32.mrf.mxu1  ;;  %v3411_v17 = vld [vmem:[#allocation7_spill] sm:$0xff] }
 0x149   :  { %v1975_v22 = vpop.f32.mrf.mxu0  ;;  %v1927_v1 = vadd.f32 %v3411_v17, %v3410_v37 }
 0x14a   :  { %v3166_v2 = vadd.f32 %v2037_v0, %v1040_v53  ;;  %v1976_v7 = vadd.f32 %v1975_v22, %v1974_v14  ;;  %v2042_v18 = vpop.f32.mrf.mxu1  ;;  %v3412_v14 = vld [vmem:[#allocation8_spill] sm:$0xff]  ;;  %v3413_v53 = vld [vmem:[#allocation10_spill] sm:$0xff] }
 0x14b   :  { %v1977_v42 = vpop.f32.mrf.mxu0  ;;  %v2043_v54 = vadd.f32 %v2042_v18, %v2041_v63  ;;  %v1863_v0 = vadd.f32 %v3413_v53, %v3412_v14 }
 0x14c   :  { %1431 = vst [vmem:[%s3353_s2 + $0x38] sm:$0xff] %v3166_v2  ;;  %v1041_v3 = vadd.f32 %v1976_v7, %v644_v60  ;;  %1528 = vrot.lane.b32.xlu1 %v3166_v2, %s2128_s8  ;;  %v2044_v56 = vpop.f32.mrf.mxu1 }
 0x14d   :  { %v1978_v52 = vpop.f32.mrf.mxu0  ;;  %v663_v41 = vadd.f32 %v1927_v1, %v1863_v0 }
 0x14e   :  { %v3178_v49 = vadd.f32 %v2040_v21, %v1041_v3  ;;  %v1979_v31 = vadd.f32 %v1978_v52, %v1977_v42  ;;  %v2045_v16 = vpop.f32.mrf.mxu1  ;;  %v3414_v42 = vld [vmem:[#allocation9_spill] sm:$0xff]  ;;  %v3415_v3 = vld [vmem:[#allocation11_spill] sm:$0xff]  ;;  %v3416_v52 = vld [vmem:[#allocation12_spill] sm:$0xff] }
 0x14f   :  { %v1980_v9 = vpop.f32.mrf.mxu0  ;;  %v2046_v28 = vadd.f32 %v2045_v16, %v2044_v56  ;;  %v1930_v21 = vadd.f32 %v3415_v3, %v3414_v42 }
 0x150   :  { %1432 = vst [vmem:[%s3353_s2 + $0x40] sm:$0xff] %v3178_v49  ;;  %v1042_v10 = vadd.f32 %v1979_v31, %v647_v47  ;;  %1530 = vrot.lane.b32.xlu0 %v3178_v49, %s2128_s8  ;;  %v2047_v46 = vpop.f32.mrf.mxu1  ;;  %v3417_v47 = vld [vmem:[#allocation14_spill] sm:$0xff] }
 0x151   :  { %v1981_v13 = vpop.f32.mrf.mxu0  ;;  %v1866_v58 = vadd.f32 %v3417_v47, %v3416_v52 }
 0x152   :  { %v3190_v50 = vadd.f32 %v2043_v54, %v1042_v10  ;;  %v1982_v40 = vadd.f32 %v1981_v13, %v1980_v9  ;;  %v2048_v45 = vpop.f32.mrf.mxu1  ;;  %v3419_v13 = vld [vmem:[#allocation15_spill] sm:$0xff] }
 0x153   :  { %v1983_v15 = vpop.f32.mrf.mxu0  ;;  %v2049_v8 = vadd.f32 %v2048_v45, %v2047_v46  ;;  %v668_v45 = vadd.f32 %v1930_v21, %v1866_v58 }
 0x154   :  { %1433 = vst [vmem:[%s3353_s2 + $0x48] sm:$0xff] %v3190_v50  ;;  %v1043_v59 = vadd.f32 %v1982_v40, %v652_v32  ;;  %1532 = vrot.lane.b32.xlu1 %v3190_v50, %s2128_s8  ;;  %v2050_v23 = vpop.f32.mrf.mxu1  ;;  %v1933_v32 = vadd.f32 %v3419_v13, %v3418_v5 }
 0x155   :  { %v1984_v35 = vpop.f32.mrf.mxu0 }
 0x156   :  { %v3202_v33 = vadd.f32 %v2046_v28, %v1043_v59  ;;  %v1985_v55 = vadd.f32 %v1984_v35, %v1983_v15  ;;  %v2051_v34 = vpop.f32.mrf.mxu1  ;;  %v3420_v15 = vld [vmem:[#allocation16_spill] sm:$0xff]  ;;  %v3421_v59 = vld [vmem:[#allocation17_spill] sm:$0xff] }
 0x157   :  { %v1986_v39 = vpop.f32.mrf.mxu0  ;;  %v2052_v7 = vadd.f32 %v2051_v34, %v2050_v23  ;;  %v1869_v28 = vadd.f32 %v3421_v59, %v3420_v15 }
 0x158   :  { %1434 = vst [vmem:[%s3353_s2 + $0x50] sm:$0xff] %v3202_v33  ;;  %v1044_v30 = vadd.f32 %v1985_v55, %v655_v27  ;;  %1534 = vrot.lane.b32.xlu0 %v3202_v33, %s2128_s8  ;;  %v2053_v36 = vpop.f32.mrf.mxu1 }
 0x159   :  { %v1987_v43 = vpop.f32.mrf.mxu0  ;;  %v671_v20 = vadd.f32 %v1933_v32, %v1869_v28 }
 0x15a   :  { %v3214_v63 = vadd.f32 %v2049_v8, %v1044_v30  ;;  %v1988_v61 = vadd.f32 %v1987_v43, %v1986_v39  ;;  %v2054_v22 = vpop.f32.mrf.mxu1 }
 0x15b   :  { %v1989_v60 = vpop.f32.mrf.mxu0  ;;  %v2055_v46 = vadd.f32 %v2054_v22, %v2053_v36 }
 0x15c   :  { %1435 = vst [vmem:[%s3353_s2 + $0x58] sm:$0xff] %v3214_v63  ;;  %v1045_v6 = vadd.f32 %v1988_v61, %v660_v62  ;;  %1536 = vrot.lane.b32.xlu1 %v3214_v63, %s2128_s8  ;;  %v2056_v18 = vpop.f32.mrf.mxu1 }
 0x15d   :  { %v1990_v56 = vpop.f32.mrf.mxu0 }
 0x15e   :  { %v3226_v31 = vadd.f32 %v2052_v7, %v1045_v6  ;;  %v1991_v16 = vadd.f32 %v1990_v56, %v1989_v60  ;;  %v2057_v9 = vpop.f32.mrf.mxu1 }
 0x15f   :  { %v1992_v10 = vpop.f32.mrf.mxu0  ;;  %v2058_v35 = vadd.f32 %v2057_v9, %v2056_v18 }
 0x160   :  { %1436 = vst [vmem:[%s3353_s2 + $0x60] sm:$0xff] %v3226_v31  ;;  %v1046_v54 = vadd.f32 %v1991_v16, %v663_v41  ;;  %1538 = vrot.lane.b32.xlu0 %v3226_v31, %s2128_s8  ;;  %v2059_v40 = vpop.f32.mrf.mxu1 }
 0x161   :  { %v1993_v25 = vpop.f32.mrf.mxu0 }
 0x162   :  { %v3238_v23 = vadd.f32 %v2055_v46, %v1046_v54  ;;  %v1994_v38 = vadd.f32 %v1993_v25, %v1992_v10  ;;  %v2060_v44 = vpop.f32.mrf.mxu1 }
 0x163   :  { %v1995_v4 = vpop.f32.mrf.mxu0  ;;  %v2061_v39 = vadd.f32 %v2060_v44, %v2059_v40 }
 0x164   :  { %1437 = vst [vmem:[%s3353_s2 + $0x68] sm:$0xff] %v3238_v23  ;;  %v1047_v19 = vadd.f32 %v1994_v38, %v668_v45  ;;  %1540 = vrot.lane.b32.xlu1 %v3238_v23, %s2128_s8 }
 0x165   :  { %v1996_v27 = vpop.f32.mrf.mxu0 }
 0x166   :  { %v3246_v24 = vadd.f32 %v2058_v35, %v1047_v19  ;;  %v1997_v55 = vadd.f32 %v1996_v27, %v1995_v4 }
 0x168   :  { %1438 = vst [vmem:[%s3353_s2 + $0x70] sm:$0xff] %v3246_v24  ;;  %v1048_v34 = vadd.f32 %v1997_v55, %v671_v20  ;;  %1542 = vrot.lane.b32.xlu0 %v3246_v24, %s2128_s8 }
 0x16a   :  { %v3254_v30 = vadd.f32 %v2061_v39, %v1048_v34 }
 0x16c   :  { %1439 = vst [vmem:[%s3353_s2 + $0x78] sm:$0xff] %v3254_v30  ;;  %1544 = vrot.lane.b32.xlu1 %v3254_v30, %s2128_s8 }
 0x1a2   :  { %v1515_v8 = vpop.permute.xlu0 %1514 }
 0x1a3   :  { %v1562_v43 = vmul.f32 %v1515_v8, %v3082_v12 }
 0x1a5   :  { %v1579_v22 = vsel %vm1578_vm3, %v1562_v43, 0.0 }
 0x1a6   :  { %v1517_v37 = vpop.permute.xlu0 %1516 }
 0x1a7   :  { %v1563_v17 = vmul.f32 %v1517_v37, %v3094_v11 }
 0x1a9   :  { %v1580_v53 = vsel %vm1578_vm3, %v1563_v17, 0.0 }
 0x1aa   :  { %v1519_v36 = vpop.permute.xlu1 %1518  ;;  %v1581_v7 = vadd.f32 %v1580_v53, %v1579_v22 }
 0x1ab   :  { %v1564_v62 = vmul.f32 %v1519_v36, %v3106_v51 }
 0x1ad   :  { %v1582_v60 = vsel %vm1578_vm3, %v1564_v62, 0.0 }
 0x1ae   :  { %v1521_v1 = vpop.permute.xlu1 %1520  ;;  %v1583_v21 = vadd.f32 %v1582_v60, %v1581_v7 }
 0x1af   :  { %v1565_v0 = vmul.f32 %v1521_v1, %v3118_v57 }
 0x1b1   :  { %v1584_v42 = vsel %vm1578_vm3, %v1565_v0, 0.0 }
 0x1b2   :  { %v1523_v14 = vpop.permute.xlu0 %1522  ;;  %v1585_v47 = vadd.f32 %v1584_v42, %v1583_v21 }
 0x1b3   :  { %v1566_v6 = vmul.f32 %v1523_v14, %v3130_v29 }
 0x1b5   :  { %v1586_v41 = vsel %vm1578_vm3, %v1566_v6, 0.0 }
 0x1b6   :  { %v1525_v61 = vpop.permute.xlu1 %1524  ;;  %v1587_v10 = vadd.f32 %v1586_v41, %v1585_v47  ;;  %v1461_v47 = vmul.f32 %v3082_v12, %v3082_v12 }
 0x1b7   :  { %v1567_v3 = vmul.f32 %v1525_v61, %v3142_v26 }
 0x1b9   :  { %v1588_v16 = vsel %vm1578_vm3, %v1567_v3, 0.0 }
 0x1ba   :  { %v1527_v18 = vpop.permute.xlu0 %1526  ;;  %v1589_v13 = vadd.f32 %v1588_v16, %v1587_v10  ;;  %v1440_v10 = vadd.f32 %v3094_v11, %v3082_v12  ;;  %v1468_v12 = vmul.f32 %v3166_v2, %v3166_v2 }
 0x1bb   :  { %v1568_v52 = vmul.f32 %v1527_v18, %v3154_v48 }
 0x1bd   :  { %v1590_v46 = vsel %vm1578_vm3, %v1568_v52, 0.0  ;;  %v1462_v52 = vmul.f32 %v3094_v11, %v3094_v11 }
 0x1be   :  { %v1529_v56 = vpop.permute.xlu1 %1528  ;;  %v1591_v45 = vadd.f32 %v1590_v46, %v1589_v13  ;;  %v1465_v46 = vmul.f32 %v3130_v29, %v3130_v29 }
 0x1bf   :  { %v1569_v9 = vmul.f32 %v1529_v56, %v3166_v2  ;;  %v1477_v16 = vadd.f32 %v1462_v52, %v1461_v47 }
 0x1c1   :  { %v1592_v25 = vsel %vm1578_vm3, %v1569_v9, 0.0  ;;  %v1464_v9 = vmul.f32 %v3118_v57, %v3118_v57 }
 0x1c2   :  { %v1531_v58 = vpop.permute.xlu0 %1530  ;;  %v1593_v38 = vadd.f32 %v1592_v25, %v1591_v45  ;;  %v1467_v45 = vmul.f32 %v3154_v48, %v3154_v48 }
 0x1c3   :  { %v1570_v5 = vmul.f32 %v1531_v58, %v3178_v49  ;;  %v1463_v58 = vmul.f32 %v3106_v51, %v3106_v51 }
 0x1c5   :  { %v1594_v59 = vsel %vm1578_vm3, %v1570_v5, 0.0  ;;  %v1441_v5 = vadd.f32 %v1440_v10, %v3106_v51  ;;  %v1469_v51 = vmul.f32 %v3178_v49, %v3178_v49 }
 0x1c6   :  { %v1533_v54 = vpop.permute.xlu1 %1532  ;;  %v1595_v27 = vadd.f32 %v1594_v59, %v1593_v38 }
 0x1c7   :  { %v1571_v40 = vmul.f32 %v1533_v54, %v3190_v50  ;;  %v1478_v54 = vadd.f32 %v1477_v16, %v1463_v58  ;;  %v1442_v25 = vadd.f32 %v1441_v5, %v3118_v57  ;;  %v1470_v57 = vmul.f32 %v3190_v50, %v3190_v50 }
 0x1c9   :  { %v1596_v19 = vsel %vm1578_vm3, %v1571_v40, 0.0  ;;  %v1479_v13 = vadd.f32 %v1478_v54, %v1464_v9 }
 0x1ca   :  { %v1535_v32 = vpop.permute.xlu0 %1534  ;;  %v1597_v55 = vadd.f32 %v1596_v19, %v1595_v27 }
 0x1cb   :  { %v1572_v28 = vmul.f32 %v1535_v32, %v3202_v33  ;;  %v1466_v32 = vmul.f32 %v3142_v26, %v3142_v26  ;;  %v1480_v40 = vadd.f32 %v1479_v13, %v1465_v46 }
 0x1cd   :  { %v1598_v44 = vsel %vm1578_vm3, %v1572_v28, 0.0  ;;  %v1481_v59 = vadd.f32 %v1480_v40, %v1466_v32 }
 0x1ce   :  { %v1537_v15 = vpop.permute.xlu1 %1536  ;;  %v1599_v36 = vadd.f32 %v1598_v44, %v1597_v55 }
 0x1cf   :  { %v1573_v35 = vmul.f32 %v1537_v15, %v3214_v63  ;;  %v1443_v15 = vadd.f32 %v1442_v25, %v3130_v29  ;;  %v1482_v28 = vadd.f32 %v1481_v59, %v1467_v45  ;;  %v1471_v29 = vmul.f32 %v3202_v33, %v3202_v33 }
 0x1d1   :  { %v1600_v39 = vsel %vm1578_vm3, %v1573_v35, 0.0  ;;  %v1444_v11 = vadd.f32 %v1443_v15, %v3142_v26  ;;  %v1472_v26 = vmul.f32 %v3214_v63, %v3214_v63 }
 0x1d2   :  { %v1539_v4 = vpop.permute.xlu0 %1538  ;;  %v1601_v17 = vadd.f32 %v1600_v39, %v1599_v36 }
 0x1d3   :  { %v1574_v20 = vmul.f32 %v1539_v4, %v3226_v31  ;;  %v1445_v38 = vadd.f32 %v1444_v11, %v3154_v48  ;;  %v1483_v4 = vadd.f32 %v1482_v28, %v1468_v12  ;;  %v1473_v48 = vmul.f32 %v3226_v31, %v3226_v31 }
 0x1d5   :  { %v1602_v37 = vsel %vm1578_vm3, %v1574_v20, 0.0  ;;  %v1446_v19 = vadd.f32 %v1445_v38, %v3166_v2  ;;  %v1484_v35 = vadd.f32 %v1483_v4, %v1469_v51  ;;  %v1474_v2 = vmul.f32 %v3238_v23, %v3238_v23 }
 0x1d6   :  { %v1541_v34 = vpop.permute.xlu1 %1540  ;;  %v1603_v14 = vadd.f32 %v1602_v37, %v1601_v17 }
 0x1d7   :  { %v1575_v8 = vmul.f32 %v1541_v34, %v3238_v23  ;;  %v1447_v27 = vadd.f32 %v1446_v19, %v3178_v49  ;;  %v1485_v44 = vadd.f32 %v1484_v35, %v1470_v57  ;;  %v1475_v49 = vmul.f32 %v3246_v24, %v3246_v24 }
 0x1d9   :  { %v1604_v43 = vsel %vm1578_vm3, %v1575_v8, 0.0  ;;  %v1448_v20 = vadd.f32 %v1447_v27, %v3190_v50  ;;  %v1486_v55 = vadd.f32 %v1485_v44, %v1471_v29  ;;  %v1476_v50 = vmul.f32 %v3254_v30, %v3254_v30 }
 0x1da   :  { %v1543_v1 = vpop.permute.xlu0 %1542  ;;  %v1605_v0 = vadd.f32 %v1604_v43, %v1603_v14 }
 0x1db   :  { %v1576_v62 = vmul.f32 %v1543_v1, %v3246_v24  ;;  %v1449_v34 = vadd.f32 %v1448_v20, %v3202_v33  ;;  %v1487_v39 = vadd.f32 %v1486_v55, %v1472_v26 }
 0x1dd   :  { %v1606_v53 = vsel %vm1578_vm3, %v1576_v62, 0.0  ;;  %v1450_v8 = vadd.f32 %v1449_v34, %v3214_v63  ;;  %v1488_v36 = vadd.f32 %v1487_v39, %v1473_v48 }
 0x1de   :  { %v1545_v61 = vpop.permute.xlu1 %1544  ;;  %v1607_v60 = vadd.f32 %v1606_v53, %v1605_v0 }
 0x1df   :  { %v1577_v22 = vmul.f32 %v1545_v61, %v3254_v30  ;;  %v1451_v37 = vadd.f32 %v1450_v8, %v3226_v31  ;;  %v1489_v17 = vadd.f32 %v1488_v36, %v1474_v2 }
 0x1e1   :  { %v1608_v6 = vsel %vm1578_vm3, %v1577_v22, 0.0  ;;  %v1452_v1 = vadd.f32 %v1451_v37, %v3238_v23  ;;  %v1490_v43 = vadd.f32 %v1489_v17, %v1475_v49 }
 0x1e2   :  { %v1609_v7 = vadd.f32 %v1608_v6, %v1607_v60 }
 0x1e3   :  { %v1453_v33 = vadd.f32 %v1452_v1, %v3246_v24  ;;  %v1491_v62 = vadd.f32 %v1490_v43, %v1476_v50 }
 0x1e4   :  { %v1610_v18 = vrot.slane %v1609_v7, 4 }
 0x1e5   :  { %v1454_v14 = vadd.f32 %v1453_v33, %v3254_v30  ;;  %v1492_v53 = vrot.slane %v1491_v62, 4 }
 0x1e6   :  { %v1611_v42 = vadd.f32 %v1610_v18, %v1609_v7 }
 0x1e7   :  { %v1455_v63 = vrot.slane %v1454_v14, 4  ;;  %v1493_v0 = vadd.f32 %v1492_v53, %v1491_v62 }
 0x1e8   :  { %v1612_v3 = vrot.slane %v1611_v42, 2 }
 0x1e9   :  { %v1456_v61 = vadd.f32 %v1455_v63, %v1454_v14  ;;  %v1494_v22 = vrot.slane %v1493_v0, 2 }
 0x1ea   :  { %v1613_v21 = vadd.f32 %v1612_v3, %v1611_v42 }
 0x1eb   :  { %v1457_v60 = vrot.slane %v1456_v61, 2  ;;  %v1495_v6 = vadd.f32 %v1494_v22, %v1493_v0 }
 0x1ec   :  { %v1614_v56 = vrot.slane %v1613_v21, 1 }
 0x1ed   :  { %v1458_v31 = vadd.f32 %v1457_v60, %v1456_v61  ;;  %v1496_v7 = vrot.slane %v1495_v6, 1 }
 0x1ee   :  { %v3294_v41 = vadd.f32 %v1614_v56, %v1613_v21 }
 0x1ef   :  { %v1459_v18 = vrot.slane %v1458_v31, 1  ;;  %v1497_v42 = vadd.f32 %v1496_v7, %v1495_v6 }
 0x1f0   :  { %1617 = vrot.lane.b32.xlu0 %v3294_v41, %s2128_s8 }
 0x1f1   :  { %v1460_v23 = vadd.f32 %v1459_v18, %v1458_v31 }
 0x1f3   :  { %v1625_v21 = vsel %vm1624_vm4, %v1460_v23, %v1497_v42 }
 0x262   :  { %v1618_v3 = vpop.permute.xlu0 %1617 }
 0x263   :  { %v1620_v24 = vsel %vm1578_vm3, %v3294_v41, %v1618_v3 }
 0x264   :  { %v1622_v30 = vrot.slane %v1620_v24, 6 }
 0x266   :  { %v1627_v56 = vsel %vm1626_vm5, %v1625_v21, %v1622_v30 }
 0x267   :  { %v1629_v52 = vsel %vm1628_vm6, %v1627_v56, 0.0 }
 0x268   :  { %1637 = vst [vmem:[%s3354_s3] sm:$0xff] %v1629_v52 }

// kernel: closed_set_classifier_forward.13
= control target key start
LH: loop header
LB: loop body
LE: loop exit
PB: predicated region body
PF: predicated region fallthrough
CT: control target
= control target key end

     0   :  { %v5276_v36 = vmov 1983009808   ;;  %v34_v38 = vlaneseq  ;;  %s6994_s1 = inlined_call_operand.vmem [shape: bf16[4096,256], index: 1, kind: input, shape index: {}]   ;;  %s6995_s0 = inlined_call_operand.vmem [shape: f32[2,4096], index: 0, kind: input, shape index: {}]   ;;  %s6996_s2 = inlined_call_operand.vmem [shape: f32[1,256], index: 2, kind: input, shape index: {}]   ;;  %s6997_s3 = inlined_call_operand.vmem [shape: f32[2,128], index: 3, kind: output, shape index: {}]  }
   0x1   :  { %v4498_v0 = vld [vmem:[%s6994_s1 + $0x74] ss:$8 sps:$4 sm:$0xff]   ;;  %v4502_v2 = vld [vmem:[%s6994_s1 + $0x70] ss:$8 sps:$4 sm:$0xff]   ;;  %v4504_v4 = vld [vmem:[%s6994_s1 + $0x64] ss:$8 sps:$4 sm:$0xff]   ;;  %v32_v37 = vunpack.c.l.s4 %v5276_v36 }
   0x2   :  { %v4500_v1 = vld [vmem:[%s6994_s1 + $0x174] ss:$8 sps:$4 sm:$0xff]   ;;  %3314 = vmatprep.subr.bf16.mxu0 %v4498_v0  ;;  %v4503_v3 = vld [vmem:[%s6994_s1 + $0x170] ss:$8 sps:$4 sm:$0xff]   ;;  %v4506_v5 = vld [vmem:[%s6994_s1 + $0x164] ss:$8 sps:$4 sm:$0xff]  }
   0x3   :  { %3355 = vmatprep.subr.bf16.mxu1 %v4500_v1  ;;  %3315 = vmatpush1.bf16.msra.mxu0 %v4502_v2  ;;  %v4508_v6 = vld [vmem:[%s6994_s1 + $0x60] ss:$8 sps:$4 sm:$0xff]   ;;  %v4510_v8 = vld [vmem:[%s6994_s1 + $0x54] ss:$8 sps:$4 sm:$0xff]   ;;  %v4514_v10 = vld [vmem:[%s6994_s1 + $0x50] ss:$8 sps:$4 sm:$0xff]   ;;  %v33_v42 = vunpack.c.0.s8 %v32_v37 }
   0x4   :  { %3356 = vmatpush1.bf16.msra.mxu1 %v4503_v3  ;;  %3316 = vmatprep.subr.bf16.mxu0 %v4504_v4  ;;  %v4509_v7 = vld [vmem:[%s6994_s1 + $0x160] ss:$8 sps:$4 sm:$0xff]   ;;  %v4512_v9 = vld [vmem:[%s6994_s1 + $0x154] ss:$8 sps:$4 sm:$0xff]   ;;  %v4515_v11 = vld [vmem:[%s6994_s1 + $0x150] ss:$8 sps:$4 sm:$0xff]  }
   0x5   :  { %3357 = vmatprep.subr.bf16.mxu1 %v4506_v5  ;;  %v4516_v12 = vld [vmem:[%s6994_s1 + $0x44] ss:$8 sps:$4 sm:$0xff]   ;;  %v4520_v14 = vld [vmem:[%s6994_s1 + $0x40] ss:$8 sps:$4 sm:$0xff]   ;;  %v4522_v16 = vld [vmem:[%s6994_s1 + $0x34] ss:$8 sps:$4 sm:$0xff]  }
   0x6   :  { %v4518_v13 = vld [vmem:[%s6994_s1 + $0x144] ss:$8 sps:$4 sm:$0xff]   ;;  %v4521_v15 = vld [vmem:[%s6994_s1 + $0x140] ss:$8 sps:$4 sm:$0xff]   ;;  %v4524_v17 = vld [vmem:[%s6994_s1 + $0x134] ss:$8 sps:$4 sm:$0xff]  }
   0x7   :  { %3317 = vmatpush1.bf16.msra.mxu0 %v4508_v6  ;;  %v4526_v18 = vld [vmem:[%s6994_s1 + $0x30] ss:$8 sps:$4 sm:$0xff]   ;;  %v4528_v20 = vld [vmem:[%s6994_s1 + $0x24] ss:$8 sps:$4 sm:$0xff]   ;;  %v4532_v22 = vld [vmem:[%s6994_s1 + $0x20] ss:$8 sps:$4 sm:$0xff]  }
   0x8   :  { %3358 = vmatpush1.bf16.msra.mxu1 %v4509_v7  ;;  %3318 = vmatprep.subr.bf16.mxu0 %v4510_v8  ;;  %v4527_v19 = vld [vmem:[%s6994_s1 + $0x130] ss:$8 sps:$4 sm:$0xff]   ;;  %v4530_v21 = vld [vmem:[%s6994_s1 + $0x124] ss:$8 sps:$4 sm:$0xff]   ;;  %v4533_v23 = vld [vmem:[%s6994_s1 + $0x120] ss:$8 sps:$4 sm:$0xff]  }
   0x9   :  { %3359 = vmatprep.subr.bf16.mxu1 %v4512_v9  ;;  %v4534_v24 = vld [vmem:[%s6994_s1 + $0x14] ss:$8 sps:$4 sm:$0xff]   ;;  %v4538_v26 = vld [vmem:[%s6994_s1 + $0x10] ss:$8 sps:$4 sm:$0xff]   ;;  %v4540_v28 = vld [vmem:[%s6994_s1 + $0x4] ss:$8 sps:$4 sm:$0xff]  }
   0xa   :  { %v4536_v25 = vld [vmem:[%s6994_s1 + $0x114] ss:$8 sps:$4 sm:$0xff]   ;;  %v4539_v27 = vld [vmem:[%s6994_s1 + $0x110] ss:$8 sps:$4 sm:$0xff]   ;;  %v4542_v29 = vld [vmem:[%s6994_s1 + $0x104] ss:$8 sps:$4 sm:$0xff]  }
   0xb   :  { %3319 = vmatpush1.bf16.msra.mxu0 %v4514_v10  ;;  %v4544_v30 = vld [vmem:[%s6994_s1] ss:$8 sps:$4 sm:$0xff]   ;;  %v4546_v32 = vld [vmem:[%s6994_s1 + $0xf4] ss:$8 sps:$4 sm:$0xff]   ;;  %v4550_v34 = vld [vmem:[%s6994_s1 + $0xf0] ss:$8 sps:$4 sm:$0xff]  }
   0xc   :  { %3360 = vmatpush1.bf16.msra.mxu1 %v4515_v11  ;;  %3320 = vmatprep.subr.bf16.mxu0 %v4516_v12  ;;  %v4545_v31 = vld [vmem:[%s6994_s1 + $0x100] ss:$8 sps:$4 sm:$0xff]   ;;  %v4548_v33 = vld [vmem:[%s6994_s1 + $0x1f4] ss:$8 sps:$4 sm:$0xff]   ;;  %v4551_v35 = vld [vmem:[%s6994_s1 + $0x1f0] ss:$8 sps:$4 sm:$0xff]  }
   0xd   :  { %3361 = vmatprep.subr.bf16.mxu1 %v4518_v13  ;;  %v4552_v39 = vld [vmem:[%s6994_s1 + $0xe4] ss:$8 sps:$4 sm:$0xff]   ;;  %v4556_v41 = vld [vmem:[%s6994_s1 + $0xe0] ss:$8 sps:$4 sm:$0xff]   ;;  %v5414_v43 = vshrl.u32 %v34_v38, 7 }
   0xe   :  { %v4554_v40 = vld [vmem:[%s6994_s1 + $0x1e4] ss:$8 sps:$4 sm:$0xff]   ;;  %v4557_v44 = vld [vmem:[%s6994_s1 + $0x1e0] ss:$8 sps:$4 sm:$0xff]   ;;  %v4558_v45 = vld [vmem:[%s6994_s1 + $0xd4] ss:$8 sps:$4 sm:$0xff]  }
   0xf   :  { %3321 = vmatpush1.bf16.msra.mxu0 %v4520_v14  ;;  %v4560_v46 = vld [vmem:[%s6994_s1 + $0x1d4] ss:$8 sps:$4 sm:$0xff]   ;;  %v4562_v47 = vld [vmem:[%s6994_s1 + $0xd0] ss:$8 sps:$4 sm:$0xff]   ;;  %v5432_v49 = vsub.s32 %v33_v42, %v5414_v43  ;;  %v4564_v50 = vld [vmem:[%s6994_s1 + $0xc4] ss:$8 sps:$4 sm:$0xff]  }
  0x10   :  { %3362 = vmatpush1.bf16.msra.mxu1 %v4521_v15  ;;  %3322 = vmatprep.subr.bf16.mxu0 %v4522_v16  ;;  %v4563_v48 = vld [vmem:[%s6994_s1 + $0x1d0] ss:$8 sps:$4 sm:$0xff]   ;;  %v4566_v51 = vld [vmem:[%s6994_s1 + $0x1c4] ss:$8 sps:$4 sm:$0xff]   ;;  %v4568_v53 = vld [vmem:[%s6994_s1 + $0xc0] ss:$8 sps:$4 sm:$0xff]  }
  0x11   :  { %3363 = vmatprep.subr.bf16.mxu1 %v4524_v17  ;;  %v14_v52 = vld [vmem:[%s6995_s0] sm:$0xff]  ;;  %v4570_v57 = vld [vmem:[%s6994_s1 + $0xb4] ss:$8 sps:$4 sm:$0xff]   ;;  %v4574_v61 = vld [vmem:[%s6994_s1 + $0xb0] ss:$8 sps:$4 sm:$0xff]  }
  0x12   :  { %v37_v54 = vrot.slane %v14_v52, %v5432_v49  ;;  %v30_v55 = vcombine.high %v14_v52, %v14_v52  ;;  %v4569_v56 = vld [vmem:[%s6994_s1 + $0x1c0] ss:$8 sps:$4 sm:$0xff]   ;;  %v4572_v58 = vld [vmem:[%s6994_s1 + $0x1b4] ss:$8 sps:$4 sm:$0xff]   ;;  %v4575_v0 = vld [vmem:[%s6994_s1 + $0x1b0] ss:$8 sps:$4 sm:$0xff]  }
  0x13   :  { %3323 = vmatpush1.bf16.msra.mxu0 %v4526_v18  ;;  %v4576_v1 = vld [vmem:[%s6994_s1 + $0xa4] ss:$8 sps:$4 sm:$0xff]   ;;  %v4580_v4 = vld [vmem:[%s6994_s1 + $0xa0] ss:$8 sps:$4 sm:$0xff]   ;;  %v4582_v6 = vld [vmem:[%s6994_s1 + $0x94] ss:$8 sps:$4 sm:$0xff]  }
  0x14   :  { %3364 = vmatpush1.bf16.msra.mxu1 %v4527_v19  ;;  %3324 = vmatprep.subr.bf16.mxu0 %v4528_v20  ;;  %v45_v59 = vcombine.high %v37_v54, %v37_v54  ;;  %v44_v60 = vrot.slane %v30_v55, %v5432_v49  ;;  %v4578_v2 = vld [vmem:[%s6994_s1 + $0x1a4] ss:$8 sps:$4 sm:$0xff]   ;;  %v4581_v5 = vld [vmem:[%s6994_s1 + $0x1a0] ss:$8 sps:$4 sm:$0xff]   ;;  %v4584_v7 = vld [vmem:[%s6994_s1 + $0x194] ss:$8 sps:$4 sm:$0xff]   ;;  %v198_v16 = vpack.c.bf16 %v37_v54, %v37_v54 }
  0x15   :  { %3365 = vmatprep.subr.bf16.mxu1 %v4530_v21  ;;  %v4586_v8 = vld [vmem:[%s6994_s1 + $0x90] ss:$8 sps:$4 sm:$0xff]   ;;  %v4588_v10 = vld [vmem:[%s6994_s1 + $0x84] ss:$8 sps:$4 sm:$0xff]   ;;  %v4592_v12 = vld [vmem:[%s6994_s1 + $0x80] ss:$8 sps:$4 sm:$0xff]  }
  0x16   :  { %v199_v62 = vpack.c.bf16 %v45_v59, %v45_v59  ;;  %v46_v63 = vcombine.high %v44_v60, %v44_v60  ;;  %v4587_v9 = vld [vmem:[%s6994_s1 + $0x190] ss:$8 sps:$4 sm:$0xff]   ;;  %v4590_v11 = vld [vmem:[%s6994_s1 + $0x184] ss:$8 sps:$4 sm:$0xff]   ;;  %v4593_v13 = vld [vmem:[%s6994_s1 + $0x180] ss:$8 sps:$4 sm:$0xff]   ;;  %v200_v17 = vpack.c.bf16 %v44_v60, %v44_v60 }
  0x17   :  { %3325 = vmatpush1.bf16.msra.mxu0 %v4532_v22  ;;  %v4597_v14 = vld [vmem:[%s6994_s1 + $0x274] ss:$8 sps:$4 sm:$0xff]   ;;  %v4595_v18 = vld [vmem:[%s6994_s1 + $0x270] ss:$8 sps:$4 sm:$0xff]   ;;  %v4603_v20 = vld [vmem:[%s6994_s1 + $0x264] ss:$8 sps:$4 sm:$0xff]  }
  0x18   :  { %3366 = vmatpush1.bf16.msra.mxu1 %v4533_v23  ;;  %3326 = vmatprep.subr.bf16.mxu0 %v4534_v24  ;;  %v201_v3 = vpack.c.bf16 %v46_v63, %v46_v63  ;;  %v4600_v15 = vld [vmem:[%s6994_s1 + $0x374] ss:$8 sps:$4 sm:$0xff]   ;;  %v4598_v19 = vld [vmem:[%s6994_s1 + $0x370] ss:$8 sps:$4 sm:$0xff]   ;;  %v4606_v21 = vld [vmem:[%s6994_s1 + $0x364] ss:$8 sps:$4 sm:$0xff]  }
  0x19   :  { %3367 = vmatprep.subr.bf16.mxu1 %v4536_v25  ;;  %3346 = vmatprep.mubr.bf16.mxu0 %v199_v62  ;;  %v4601_v22 = vld [vmem:[%s6994_s1 + $0x260] ss:$8 sps:$4 sm:$0xff]   ;;  %v4609_v24 = vld [vmem:[%s6994_s1 + $0x254] ss:$8 sps:$4 sm:$0xff]   ;;  %v4627_v36 = vld [vmem:[%s6994_s1 + $0x224] ss:$8 sps:$4 sm:$0xff]  }
  0x1a   :  { %3387 = vmatprep.mubr.bf16.mxu1 %v201_v3  ;;  %v4604_v23 = vld [vmem:[%s6994_s1 + $0x360] ss:$8 sps:$4 sm:$0xff]   ;;  %v4612_v25 = vld [vmem:[%s6994_s1 + $0x354] ss:$8 sps:$4 sm:$0xff]   ;;  %v4630_v37 = vld [vmem:[%s6994_s1 + $0x324] ss:$8 sps:$4 sm:$0xff]  }
  0x1b   :  { %3327 = vmatpush1.bf16.msra.mxu0 %v4538_v26  ;;  %v4607_v26 = vld [vmem:[%s6994_s1 + $0x250] ss:$8 sps:$4 sm:$0xff]   ;;  %v4625_v38 = vld [vmem:[%s6994_s1 + $0x220] ss:$8 sps:$4 sm:$0xff]   ;;  %v4642_v52 = vld [vmem:[%s6994_s1 + $0x304] ss:$8 sps:$4 sm:$0xff]  }
  0x1c   :  { %3368 = vmatpush1.bf16.msra.mxu1 %v4539_v27  ;;  %3328 = vmatprep.subr.bf16.mxu0 %v4540_v28  ;;  %v4610_v27 = vld [vmem:[%s6994_s1 + $0x350] ss:$8 sps:$4 sm:$0xff]   ;;  %v4615_v28 = vld [vmem:[%s6994_s1 + $0x244] ss:$8 sps:$4 sm:$0xff]   ;;  %v4637_v55 = vld [vmem:[%s6994_s1 + $0x200] ss:$8 sps:$4 sm:$0xff]  }
  0x1d   :  { %3369 = vmatprep.subr.bf16.mxu1 %v4542_v29  ;;  %v4618_v29 = vld [vmem:[%s6994_s1 + $0x344] ss:$8 sps:$4 sm:$0xff]   ;;  %v4648_v59 = vld [vmem:[%s6994_s1 + $0x3f4] ss:$8 sps:$4 sm:$0xff]   ;;  %v4643_v60 = vld [vmem:[%s6994_s1 + $0x2f0] ss:$8 sps:$4 sm:$0xff]  }
  0x1e   :  { %v15_v42 = vld [vmem:[%s6995_s0 + $0x8] sm:$0xff]  ;;  %v4660_v3 = vld [vmem:[%s6994_s1 + $0x3d4] ss:$8 sps:$4 sm:$0xff]  }
  0x1f   :  { %3329 = vmatpush1.bf16.msra.mxu0 %v4544_v30  ;;  %v4613_v30 = vld [vmem:[%s6994_s1 + $0x240] ss:$8 sps:$4 sm:$0xff]   ;;  %v4651_v62 = vld [vmem:[%s6994_s1 + $0x2e4] ss:$8 sps:$4 sm:$0xff]  }
  0x20   :  { %3370 = vmatpush1.bf16.msra.mxu1 %v4545_v31  ;;  %3330 = vmatprep.subr.bf16.mxu0 %v4546_v32  ;;  %v4616_v31 = vld [vmem:[%s6994_s1 + $0x340] ss:$8 sps:$4 sm:$0xff]   ;;  %v4621_v32 = vld [vmem:[%s6994_s1 + $0x234] ss:$8 sps:$4 sm:$0xff]   ;;  %v4654_v63 = vld [vmem:[%s6994_s1 + $0x3e4] ss:$8 sps:$4 sm:$0xff]  }
  0x21   :  { %3371 = vmatprep.subr.bf16.mxu1 %v4548_v33  ;;  %v4624_v33 = vld [vmem:[%s6994_s1 + $0x334] ss:$8 sps:$4 sm:$0xff]  }
  0x23   :  { %3331 = vmatpush2.bf16.msra.mxu0 %v4550_v34  ;;  %v4619_v34 = vld [vmem:[%s6994_s1 + $0x230] ss:$8 sps:$4 sm:$0xff]  }
  0x24   :  { %3372 = vmatpush2.bf16.msra.mxu1 %v4551_v35  ;;  %3332 = vmatprep.subr.bf16.mxu0 %v4552_v39  ;;  %v4622_v35 = vld [vmem:[%s6994_s1 + $0x330] ss:$8 sps:$4 sm:$0xff]   ;;  %v4628_v39 = vld [vmem:[%s6994_s1 + $0x320] ss:$8 sps:$4 sm:$0xff]  }
  0x25   :  { %3373 = vmatprep.subr.bf16.mxu1 %v4554_v40  ;;  %v4633_v40 = vld [vmem:[%s6994_s1 + $0x214] ss:$8 sps:$4 sm:$0xff]  }
  0x27   :  { %3333 = vmatpush2.bf16.msra.mxu0 %v4556_v41  ;;  %v4636_v41 = vld [vmem:[%s6994_s1 + $0x314] ss:$8 sps:$4 sm:$0xff]  }
  0x28   :  { %3374 = vmatpush2.bf16.msra.mxu1 %v4557_v44  ;;  %3334 = vmatprep.subr.bf16.mxu0 %v4558_v45  ;;  %v5581_v44 = vrot.slane %v15_v42, %v5432_v49  ;;  %v47_v45 = vcombine.high %v15_v42, %v15_v42  ;;  %v4709_v42 = vld [vmem:[%s6994_s1 + $0x554] ss:$8 sps:$4 sm:$0xff]  }
  0x29   :  { %3375 = vmatprep.subr.bf16.mxu1 %v4560_v46  ;;  %v4631_v46 = vld [vmem:[%s6994_s1 + $0x210] ss:$8 sps:$4 sm:$0xff]  }
  0x2b   :  { %3335 = vmatpush2.bf16.msra.mxu0 %v4562_v47  ;;  %v4634_v47 = vld [vmem:[%s6994_s1 + $0x310] ss:$8 sps:$4 sm:$0xff]  }
  0x2c   :  { %3376 = vmatpush2.bf16.msra.mxu1 %v4563_v48  ;;  %3336 = vmatprep.subr.bf16.mxu0 %v4564_v50  ;;  %v62_v48 = vcombine.high %v5581_v44, %v5581_v44  ;;  %v5592_v50 = vrot.slane %v47_v45, %v5432_v49 }
  0x2d   :  { %3377 = vmatprep.subr.bf16.mxu1 %v4566_v51  ;;  %v4639_v51 = vld [vmem:[%s6994_s1 + $0x204] ss:$8 sps:$4 sm:$0xff]  }
  0x2e   :  { %v63_v54 = vcombine.high %v5592_v50, %v5592_v50 }
  0x2f   :  { %3337 = vmatpush2.bf16.msra.mxu0 %v4568_v53  ;;  %v203_v53 = vpack.c.bf16 %v62_v48, %v62_v48  ;;  %v4707_v48 = vld [vmem:[%s6994_s1 + $0x550] ss:$8 sps:$4 sm:$0xff]  }
  0x30   :  { %3378 = vmatpush2.bf16.msra.mxu1 %v4569_v56  ;;  %3338 = vmatprep.subr.bf16.mxu0 %v4570_v57  ;;  %v4640_v56 = vld [vmem:[%s6994_s1 + $0x300] ss:$8 sps:$4 sm:$0xff]   ;;  %v205_v57 = vpack.c.bf16 %v63_v54, %v63_v54  ;;  %v4718_v54 = vld [vmem:[%s6994_s1 + $0x434] ss:$8 sps:$4 sm:$0xff]  }
  0x31   :  { %3379 = vmatprep.subr.bf16.mxu1 %v4572_v58  ;;  %v4645_v58 = vld [vmem:[%s6994_s1 + $0x2f4] ss:$8 sps:$4 sm:$0xff]  }
  0x33   :  { %3339 = vmatpush2.bf16.msra.mxu0 %v4574_v61  ;;  %v4646_v61 = vld [vmem:[%s6994_s1 + $0x3f0] ss:$8 sps:$4 sm:$0xff]  }
  0x34   :  { %3380 = vmatpush2.bf16.msra.mxu1 %v4575_v0  ;;  %3340 = vmatprep.subr.bf16.mxu0 %v4576_v1  ;;  %v4649_v0 = vld [vmem:[%s6994_s1 + $0x2e0] ss:$8 sps:$4 sm:$0xff]  }
  0x35   :  { %3381 = vmatprep.subr.bf16.mxu1 %v4578_v2  ;;  %v4652_v1 = vld [vmem:[%s6994_s1 + $0x3e0] ss:$8 sps:$4 sm:$0xff]   ;;  %v4657_v2 = vld [vmem:[%s6994_s1 + $0x2d4] ss:$8 sps:$4 sm:$0xff]  }
  0x37   :  { %3341 = vmatpush2.bf16.msra.mxu0 %v4580_v4  ;;  %v4655_v4 = vld [vmem:[%s6994_s1 + $0x2d0] ss:$8 sps:$4 sm:$0xff]  }
  0x38   :  { %3382 = vmatpush2.bf16.msra.mxu1 %v4581_v5  ;;  %3342 = vmatprep.subr.bf16.mxu0 %v4582_v6  ;;  %v4658_v5 = vld [vmem:[%s6994_s1 + $0x3d0] ss:$8 sps:$4 sm:$0xff]   ;;  %v4663_v6 = vld [vmem:[%s6994_s1 + $0x2c4] ss:$8 sps:$4 sm:$0xff]  }
  0x39   :  { %3383 = vmatprep.subr.bf16.mxu1 %v4584_v7  ;;  %v4666_v7 = vld [vmem:[%s6994_s1 + $0x3c4] ss:$8 sps:$4 sm:$0xff]  }
  0x3b   :  { %3343 = vmatpush2.bf16.msra.mxu0 %v4586_v8  ;;  %v4661_v8 = vld [vmem:[%s6994_s1 + $0x2c0] ss:$8 sps:$4 sm:$0xff]  }
  0x3c   :  { %3384 = vmatpush2.bf16.msra.mxu1 %v4587_v9  ;;  %3344 = vmatprep.subr.bf16.mxu0 %v4588_v10  ;;  %v4664_v9 = vld [vmem:[%s6994_s1 + $0x3c0] ss:$8 sps:$4 sm:$0xff]   ;;  %v4669_v10 = vld [vmem:[%s6994_s1 + $0x2b4] ss:$8 sps:$4 sm:$0xff]  }
  0x3d   :  { %3385 = vmatprep.subr.bf16.mxu1 %v4590_v11  ;;  %v4672_v11 = vld [vmem:[%s6994_s1 + $0x3b4] ss:$8 sps:$4 sm:$0xff]  }
  0x3f   :  { %3345 = vmatpush2.bf16.msra.mxu0 %v4592_v12  ;;  %v4667_v12 = vld [vmem:[%s6994_s1 + $0x2b0] ss:$8 sps:$4 sm:$0xff]  }
  0x40   :  { %3386 = vmatpush2.bf16.msra.mxu1 %v4593_v13  ;;  %3396 = vmatprep.subr.bf16.mxu0 %v4597_v14  ;;  %v4670_v13 = vld [vmem:[%s6994_s1 + $0x3b0] ss:$8 sps:$4 sm:$0xff]   ;;  %v4675_v14 = vld [vmem:[%s6994_s1 + $0x2a4] ss:$8 sps:$4 sm:$0xff]  }
  0x41   :  { %3437 = vmatprep.subr.bf16.mxu1 %v4600_v15  ;;  %v4678_v15 = vld [vmem:[%s6994_s1 + $0x3a4] ss:$8 sps:$4 sm:$0xff]  }
  0x42   :  { %3347 = vmatmul.mubr.bf16.vlgmr.msra.gmra.mxu0 %v198_v16  ;;  %v4673_v16 = vld [vmem:[%s6994_s1 + $0x2a0] ss:$8 sps:$4 sm:$0xff]  }
  0x43   :  { %3388 = vmatmul.mubr.bf16.vlgmr.msra.gmra.mxu1 %v200_v17  ;;  %3397 = vmatpush1.bf16.msra.mxu0 %v4595_v18  ;;  %v4676_v17 = vld [vmem:[%s6994_s1 + $0x3a0] ss:$8 sps:$4 sm:$0xff]   ;;  %v4681_v18 = vld [vmem:[%s6994_s1 + $0x294] ss:$8 sps:$4 sm:$0xff]  }
  0x44   :  { %3438 = vmatpush1.bf16.msra.mxu1 %v4598_v19  ;;  %3398 = vmatprep.subr.bf16.mxu0 %v4603_v20  ;;  %v4684_v19 = vld [vmem:[%s6994_s1 + $0x394] ss:$8 sps:$4 sm:$0xff]   ;;  %v4679_v20 = vld [vmem:[%s6994_s1 + $0x290] ss:$8 sps:$4 sm:$0xff]  }
  0x45   :  { %3439 = vmatprep.subr.bf16.mxu1 %v4606_v21  ;;  %3428 = vmatprep.mubr.bf16.mxu0 %v203_v53  ;;  %v4682_v21 = vld [vmem:[%s6994_s1 + $0x390] ss:$8 sps:$4 sm:$0xff]   ;;  %v4713_v53 = vld [vmem:[%s6994_s1 + $0x540] ss:$8 sps:$4 sm:$0xff]  }
  0x46   :  { %3469 = vmatprep.mubr.bf16.mxu1 %v205_v57  ;;  %v4719_v57 = vld [vmem:[%s6994_s1 + $0x530] ss:$8 sps:$4 sm:$0xff]  }
  0x47   :  { %3399 = vmatpush1.bf16.msra.mxu0 %v4601_v22  ;;  %v4687_v22 = vld [vmem:[%s6994_s1 + $0x284] ss:$8 sps:$4 sm:$0xff]  }
  0x48   :  { %3440 = vmatpush1.bf16.msra.mxu1 %v4604_v23  ;;  %3400 = vmatprep.subr.bf16.mxu0 %v4609_v24  ;;  %v4690_v23 = vld [vmem:[%s6994_s1 + $0x384] ss:$8 sps:$4 sm:$0xff]   ;;  %v4685_v24 = vld [vmem:[%s6994_s1 + $0x280] ss:$8 sps:$4 sm:$0xff]  }
  0x49   :  { %3441 = vmatprep.subr.bf16.mxu1 %v4612_v25  ;;  %v4688_v25 = vld [vmem:[%s6994_s1 + $0x380] ss:$8 sps:$4 sm:$0xff]  }
  0x4b   :  { %3401 = vmatpush1.bf16.msra.mxu0 %v4607_v26  ;;  %v4694_v26 = vld [vmem:[%s6994_s1 + $0x474] ss:$8 sps:$4 sm:$0xff]  }
  0x4c   :  { %3442 = vmatpush1.bf16.msra.mxu1 %v4610_v27  ;;  %3402 = vmatprep.subr.bf16.mxu0 %v4615_v28  ;;  %v4697_v27 = vld [vmem:[%s6994_s1 + $0x574] ss:$8 sps:$4 sm:$0xff]   ;;  %v202_v28 = vpack.c.bf16 %v5581_v44, %v5581_v44 }
  0x4d   :  { %3443 = vmatprep.subr.bf16.mxu1 %v4618_v29  ;;  %v204_v29 = vpack.c.bf16 %v5592_v50, %v5592_v50  ;;  %v4712_v50 = vld [vmem:[%s6994_s1 + $0x444] ss:$8 sps:$4 sm:$0xff]  }
  0x4f   :  { %3403 = vmatpush1.bf16.msra.mxu0 %v4613_v30  ;;  %v4692_v30 = vld [vmem:[%s6994_s1 + $0x470] ss:$8 sps:$4 sm:$0xff]  }
  0x50   :  { %3444 = vmatpush1.bf16.msra.mxu1 %v4616_v31  ;;  %3404 = vmatprep.subr.bf16.mxu0 %v4621_v32  ;;  %v4695_v31 = vld [vmem:[%s6994_s1 + $0x570] ss:$8 sps:$4 sm:$0xff]   ;;  %v4700_v32 = vld [vmem:[%s6994_s1 + $0x464] ss:$8 sps:$4 sm:$0xff]  }
  0x51   :  { %3445 = vmatprep.subr.bf16.mxu1 %v4624_v33  ;;  %v16_v33 = vld [vmem:[%s6995_s0 + $0x10] sm:$0xff] }
  0x53   :  { %3405 = vmatpush1.bf16.msra.mxu0 %v4619_v34  ;;  %v4703_v34 = vld [vmem:[%s6994_s1 + $0x564] ss:$8 sps:$4 sm:$0xff]  }
  0x54   :  { %3446 = vmatpush1.bf16.msra.mxu1 %v4622_v35  ;;  %3406 = vmatprep.subr.bf16.mxu0 %v4627_v36  ;;  %v5730_v35 = vrot.slane %v16_v33, %v5432_v49  ;;  %v64_v36 = vcombine.high %v16_v33, %v16_v33 }
  0x55   :  { %3447 = vmatprep.subr.bf16.mxu1 %v4630_v37  ;;  %v4698_v37 = vld [vmem:[%s6994_s1 + $0x460] ss:$8 sps:$4 sm:$0xff]  }
  0x57   :  { %3407 = vmatpush1.bf16.msra.mxu0 %v4625_v38  ;;  %v79_v38 = vcombine.high %v5730_v35, %v5730_v35 }
  0x58   :  { %3448 = vmatpush1.bf16.msra.mxu1 %v4628_v39  ;;  %3408 = vmatprep.subr.bf16.mxu0 %v4633_v40  ;;  %v5738_v39 = vrot.slane %v64_v36, %v5432_v49  ;;  %v4701_v40 = vld [vmem:[%s6994_s1 + $0x560] ss:$8 sps:$4 sm:$0xff]   ;;  %v4779_v36 = vld [vmem:[%s6994_s1 + $0x590] ss:$8 sps:$4 sm:$0xff]  }
  0x59   :  { %3449 = vmatprep.subr.bf16.mxu1 %v4636_v41  ;;  %v4706_v41 = vld [vmem:[%s6994_s1 + $0x454] ss:$8 sps:$4 sm:$0xff]   ;;  %v207_v44 = vpack.c.bf16 %v79_v38, %v79_v38  ;;  %v4787_v38 = vld [vmem:[%s6994_s1 + $0x584] ss:$8 sps:$4 sm:$0xff]  }
  0x5a   :  { %v80_v45 = vcombine.high %v5738_v39, %v5738_v39 }
  0x5b   :  { %3409 = vmatpush1.bf16.msra.mxu0 %v4631_v46  ;;  %v4704_v46 = vld [vmem:[%s6994_s1 + $0x450] ss:$8 sps:$4 sm:$0xff]  }
  0x5c   :  { %3450 = vmatpush1.bf16.msra.mxu1 %v4634_v47  ;;  %3410 = vmatprep.subr.bf16.mxu0 %v4639_v51  ;;  %v209_v47 = vpack.c.bf16 %v80_v45, %v80_v45  ;;  %v4715_v51 = vld [vmem:[%s6994_s1 + $0x544] ss:$8 sps:$4 sm:$0xff]   ;;  %v4791_v45 = vld [vmem:[%s6994_s1 + $0x674] ss:$8 sps:$4 sm:$0xff]  }
  0x5d   :  { %3451 = vmatprep.subr.bf16.mxu1 %v4642_v52  ;;  %v4710_v52 = vld [vmem:[%s6994_s1 + $0x440] ss:$8 sps:$4 sm:$0xff]  }
  0x5f   :  { %3411 = vmatpush1.bf16.msra.mxu0 %v4637_v55  ;;  %v4721_v55 = vld [vmem:[%s6994_s1 + $0x534] ss:$8 sps:$4 sm:$0xff]  }
  0x60   :  { %3452 = vmatpush1.bf16.msra.mxu1 %v4640_v56  ;;  %3412 = vmatprep.subr.bf16.mxu0 %v4645_v58  ;;  %v4716_v56 = vld [vmem:[%s6994_s1 + $0x430] ss:$8 sps:$4 sm:$0xff]   ;;  %v4724_v58 = vld [vmem:[%s6994_s1 + $0x424] ss:$8 sps:$4 sm:$0xff]  }
  0x61   :  { %3453 = vmatprep.subr.bf16.mxu1 %v4648_v59  ;;  %v4727_v59 = vld [vmem:[%s6994_s1 + $0x524] ss:$8 sps:$4 sm:$0xff]  }
  0x63   :  { %3413 = vmatpush2.bf16.msra.mxu0 %v4643_v60  ;;  %v4722_v60 = vld [vmem:[%s6994_s1 + $0x420] ss:$8 sps:$4 sm:$0xff]  }
  0x64   :  { %3454 = vmatpush2.bf16.msra.mxu1 %v4646_v61  ;;  %3414 = vmatprep.subr.bf16.mxu0 %v4651_v62  ;;  %v4725_v61 = vld [vmem:[%s6994_s1 + $0x520] ss:$8 sps:$4 sm:$0xff]   ;;  %v4730_v62 = vld [vmem:[%s6994_s1 + $0x414] ss:$8 sps:$4 sm:$0xff]  }
  0x65   :  { %3455 = vmatprep.subr.bf16.mxu1 %v4654_v63  ;;  %v4733_v63 = vld [vmem:[%s6994_s1 + $0x514] ss:$8 sps:$4 sm:$0xff]  }
  0x67   :  { %3415 = vmatpush2.bf16.msra.mxu0 %v4649_v0  ;;  %v4728_v0 = vld [vmem:[%s6994_s1 + $0x410] ss:$8 sps:$4 sm:$0xff]  }
  0x68   :  { %3456 = vmatpush2.bf16.msra.mxu1 %v4652_v1  ;;  %3416 = vmatprep.subr.bf16.mxu0 %v4657_v2  ;;  %v4731_v1 = vld [vmem:[%s6994_s1 + $0x510] ss:$8 sps:$4 sm:$0xff]   ;;  %v4736_v2 = vld [vmem:[%s6994_s1 + $0x404] ss:$8 sps:$4 sm:$0xff]  }
  0x69   :  { %3457 = vmatprep.subr.bf16.mxu1 %v4660_v3  ;;  %v4739_v3 = vld [vmem:[%s6994_s1 + $0x504] ss:$8 sps:$4 sm:$0xff]  }
  0x6b   :  { %3417 = vmatpush2.bf16.msra.mxu0 %v4655_v4  ;;  %v4734_v4 = vld [vmem:[%s6994_s1 + $0x400] ss:$8 sps:$4 sm:$0xff]  }
  0x6c   :  { %3458 = vmatpush2.bf16.msra.mxu1 %v4658_v5  ;;  %3418 = vmatprep.subr.bf16.mxu0 %v4663_v6  ;;  %v4737_v5 = vld [vmem:[%s6994_s1 + $0x500] ss:$8 sps:$4 sm:$0xff]   ;;  %v4742_v6 = vld [vmem:[%s6994_s1 + $0x4f4] ss:$8 sps:$4 sm:$0xff]  }
  0x6d   :  { %3459 = vmatprep.subr.bf16.mxu1 %v4666_v7  ;;  %v4745_v7 = vld [vmem:[%s6994_s1 + $0x5f4] ss:$8 sps:$4 sm:$0xff]  }
  0x6f   :  { %3419 = vmatpush2.bf16.msra.mxu0 %v4661_v8  ;;  %v4740_v8 = vld [vmem:[%s6994_s1 + $0x4f0] ss:$8 sps:$4 sm:$0xff]  }
  0x70   :  { %3460 = vmatpush2.bf16.msra.mxu1 %v4664_v9  ;;  %3420 = vmatprep.subr.bf16.mxu0 %v4669_v10  ;;  %v4743_v9 = vld [vmem:[%s6994_s1 + $0x5f0] ss:$8 sps:$4 sm:$0xff]   ;;  %v4748_v10 = vld [vmem:[%s6994_s1 + $0x4e4] ss:$8 sps:$4 sm:$0xff]  }
  0x71   :  { %3461 = vmatprep.subr.bf16.mxu1 %v4672_v11  ;;  %v4751_v11 = vld [vmem:[%s6994_s1 + $0x5e4] ss:$8 sps:$4 sm:$0xff]  }
  0x73   :  { %3421 = vmatpush2.bf16.msra.mxu0 %v4667_v12  ;;  %v4746_v12 = vld [vmem:[%s6994_s1 + $0x4e0] ss:$8 sps:$4 sm:$0xff]  }
  0x74   :  { %3462 = vmatpush2.bf16.msra.mxu1 %v4670_v13  ;;  %3422 = vmatprep.subr.bf16.mxu0 %v4675_v14  ;;  %v4749_v13 = vld [vmem:[%s6994_s1 + $0x5e0] ss:$8 sps:$4 sm:$0xff]   ;;  %v4754_v14 = vld [vmem:[%s6994_s1 + $0x4d4] ss:$8 sps:$4 sm:$0xff]  }
  0x75   :  { %3463 = vmatprep.subr.bf16.mxu1 %v4678_v15  ;;  %v4757_v15 = vld [vmem:[%s6994_s1 + $0x5d4] ss:$8 sps:$4 sm:$0xff]  }
  0x77   :  { %3423 = vmatpush2.bf16.msra.mxu0 %v4673_v16  ;;  %v4752_v16 = vld [vmem:[%s6994_s1 + $0x4d0] ss:$8 sps:$4 sm:$0xff]  }
  0x78   :  { %3464 = vmatpush2.bf16.msra.mxu1 %v4676_v17  ;;  %3424 = vmatprep.subr.bf16.mxu0 %v4681_v18  ;;  %v4755_v17 = vld [vmem:[%s6994_s1 + $0x5d0] ss:$8 sps:$4 sm:$0xff]   ;;  %v4760_v18 = vld [vmem:[%s6994_s1 + $0x4c4] ss:$8 sps:$4 sm:$0xff]  }
  0x79   :  { %3465 = vmatprep.subr.bf16.mxu1 %v4684_v19  ;;  %v4763_v19 = vld [vmem:[%s6994_s1 + $0x5c4] ss:$8 sps:$4 sm:$0xff]  }
  0x7b   :  { %3425 = vmatpush2.bf16.msra.mxu0 %v4679_v20  ;;  %v4758_v20 = vld [vmem:[%s6994_s1 + $0x4c0] ss:$8 sps:$4 sm:$0xff]  }
  0x7c   :  { %3466 = vmatpush2.bf16.msra.mxu1 %v4682_v21  ;;  %3426 = vmatprep.subr.bf16.mxu0 %v4687_v22  ;;  %v4761_v21 = vld [vmem:[%s6994_s1 + $0x5c0] ss:$8 sps:$4 sm:$0xff]   ;;  %v4766_v22 = vld [vmem:[%s6994_s1 + $0x4b4] ss:$8 sps:$4 sm:$0xff]  }
  0x7d   :  { %3467 = vmatprep.subr.bf16.mxu1 %v4690_v23  ;;  %v4769_v23 = vld [vmem:[%s6994_s1 + $0x5b4] ss:$8 sps:$4 sm:$0xff]  }
  0x7f   :  { %3427 = vmatpush2.bf16.msra.mxu0 %v4685_v24  ;;  %v4764_v24 = vld [vmem:[%s6994_s1 + $0x4b0] ss:$8 sps:$4 sm:$0xff]  }
  0x80   :  { %3468 = vmatpush2.bf16.msra.mxu1 %v4688_v25  ;;  %3478 = vmatprep.subr.bf16.mxu0 %v4694_v26  ;;  %v4767_v25 = vld [vmem:[%s6994_s1 + $0x5b0] ss:$8 sps:$4 sm:$0xff]   ;;  %v4772_v26 = vld [vmem:[%s6994_s1 + $0x4a4] ss:$8 sps:$4 sm:$0xff]  }
  0x81   :  { %3519 = vmatprep.subr.bf16.mxu1 %v4697_v27  ;;  %v4775_v27 = vld [vmem:[%s6994_s1 + $0x5a4] ss:$8 sps:$4 sm:$0xff]  }
  0x82   :  { %3429 = vmatmul.mubr.bf16.vlgmr.msra.gmra.mxu0 %v202_v28  ;;  %v4770_v28 = vld [vmem:[%s6994_s1 + $0x4a0] ss:$8 sps:$4 sm:$0xff]  }
  0x83   :  { %3470 = vmatmul.mubr.bf16.vlgmr.msra.gmra.mxu1 %v204_v29  ;;  %3479 = vmatpush1.bf16.msra.mxu0 %v4692_v30  ;;  %v17_v29 = vld [vmem:[%s6995_s0 + $0x18] sm:$0xff]  ;;  %v4773_v30 = vld [vmem:[%s6994_s1 + $0x5a0] ss:$8 sps:$4 sm:$0xff]  }
  0x84   :  { %3520 = vmatpush1.bf16.msra.mxu1 %v4695_v31  ;;  %3480 = vmatprep.subr.bf16.mxu0 %v4700_v32  ;;  %v4778_v31 = vld [vmem:[%s6994_s1 + $0x494] ss:$8 sps:$4 sm:$0xff]   ;;  %v81_v33 = vcombine.high %v17_v29, %v17_v29 }
  0x85   :  { %3521 = vmatprep.subr.bf16.mxu1 %v4703_v34  ;;  %3510 = vmatprep.mubr.bf16.mxu0 %v207_v44  ;;  %v4781_v32 = vld [vmem:[%s6994_s1 + $0x594] ss:$8 sps:$4 sm:$0xff]   ;;  %v4776_v34 = vld [vmem:[%s6994_s1 + $0x490] ss:$8 sps:$4 sm:$0xff]   ;;  %v4785_v44 = vld [vmem:[%s6994_s1 + $0x580] ss:$8 sps:$4 sm:$0xff]  }
  0x86   :  { %3551 = vmatprep.mubr.bf16.mxu1 %v209_v47 }
  0x87   :  { %3481 = vmatpush1.bf16.msra.mxu0 %v4698_v37  ;;  %v4784_v37 = vld [vmem:[%s6994_s1 + $0x484] ss:$8 sps:$4 sm:$0xff]  }
  0x88   :  { %3522 = vmatpush1.bf16.msra.mxu1 %v4701_v40  ;;  %3482 = vmatprep.subr.bf16.mxu0 %v4706_v41  ;;  %v5911_v40 = vrot.slane %v17_v29, %v5432_v49  ;;  %v5914_v41 = vrot.slane %v81_v33, %v5432_v49  ;;  %v4852_v29 = vld [vmem:[%s6994_s1 + $0x7d0] ss:$8 sps:$4 sm:$0xff]   ;;  %v4858_v33 = vld [vmem:[%s6994_s1 + $0x7c0] ss:$8 sps:$4 sm:$0xff]  }
  0x89   :  { %3523 = vmatprep.subr.bf16.mxu1 %v4709_v42  ;;  %v4782_v42 = vld [vmem:[%s6994_s1 + $0x480] ss:$8 sps:$4 sm:$0xff]  }
  0x8a   :  { %v96_v47 = vcombine.high %v5911_v40, %v5911_v40 }
  0x8b   :  { %3483 = vmatpush1.bf16.msra.mxu0 %v4704_v46  ;;  %v4794_v46 = vld [vmem:[%s6994_s1 + $0x774] ss:$8 sps:$4 sm:$0xff]  }
  0x8c   :  { %3524 = vmatpush1.bf16.msra.mxu1 %v4707_v48  ;;  %3484 = vmatprep.subr.bf16.mxu0 %v4712_v50  ;;  %v97_v48 = vcombine.high %v5914_v41, %v5914_v41  ;;  %v206_v50 = vpack.c.bf16 %v5730_v35, %v5730_v35  ;;  %v4800_v35 = vld [vmem:[%s6994_s1 + $0x764] ss:$8 sps:$4 sm:$0xff]  }
  0x8d   :  { %3525 = vmatprep.subr.bf16.mxu1 %v4715_v51  ;;  %v208_v51 = vpack.c.bf16 %v5738_v39, %v5738_v39  ;;  %v211_v39 = vpack.c.bf16 %v96_v47, %v96_v47  ;;  %v4870_v47 = vld [vmem:[%s6994_s1 + $0x7a0] ss:$8 sps:$4 sm:$0xff]  }
  0x8f   :  { %3485 = vmatpush1.bf16.msra.mxu0 %v4710_v52  ;;  %v4789_v52 = vld [vmem:[%s6994_s1 + $0x670] ss:$8 sps:$4 sm:$0xff]  }
  0x90   :  { %3526 = vmatpush1.bf16.msra.mxu1 %v4713_v53  ;;  %3486 = vmatprep.subr.bf16.mxu0 %v4718_v54  ;;  %v4792_v53 = vld [vmem:[%s6994_s1 + $0x770] ss:$8 sps:$4 sm:$0xff]   ;;  %v4797_v54 = vld [vmem:[%s6994_s1 + $0x664] ss:$8 sps:$4 sm:$0xff]  }
  0x91   :  { %3527 = vmatprep.subr.bf16.mxu1 %v4721_v55  ;;  %v213_v55 = vpack.c.bf16 %v97_v48, %v97_v48  ;;  %v4875_v48 = vld [vmem:[%s6994_s1 + $0x694] ss:$8 sps:$4 sm:$0xff]  }
  0x93   :  { %3487 = vmatpush1.bf16.msra.mxu0 %v4716_v56  ;;  %v4795_v56 = vld [vmem:[%s6994_s1 + $0x660] ss:$8 sps:$4 sm:$0xff]  }
  0x94   :  { %3528 = vmatpush1.bf16.msra.mxu1 %v4719_v57  ;;  %3488 = vmatprep.subr.bf16.mxu0 %v4724_v58  ;;  %v4798_v57 = vld [vmem:[%s6994_s1 + $0x760] ss:$8 sps:$4 sm:$0xff]   ;;  %v4803_v58 = vld [vmem:[%s6994_s1 + $0x654] ss:$8 sps:$4 sm:$0xff]  }
  0x95   :  { %3529 = vmatprep.subr.bf16.mxu1 %v4727_v59  ;;  %v4806_v59 = vld [vmem:[%s6994_s1 + $0x754] ss:$8 sps:$4 sm:$0xff]  }
  0x97   :  { %3489 = vmatpush1.bf16.msra.mxu0 %v4722_v60  ;;  %v4801_v60 = vld [vmem:[%s6994_s1 + $0x650] ss:$8 sps:$4 sm:$0xff]  }
  0x98   :  { %3530 = vmatpush1.bf16.msra.mxu1 %v4725_v61  ;;  %3490 = vmatprep.subr.bf16.mxu0 %v4730_v62  ;;  %v4804_v61 = vld [vmem:[%s6994_s1 + $0x750] ss:$8 sps:$4 sm:$0xff]   ;;  %v4809_v62 = vld [vmem:[%s6994_s1 + $0x644] ss:$8 sps:$4 sm:$0xff]  }
  0x99   :  { %3531 = vmatprep.subr.bf16.mxu1 %v4733_v63  ;;  %v4812_v63 = vld [vmem:[%s6994_s1 + $0x744] ss:$8 sps:$4 sm:$0xff]  }
  0x9b   :  { %3491 = vmatpush1.bf16.msra.mxu0 %v4728_v0  ;;  %v4807_v0 = vld [vmem:[%s6994_s1 + $0x640] ss:$8 sps:$4 sm:$0xff]  }
  0x9c   :  { %3532 = vmatpush1.bf16.msra.mxu1 %v4731_v1  ;;  %3492 = vmatprep.subr.bf16.mxu0 %v4736_v2  ;;  %v4810_v1 = vld [vmem:[%s6994_s1 + $0x740] ss:$8 sps:$4 sm:$0xff]   ;;  %v4815_v2 = vld [vmem:[%s6994_s1 + $0x634] ss:$8 sps:$4 sm:$0xff]  }
  0x9d   :  { %3533 = vmatprep.subr.bf16.mxu1 %v4739_v3  ;;  %v4818_v3 = vld [vmem:[%s6994_s1 + $0x734] ss:$8 sps:$4 sm:$0xff]  }
  0x9f   :  { %3493 = vmatpush1.bf16.msra.mxu0 %v4734_v4  ;;  %v4813_v4 = vld [vmem:[%s6994_s1 + $0x630] ss:$8 sps:$4 sm:$0xff]  }
  0xa0   :  { %3534 = vmatpush1.bf16.msra.mxu1 %v4737_v5  ;;  %3494 = vmatprep.subr.bf16.mxu0 %v4742_v6  ;;  %v4816_v5 = vld [vmem:[%s6994_s1 + $0x730] ss:$8 sps:$4 sm:$0xff]   ;;  %v4821_v6 = vld [vmem:[%s6994_s1 + $0x624] ss:$8 sps:$4 sm:$0xff]  }
  0xa1   :  { %3535 = vmatprep.subr.bf16.mxu1 %v4745_v7  ;;  %v4824_v7 = vld [vmem:[%s6994_s1 + $0x724] ss:$8 sps:$4 sm:$0xff]  }
  0xa3   :  { %3495 = vmatpush2.bf16.msra.mxu0 %v4740_v8  ;;  %v4819_v8 = vld [vmem:[%s6994_s1 + $0x620] ss:$8 sps:$4 sm:$0xff]  }
  0xa4   :  { %3536 = vmatpush2.bf16.msra.mxu1 %v4743_v9  ;;  %3496 = vmatprep.subr.bf16.mxu0 %v4748_v10  ;;  %v4822_v9 = vld [vmem:[%s6994_s1 + $0x720] ss:$8 sps:$4 sm:$0xff]   ;;  %v4827_v10 = vld [vmem:[%s6994_s1 + $0x614] ss:$8 sps:$4 sm:$0xff]  }
  0xa5   :  { %3537 = vmatprep.subr.bf16.mxu1 %v4751_v11  ;;  %v4830_v11 = vld [vmem:[%s6994_s1 + $0x714] ss:$8 sps:$4 sm:$0xff]  }
  0xa7   :  { %3497 = vmatpush2.bf16.msra.mxu0 %v4746_v12  ;;  %v4825_v12 = vld [vmem:[%s6994_s1 + $0x610] ss:$8 sps:$4 sm:$0xff]  }
  0xa8   :  { %3538 = vmatpush2.bf16.msra.mxu1 %v4749_v13  ;;  %3498 = vmatprep.subr.bf16.mxu0 %v4754_v14  ;;  %v4828_v13 = vld [vmem:[%s6994_s1 + $0x710] ss:$8 sps:$4 sm:$0xff]   ;;  %v4833_v14 = vld [vmem:[%s6994_s1 + $0x604] ss:$8 sps:$4 sm:$0xff]  }
  0xa9   :  { %3539 = vmatprep.subr.bf16.mxu1 %v4757_v15  ;;  %v4836_v15 = vld [vmem:[%s6994_s1 + $0x704] ss:$8 sps:$4 sm:$0xff]  }
  0xab   :  { %3499 = vmatpush2.bf16.msra.mxu0 %v4752_v16  ;;  %v4831_v16 = vld [vmem:[%s6994_s1 + $0x600] ss:$8 sps:$4 sm:$0xff]  }
  0xac   :  { %3540 = vmatpush2.bf16.msra.mxu1 %v4755_v17  ;;  %3500 = vmatprep.subr.bf16.mxu0 %v4760_v18  ;;  %v4834_v17 = vld [vmem:[%s6994_s1 + $0x700] ss:$8 sps:$4 sm:$0xff]   ;;  %v4839_v18 = vld [vmem:[%s6994_s1 + $0x6f4] ss:$8 sps:$4 sm:$0xff]  }
  0xad   :  { %3541 = vmatprep.subr.bf16.mxu1 %v4763_v19  ;;  %v4842_v19 = vld [vmem:[%s6994_s1 + $0x7f4] ss:$8 sps:$4 sm:$0xff]  }
  0xaf   :  { %3501 = vmatpush2.bf16.msra.mxu0 %v4758_v20  ;;  %v4837_v20 = vld [vmem:[%s6994_s1 + $0x6f0] ss:$8 sps:$4 sm:$0xff]  }
  0xb0   :  { %3542 = vmatpush2.bf16.msra.mxu1 %v4761_v21  ;;  %3502 = vmatprep.subr.bf16.mxu0 %v4766_v22  ;;  %v4840_v21 = vld [vmem:[%s6994_s1 + $0x7f0] ss:$8 sps:$4 sm:$0xff]   ;;  %v4845_v22 = vld [vmem:[%s6994_s1 + $0x6e4] ss:$8 sps:$4 sm:$0xff]  }
  0xb1   :  { %3543 = vmatprep.subr.bf16.mxu1 %v4769_v23  ;;  %v4848_v23 = vld [vmem:[%s6994_s1 + $0x7e4] ss:$8 sps:$4 sm:$0xff]  }
  0xb3   :  { %3503 = vmatpush2.bf16.msra.mxu0 %v4764_v24  ;;  %v4843_v24 = vld [vmem:[%s6994_s1 + $0x6e0] ss:$8 sps:$4 sm:$0xff]  }
  0xb4   :  { %3544 = vmatpush2.bf16.msra.mxu1 %v4767_v25  ;;  %3504 = vmatprep.subr.bf16.mxu0 %v4772_v26  ;;  %v4846_v25 = vld [vmem:[%s6994_s1 + $0x7e0] ss:$8 sps:$4 sm:$0xff]   ;;  %v4851_v26 = vld [vmem:[%s6994_s1 + $0x6d4] ss:$8 sps:$4 sm:$0xff]  }
  0xb5   :  { %3545 = vmatprep.subr.bf16.mxu1 %v4775_v27  ;;  %v4854_v27 = vld [vmem:[%s6994_s1 + $0x7d4] ss:$8 sps:$4 sm:$0xff]  }
  0xb7   :  { %3505 = vmatpush2.bf16.msra.mxu0 %v4770_v28  ;;  %v4849_v28 = vld [vmem:[%s6994_s1 + $0x6d0] ss:$8 sps:$4 sm:$0xff]  }
  0xb8   :  { %3546 = vmatpush2.bf16.msra.mxu1 %v4773_v30  ;;  %3506 = vmatprep.subr.bf16.mxu0 %v4778_v31  ;;  %v4857_v30 = vld [vmem:[%s6994_s1 + $0x6c4] ss:$8 sps:$4 sm:$0xff]  }
  0xb9   :  { %3547 = vmatprep.subr.bf16.mxu1 %v4781_v32  ;;  %v4860_v31 = vld [vmem:[%s6994_s1 + $0x7c4] ss:$8 sps:$4 sm:$0xff]   ;;  %v4855_v32 = vld [vmem:[%s6994_s1 + $0x6c0] ss:$8 sps:$4 sm:$0xff]  }
  0xbb   :  { %3507 = vmatpush2.bf16.msra.mxu0 %v4776_v34  ;;  %v4863_v34 = vld [vmem:[%s6994_s1 + $0x6b4] ss:$8 sps:$4 sm:$0xff]  }
  0xbc   :  { %3548 = vmatpush2.bf16.msra.mxu1 %v4779_v36  ;;  %3508 = vmatprep.subr.bf16.mxu0 %v4784_v37  ;;  %v4866_v36 = vld [vmem:[%s6994_s1 + $0x7b4] ss:$8 sps:$4 sm:$0xff]   ;;  %v4861_v37 = vld [vmem:[%s6994_s1 + $0x6b0] ss:$8 sps:$4 sm:$0xff]  }
  0xbd   :  { %3549 = vmatprep.subr.bf16.mxu1 %v4787_v38  ;;  %v4864_v38 = vld [vmem:[%s6994_s1 + $0x7b0] ss:$8 sps:$4 sm:$0xff]  }
  0xbf   :  { %3509 = vmatpush2.bf16.msra.mxu0 %v4782_v42  ;;  %v4869_v42 = vld [vmem:[%s6994_s1 + $0x6a4] ss:$8 sps:$4 sm:$0xff]  }
  0xc0   :  { %3550 = vmatpush2.bf16.msra.mxu1 %v4785_v44  ;;  %3560 = vmatprep.subr.bf16.mxu0 %v4791_v45  ;;  %v4872_v44 = vld [vmem:[%s6994_s1 + $0x7a4] ss:$8 sps:$4 sm:$0xff]  }
  0xc1   :  { %3601 = vmatprep.subr.bf16.mxu1 %v4794_v46  ;;  %v18_v45 = vld [vmem:[%s6995_s0 + $0x20] sm:$0xff] }
  0xc2   :  { %3511 = vmatmul.mubr.bf16.vlgmr.msra.gmra.mxu0 %v206_v50  ;;  %v4867_v46 = vld [vmem:[%s6994_s1 + $0x6a0] ss:$8 sps:$4 sm:$0xff]   ;;  %v4878_v50 = vld [vmem:[%s6994_s1 + $0x794] ss:$8 sps:$4 sm:$0xff]  }
  0xc3   :  { %3552 = vmatmul.mubr.bf16.vlgmr.msra.gmra.mxu1 %v208_v51  ;;  %3561 = vmatpush1.bf16.msra.mxu0 %v4789_v52  ;;  %v98_v51 = vcombine.high %v18_v45, %v18_v45  ;;  %v4873_v52 = vld [vmem:[%s6994_s1 + $0x690] ss:$8 sps:$4 sm:$0xff]  }
  0xc4   :  { %3602 = vmatpush1.bf16.msra.mxu1 %v4792_v53  ;;  %3562 = vmatprep.subr.bf16.mxu0 %v4797_v54  ;;  %v4876_v53 = vld [vmem:[%s6994_s1 + $0x790] ss:$8 sps:$4 sm:$0xff]   ;;  %v4881_v54 = vld [vmem:[%s6994_s1 + $0x684] ss:$8 sps:$4 sm:$0xff]  }
  0xc5   :  { %3603 = vmatprep.subr.bf16.mxu1 %v4800_v35  ;;  %3592 = vmatprep.mubr.bf16.mxu0 %v211_v39  ;;  %v4884_v35 = vld [vmem:[%s6994_s1 + $0x784] ss:$8 sps:$4 sm:$0xff]   ;;  %v6120_v39 = vrot.slane %v18_v45, %v5432_v49  ;;  %v4922_v45 = vld [vmem:[%s6994_s1 + $0x810] ss:$8 sps:$4 sm:$0xff]  }
  0xc6   :  { %3633 = vmatprep.mubr.bf16.mxu1 %v213_v55  ;;  %v6123_v55 = vrot.slane %v98_v51, %v5432_v49  ;;  %v4931_v51 = vld [vmem:[%s6994_s1 + $0x900] ss:$8 sps:$4 sm:$0xff]  }
  0xc7   :  { %3563 = vmatpush1.bf16.msra.mxu0 %v4795_v56  ;;  %v4879_v56 = vld [vmem:[%s6994_s1 + $0x680] ss:$8 sps:$4 sm:$0xff]  }
  0xc8   :  { %3604 = vmatpush1.bf16.msra.mxu1 %v4798_v57  ;;  %3564 = vmatprep.subr.bf16.mxu0 %v4803_v58  ;;  %v4882_v57 = vld [vmem:[%s6994_s1 + $0x780] ss:$8 sps:$4 sm:$0xff]  }
  0xc9   :  { %3605 = vmatprep.subr.bf16.mxu1 %v4806_v59  ;;  %v742_v58 = vld [vmem:[%s6996_s2] sm:$0x3]  ;;  %v746_v59 = vsub.s32 0, %v5414_v43 }
  0xcb   :  { %3565 = vmatpush1.bf16.msra.mxu0 %v4801_v60  ;;  %v4888_v60 = vld [vmem:[%s6994_s1 + $0x874] ss:$8 sps:$4 sm:$0xff]  }
  0xcc   :  { %3606 = vmatpush1.bf16.msra.mxu1 %v4804_v61  ;;  %3566 = vmatprep.subr.bf16.mxu0 %v4809_v62  ;;  %v4891_v61 = vld [vmem:[%s6994_s1 + $0x974] ss:$8 sps:$4 sm:$0xff]   ;;  %v750_v62 = vsub.s32 1, %v5414_v43  ;;  %v4889_v43 = vld [vmem:[%s6994_s1 + $0x970] ss:$8 sps:$4 sm:$0xff]  }
  0xcd   :  { %3607 = vmatprep.subr.bf16.mxu1 %v4812_v63  ;;  %v113_v63 = vcombine.high %v6120_v39, %v6120_v39 }
  0xcf   :  { %3567 = vmatpush1.bf16.msra.mxu0 %v4807_v0  ;;  %v114_v0 = vcombine.high %v6123_v55, %v6123_v55 }
  0xd0   :  { %3608 = vmatpush1.bf16.msra.mxu1 %v4810_v1  ;;  %3568 = vmatprep.subr.bf16.mxu0 %v4815_v2  ;;  %v210_v1 = vpack.c.bf16 %v5911_v40, %v5911_v40  ;;  %v212_v2 = vpack.c.bf16 %v5914_v41, %v5914_v41  ;;  %v4894_v40 = vld [vmem:[%s6994_s1 + $0x864] ss:$8 sps:$4 sm:$0xff]  }
  0xd1   :  { %3609 = vmatprep.subr.bf16.mxu1 %v4818_v3  ;;  %v747_v3 = vrot.slane %v742_v58, %v746_v59  ;;  %v4897_v41 = vld [vmem:[%s6994_s1 + $0x964] ss:$8 sps:$4 sm:$0xff]   ;;  %v4943_v59 = vld [vmem:[%s6994_s1 + $0x9e0] ss:$8 sps:$4 sm:$0xff]  }
  0xd3   :  { %3569 = vmatpush1.bf16.msra.mxu0 %v4813_v4  ;;  %v4886_v4 = vld [vmem:[%s6994_s1 + $0x870] ss:$8 sps:$4 sm:$0xff]  }
  0xd4   :  { %3610 = vmatpush1.bf16.msra.mxu1 %v4816_v5  ;;  %3570 = vmatprep.subr.bf16.mxu0 %v4821_v6  ;;  %v751_v5 = vrot.slane %v742_v58, %v750_v62  ;;  %v215_v6 = vpack.c.bf16 %v113_v63, %v113_v63  ;;  %v4940_v58 = vld [vmem:[%s6994_s1 + $0x8e0] ss:$8 sps:$4 sm:$0xff]   ;;  %v4946_v62 = vld [vmem:[%s6994_s1 + $0x8d0] ss:$8 sps:$4 sm:$0xff]  }
  0xd5   :  { %3611 = vmatprep.subr.bf16.mxu1 %v4824_v7  ;;  %v217_v7 = vpack.c.bf16 %v114_v0, %v114_v0  ;;  %v4949_v63 = vld [vmem:[%s6994_s1 + $0x9d0] ss:$8 sps:$4 sm:$0xff]   ;;  %v4954_v0 = vld [vmem:[%s6994_s1 + $0x8c4] ss:$8 sps:$4 sm:$0xff]  }
  0xd7   :  { %3571 = vmatpush1.bf16.msra.mxu0 %v4819_v8 }
  0xd8   :  { %3612 = vmatpush1.bf16.msra.mxu1 %v4822_v9  ;;  %3572 = vmatprep.subr.bf16.mxu0 %v4827_v10  ;;  %v4892_v10 = vld [vmem:[%s6994_s1 + $0x860] ss:$8 sps:$4 sm:$0xff]  }
  0xd9   :  { %3613 = vmatprep.subr.bf16.mxu1 %v4830_v11 }
  0xdb   :  { %3573 = vmatpush1.bf16.msra.mxu0 %v4825_v12  ;;  %v4895_v12 = vld [vmem:[%s6994_s1 + $0x960] ss:$8 sps:$4 sm:$0xff]  }
  0xdc   :  { %3614 = vmatpush1.bf16.msra.mxu1 %v4828_v13  ;;  %3574 = vmatprep.subr.bf16.mxu0 %v4833_v14  ;;  %v4900_v13 = vld [vmem:[%s6994_s1 + $0x854] ss:$8 sps:$4 sm:$0xff]  }
  0xdd   :  { %3615 = vmatprep.subr.bf16.mxu1 %v4836_v15 }
  0xdf   :  { %3575 = vmatpush1.bf16.msra.mxu0 %v4831_v16  ;;  %v4903_v16 = vld [vmem:[%s6994_s1 + $0x954] ss:$8 sps:$4 sm:$0xff]  }
  0xe0   :  { %3616 = vmatpush1.bf16.msra.mxu1 %v4834_v17  ;;  %3576 = vmatprep.subr.bf16.mxu0 %v4839_v18 }
  0xe1   :  { %3617 = vmatprep.subr.bf16.mxu1 %v4842_v19 }
  0xe3   :  { %3577 = vmatpush2.bf16.msra.mxu0 %v4837_v20 }
  0xe4   :  { %3618 = vmatpush2.bf16.msra.mxu1 %v4840_v21  ;;  %3578 = vmatprep.subr.bf16.mxu0 %v4845_v22  ;;  %v4898_v21 = vld [vmem:[%s6994_s1 + $0x850] ss:$8 sps:$4 sm:$0xff]  }
  0xe5   :  { %3619 = vmatprep.subr.bf16.mxu1 %v4848_v23  ;;  %v4901_v22 = vld [vmem:[%s6994_s1 + $0x950] ss:$8 sps:$4 sm:$0xff]  }
  0xe7   :  { %3579 = vmatpush2.bf16.msra.mxu0 %v4843_v24 }
  0xe8   :  { %3620 = vmatpush2.bf16.msra.mxu1 %v4846_v25  ;;  %3580 = vmatprep.subr.bf16.mxu0 %v4851_v26  ;;  %v4906_v26 = vld [vmem:[%s6994_s1 + $0x844] ss:$8 sps:$4 sm:$0xff]  }
  0xe9   :  { %3621 = vmatprep.subr.bf16.mxu1 %v4854_v27  ;;  %v4909_v27 = vld [vmem:[%s6994_s1 + $0x944] ss:$8 sps:$4 sm:$0xff]  }
  0xeb   :  { %3581 = vmatpush2.bf16.msra.mxu0 %v4849_v28  ;;  %v4904_v28 = vld [vmem:[%s6994_s1 + $0x840] ss:$8 sps:$4 sm:$0xff]  }
  0xec   :  { %3622 = vmatpush2.bf16.msra.mxu1 %v4852_v29  ;;  %3582 = vmatprep.subr.bf16.mxu0 %v4857_v30  ;;  %v4907_v29 = vld [vmem:[%s6994_s1 + $0x940] ss:$8 sps:$4 sm:$0xff]   ;;  %v4912_v30 = vld [vmem:[%s6994_s1 + $0x834] ss:$8 sps:$4 sm:$0xff]  }
  0xed   :  { %3623 = vmatprep.subr.bf16.mxu1 %v4860_v31  ;;  %v4915_v31 = vld [vmem:[%s6994_s1 + $0x934] ss:$8 sps:$4 sm:$0xff]  }
  0xef   :  { %3583 = vmatpush2.bf16.msra.mxu0 %v4855_v32  ;;  %v4910_v32 = vld [vmem:[%s6994_s1 + $0x830] ss:$8 sps:$4 sm:$0xff]  }
  0xf0   :  { %3624 = vmatpush2.bf16.msra.mxu1 %v4858_v33  ;;  %3584 = vmatprep.subr.bf16.mxu0 %v4863_v34  ;;  %v4913_v33 = vld [vmem:[%s6994_s1 + $0x930] ss:$8 sps:$4 sm:$0xff]   ;;  %v4918_v34 = vld [vmem:[%s6994_s1 + $0x824] ss:$8 sps:$4 sm:$0xff]  }
  0xf1   :  { %3625 = vmatprep.subr.bf16.mxu1 %v4866_v36  ;;  %v4921_v36 = vld [vmem:[%s6994_s1 + $0x924] ss:$8 sps:$4 sm:$0xff]  }
  0xf3   :  { %3585 = vmatpush2.bf16.msra.mxu0 %v4861_v37  ;;  %v4916_v37 = vld [vmem:[%s6994_s1 + $0x820] ss:$8 sps:$4 sm:$0xff]  }
  0xf4   :  { %3626 = vmatpush2.bf16.msra.mxu1 %v4864_v38  ;;  %3586 = vmatprep.subr.bf16.mxu0 %v4869_v42  ;;  %v4919_v38 = vld [vmem:[%s6994_s1 + $0x920] ss:$8 sps:$4 sm:$0xff]   ;;  %v4924_v42 = vld [vmem:[%s6994_s1 + $0x814] ss:$8 sps:$4 sm:$0xff]  }
  0xf5   :  { %3627 = vmatprep.subr.bf16.mxu1 %v4872_v44  ;;  %v4927_v44 = vld [vmem:[%s6994_s1 + $0x914] ss:$8 sps:$4 sm:$0xff]  }
  0xf7   :  { %3587 = vmatpush2.bf16.msra.mxu0 %v4867_v46  ;;  %v4925_v46 = vld [vmem:[%s6994_s1 + $0x910] ss:$8 sps:$4 sm:$0xff]  }
  0xf8   :  { %3628 = vmatpush2.bf16.msra.mxu1 %v4870_v47  ;;  %3588 = vmatprep.subr.bf16.mxu0 %v4875_v48  ;;  %v4930_v47 = vld [vmem:[%s6994_s1 + $0x804] ss:$8 sps:$4 sm:$0xff]  }
  0xf9   :  { %3629 = vmatprep.subr.bf16.mxu1 %v4878_v50  ;;  %v4933_v48 = vld [vmem:[%s6994_s1 + $0x904] ss:$8 sps:$4 sm:$0xff]   ;;  %v4928_v50 = vld [vmem:[%s6994_s1 + $0x800] ss:$8 sps:$4 sm:$0xff]  }
  0xfb   :  { %3589 = vmatpush2.bf16.msra.mxu0 %v4873_v52  ;;  %v4936_v52 = vld [vmem:[%s6994_s1 + $0x8f4] ss:$8 sps:$4 sm:$0xff]  }
  0xfc   :  { %3630 = vmatpush2.bf16.msra.mxu1 %v4876_v53  ;;  %3590 = vmatprep.subr.bf16.mxu0 %v4881_v54  ;;  %v4939_v53 = vld [vmem:[%s6994_s1 + $0x9f4] ss:$8 sps:$4 sm:$0xff]   ;;  %v4934_v54 = vld [vmem:[%s6994_s1 + $0x8f0] ss:$8 sps:$4 sm:$0xff]  }
  0xfd   :  { %3631 = vmatprep.subr.bf16.mxu1 %v4884_v35  ;;  %v4937_v35 = vld [vmem:[%s6994_s1 + $0x9f0] ss:$8 sps:$4 sm:$0xff]  }
  0xff   :  { %3591 = vmatpush2.bf16.msra.mxu0 %v4879_v56  ;;  %v4942_v56 = vld [vmem:[%s6994_s1 + $0x8e4] ss:$8 sps:$4 sm:$0xff]  }
 0x100   :  { %3632 = vmatpush2.bf16.msra.mxu1 %v4882_v57  ;;  %3642 = vmatprep.subr.bf16.mxu0 %v4888_v60  ;;  %v4945_v57 = vld [vmem:[%s6994_s1 + $0x9e4] ss:$8 sps:$4 sm:$0xff]   ;;  %v4948_v60 = vld [vmem:[%s6994_s1 + $0x8d4] ss:$8 sps:$4 sm:$0xff]  }
 0x101   :  { %3683 = vmatprep.subr.bf16.mxu1 %v4891_v61  ;;  %v4951_v61 = vld [vmem:[%s6994_s1 + $0x9d4] ss:$8 sps:$4 sm:$0xff]  }
 0x102   :  { %v3348_v8 = vpop.f32.mrf.mxu0  ;;  %3593 = vmatmul.mubr.bf16.vlgmr.msra.gmra.mxu0 %v210_v1  ;;  %v4957_v1 = vld [vmem:[%s6994_s1 + $0x9c4] ss:$8 sps:$4 sm:$0xff]  }
 0x103   :  { %v3389_v9 = vpop.f32.mrf.mxu1  ;;  %3634 = vmatmul.mubr.bf16.vlgmr.msra.gmra.mxu1 %v212_v2  ;;  %v3349_v11 = vadd.f32 %v3348_v8, %v747_v3  ;;  %3643 = vmatpush1.bf16.msra.mxu0 %v4886_v4  ;;  %v4952_v2 = vld [vmem:[%s6994_s1 + $0x8c0] ss:$8 sps:$4 sm:$0xff]   ;;  %v4960_v4 = vld [vmem:[%s6994_s1 + $0x8b4] ss:$8 sps:$4 sm:$0xff]  }
 0x104   :  { %3684 = vmatpush1.bf16.msra.mxu1 %v4889_v43  ;;  %v3350_v14 = vpop.f32.mrf.mxu0  ;;  %3644 = vmatprep.subr.bf16.mxu0 %v4894_v40  ;;  %v4955_v3 = vld [vmem:[%s6994_s1 + $0x9c0] ss:$8 sps:$4 sm:$0xff]   ;;  %v4963_v43 = vld [vmem:[%s6994_s1 + $0x9b4] ss:$8 sps:$4 sm:$0xff]   ;;  %v4958_v40 = vld [vmem:[%s6994_s1 + $0x8b0] ss:$8 sps:$4 sm:$0xff]  }
 0x105   :  { %v3391_v15 = vpop.f32.mrf.mxu1  ;;  %3685 = vmatprep.subr.bf16.mxu1 %v4897_v41  ;;  %v6174_v17 = vadd.f32 %v3389_v9, %v3349_v11  ;;  %v3351_v18 = vadd.f32 %v3350_v14, %v751_v5  ;;  %3674 = vmatprep.mubr.bf16.mxu0 %v215_v6  ;;  %v4961_v41 = vld [vmem:[%s6994_s1 + $0x9b0] ss:$8 sps:$4 sm:$0xff]   ;;  %v4966_v5 = vld [vmem:[%s6994_s1 + $0x8a4] ss:$8 sps:$4 sm:$0xff]   ;;  %v4964_v8 = vld [vmem:[%s6994_s1 + $0x8a0] ss:$8 sps:$4 sm:$0xff]  }
 0x106   :  { %3715 = vmatprep.mubr.bf16.mxu1 %v217_v7  ;;  %v3352_v19 = vpop.f32.mrf.mxu0  ;;  %v4969_v6 = vld [vmem:[%s6994_s1 + $0x9a4] ss:$8 sps:$4 sm:$0xff]   ;;  %v4967_v9 = vld [vmem:[%s6994_s1 + $0x9a0] ss:$8 sps:$4 sm:$0xff]   ;;  %v4975_v11 = vld [vmem:[%s6994_s1 + $0x994] ss:$8 sps:$4 sm:$0xff]  }
 0x107   :  { %v3393_v20 = vpop.f32.mrf.mxu1  ;;  %v6182_v23 = vadd.f32 %v3391_v15, %v3351_v18  ;;  %3645 = vmatpush1.bf16.msra.mxu0 %v4892_v10  ;;  %v19_v7 = vld [vmem:[%s6995_s0 + $0x28] sm:$0xff]  ;;  %v4972_v10 = vld [vmem:[%s6994_s1 + $0x894] ss:$8 sps:$4 sm:$0xff]   ;;  %v4973_v14 = vld [vmem:[%s6994_s1 + $0x990] ss:$8 sps:$4 sm:$0xff]  }
 0x108   :  { %3686 = vmatpush1.bf16.msra.mxu1 %v4895_v12  ;;  %v3353_v24 = vpop.f32.mrf.mxu0  ;;  %3646 = vmatprep.subr.bf16.mxu0 %v4900_v13  ;;  %v115_v12 = vcombine.high %v19_v7, %v19_v7  ;;  %v4970_v13 = vld [vmem:[%s6994_s1 + $0x890] ss:$8 sps:$4 sm:$0xff]   ;;  %v4978_v15 = vld [vmem:[%s6994_s1 + $0x884] ss:$8 sps:$4 sm:$0xff]   ;;  %v6338_v18 = vrot.slane %v19_v7, %v5432_v49  ;;  %v4976_v20 = vld [vmem:[%s6994_s1 + $0x880] ss:$8 sps:$4 sm:$0xff]  }
 0x109   :  { %v3394_v25 = vpop.f32.mrf.mxu1  ;;  %3687 = vmatprep.subr.bf16.mxu1 %v4903_v16  ;;  %v4981_v16 = vld [vmem:[%s6994_s1 + $0x984] ss:$8 sps:$4 sm:$0xff]   ;;  %v4988_v24 = vld [vmem:[%s6994_s1 + $0xb74] ss:$8 sps:$4 sm:$0xff]   ;;  %v5028_v7 = vld [vmem:[%s6994_s1 + $0xb00] ss:$8 sps:$4 sm:$0xff]  }
 0x10a   :  { %v6341_v19 = vrot.slane %v115_v12, %v5432_v49  ;;  %v4983_v25 = vld [vmem:[%s6994_s1 + $0xa70] ss:$8 sps:$4 sm:$0xff]   ;;  %v5039_v12 = vld [vmem:[%s6994_s1 + $0xae4] ss:$8 sps:$4 sm:$0xff]  }
 0x10b   :  { %3647 = vmatpush1.bf16.msra.mxu0 %v4898_v21  ;;  %v4979_v21 = vld [vmem:[%s6994_s1 + $0x980] ss:$8 sps:$4 sm:$0xff]  }
 0x10c   :  { %3688 = vmatpush1.bf16.msra.mxu1 %v4901_v22  ;;  %3648 = vmatprep.subr.bf16.mxu0 %v4906_v26  ;;  %v4985_v22 = vld [vmem:[%s6994_s1 + $0xa74] ss:$8 sps:$4 sm:$0xff]   ;;  %v4986_v26 = vld [vmem:[%s6994_s1 + $0xb70] ss:$8 sps:$4 sm:$0xff]  }
 0x10d   :  { %3689 = vmatprep.subr.bf16.mxu1 %v4909_v27  ;;  %v130_v27 = vcombine.high %v6338_v18, %v6338_v18 }
 0x10f   :  { %3649 = vmatpush1.bf16.msra.mxu0 %v4904_v28  ;;  %v131_v28 = vcombine.high %v6341_v19, %v6341_v19 }
 0x110   :  { %3690 = vmatpush1.bf16.msra.mxu1 %v4907_v29  ;;  %3650 = vmatprep.subr.bf16.mxu0 %v4912_v30  ;;  %v214_v29 = vpack.c.bf16 %v6120_v39, %v6120_v39  ;;  %v216_v30 = vpack.c.bf16 %v6123_v55, %v6123_v55  ;;  %v4989_v55 = vld [vmem:[%s6994_s1 + $0xa60] ss:$8 sps:$4 sm:$0xff]  }
 0x111   :  { %3691 = vmatprep.subr.bf16.mxu1 %v4915_v31  ;;  %v4991_v31 = vld [vmem:[%s6994_s1 + $0xa64] ss:$8 sps:$4 sm:$0xff]  }
 0x113   :  { %3651 = vmatpush1.bf16.msra.mxu0 %v4910_v32  ;;  %v4994_v32 = vld [vmem:[%s6994_s1 + $0xb64] ss:$8 sps:$4 sm:$0xff]  }
 0x114   :  { %3692 = vmatpush1.bf16.msra.mxu1 %v4913_v33  ;;  %3652 = vmatprep.subr.bf16.mxu0 %v4918_v34  ;;  %v219_v33 = vpack.c.bf16 %v130_v27, %v130_v27  ;;  %v221_v34 = vpack.c.bf16 %v131_v28, %v131_v28  ;;  %v5052_v27 = vld [vmem:[%s6994_s1 + $0xbc0] ss:$8 sps:$4 sm:$0xff]   ;;  %v5057_v28 = vld [vmem:[%s6994_s1 + $0xab4] ss:$8 sps:$4 sm:$0xff]  }
 0x115   :  { %3693 = vmatprep.subr.bf16.mxu1 %v4921_v36 }
 0x117   :  { %3653 = vmatpush1.bf16.msra.mxu0 %v4916_v37 }
 0x118   :  { %3694 = vmatpush1.bf16.msra.mxu1 %v4919_v38  ;;  %3654 = vmatprep.subr.bf16.mxu0 %v4924_v42  ;;  %v4992_v38 = vld [vmem:[%s6994_s1 + $0xb60] ss:$8 sps:$4 sm:$0xff]  }
 0x119   :  { %3695 = vmatprep.subr.bf16.mxu1 %v4927_v44 }
 0x11b   :  { %3655 = vmatpush1.bf16.msra.mxu0 %v4922_v45  ;;  %v4997_v45 = vld [vmem:[%s6994_s1 + $0xa54] ss:$8 sps:$4 sm:$0xff]  }
 0x11c   :  { %3696 = vmatpush1.bf16.msra.mxu1 %v4925_v46  ;;  %3656 = vmatprep.subr.bf16.mxu0 %v4930_v47 }
 0x11d   :  { %3697 = vmatprep.subr.bf16.mxu1 %v4933_v48 }
 0x11f   :  { %3657 = vmatpush1.bf16.msra.mxu0 %v4928_v50 }
 0x120   :  { %3698 = vmatpush1.bf16.msra.mxu1 %v4931_v51  ;;  %3658 = vmatprep.subr.bf16.mxu0 %v4936_v52  ;;  %v4995_v52 = vld [vmem:[%s6994_s1 + $0xa50] ss:$8 sps:$4 sm:$0xff]  }
 0x121   :  { %3699 = vmatprep.subr.bf16.mxu1 %v4939_v53  ;;  %v4998_v53 = vld [vmem:[%s6994_s1 + $0xb50] ss:$8 sps:$4 sm:$0xff]  }
 0x123   :  { %3659 = vmatpush2.bf16.msra.mxu0 %v4934_v54 }
 0x124   :  { %3700 = vmatpush2.bf16.msra.mxu1 %v4937_v35  ;;  %3660 = vmatprep.subr.bf16.mxu0 %v4942_v56  ;;  %v5006_v56 = vld [vmem:[%s6994_s1 + $0xb44] ss:$8 sps:$4 sm:$0xff]  }
 0x125   :  { %3701 = vmatprep.subr.bf16.mxu1 %v4945_v57  ;;  %v5001_v57 = vld [vmem:[%s6994_s1 + $0xa40] ss:$8 sps:$4 sm:$0xff]  }
 0x127   :  { %3661 = vmatpush2.bf16.msra.mxu0 %v4940_v58  ;;  %v5004_v58 = vld [vmem:[%s6994_s1 + $0xb40] ss:$8 sps:$4 sm:$0xff]  }
 0x128   :  { %3702 = vmatpush2.bf16.msra.mxu1 %v4943_v59  ;;  %3662 = vmatprep.subr.bf16.mxu0 %v4948_v60  ;;  %v5009_v59 = vld [vmem:[%s6994_s1 + $0xa34] ss:$8 sps:$4 sm:$0xff]  }
 0x129   :  { %3703 = vmatprep.subr.bf16.mxu1 %v4951_v61  ;;  %v5012_v60 = vld [vmem:[%s6994_s1 + $0xb34] ss:$8 sps:$4 sm:$0xff]   ;;  %v5007_v61 = vld [vmem:[%s6994_s1 + $0xa30] ss:$8 sps:$4 sm:$0xff]  }
 0x12b   :  { %3663 = vmatpush2.bf16.msra.mxu0 %v4946_v62  ;;  %v5010_v62 = vld [vmem:[%s6994_s1 + $0xb30] ss:$8 sps:$4 sm:$0xff]  }
 0x12c   :  { %3704 = vmatpush2.bf16.msra.mxu1 %v4949_v63  ;;  %3664 = vmatprep.subr.bf16.mxu0 %v4954_v0  ;;  %v5015_v63 = vld [vmem:[%s6994_s1 + $0xa24] ss:$8 sps:$4 sm:$0xff]  }
 0x12d   :  { %3705 = vmatprep.subr.bf16.mxu1 %v4957_v1  ;;  %v5018_v0 = vld [vmem:[%s6994_s1 + $0xb24] ss:$8 sps:$4 sm:$0xff]   ;;  %v5013_v1 = vld [vmem:[%s6994_s1 + $0xa20] ss:$8 sps:$4 sm:$0xff]  }
 0x12f   :  { %3665 = vmatpush2.bf16.msra.mxu0 %v4952_v2  ;;  %v5016_v2 = vld [vmem:[%s6994_s1 + $0xb20] ss:$8 sps:$4 sm:$0xff]  }
 0x130   :  { %3706 = vmatpush2.bf16.msra.mxu1 %v4955_v3  ;;  %3666 = vmatprep.subr.bf16.mxu0 %v4960_v4  ;;  %v5021_v3 = vld [vmem:[%s6994_s1 + $0xa14] ss:$8 sps:$4 sm:$0xff]  }
 0x131   :  { %3707 = vmatprep.subr.bf16.mxu1 %v4963_v43  ;;  %v5024_v4 = vld [vmem:[%s6994_s1 + $0xb14] ss:$8 sps:$4 sm:$0xff]   ;;  %v5019_v43 = vld [vmem:[%s6994_s1 + $0xa10] ss:$8 sps:$4 sm:$0xff]  }
 0x133   :  { %3667 = vmatpush2.bf16.msra.mxu0 %v4958_v40  ;;  %v5022_v40 = vld [vmem:[%s6994_s1 + $0xb10] ss:$8 sps:$4 sm:$0xff]  }
 0x134   :  { %3708 = vmatpush2.bf16.msra.mxu1 %v4961_v41  ;;  %3668 = vmatprep.subr.bf16.mxu0 %v4966_v5  ;;  %v5027_v41 = vld [vmem:[%s6994_s1 + $0xa04] ss:$8 sps:$4 sm:$0xff]  }
 0x135   :  { %3709 = vmatprep.subr.bf16.mxu1 %v4969_v6  ;;  %v5030_v5 = vld [vmem:[%s6994_s1 + $0xb04] ss:$8 sps:$4 sm:$0xff]   ;;  %v5025_v6 = vld [vmem:[%s6994_s1 + $0xa00] ss:$8 sps:$4 sm:$0xff]  }
 0x137   :  { %3669 = vmatpush2.bf16.msra.mxu0 %v4964_v8  ;;  %v5033_v8 = vld [vmem:[%s6994_s1 + $0xaf4] ss:$8 sps:$4 sm:$0xff]  }
 0x138   :  { %3710 = vmatpush2.bf16.msra.mxu1 %v4967_v9  ;;  %3670 = vmatprep.subr.bf16.mxu0 %v4972_v10  ;;  %v5036_v9 = vld [vmem:[%s6994_s1 + $0xbf4] ss:$8 sps:$4 sm:$0xff]   ;;  %v5031_v10 = vld [vmem:[%s6994_s1 + $0xaf0] ss:$8 sps:$4 sm:$0xff]  }
 0x139   :  { %3711 = vmatprep.subr.bf16.mxu1 %v4975_v11  ;;  %v5034_v11 = vld [vmem:[%s6994_s1 + $0xbf0] ss:$8 sps:$4 sm:$0xff]  }
 0x13b   :  { %3671 = vmatpush2.bf16.msra.mxu0 %v4970_v13  ;;  %v5042_v13 = vld [vmem:[%s6994_s1 + $0xbe4] ss:$8 sps:$4 sm:$0xff]  }
 0x13c   :  { %3712 = vmatpush2.bf16.msra.mxu1 %v4973_v14  ;;  %3672 = vmatprep.subr.bf16.mxu0 %v4978_v15  ;;  %v5037_v14 = vld [vmem:[%s6994_s1 + $0xae0] ss:$8 sps:$4 sm:$0xff]  }
 0x13d   :  { %3713 = vmatprep.subr.bf16.mxu1 %v4981_v16  ;;  %v5040_v15 = vld [vmem:[%s6994_s1 + $0xbe0] ss:$8 sps:$4 sm:$0xff]   ;;  %v5045_v16 = vld [vmem:[%s6994_s1 + $0xad4] ss:$8 sps:$4 sm:$0xff]  }
 0x13f   :  { %3673 = vmatpush2.bf16.msra.mxu0 %v4976_v20  ;;  %v5048_v20 = vld [vmem:[%s6994_s1 + $0xbd4] ss:$8 sps:$4 sm:$0xff]  }
 0x140   :  { %3714 = vmatpush2.bf16.msra.mxu1 %v4979_v21  ;;  %3724 = vmatprep.subr.bf16.mxu0 %v4985_v22  ;;  %v5043_v21 = vld [vmem:[%s6994_s1 + $0xad0] ss:$8 sps:$4 sm:$0xff]  }
 0x141   :  { %3765 = vmatprep.subr.bf16.mxu1 %v4988_v24  ;;  %v5046_v22 = vld [vmem:[%s6994_s1 + $0xbd0] ss:$8 sps:$4 sm:$0xff]   ;;  %v5051_v24 = vld [vmem:[%s6994_s1 + $0xac4] ss:$8 sps:$4 sm:$0xff]  }
 0x142   :  { %v3430_v36 = vpop.f32.mrf.mxu0  ;;  %3675 = vmatmul.mubr.bf16.vlgmr.msra.gmra.mxu0 %v214_v29  ;;  %v5060_v29 = vld [vmem:[%s6994_s1 + $0xbb4] ss:$8 sps:$4 sm:$0xff]  }
 0x143   :  { %v3471_v37 = vpop.f32.mrf.mxu1  ;;  %3716 = vmatmul.mubr.bf16.vlgmr.msra.gmra.mxu1 %v216_v30  ;;  %v3431_v39 = vadd.f32 %v3430_v36, %v6174_v17  ;;  %3725 = vmatpush1.bf16.msra.mxu0 %v4983_v25  ;;  %v5000_v17 = vld [vmem:[%s6994_s1 + $0xb54] ss:$8 sps:$4 sm:$0xff]   ;;  %v5054_v25 = vld [vmem:[%s6994_s1 + $0xbc4] ss:$8 sps:$4 sm:$0xff]   ;;  %v5055_v30 = vld [vmem:[%s6994_s1 + $0xab0] ss:$8 sps:$4 sm:$0xff]  }
 0x144   :  { %3766 = vmatpush1.bf16.msra.mxu1 %v4986_v26  ;;  %v3432_v42 = vpop.f32.mrf.mxu0  ;;  %3726 = vmatprep.subr.bf16.mxu0 %v4991_v31  ;;  %v5049_v26 = vld [vmem:[%s6994_s1 + $0xac0] ss:$8 sps:$4 sm:$0xff]   ;;  %v5058_v31 = vld [vmem:[%s6994_s1 + $0xbb0] ss:$8 sps:$4 sm:$0xff]  }
 0x145   :  { %v3473_v44 = vpop.f32.mrf.mxu1  ;;  %3767 = vmatprep.subr.bf16.mxu1 %v4994_v32  ;;  %v6388_v46 = vadd.f32 %v3471_v37, %v3431_v39  ;;  %v3433_v47 = vadd.f32 %v3432_v42, %v6182_v23  ;;  %3756 = vmatprep.mubr.bf16.mxu0 %v219_v33  ;;  %v5003_v23 = vld [vmem:[%s6994_s1 + $0xa44] ss:$8 sps:$4 sm:$0xff]   ;;  %v5061_v36 = vld [vmem:[%s6994_s1 + $0xaa0] ss:$8 sps:$4 sm:$0xff]   ;;  %v5069_v39 = vld [vmem:[%s6994_s1 + $0xa94] ss:$8 sps:$4 sm:$0xff]  }
 0x146   :  { %3797 = vmatprep.mubr.bf16.mxu1 %v221_v34  ;;  %v3434_v48 = vpop.f32.mrf.mxu0  ;;  %v5063_v32 = vld [vmem:[%s6994_s1 + $0xaa4] ss:$8 sps:$4 sm:$0xff]   ;;  %v20_v34 = vld [vmem:[%s6995_s0 + $0x30] sm:$0xff]  ;;  %v5064_v37 = vld [vmem:[%s6994_s1 + $0xba0] ss:$8 sps:$4 sm:$0xff]  }
 0x147   :  { %v3475_v50 = vpop.f32.mrf.mxu1  ;;  %v6391_v51 = vadd.f32 %v3473_v44, %v3433_v47  ;;  %3727 = vmatpush1.bf16.msra.mxu0 %v4989_v55  ;;  %v5066_v33 = vld [vmem:[%s6994_s1 + $0xba4] ss:$8 sps:$4 sm:$0xff]   ;;  %v5072_v55 = vld [vmem:[%s6994_s1 + $0xb94] ss:$8 sps:$4 sm:$0xff]   ;;  %v5067_v42 = vld [vmem:[%s6994_s1 + $0xa90] ss:$8 sps:$4 sm:$0xff]   ;;  %v6553_v47 = vrot.slane %v20_v34, %v5432_v49 }
 0x148   :  { %3768 = vmatpush1.bf16.msra.mxu1 %v4992_v38  ;;  %v3435_v54 = vpop.f32.mrf.mxu0  ;;  %3728 = vmatprep.subr.bf16.mxu0 %v4997_v45  ;;  %v132_v38 = vcombine.high %v20_v34, %v20_v34  ;;  %v5070_v44 = vld [vmem:[%s6994_s1 + $0xb90] ss:$8 sps:$4 sm:$0xff]   ;;  %v5075_v45 = vld [vmem:[%s6994_s1 + $0xa84] ss:$8 sps:$4 sm:$0xff]   ;;  %v5073_v50 = vld [vmem:[%s6994_s1 + $0xa80] ss:$8 sps:$4 sm:$0xff]  }
 0x149   :  { %v3476_v35 = vpop.f32.mrf.mxu1  ;;  %3769 = vmatprep.subr.bf16.mxu1 %v5000_v17  ;;  %v5078_v17 = vld [vmem:[%s6994_s1 + $0xb84] ss:$8 sps:$4 sm:$0xff]   ;;  %v5085_v54 = vld [vmem:[%s6994_s1 + $0xd74] ss:$8 sps:$4 sm:$0xff]   ;;  %v5125_v34 = vld [vmem:[%s6994_s1 + $0xd00] ss:$8 sps:$4 sm:$0xff]  }
 0x14a   :  { %v6556_v48 = vrot.slane %v132_v38, %v5432_v49  ;;  %v147_v35 = vcombine.high %v6553_v47, %v6553_v47  ;;  %v5136_v38 = vld [vmem:[%s6994_s1 + $0xce4] ss:$8 sps:$4 sm:$0xff]  }
 0x14b   :  { %3729 = vmatpush1.bf16.msra.mxu0 %v4995_v52  ;;  %v5076_v52 = vld [vmem:[%s6994_s1 + $0xb80] ss:$8 sps:$4 sm:$0xff]  }
 0x14c   :  { %3770 = vmatpush1.bf16.msra.mxu1 %v4998_v53  ;;  %3730 = vmatprep.subr.bf16.mxu0 %v5003_v23  ;;  %v5082_v53 = vld [vmem:[%s6994_s1 + $0xc74] ss:$8 sps:$4 sm:$0xff]   ;;  %v148_v23 = vcombine.high %v6556_v48, %v6556_v48 }
 0x14d   :  { %3771 = vmatprep.subr.bf16.mxu1 %v5006_v56  ;;  %v218_v56 = vpack.c.bf16 %v6338_v18, %v6338_v18  ;;  %v5091_v18 = vld [vmem:[%s6994_s1 + $0xd64] ss:$8 sps:$4 sm:$0xff]  }
 0x14f   :  { %3731 = vmatpush1.bf16.msra.mxu0 %v5001_v57  ;;  %v220_v57 = vpack.c.bf16 %v6341_v19, %v6341_v19  ;;  %v223_v19 = vpack.c.bf16 %v147_v35, %v147_v35  ;;  %v5151_v35 = vld [vmem:[%s6994_s1 + $0xdc4] ss:$8 sps:$4 sm:$0xff]  }
 0x150   :  { %3772 = vmatpush1.bf16.msra.mxu1 %v5004_v58  ;;  %3732 = vmatprep.subr.bf16.mxu0 %v5009_v59  ;;  %v5080_v58 = vld [vmem:[%s6994_s1 + $0xc70] ss:$8 sps:$4 sm:$0xff]  }
 0x151   :  { %3773 = vmatprep.subr.bf16.mxu1 %v5012_v60  ;;  %v5083_v59 = vld [vmem:[%s6994_s1 + $0xd70] ss:$8 sps:$4 sm:$0xff]   ;;  %v5088_v60 = vld [vmem:[%s6994_s1 + $0xc64] ss:$8 sps:$4 sm:$0xff]  }
 0x153   :  { %3733 = vmatpush1.bf16.msra.mxu0 %v5007_v61  ;;  %v225_v61 = vpack.c.bf16 %v148_v23, %v148_v23  ;;  %v5146_v23 = vld [vmem:[%s6994_s1 + $0xcc0] ss:$8 sps:$4 sm:$0xff]  }
 0x154   :  { %3774 = vmatpush1.bf16.msra.mxu1 %v5010_v62  ;;  %3734 = vmatprep.subr.bf16.mxu0 %v5015_v63 }
 0x155   :  { %3775 = vmatprep.subr.bf16.mxu1 %v5018_v0 }
 0x157   :  { %3735 = vmatpush1.bf16.msra.mxu0 %v5013_v1  ;;  %v5086_v1 = vld [vmem:[%s6994_s1 + $0xc60] ss:$8 sps:$4 sm:$0xff]  }
 0x158   :  { %3776 = vmatpush1.bf16.msra.mxu1 %v5016_v2  ;;  %3736 = vmatprep.subr.bf16.mxu0 %v5021_v3  ;;  %v5089_v2 = vld [vmem:[%s6994_s1 + $0xd60] ss:$8 sps:$4 sm:$0xff]  }
 0x159   :  { %3777 = vmatprep.subr.bf16.mxu1 %v5024_v4 }
 0x15b   :  { %3737 = vmatpush1.bf16.msra.mxu0 %v5019_v43  ;;  %v5094_v43 = vld [vmem:[%s6994_s1 + $0xc54] ss:$8 sps:$4 sm:$0xff]  }
 0x15c   :  { %3778 = vmatpush1.bf16.msra.mxu1 %v5022_v40  ;;  %3738 = vmatprep.subr.bf16.mxu0 %v5027_v41 }
 0x15d   :  { %3779 = vmatprep.subr.bf16.mxu1 %v5030_v5 }
 0x15f   :  { %3739 = vmatpush1.bf16.msra.mxu0 %v5025_v6 }
 0x160   :  { %3780 = vmatpush1.bf16.msra.mxu1 %v5028_v7  ;;  %3740 = vmatprep.subr.bf16.mxu0 %v5033_v8  ;;  %v5092_v8 = vld [vmem:[%s6994_s1 + $0xc50] ss:$8 sps:$4 sm:$0xff]  }
 0x161   :  { %3781 = vmatprep.subr.bf16.mxu1 %v5036_v9  ;;  %v5095_v9 = vld [vmem:[%s6994_s1 + $0xd50] ss:$8 sps:$4 sm:$0xff]  }
 0x163   :  { %3741 = vmatpush2.bf16.msra.mxu0 %v5031_v10 }
 0x164   :  { %3782 = vmatpush2.bf16.msra.mxu1 %v5034_v11  ;;  %3742 = vmatprep.subr.bf16.mxu0 %v5039_v12  ;;  %v5103_v12 = vld [vmem:[%s6994_s1 + $0xd44] ss:$8 sps:$4 sm:$0xff]  }
 0x165   :  { %3783 = vmatprep.subr.bf16.mxu1 %v5042_v13  ;;  %v5098_v13 = vld [vmem:[%s6994_s1 + $0xc40] ss:$8 sps:$4 sm:$0xff]  }
 0x167   :  { %3743 = vmatpush2.bf16.msra.mxu0 %v5037_v14  ;;  %v5101_v14 = vld [vmem:[%s6994_s1 + $0xd40] ss:$8 sps:$4 sm:$0xff]  }
 0x168   :  { %3784 = vmatpush2.bf16.msra.mxu1 %v5040_v15  ;;  %3744 = vmatprep.subr.bf16.mxu0 %v5045_v16  ;;  %v5106_v15 = vld [vmem:[%s6994_s1 + $0xc34] ss:$8 sps:$4 sm:$0xff]  }
 0x169   :  { %3785 = vmatprep.subr.bf16.mxu1 %v5048_v20  ;;  %v5109_v16 = vld [vmem:[%s6994_s1 + $0xd34] ss:$8 sps:$4 sm:$0xff]   ;;  %v5104_v20 = vld [vmem:[%s6994_s1 + $0xc30] ss:$8 sps:$4 sm:$0xff]  }
 0x16b   :  { %3745 = vmatpush2.bf16.msra.mxu0 %v5043_v21  ;;  %v5107_v21 = vld [vmem:[%s6994_s1 + $0xd30] ss:$8 sps:$4 sm:$0xff]  }
 0x16c   :  { %3786 = vmatpush2.bf16.msra.mxu1 %v5046_v22  ;;  %3746 = vmatprep.subr.bf16.mxu0 %v5051_v24  ;;  %v5112_v22 = vld [vmem:[%s6994_s1 + $0xc24] ss:$8 sps:$4 sm:$0xff]  }
 0x16d   :  { %3787 = vmatprep.subr.bf16.mxu1 %v5054_v25  ;;  %v5115_v24 = vld [vmem:[%s6994_s1 + $0xd24] ss:$8 sps:$4 sm:$0xff]   ;;  %v5110_v25 = vld [vmem:[%s6994_s1 + $0xc20] ss:$8 sps:$4 sm:$0xff]  }
 0x16f   :  { %3747 = vmatpush2.bf16.msra.mxu0 %v5049_v26  ;;  %v5113_v26 = vld [vmem:[%s6994_s1 + $0xd20] ss:$8 sps:$4 sm:$0xff]  }
 0x170   :  { %3788 = vmatpush2.bf16.msra.mxu1 %v5052_v27  ;;  %3748 = vmatprep.subr.bf16.mxu0 %v5057_v28  ;;  %v5118_v27 = vld [vmem:[%s6994_s1 + $0xc14] ss:$8 sps:$4 sm:$0xff]  }
 0x171   :  { %3789 = vmatprep.subr.bf16.mxu1 %v5060_v29  ;;  %v5121_v28 = vld [vmem:[%s6994_s1 + $0xd14] ss:$8 sps:$4 sm:$0xff]   ;;  %v5116_v29 = vld [vmem:[%s6994_s1 + $0xc10] ss:$8 sps:$4 sm:$0xff]  }
 0x173   :  { %3749 = vmatpush2.bf16.msra.mxu0 %v5055_v30  ;;  %v5119_v30 = vld [vmem:[%s6994_s1 + $0xd10] ss:$8 sps:$4 sm:$0xff]  }
 0x174   :  { %3790 = vmatpush2.bf16.msra.mxu1 %v5058_v31  ;;  %3750 = vmatprep.subr.bf16.mxu0 %v5063_v32  ;;  %v5124_v31 = vld [vmem:[%s6994_s1 + $0xc04] ss:$8 sps:$4 sm:$0xff]  }
 0x175   :  { %3791 = vmatprep.subr.bf16.mxu1 %v5066_v33  ;;  %v5127_v32 = vld [vmem:[%s6994_s1 + $0xd04] ss:$8 sps:$4 sm:$0xff]   ;;  %v5122_v33 = vld [vmem:[%s6994_s1 + $0xc00] ss:$8 sps:$4 sm:$0xff]  }
 0x177   :  { %3751 = vmatpush2.bf16.msra.mxu0 %v5061_v36  ;;  %v5130_v36 = vld [vmem:[%s6994_s1 + $0xcf4] ss:$8 sps:$4 sm:$0xff]  }
 0x178   :  { %3792 = vmatpush2.bf16.msra.mxu1 %v5064_v37  ;;  %3752 = vmatprep.subr.bf16.mxu0 %v5069_v39  ;;  %v5133_v37 = vld [vmem:[%s6994_s1 + $0xdf4] ss:$8 sps:$4 sm:$0xff]   ;;  %v5128_v39 = vld [vmem:[%s6994_s1 + $0xcf0] ss:$8 sps:$4 sm:$0xff]  }
 0x179   :  { %3793 = vmatprep.subr.bf16.mxu1 %v5072_v55  ;;  %v5131_v55 = vld [vmem:[%s6994_s1 + $0xdf0] ss:$8 sps:$4 sm:$0xff]  }
 0x17b   :  { %3753 = vmatpush2.bf16.msra.mxu0 %v5067_v42  ;;  %v5139_v42 = vld [vmem:[%s6994_s1 + $0xde4] ss:$8 sps:$4 sm:$0xff]  }
 0x17c   :  { %3794 = vmatpush2.bf16.msra.mxu1 %v5070_v44  ;;  %3754 = vmatprep.subr.bf16.mxu0 %v5075_v45  ;;  %v5134_v44 = vld [vmem:[%s6994_s1 + $0xce0] ss:$8 sps:$4 sm:$0xff]  }
 0x17d   :  { %3795 = vmatprep.subr.bf16.mxu1 %v5078_v17  ;;  %v5137_v45 = vld [vmem:[%s6994_s1 + $0xde0] ss:$8 sps:$4 sm:$0xff]   ;;  %v5142_v17 = vld [vmem:[%s6994_s1 + $0xcd4] ss:$8 sps:$4 sm:$0xff]  }
 0x17f   :  { %3755 = vmatpush2.bf16.msra.mxu0 %v5073_v50  ;;  %v5145_v50 = vld [vmem:[%s6994_s1 + $0xdd4] ss:$8 sps:$4 sm:$0xff]  }
 0x180   :  { %3796 = vmatpush2.bf16.msra.mxu1 %v5076_v52  ;;  %3806 = vmatprep.subr.bf16.mxu0 %v5082_v53  ;;  %v5140_v52 = vld [vmem:[%s6994_s1 + $0xcd0] ss:$8 sps:$4 sm:$0xff]  }
 0x181   :  { %3847 = vmatprep.subr.bf16.mxu1 %v5085_v54  ;;  %v5143_v53 = vld [vmem:[%s6994_s1 + $0xdd0] ss:$8 sps:$4 sm:$0xff]   ;;  %v5148_v54 = vld [vmem:[%s6994_s1 + $0xcc4] ss:$8 sps:$4 sm:$0xff]  }
 0x182   :  { %v3512_v62 = vpop.f32.mrf.mxu0  ;;  %3757 = vmatmul.mubr.bf16.vlgmr.msra.gmra.mxu0 %v218_v56  ;;  %v5149_v56 = vld [vmem:[%s6994_s1 + $0xdc0] ss:$8 sps:$4 sm:$0xff]  }
 0x183   :  { %v3553_v63 = vpop.f32.mrf.mxu1  ;;  %3798 = vmatmul.mubr.bf16.vlgmr.msra.gmra.mxu1 %v220_v57  ;;  %v3513_v0 = vadd.f32 %v3512_v62, %v6388_v46  ;;  %3807 = vmatpush1.bf16.msra.mxu0 %v5080_v58  ;;  %v5097_v46 = vld [vmem:[%s6994_s1 + $0xd54] ss:$8 sps:$4 sm:$0xff]   ;;  %v5158_v62 = vld [vmem:[%s6994_s1 + $0xca0] ss:$8 sps:$4 sm:$0xff]  }
 0x184   :  { %3848 = vmatpush1.bf16.msra.mxu1 %v5083_v59  ;;  %v3514_v3 = vpop.f32.mrf.mxu0  ;;  %3808 = vmatprep.subr.bf16.mxu0 %v5088_v60  ;;  %v5154_v57 = vld [vmem:[%s6994_s1 + $0xcb4] ss:$8 sps:$4 sm:$0xff]   ;;  %v5152_v59 = vld [vmem:[%s6994_s1 + $0xcb0] ss:$8 sps:$4 sm:$0xff]  }
 0x185   :  { %v3555_v4 = vpop.f32.mrf.mxu1  ;;  %3849 = vmatprep.subr.bf16.mxu1 %v5091_v18  ;;  %v6603_v40 = vadd.f32 %v3553_v63, %v3513_v0  ;;  %v3515_v41 = vadd.f32 %v3514_v3, %v6391_v51  ;;  %3838 = vmatprep.mubr.bf16.mxu0 %v223_v19  ;;  %v5100_v51 = vld [vmem:[%s6994_s1 + $0xc44] ss:$8 sps:$4 sm:$0xff]   ;;  %v5157_v58 = vld [vmem:[%s6994_s1 + $0xdb4] ss:$8 sps:$4 sm:$0xff]   ;;  %v5155_v60 = vld [vmem:[%s6994_s1 + $0xdb0] ss:$8 sps:$4 sm:$0xff]  }
 0x186   :  { %3879 = vmatprep.mubr.bf16.mxu1 %v225_v61  ;;  %v3516_v5 = vpop.f32.mrf.mxu0  ;;  %v5160_v18 = vld [vmem:[%s6994_s1 + $0xca4] ss:$8 sps:$4 sm:$0xff]   ;;  %v21_v61 = vld [vmem:[%s6995_s0 + $0x38] sm:$0xff]  ;;  %v5161_v63 = vld [vmem:[%s6994_s1 + $0xda0] ss:$8 sps:$4 sm:$0xff]  }
 0x187   :  { %v3557_v6 = vpop.f32.mrf.mxu1  ;;  %v6606_v7 = vadd.f32 %v3555_v4, %v3515_v41  ;;  %3809 = vmatpush1.bf16.msra.mxu0 %v5086_v1  ;;  %v5163_v19 = vld [vmem:[%s6994_s1 + $0xda4] ss:$8 sps:$4 sm:$0xff]   ;;  %v5166_v0 = vld [vmem:[%s6994_s1 + $0xc94] ss:$8 sps:$4 sm:$0xff]   ;;  %v5164_v3 = vld [vmem:[%s6994_s1 + $0xc90] ss:$8 sps:$4 sm:$0xff]   ;;  %v6768_v41 = vrot.slane %v21_v61, %v5432_v49 }
 0x188   :  { %3850 = vmatpush1.bf16.msra.mxu1 %v5089_v2  ;;  %v3517_v10 = vpop.f32.mrf.mxu0  ;;  %3810 = vmatprep.subr.bf16.mxu0 %v5094_v43  ;;  %v5169_v1 = vld [vmem:[%s6994_s1 + $0xd94] ss:$8 sps:$4 sm:$0xff]   ;;  %v149_v2 = vcombine.high %v21_v61, %v21_v61  ;;  %v5167_v4 = vld [vmem:[%s6994_s1 + $0xd90] ss:$8 sps:$4 sm:$0xff]   ;;  %v5172_v43 = vld [vmem:[%s6994_s1 + $0xc84] ss:$8 sps:$4 sm:$0xff]  }
 0x189   :  { %v3558_v11 = vpop.f32.mrf.mxu1  ;;  %3851 = vmatprep.subr.bf16.mxu1 %v5097_v46  ;;  %v5175_v46 = vld [vmem:[%s6994_s1 + $0xd84] ss:$8 sps:$4 sm:$0xff]   ;;  %v5170_v6 = vld [vmem:[%s6994_s1 + $0xc80] ss:$8 sps:$4 sm:$0xff]   ;;  %v164_v10 = vcombine.high %v6768_v41, %v6768_v41  ;;  %v5227_v61 = vld [vmem:[%s6994_s1 + $0xef4] ss:$8 sps:$4 sm:$0xff]  }
 0x18a   :  { %v6771_v5 = vrot.slane %v149_v2, %v5432_v49  ;;  %v5182_v49 = vld [vmem:[%s6994_s1 + $0xf74] ss:$8 sps:$4 sm:$0xff]   ;;  %v5236_v2 = vld [vmem:[%s6994_s1 + $0xfe4] ss:$8 sps:$4 sm:$0xff]  }
 0x18b   :  { %3811 = vmatpush1.bf16.msra.mxu0 %v5092_v8  ;;  %v5173_v8 = vld [vmem:[%s6994_s1 + $0xd80] ss:$8 sps:$4 sm:$0xff]  }
 0x18c   :  { %3852 = vmatpush1.bf16.msra.mxu1 %v5095_v9  ;;  %3812 = vmatprep.subr.bf16.mxu0 %v5100_v51  ;;  %v5179_v9 = vld [vmem:[%s6994_s1 + $0xe74] ss:$8 sps:$4 sm:$0xff]   ;;  %v165_v11 = vcombine.high %v6771_v5, %v6771_v5  ;;  %v222_v51 = vpack.c.bf16 %v6553_v47, %v6553_v47  ;;  %v5188_v47 = vld [vmem:[%s6994_s1 + $0xf64] ss:$8 sps:$4 sm:$0xff]  }
 0x18d   :  { %3853 = vmatprep.subr.bf16.mxu1 %v5103_v12  ;;  %v224_v12 = vpack.c.bf16 %v6556_v48, %v6556_v48  ;;  %v227_v48 = vpack.c.bf16 %v164_v10, %v164_v10  ;;  %v5243_v10 = vld [vmem:[%s6994_s1 + $0xec0] ss:$8 sps:$4 sm:$0xff]  }
 0x18f   :  { %3813 = vmatpush1.bf16.msra.mxu0 %v5098_v13  ;;  %v5177_v13 = vld [vmem:[%s6994_s1 + $0xe70] ss:$8 sps:$4 sm:$0xff]  }
 0x190   :  { %3854 = vmatpush1.bf16.msra.mxu1 %v5101_v14  ;;  %3814 = vmatprep.subr.bf16.mxu0 %v5106_v15  ;;  %v5180_v14 = vld [vmem:[%s6994_s1 + $0xf70] ss:$8 sps:$4 sm:$0xff]   ;;  %v5185_v15 = vld [vmem:[%s6994_s1 + $0xe64] ss:$8 sps:$4 sm:$0xff]  }
 0x191   :  { %3855 = vmatprep.subr.bf16.mxu1 %v5109_v16  ;;  %v229_v16 = vpack.c.bf16 %v165_v11, %v165_v11  ;;  %v5246_v11 = vld [vmem:[%s6994_s1 + $0xfc0] ss:$8 sps:$4 sm:$0xff]  }
 0x193   :  { %3815 = vmatpush1.bf16.msra.mxu0 %v5104_v20 }
 0x194   :  { %3856 = vmatpush1.bf16.msra.mxu1 %v5107_v21  ;;  %3816 = vmatprep.subr.bf16.mxu0 %v5112_v22 }
 0x195   :  { %3857 = vmatprep.subr.bf16.mxu1 %v5115_v24  ;;  %v5183_v24 = vld [vmem:[%s6994_s1 + $0xe60] ss:$8 sps:$4 sm:$0xff]  }
 0x197   :  { %3817 = vmatpush1.bf16.msra.mxu0 %v5110_v25  ;;  %v5186_v25 = vld [vmem:[%s6994_s1 + $0xf60] ss:$8 sps:$4 sm:$0xff]  }
 0x198   :  { %3858 = vmatpush1.bf16.msra.mxu1 %v5113_v26  ;;  %3818 = vmatprep.subr.bf16.mxu0 %v5118_v27 }
 0x199   :  { %3859 = vmatprep.subr.bf16.mxu1 %v5121_v28  ;;  %v5191_v28 = vld [vmem:[%s6994_s1 + $0xe54] ss:$8 sps:$4 sm:$0xff]  }
 0x19b   :  { %3819 = vmatpush1.bf16.msra.mxu0 %v5116_v29 }
 0x19c   :  { %3860 = vmatpush1.bf16.msra.mxu1 %v5119_v30  ;;  %3820 = vmatprep.subr.bf16.mxu0 %v5124_v31 }
 0x19d   :  { %3861 = vmatprep.subr.bf16.mxu1 %v5127_v32 }
 0x19f   :  { %3821 = vmatpush1.bf16.msra.mxu0 %v5122_v33 }
 0x1a0   :  { %3862 = vmatpush1.bf16.msra.mxu1 %v5125_v34  ;;  %3822 = vmatprep.subr.bf16.mxu0 %v5130_v36  ;;  %v5189_v34 = vld [vmem:[%s6994_s1 + $0xe50] ss:$8 sps:$4 sm:$0xff]  }
 0x1a1   :  { %3863 = vmatprep.subr.bf16.mxu1 %v5133_v37  ;;  %v5192_v36 = vld [vmem:[%s6994_s1 + $0xf50] ss:$8 sps:$4 sm:$0xff]  }
 0x1a3   :  { %3823 = vmatpush2.bf16.msra.mxu0 %v5128_v39 }
 0x1a4   :  { %3864 = vmatpush2.bf16.msra.mxu1 %v5131_v55  ;;  %3824 = vmatprep.subr.bf16.mxu0 %v5136_v38  ;;  %v5200_v55 = vld [vmem:[%s6994_s1 + $0xf44] ss:$8 sps:$4 sm:$0xff]   ;;  %v5195_v38 = vld [vmem:[%s6994_s1 + $0xe40] ss:$8 sps:$4 sm:$0xff]  }
 0x1a5   :  { %3865 = vmatprep.subr.bf16.mxu1 %v5139_v42  ;;  %v5198_v42 = vld [vmem:[%s6994_s1 + $0xf40] ss:$8 sps:$4 sm:$0xff]  }
 0x1a7   :  { %3825 = vmatpush2.bf16.msra.mxu0 %v5134_v44  ;;  %v5203_v44 = vld [vmem:[%s6994_s1 + $0xe34] ss:$8 sps:$4 sm:$0xff]  }
 0x1a8   :  { %3866 = vmatpush2.bf16.msra.mxu1 %v5137_v45  ;;  %3826 = vmatprep.subr.bf16.mxu0 %v5142_v17  ;;  %v5206_v45 = vld [vmem:[%s6994_s1 + $0xf34] ss:$8 sps:$4 sm:$0xff]   ;;  %v5201_v17 = vld [vmem:[%s6994_s1 + $0xe30] ss:$8 sps:$4 sm:$0xff]  }
 0x1a9   :  { %3867 = vmatprep.subr.bf16.mxu1 %v5145_v50  ;;  %v5204_v50 = vld [vmem:[%s6994_s1 + $0xf30] ss:$8 sps:$4 sm:$0xff]  }
 0x1ab   :  { %3827 = vmatpush2.bf16.msra.mxu0 %v5140_v52  ;;  %v5209_v52 = vld [vmem:[%s6994_s1 + $0xe24] ss:$8 sps:$4 sm:$0xff]  }
 0x1ac   :  { %3868 = vmatpush2.bf16.msra.mxu1 %v5143_v53  ;;  %3828 = vmatprep.subr.bf16.mxu0 %v5148_v54  ;;  %v5212_v53 = vld [vmem:[%s6994_s1 + $0xf24] ss:$8 sps:$4 sm:$0xff]   ;;  %v5207_v54 = vld [vmem:[%s6994_s1 + $0xe20] ss:$8 sps:$4 sm:$0xff]  }
 0x1ad   :  { %3869 = vmatprep.subr.bf16.mxu1 %v5151_v35  ;;  %v5210_v35 = vld [vmem:[%s6994_s1 + $0xf20] ss:$8 sps:$4 sm:$0xff]  }
 0x1af   :  { %3829 = vmatpush2.bf16.msra.mxu0 %v5146_v23  ;;  %v5215_v23 = vld [vmem:[%s6994_s1 + $0xe14] ss:$8 sps:$4 sm:$0xff]  }
 0x1b0   :  { %3870 = vmatpush2.bf16.msra.mxu1 %v5149_v56  ;;  %3830 = vmatprep.subr.bf16.mxu0 %v5154_v57  ;;  %v5218_v56 = vld [vmem:[%s6994_s1 + $0xf14] ss:$8 sps:$4 sm:$0xff]   ;;  %v5213_v57 = vld [vmem:[%s6994_s1 + $0xe10] ss:$8 sps:$4 sm:$0xff]  }
 0x1b1   :  { %3871 = vmatprep.subr.bf16.mxu1 %v5157_v58  ;;  %v5216_v58 = vld [vmem:[%s6994_s1 + $0xf10] ss:$8 sps:$4 sm:$0xff]  }
 0x1b3   :  { %3831 = vmatpush2.bf16.msra.mxu0 %v5152_v59  ;;  %v5221_v59 = vld [vmem:[%s6994_s1 + $0xe04] ss:$8 sps:$4 sm:$0xff]  }
 0x1b4   :  { %3872 = vmatpush2.bf16.msra.mxu1 %v5155_v60  ;;  %3832 = vmatprep.subr.bf16.mxu0 %v5160_v18  ;;  %v5224_v60 = vld [vmem:[%s6994_s1 + $0xf04] ss:$8 sps:$4 sm:$0xff]   ;;  %v5219_v18 = vld [vmem:[%s6994_s1 + $0xe00] ss:$8 sps:$4 sm:$0xff]  }
 0x1b5   :  { %3873 = vmatprep.subr.bf16.mxu1 %v5163_v19  ;;  %v5222_v19 = vld [vmem:[%s6994_s1 + $0xf00] ss:$8 sps:$4 sm:$0xff]  }
 0x1b7   :  { %3833 = vmatpush2.bf16.msra.mxu0 %v5158_v62  ;;  %v5230_v62 = vld [vmem:[%s6994_s1 + $0xff4] ss:$8 sps:$4 sm:$0xff]  }
 0x1b8   :  { %3874 = vmatpush2.bf16.msra.mxu1 %v5161_v63  ;;  %3834 = vmatprep.subr.bf16.mxu0 %v5166_v0  ;;  %v5225_v63 = vld [vmem:[%s6994_s1 + $0xef0] ss:$8 sps:$4 sm:$0xff]  }
 0x1b9   :  { %3875 = vmatprep.subr.bf16.mxu1 %v5169_v1  ;;  %v5228_v0 = vld [vmem:[%s6994_s1 + $0xff0] ss:$8 sps:$4 sm:$0xff]   ;;  %v5233_v1 = vld [vmem:[%s6994_s1 + $0xee4] ss:$8 sps:$4 sm:$0xff]  }
 0x1bb   :  { %3835 = vmatpush2.bf16.msra.mxu0 %v5164_v3  ;;  %v5231_v3 = vld [vmem:[%s6994_s1 + $0xee0] ss:$8 sps:$4 sm:$0xff]  }
 0x1bc   :  { %3876 = vmatpush2.bf16.msra.mxu1 %v5167_v4  ;;  %3836 = vmatprep.subr.bf16.mxu0 %v5172_v43  ;;  %v5234_v4 = vld [vmem:[%s6994_s1 + $0xfe0] ss:$8 sps:$4 sm:$0xff]   ;;  %v5239_v43 = vld [vmem:[%s6994_s1 + $0xed4] ss:$8 sps:$4 sm:$0xff]  }
 0x1bd   :  { %3877 = vmatprep.subr.bf16.mxu1 %v5175_v46  ;;  %v5242_v46 = vld [vmem:[%s6994_s1 + $0xfd4] ss:$8 sps:$4 sm:$0xff]  }
 0x1bf   :  { %3837 = vmatpush2.bf16.msra.mxu0 %v5170_v6  ;;  %v5237_v6 = vld [vmem:[%s6994_s1 + $0xed0] ss:$8 sps:$4 sm:$0xff]  }
 0x1c0   :  { %3878 = vmatpush2.bf16.msra.mxu1 %v5173_v8  ;;  %3888 = vmatprep.subr.bf16.mxu0 %v5179_v9  ;;  %v5240_v8 = vld [vmem:[%s6994_s1 + $0xfd0] ss:$8 sps:$4 sm:$0xff]   ;;  %v5245_v9 = vld [vmem:[%s6994_s1 + $0xec4] ss:$8 sps:$4 sm:$0xff]  }
 0x1c1   :  { %3929 = vmatprep.subr.bf16.mxu1 %v5182_v49  ;;  %v5248_v49 = vld [vmem:[%s6994_s1 + $0xfc4] ss:$8 sps:$4 sm:$0xff]  }
 0x1c2   :  { %v3594_v20 = vpop.f32.mrf.mxu0  ;;  %3839 = vmatmul.mubr.bf16.vlgmr.msra.gmra.mxu0 %v222_v51  ;;  %v5251_v51 = vld [vmem:[%s6994_s1 + $0xeb4] ss:$8 sps:$4 sm:$0xff]  }
 0x1c3   :  { %v3635_v21 = vpop.f32.mrf.mxu1  ;;  %3880 = vmatmul.mubr.bf16.vlgmr.msra.gmra.mxu1 %v224_v12  ;;  %v3595_v22 = vadd.f32 %v3594_v20, %v6603_v40  ;;  %3889 = vmatpush1.bf16.msra.mxu0 %v5177_v13  ;;  %v5194_v40 = vld [vmem:[%s6994_s1 + $0xf54] ss:$8 sps:$4 sm:$0xff]   ;;  %v5249_v13 = vld [vmem:[%s6994_s1 + $0xeb0] ss:$8 sps:$4 sm:$0xff]  }
 0x1c4   :  { %3930 = vmatpush1.bf16.msra.mxu1 %v5180_v14  ;;  %v3596_v26 = vpop.f32.mrf.mxu0  ;;  %3890 = vmatprep.subr.bf16.mxu0 %v5185_v15  ;;  %v5254_v12 = vld [vmem:[%s6994_s1 + $0xfb4] ss:$8 sps:$4 sm:$0xff]   ;;  %v5252_v14 = vld [vmem:[%s6994_s1 + $0xfb0] ss:$8 sps:$4 sm:$0xff]   ;;  %v5257_v15 = vld [vmem:[%s6994_s1 + $0xea4] ss:$8 sps:$4 sm:$0xff]  }
 0x1c5   :  { %v3637_v27 = vpop.f32.mrf.mxu1  ;;  %3931 = vmatprep.subr.bf16.mxu1 %v5188_v47  ;;  %v6818_v29 = vadd.f32 %v3635_v21, %v3595_v22  ;;  %v3597_v30 = vadd.f32 %v3596_v26, %v6606_v7  ;;  %3920 = vmatprep.mubr.bf16.mxu0 %v227_v48  ;;  %v5197_v7 = vld [vmem:[%s6994_s1 + $0xe44] ss:$8 sps:$4 sm:$0xff]   ;;  %v5255_v48 = vld [vmem:[%s6994_s1 + $0xea0] ss:$8 sps:$4 sm:$0xff]   ;;  %v5263_v20 = vld [vmem:[%s6994_s1 + $0xe94] ss:$8 sps:$4 sm:$0xff]  }
 0x1c6   :  { %3961 = vmatprep.mubr.bf16.mxu1 %v229_v16  ;;  %v3598_v31 = vpop.f32.mrf.mxu0  ;;  %v5260_v47 = vld [vmem:[%s6994_s1 + $0xfa4] ss:$8 sps:$4 sm:$0xff]   ;;  %v5258_v16 = vld [vmem:[%s6994_s1 + $0xfa0] ss:$8 sps:$4 sm:$0xff]   ;;  %v5266_v21 = vld [vmem:[%s6994_s1 + $0xf94] ss:$8 sps:$4 sm:$0xff]  }
 0x1c7   :  { %v3639_v32 = vpop.f32.mrf.mxu1  ;;  %v6821_v33 = vadd.f32 %v3637_v27, %v3597_v30  ;;  %3891 = vmatpush1.bf16.msra.mxu0 %v5183_v24  ;;  %v5261_v22 = vld [vmem:[%s6994_s1 + $0xe90] ss:$8 sps:$4 sm:$0xff]   ;;  %v5272_v26 = vld [vmem:[%s6994_s1 + $0xf84] ss:$8 sps:$4 sm:$0xff]   ;;  %v5267_v27 = vld [vmem:[%s6994_s1 + $0xe80] ss:$8 sps:$4 sm:$0xff]   ;;  %v228_v30 = vpack.c.bf16 %v6771_v5, %v6771_v5 }
 0x1c8   :  { %3932 = vmatpush1.bf16.msra.mxu1 %v5186_v25  ;;  %v3599_v37 = vpop.f32.mrf.mxu0  ;;  %3892 = vmatprep.subr.bf16.mxu0 %v5191_v28  ;;  %v5264_v24 = vld [vmem:[%s6994_s1 + $0xf90] ss:$8 sps:$4 sm:$0xff]   ;;  %v5269_v25 = vld [vmem:[%s6994_s1 + $0xe84] ss:$8 sps:$4 sm:$0xff]   ;;  %v5270_v28 = vld [vmem:[%s6994_s1 + $0xf80] ss:$8 sps:$4 sm:$0xff]  }
 0x1c9   :  { %v3640_v39 = vpop.f32.mrf.mxu1  ;;  %3933 = vmatprep.subr.bf16.mxu1 %v5194_v40  ;;  %v226_v40 = vpack.c.bf16 %v6768_v41, %v6768_v41 }
 0x1cb   :  { %3893 = vmatpush1.bf16.msra.mxu0 %v5189_v34 }
 0x1cc   :  { %3934 = vmatpush1.bf16.msra.mxu1 %v5192_v36  ;;  %3894 = vmatprep.subr.bf16.mxu0 %v5197_v7 }
 0x1cd   :  { %3935 = vmatprep.subr.bf16.mxu1 %v5200_v55 }
 0x1cf   :  { %3895 = vmatpush1.bf16.msra.mxu0 %v5195_v38 }
 0x1d0   :  { %3936 = vmatpush1.bf16.msra.mxu1 %v5198_v42  ;;  %3896 = vmatprep.subr.bf16.mxu0 %v5203_v44 }
 0x1d1   :  { %3937 = vmatprep.subr.bf16.mxu1 %v5206_v45 }
 0x1d3   :  { %3897 = vmatpush1.bf16.msra.mxu0 %v5201_v17 }
 0x1d4   :  { %3938 = vmatpush1.bf16.msra.mxu1 %v5204_v50  ;;  %3898 = vmatprep.subr.bf16.mxu0 %v5209_v52 }
 0x1d5   :  { %3939 = vmatprep.subr.bf16.mxu1 %v5212_v53 }
 0x1d7   :  { %3899 = vmatpush1.bf16.msra.mxu0 %v5207_v54 }
 0x1d8   :  { %3940 = vmatpush1.bf16.msra.mxu1 %v5210_v35  ;;  %3900 = vmatprep.subr.bf16.mxu0 %v5215_v23 }
 0x1d9   :  { %3941 = vmatprep.subr.bf16.mxu1 %v5218_v56 }
 0x1db   :  { %3901 = vmatpush1.bf16.msra.mxu0 %v5213_v57 }
 0x1dc   :  { %3942 = vmatpush1.bf16.msra.mxu1 %v5216_v58  ;;  %3902 = vmatprep.subr.bf16.mxu0 %v5221_v59 }
 0x1dd   :  { %3943 = vmatprep.subr.bf16.mxu1 %v5224_v60 }
 0x1df   :  { %3903 = vmatpush1.bf16.msra.mxu0 %v5219_v18 }
 0x1e0   :  { %3944 = vmatpush1.bf16.msra.mxu1 %v5222_v19  ;;  %3904 = vmatprep.subr.bf16.mxu0 %v5227_v61 }
 0x1e1   :  { %3945 = vmatprep.subr.bf16.mxu1 %v5230_v62 }
 0x1e3   :  { %3905 = vmatpush2.bf16.msra.mxu0 %v5225_v63 }
 0x1e4   :  { %3946 = vmatpush2.bf16.msra.mxu1 %v5228_v0  ;;  %3906 = vmatprep.subr.bf16.mxu0 %v5233_v1 }
 0x1e5   :  { %3947 = vmatprep.subr.bf16.mxu1 %v5236_v2 }
 0x1e7   :  { %3907 = vmatpush2.bf16.msra.mxu0 %v5231_v3 }
 0x1e8   :  { %3948 = vmatpush2.bf16.msra.mxu1 %v5234_v4  ;;  %3908 = vmatprep.subr.bf16.mxu0 %v5239_v43 }
 0x1e9   :  { %3949 = vmatprep.subr.bf16.mxu1 %v5242_v46 }
 0x1eb   :  { %3909 = vmatpush2.bf16.msra.mxu0 %v5237_v6 }
 0x1ec   :  { %3950 = vmatpush2.bf16.msra.mxu1 %v5240_v8  ;;  %3910 = vmatprep.subr.bf16.mxu0 %v5245_v9 }
 0x1ed   :  { %3951 = vmatprep.subr.bf16.mxu1 %v5248_v49 }
 0x1ef   :  { %3911 = vmatpush2.bf16.msra.mxu0 %v5243_v10 }
 0x1f0   :  { %3952 = vmatpush2.bf16.msra.mxu1 %v5246_v11  ;;  %3912 = vmatprep.subr.bf16.mxu0 %v5251_v51 }
 0x1f1   :  { %3953 = vmatprep.subr.bf16.mxu1 %v5254_v12 }
 0x1f3   :  { %3913 = vmatpush2.bf16.msra.mxu0 %v5249_v13 }
 0x1f4   :  { %3954 = vmatpush2.bf16.msra.mxu1 %v5252_v14  ;;  %3914 = vmatprep.subr.bf16.mxu0 %v5257_v15 }
 0x1f5   :  { %3955 = vmatprep.subr.bf16.mxu1 %v5260_v47 }
 0x1f7   :  { %3915 = vmatpush2.bf16.msra.mxu0 %v5255_v48 }
 0x1f8   :  { %3956 = vmatpush2.bf16.msra.mxu1 %v5258_v16  ;;  %3916 = vmatprep.subr.bf16.mxu0 %v5263_v20 }
 0x1f9   :  { %3957 = vmatprep.subr.bf16.mxu1 %v5266_v21 }
 0x1fb   :  { %3917 = vmatpush2.bf16.msra.mxu0 %v5261_v22 }
 0x1fc   :  { %3958 = vmatpush2.bf16.msra.mxu1 %v5264_v24  ;;  %3918 = vmatprep.subr.bf16.mxu0 %v5269_v25 }
 0x1fd   :  { %3959 = vmatprep.subr.bf16.mxu1 %v5272_v26 }
 0x1ff   :  { %3919 = vmatpush2.bf16.msra.mxu0 %v5267_v27 }
 0x200   :  { %3960 = vmatpush2.bf16.msra.mxu1 %v5270_v28 }
 0x202   :  { %v3676_v31 = vpop.f32.mrf.mxu0  ;;  %3921 = vmatmul.mubr.bf16.vlgmr.msra.gmra.mxu0 %v226_v40 }
 0x203   :  { %v3717_v32 = vpop.f32.mrf.mxu1  ;;  %3962 = vmatmul.mubr.bf16.vlgmr.msra.gmra.mxu1 %v228_v30  ;;  %v3677_v34 = vadd.f32 %v3676_v31, %v6818_v29 }
 0x204   :  { %v3678_v36 = vpop.f32.mrf.mxu0 }
 0x205   :  { %v3719_v37 = vpop.f32.mrf.mxu1  ;;  %v3718_v39 = vadd.f32 %v3717_v32, %v3677_v34  ;;  %v3679_v7 = vadd.f32 %v3678_v36, %v6821_v33 }
 0x206   :  { %v3680_v55 = vpop.f32.mrf.mxu0 }
 0x207   :  { %v3721_v38 = vpop.f32.mrf.mxu1  ;;  %v3720_v42 = vadd.f32 %v3719_v37, %v3679_v7 }
 0x208   :  { %v3681_v41 = vpop.f32.mrf.mxu0 }
 0x209   :  { %v3722_v44 = vpop.f32.mrf.mxu1 }
 0x242   :  { %v3758_v45 = vpop.f32.mrf.mxu0 }
 0x243   :  { %v3799_v5 = vpop.f32.mrf.mxu1  ;;  %v3759_v17 = vadd.f32 %v3758_v45, %v3718_v39 }
 0x244   :  { %v3760_v50 = vpop.f32.mrf.mxu0 }
 0x245   :  { %v3801_v52 = vpop.f32.mrf.mxu1  ;;  %v3800_v53 = vadd.f32 %v3799_v5, %v3759_v17  ;;  %v3761_v54 = vadd.f32 %v3760_v50, %v3720_v42 }
 0x246   :  { %v3762_v35 = vpop.f32.mrf.mxu0 }
 0x247   :  { %v3803_v23 = vpop.f32.mrf.mxu1  ;;  %v3802_v29 = vadd.f32 %v3801_v52, %v3761_v54 }
 0x248   :  { %v3763_v56 = vpop.f32.mrf.mxu0 }
 0x249   :  { %v3804_v57 = vpop.f32.mrf.mxu1 }
 0x282   :  { %v3840_v58 = vpop.f32.mrf.mxu0 }
 0x283   :  { %v3881_v59 = vpop.f32.mrf.mxu1  ;;  %v3841_v33 = vadd.f32 %v3840_v58, %v3800_v53 }
 0x284   :  { %v3842_v60 = vpop.f32.mrf.mxu0 }
 0x285   :  { %v3883_v18 = vpop.f32.mrf.mxu1  ;;  %v3882_v19 = vadd.f32 %v3881_v59, %v3841_v33  ;;  %v3843_v1 = vadd.f32 %v3842_v60, %v3802_v29 }
 0x286   :  { %v3844_v61 = vpop.f32.mrf.mxu0 }
 0x287   :  { %v3885_v62 = vpop.f32.mrf.mxu1  ;;  %v3884_v4 = vadd.f32 %v3883_v18, %v3843_v1 }
 0x288   :  { %v3845_v63 = vpop.f32.mrf.mxu0 }
 0x289   :  { %v3886_v0 = vpop.f32.mrf.mxu1 }
 0x2c2   :  { %v3922_v2 = vpop.f32.mrf.mxu0 }
 0x2c3   :  { %v3963_v3 = vpop.f32.mrf.mxu1  ;;  %v3923_v43 = vadd.f32 %v3922_v2, %v3882_v19 }
 0x2c4   :  { %v3924_v46 = vpop.f32.mrf.mxu0 }
 0x2c5   :  { %v3965_v6 = vpop.f32.mrf.mxu1  ;;  %v3964_v8 = vadd.f32 %v3963_v3, %v3923_v43  ;;  %v3925_v9 = vadd.f32 %v3924_v46, %v3884_v4 }
 0x2c6   :  { %v3926_v49 = vpop.f32.mrf.mxu0 }
 0x2c7   :  { %v3967_v10 = vpop.f32.mrf.mxu1  ;;  %v3966_v11 = vadd.f32 %v3965_v6, %v3925_v9  ;;  %v3970_v13 = vmul.f32 %v3964_v8, %v3964_v8 }
 0x2c8   :  { %v3927_v51 = vpop.f32.mrf.mxu0 }
 0x2c9   :  { %v3968_v12 = vpop.f32.mrf.mxu1  ;;  %v3971_v14 = vmul.f32 %v3966_v11, %v3966_v11 }
 0x2cb   :  { %v3972_v15 = vadd.f32 %v3971_v14, %v3970_v13 }
 0x2cd   :  { %5274 = vrsqrt.f32 %v3972_v15  ;;  %vm3975_vm0 = vcmp.eq.f32.partialorder %v3972_v15, inf  ;;  %v3978_v16 = vand.u32 2147483648, %v3972_v15  ;;  %vm3977_vm1 = vcmp.eq.f32.partialorder %v3972_v15, 0.0 }
 0x2da   :  { %v5275_v47 = vpop.eup %5274 }
 0x2db   :  { %v3974_v48 = vmul.f32 %v5275_v47, %v3972_v15 }
 0x2dd   :  { %v3976_v20 = vsel %vm3975_vm0, %v3972_v15, %v3974_v48 }
 0x2de   :  { %v3979_v21 = vsel %vm3977_vm1, %v3978_v16, %v3976_v20 }
 0x2df   :  { %3980 = vst [vmem:[%s6997_s3] sm:$0x3] %v3979_v21 }

</bundles_post_ra>
